<compile_context>
chip_gen: v5e
topology: v5e:2x2
jax: 0.10.0
libtpu: 0.0.40
codegen_flags: <defaults>
</compile_context>

<pallas_src>
import jax
import jax.numpy as jnp
from jax.experimental import pallas as pl
from jax.experimental.pallas import tpu as pltpu

EPS = 1e-5  # nn.BatchNorm2d default


def _round_up(x, m):
    return (x + m - 1) // m * m


def _fold_bn(w_oihw, gamma, beta, mean, var, eps=EPS):
    """Fold eval-mode BatchNorm into conv weights: y = conv(x, w_f) + b_f."""
    s = gamma / jnp.sqrt(var + eps)
    w_f = w_oihw * s[:, None, None, None]
    b_f = beta - mean * s
    return w_f, b_f


def _tap_weights(w_oihw):
    """(O, I, 3, 3) -> (9, I, O) per-tap matrices (tap t = 3*dy + dx), bf16 for the MXU."""
    o, i = w_oihw.shape[0], w_oihw.shape[1]
    w = jnp.transpose(w_oihw, (2, 3, 1, 0)).reshape(9, i, o)
    return w.astype(jnp.bfloat16)


def make_basic_block_kernel(H, W, C, P, NB):
    """Kernel closure over static spatial/channel sizes."""
    Hp, Wp = H + 2, W + 2
    Npix = Hp * Wp
    M = NB * Npix
    # Halo rows >= max |tap shift| = Wp + 1; multiple of 16 keeps interior
    # writes/reads sublane-aligned for both f32 and packed bf16.
    R = _round_up(Wp + 1, 16)
    shifts = [(dy - 1) * Wp + (dx - 1) for dy in range(3) for dx in range(3)]

    def kernel(x_ref, mask_ref, w1_ref, b1_ref, w2_ref, b2_ref, o_ref, h1_ref):
        # x_ref   : (1, M + 2R, C)  f32  halo'd flattened padded pixels (channel-minor)
        # mask_ref: (M, 1)          f32  1.0 interior pixel / 0.0 spatial-padding pixel
        # w1_ref  : (9, C, P)       bf16 folded conv1+bn1, one (C,P) matrix per tap
        # b1_ref  : (1, P)          f32
        # w2_ref  : (9, P, P)       bf16 folded conv2+bn2
        # b2_ref  : (1, P)          f32
        # o_ref   : (1, M, P)       f32  output at all padded pixel positions
        # h1_ref  : (M + 2R, P)     bf16 VMEM scratch, halo'd conv1 output
        @pl.when(pl.program_id(0) == 0)
        def _init():
            # Zero-once: the halo stays zero afterwards (interior fully rewritten
            # every step).  Halo values only feed discarded border outputs, so
            # this is safe even if a second TensorCore never executes step 0.
            h1_ref[...] = jnp.zeros_like(h1_ref)

        x = x_ref[0]                          # (M + 2R, C) f32
        xb = x.astype(jnp.bfloat16)
        mask = mask_ref[...]                  # (M, 1)

        # ---- conv1 (3x3, stride 1, pad 1) + bn1 + ReLU ----
        acc1 = jnp.zeros((M, P), jnp.float32)
        for t, s in enumerate(shifts):
            acc1 += jnp.dot(xb[R + s:R + s + M, :], w1_ref[t],
                            preferred_element_type=jnp.float32)
        out1 = jnp.maximum(acc1 + b1_ref[...], 0.0) * mask
        h1_ref[R:R + M, :] = out1.astype(jnp.bfloat16)

        # ---- conv2 (3x3, stride 1, pad 1) + bn2 ----
        h1 = h1_ref[...]
        acc2 = jnp.zeros((M, P), jnp.float32)
        for t, s in enumerate(shifts):
            acc2 += jnp.dot(h1[R + s:R + s + M, :], w2_ref[t],
                            preferred_element_type=jnp.float32)
        out2 = acc2 + b2_ref[...]

        # ---- identity residual + ReLU (aligned slice: R % 8 == 0, lane offset 0) ----
        residual = x[R:R + M, :]
        o_ref[0] = jnp.maximum(out2 + residual, 0.0)

    return kernel, R, M, Npix


def basic_block_forward(x_nchw, params, nb=1):
    """Pallas implementation of BasicBlock.forward (stride=1, downsample=None)."""
    N, C, H, W = x_nchw.shape
    P = params["w1"].shape[0]
    assert C == P, "identity residual requires inplanes == planes"
    assert N % nb == 0
    G = N // nb
    Hp, Wp = H + 2, W + 2

    kernel, R, M, Npix = make_basic_block_kernel(H, W, C, P, nb)

    # NCHW -> NHWC -> zero-pad spatially -> flatten pixels per image group and
    # add an R-row halo so every conv tap is an in-bounds sublane shift.
    x_nhwc = jnp.transpose(x_nchw, (0, 2, 3, 1)).astype(jnp.float32)
    x_pad = jnp.pad(x_nhwc, ((0, 0), (1, 1), (1, 1), (0, 0)))        # (N, Hp, Wp, C)
    x_flat = x_pad.reshape(G, nb * Npix, C)
    x_halo = jnp.pad(x_flat, ((0, 0), (R, R), (0, 0)))               # (G, M + 2R, C)

    # Interior-pixel mask over the flattened padded grid (same for every image).
    pidx = jnp.arange(Npix)
    ph, pw = pidx // Wp, pidx % Wp
    interior = ((ph >= 1) & (ph <= H) & (pw >= 1) & (pw <= W)).astype(jnp.float32)
    mask = jnp.tile(interior, nb).reshape(M, 1)

    w1f, b1f = _fold_bn(params["w1"], params["g1"], params["be1"],
                        params["m1"], params["v1"])
    w2f, b2f = _fold_bn(params["w2"], params["g2"], params["be2"],
                        params["m2"], params["v2"])
    w1t, w2t = _tap_weights(w1f), _tap_weights(w2f)
    b1 = b1f.astype(jnp.float32).reshape(1, P)
    b2 = b2f.astype(jnp.float32).reshape(1, P)

    out = pl.pallas_call(
        kernel,
        out_shape=jax.ShapeDtypeStruct((G, M, P), jnp.float32),
        grid_spec=pltpu.PrefetchScalarGridSpec(
            num_scalar_prefetch=0,
            grid=(G,),
            in_specs=[
                pl.BlockSpec((1, M + 2 * R, C), lambda g: (g, 0, 0)),
                pl.BlockSpec((M, 1), lambda g: (0, 0)),
                pl.BlockSpec((9, C, P), lambda g: (0, 0, 0)),
                pl.BlockSpec((1, P), lambda g: (0, 0)),
                pl.BlockSpec((9, P, P), lambda g: (0, 0, 0)),
                pl.BlockSpec((1, P), lambda g: (0, 0)),
            ],
            out_specs=pl.BlockSpec((1, M, P), lambda g: (g, 0, 0)),
            scratch_shapes=[pltpu.VMEM((M + 2 * R, P), jnp.bfloat16)],
        ),
        compiler_params=pltpu.CompilerParams(
            dimension_semantics=("parallel",),
            vmem_limit_bytes=64 * 1024 * 1024,
        ),
    )(x_halo, mask, w1t, b1, w2t, b2)

    # Drop the padded border pixels and return NCHW.
    out_nhwc = out.reshape(N, Hp, Wp, P)[:, 1:H + 1, 1:W + 1, :]
    return jnp.transpose(out_nhwc, (0, 3, 1, 2))


def basic_block_reference(x, params):
    """Pure-JAX reference matching the PyTorch forward (eval-mode BN)."""
    def conv(x, w):
        return jax.lax.conv_general_dilated(
            x, w, window_strides=(1, 1), padding=((1, 1), (1, 1)),
            dimension_numbers=("NCHW", "OIHW", "NCHW"))

    def bn(x, g, b, m, v):
        return ((x - m[None, :, None, None])
                / jnp.sqrt(v + EPS)[None, :, None, None]
                * g[None, :, None, None] + b[None, :, None, None])

    out = jax.nn.relu(bn(conv(x, params["w1"]),
                         params["g1"], params["be1"], params["m1"], params["v1"]))
    out = bn(conv(out, params["w2"]),
             params["g2"], params["be2"], params["m2"], params["v2"])
    return jax.nn.relu(out + x)


if __name__ == "__main__":
    key = jax.random.PRNGKey(0)
    N, C, H, W = 2, 4, 16, 16   # inplanes = planes = 4, stride = 1
    P = C

    keys = jax.random.split(key, 11)
    params = {
        "w1": 0.1 * jax.random.normal(keys[0], (P, C, 3, 3), jnp.float32),
        "g1": 1.0 + 0.1 * jax.random.normal(keys[1], (P,), jnp.float32),
        "be1": 0.1 * jax.random.normal(keys[2], (P,), jnp.float32),
        "m1": 0.1 * jax.random.normal(keys[3], (P,), jnp.float32),
        "v1": 1.0 + 0.1 * jax.random.uniform(keys[4], (P,), jnp.float32),
        "w2": 0.1 * jax.random.normal(keys[5], (P, P, 3, 3), jnp.float32),
        "g2": 1.0 + 0.1 * jax.random.normal(keys[6], (P,), jnp.float32),
        "be2": 0.1 * jax.random.normal(keys[7], (P,), jnp.float32),
        "m2": 0.1 * jax.random.normal(keys[8], (P,), jnp.float32),
        "v2": 1.0 + 0.1 * jax.random.uniform(keys[9], (P,), jnp.float32),
    }
    x = jax.random.normal(keys[10], (N, C, H, W), jnp.float32)

    out = jax.block_until_ready(basic_block_forward(x, params))
    ref = jax.block_until_ready(basic_block_reference(x, params))
    assert out.shape == ref.shape == (N, C, H, W)
    max_err = float(jnp.max(jnp.abs(out - ref)))
    # bf16 MXU operands (per perf review) => tolerance looser than the f32 path.
    if max_err > 3e-2:
        raise AssertionError(f"mismatch vs reference, max abs err = {max_err}")

    print("KERNEL_OK")
</pallas_src>

<mosaic_0001>
module attributes {stable_mosaic.version = 11 : i64} {
  func.func @kernel(%arg0: i32, %arg1: memref<1x388x4xf32, #tpu.memory_space<vmem>>, %arg2: memref<324x1xf32, #tpu.memory_space<vmem>>, %arg3: memref<9x4x4xbf16, #tpu.memory_space<vmem>>, %arg4: memref<1x4xf32, #tpu.memory_space<vmem>>, %arg5: memref<9x4x4xbf16, #tpu.memory_space<vmem>>, %arg6: memref<1x4xf32, #tpu.memory_space<vmem>>, %arg7: memref<1x324x4xf32, #tpu.memory_space<vmem>>, %arg8: memref<388x4xbf16, #tpu.memory_space<vmem>>) attributes {dimension_semantics = [#tpu.dimension_semantics<parallel>], iteration_bounds = array<i64: 2>, scalar_prefetch = 0 : i64, scratch_operands = 1 : i64, tpu.core_type = #tpu.core_type<tc>, window_params = [{transform_indices = @transform_0, window_bounds = array<i64: 1, 388, 4>}, {pipeline_mode = #tpu.pipeline_mode<synchronous>, transform_indices = @transform_1, window_bounds = array<i64: 324, 1>}, {pipeline_mode = #tpu.pipeline_mode<synchronous>, transform_indices = @transform_2, window_bounds = array<i64: 9, 4, 4>}, {pipeline_mode = #tpu.pipeline_mode<synchronous>, transform_indices = @transform_3, window_bounds = array<i64: 1, 4>}, {pipeline_mode = #tpu.pipeline_mode<synchronous>, transform_indices = @transform_4, window_bounds = array<i64: 9, 4, 4>}, {pipeline_mode = #tpu.pipeline_mode<synchronous>, transform_indices = @transform_5, window_bounds = array<i64: 1, 4>}, {transform_indices = @transform_6, window_bounds = array<i64: 1, 324, 4>}]} {
    %c0_i32 = arith.constant 0 : i32
    %0 = arith.cmpi eq, %arg0, %c0_i32 : i32
    %1 = arith.extui %0 : i1 to i32
    %c0_i32_0 = arith.constant 0 : i32
    %2 = arith.cmpi ne, %1, %c0_i32_0 : i32
    scf.if %2 {
      %cst_82 = arith.constant 0.000000e+00 : bf16
      %119 = vector.broadcast %cst_82 : bf16 to vector<388x4xbf16>
      %c0_83 = arith.constant 0 : index
      %c0_84 = arith.constant 0 : index
      %120 = vector.load %arg8[%c0_83, %c0_84] : memref<388x4xbf16, #tpu.memory_space<vmem>>, vector<388x4xbf16>
      tpu.vector_store %arg8[%c0_83, %c0_84], %119 {strides = array<i32>} : memref<388x4xbf16, #tpu.memory_space<vmem>>, vector<388x4xbf16>,
    } else {
    }
    %c0 = arith.constant 0 : index
    %c0_1 = arith.constant 0 : index
    %c0_2 = arith.constant 0 : index
    %3 = vector.load %arg1[%c0, %c0_1, %c0_2] : memref<1x388x4xf32, #tpu.memory_space<vmem>>, vector<1x388x4xf32>
    %4 = vector.shape_cast %3 : vector<1x388x4xf32> to vector<388x4xf32>
    %5 = arith.truncf %4 : vector<388x4xf32> to vector<388x4xbf16>
    %c0_3 = arith.constant 0 : index
    %c0_4 = arith.constant 0 : index
    %6 = vector.load %arg2[%c0_3, %c0_4] : memref<324x1xf32, #tpu.memory_space<vmem>>, vector<324x1xf32>
    %cst = arith.constant 0.000000e+00 : f32
    %7 = vector.broadcast %cst : f32 to vector<324x4xf32>
    %8 = vector.extract_strided_slice %5 {offsets = [13, 0], sizes = [324, 4], strides = [1, 1]} : vector<388x4xbf16> to vector<324x4xbf16>
    %c0_5 = arith.constant 0 : index
    %c0_6 = arith.constant 0 : index
    %c0_7 = arith.constant 0 : index
    %9 = vector.load %arg3[%c0_5, %c0_6, %c0_7] : memref<9x4x4xbf16, #tpu.memory_space<vmem>>, vector<1x4x4xbf16>
    %10 = vector.shape_cast %9 : vector<1x4x4xbf16> to vector<4x4xbf16>
    %cst_8 = arith.constant dense<0.000000e+00> : vector<324x4xf32>
    %11 = tpu.matmul %8, %10, %cst_8 {dimension_numbers = #tpu.dot_dimension_numbers<[1], [0], [0], [1], [0, 0, 1, 1], [], []>} : vector<324x4xbf16>, vector<4x4xbf16>, vector<324x4xf32> -> vector<324x4xf32>
    %12 = arith.addf %7, %11 : vector<324x4xf32>
    %13 = vector.extract_strided_slice %5 {offsets = [14, 0], sizes = [324, 4], strides = [1, 1]} : vector<388x4xbf16> to vector<324x4xbf16>
    %c1 = arith.constant 1 : index
    %c0_9 = arith.constant 0 : index
    %c0_10 = arith.constant 0 : index
    %14 = vector.load %arg3[%c1, %c0_9, %c0_10] : memref<9x4x4xbf16, #tpu.memory_space<vmem>>, vector<1x4x4xbf16>
    %15 = vector.shape_cast %14 : vector<1x4x4xbf16> to vector<4x4xbf16>
    %cst_11 = arith.constant dense<0.000000e+00> : vector<324x4xf32>
    %16 = tpu.matmul %13, %15, %cst_11 {dimension_numbers = #tpu.dot_dimension_numbers<[1], [0], [0], [1], [0, 0, 1, 1], [], []>} : vector<324x4xbf16>, vector<4x4xbf16>, vector<324x4xf32> -> vector<324x4xf32>
    %17 = arith.addf %12, %16 : vector<324x4xf32>
    %18 = vector.extract_strided_slice %5 {offsets = [15, 0], sizes = [324, 4], strides = [1, 1]} : vector<388x4xbf16> to vector<324x4xbf16>
    %c2 = arith.constant 2 : index
    %c0_12 = arith.constant 0 : index
    %c0_13 = arith.constant 0 : index
    %19 = vector.load %arg3[%c2, %c0_12, %c0_13] : memref<9x4x4xbf16, #tpu.memory_space<vmem>>, vector<1x4x4xbf16>
    %20 = vector.shape_cast %19 : vector<1x4x4xbf16> to vector<4x4xbf16>
    %cst_14 = arith.constant dense<0.000000e+00> : vector<324x4xf32>
    %21 = tpu.matmul %18, %20, %cst_14 {dimension_numbers = #tpu.dot_dimension_numbers<[1], [0], [0], [1], [0, 0, 1, 1], [], []>} : vector<324x4xbf16>, vector<4x4xbf16>, vector<324x4xf32> -> vector<324x4xf32>
    %22 = arith.addf %17, %21 : vector<324x4xf32>
    %23 = vector.extract_strided_slice %5 {offsets = [31, 0], sizes = [324, 4], strides = [1, 1]} : vector<388x4xbf16> to vector<324x4xbf16>
    %c3 = arith.constant 3 : index
    %c0_15 = arith.constant 0 : index
    %c0_16 = arith.constant 0 : index
    %24 = vector.load %arg3[%c3, %c0_15, %c0_16] : memref<9x4x4xbf16, #tpu.memory_space<vmem>>, vector<1x4x4xbf16>
    %25 = vector.shape_cast %24 : vector<1x4x4xbf16> to vector<4x4xbf16>
    %cst_17 = arith.constant dense<0.000000e+00> : vector<324x4xf32>
    %26 = tpu.matmul %23, %25, %cst_17 {dimension_numbers = #tpu.dot_dimension_numbers<[1], [0], [0], [1], [0, 0, 1, 1], [], []>} : vector<324x4xbf16>, vector<4x4xbf16>, vector<324x4xf32> -> vector<324x4xf32>
    %27 = arith.addf %22, %26 : vector<324x4xf32>
    %28 = vector.extract_strided_slice %5 {offsets = [32, 0], sizes = [324, 4], strides = [1, 1]} : vector<388x4xbf16> to vector<324x4xbf16>
    %c4 = arith.constant 4 : index
    %c0_18 = arith.constant 0 : index
    %c0_19 = arith.constant 0 : index
    %29 = vector.load %arg3[%c4, %c0_18, %c0_19] : memref<9x4x4xbf16, #tpu.memory_space<vmem>>, vector<1x4x4xbf16>
    %30 = vector.shape_cast %29 : vector<1x4x4xbf16> to vector<4x4xbf16>
    %cst_20 = arith.constant dense<0.000000e+00> : vector<324x4xf32>
    %31 = tpu.matmul %28, %30, %cst_20 {dimension_numbers = #tpu.dot_dimension_numbers<[1], [0], [0], [1], [0, 0, 1, 1], [], []>} : vector<324x4xbf16>, vector<4x4xbf16>, vector<324x4xf32> -> vector<324x4xf32>
    %32 = arith.addf %27, %31 : vector<324x4xf32>
    %33 = vector.extract_strided_slice %5 {offsets = [33, 0], sizes = [324, 4], strides = [1, 1]} : vector<388x4xbf16> to vector<324x4xbf16>
    %c5 = arith.constant 5 : index
    %c0_21 = arith.constant 0 : index
    %c0_22 = arith.constant 0 : index
    %34 = vector.load %arg3[%c5, %c0_21, %c0_22] : memref<9x4x4xbf16, #tpu.memory_space<vmem>>, vector<1x4x4xbf16>
    %35 = vector.shape_cast %34 : vector<1x4x4xbf16> to vector<4x4xbf16>
    %cst_23 = arith.constant dense<0.000000e+00> : vector<324x4xf32>
    %36 = tpu.matmul %33, %35, %cst_23 {dimension_numbers = #tpu.dot_dimension_numbers<[1], [0], [0], [1], [0, 0, 1, 1], [], []>} : vector<324x4xbf16>, vector<4x4xbf16>, vector<324x4xf32> -> vector<324x4xf32>
    %37 = arith.addf %32, %36 : vector<324x4xf32>
    %38 = vector.extract_strided_slice %5 {offsets = [49, 0], sizes = [324, 4], strides = [1, 1]} : vector<388x4xbf16> to vector<324x4xbf16>
    %c6 = arith.constant 6 : index
    %c0_24 = arith.constant 0 : index
    %c0_25 = arith.constant 0 : index
    %39 = vector.load %arg3[%c6, %c0_24, %c0_25] : memref<9x4x4xbf16, #tpu.memory_space<vmem>>, vector<1x4x4xbf16>
    %40 = vector.shape_cast %39 : vector<1x4x4xbf16> to vector<4x4xbf16>
    %cst_26 = arith.constant dense<0.000000e+00> : vector<324x4xf32>
    %41 = tpu.matmul %38, %40, %cst_26 {dimension_numbers = #tpu.dot_dimension_numbers<[1], [0], [0], [1], [0, 0, 1, 1], [], []>} : vector<324x4xbf16>, vector<4x4xbf16>, vector<324x4xf32> -> vector<324x4xf32>
    %42 = arith.addf %37, %41 : vector<324x4xf32>
    %43 = vector.extract_strided_slice %5 {offsets = [50, 0], sizes = [324, 4], strides = [1, 1]} : vector<388x4xbf16> to vector<324x4xbf16>
    %c7 = arith.constant 7 : index
    %c0_27 = arith.constant 0 : index
    %c0_28 = arith.constant 0 : index
    %44 = vector.load %arg3[%c7, %c0_27, %c0_28] : memref<9x4x4xbf16, #tpu.memory_space<vmem>>, vector<1x4x4xbf16>
    %45 = vector.shape_cast %44 : vector<1x4x4xbf16> to vector<4x4xbf16>
    %cst_29 = arith.constant dense<0.000000e+00> : vector<324x4xf32>
    %46 = tpu.matmul %43, %45, %cst_29 {dimension_numbers = #tpu.dot_dimension_numbers<[1], [0], [0], [1], [0, 0, 1, 1], [], []>} : vector<324x4xbf16>, vector<4x4xbf16>, vector<324x4xf32> -> vector<324x4xf32>
    %47 = arith.addf %42, %46 : vector<324x4xf32>
    %48 = vector.extract_strided_slice %5 {offsets = [51, 0], sizes = [324, 4], strides = [1, 1]} : vector<388x4xbf16> to vector<324x4xbf16>
    %c8 = arith.constant 8 : index
    %c0_30 = arith.constant 0 : index
    %c0_31 = arith.constant 0 : index
    %49 = vector.load %arg3[%c8, %c0_30, %c0_31] : memref<9x4x4xbf16, #tpu.memory_space<vmem>>, vector<1x4x4xbf16>
    %50 = vector.shape_cast %49 : vector<1x4x4xbf16> to vector<4x4xbf16>
    %cst_32 = arith.constant dense<0.000000e+00> : vector<324x4xf32>
    %51 = tpu.matmul %48, %50, %cst_32 {dimension_numbers = #tpu.dot_dimension_numbers<[1], [0], [0], [1], [0, 0, 1, 1], [], []>} : vector<324x4xbf16>, vector<4x4xbf16>, vector<324x4xf32> -> vector<324x4xf32>
    %52 = arith.addf %47, %51 : vector<324x4xf32>
    %c0_33 = arith.constant 0 : index
    %c0_34 = arith.constant 0 : index
    %53 = vector.load %arg4[%c0_33, %c0_34] : memref<1x4xf32, #tpu.memory_space<vmem>>, vector<1x4xf32>
    %54 = vector.broadcast %53 : vector<1x4xf32> to vector<324x4xf32>
    %55 = arith.addf %52, %54 : vector<324x4xf32>
    %cst_35 = arith.constant 0.000000e+00 : f32
    %56 = vector.broadcast %cst_35 : f32 to vector<324x4xf32>
    %57 = arith.maximumf %55, %56 : vector<324x4xf32>
    %58 = vector.broadcast %6 : vector<324x1xf32> to vector<324x4xf32>
    %59 = arith.mulf %57, %58 : vector<324x4xf32>
    %60 = arith.truncf %59 : vector<324x4xf32> to vector<324x4xbf16>
    %c32 = arith.constant 32 : index
    %c0_36 = arith.constant 0 : index
    %61 = vector.load %arg8[%c32, %c0_36] : memref<388x4xbf16, #tpu.memory_space<vmem>>, vector<324x4xbf16>
    tpu.vector_store %arg8[%c32, %c0_36], %60 {strides = array<i32>} : memref<388x4xbf16, #tpu.memory_space<vmem>>, vector<324x4xbf16>,
    %c0_37 = arith.constant 0 : index
    %c0_38 = arith.constant 0 : index
    %62 = vector.load %arg8[%c0_37, %c0_38] : memref<388x4xbf16, #tpu.memory_space<vmem>>, vector<388x4xbf16>
    %cst_39 = arith.constant 0.000000e+00 : f32
    %63 = vector.broadcast %cst_39 : f32 to vector<324x4xf32>
    %64 = vector.extract_strided_slice %62 {offsets = [13, 0], sizes = [324, 4], strides = [1, 1]} : vector<388x4xbf16> to vector<324x4xbf16>
    %c0_40 = arith.constant 0 : index
    %c0_41 = arith.constant 0 : index
    %c0_42 = arith.constant 0 : index
    %65 = vector.load %arg5[%c0_40, %c0_41, %c0_42] : memref<9x4x4xbf16, #tpu.memory_space<vmem>>, vector<1x4x4xbf16>
    %66 = vector.shape_cast %65 : vector<1x4x4xbf16> to vector<4x4xbf16>
    %cst_43 = arith.constant dense<0.000000e+00> : vector<324x4xf32>
    %67 = tpu.matmul %64, %66, %cst_43 {dimension_numbers = #tpu.dot_dimension_numbers<[1], [0], [0], [1], [0, 0, 1, 1], [], []>} : vector<324x4xbf16>, vector<4x4xbf16>, vector<324x4xf32> -> vector<324x4xf32>
    %68 = arith.addf %63, %67 : vector<324x4xf32>
    %69 = vector.extract_strided_slice %62 {offsets = [14, 0], sizes = [324, 4], strides = [1, 1]} : vector<388x4xbf16> to vector<324x4xbf16>
    %c1_44 = arith.constant 1 : index
    %c0_45 = arith.constant 0 : index
    %c0_46 = arith.constant 0 : index
    %70 = vector.load %arg5[%c1_44, %c0_45, %c0_46] : memref<9x4x4xbf16, #tpu.memory_space<vmem>>, vector<1x4x4xbf16>
    %71 = vector.shape_cast %70 : vector<1x4x4xbf16> to vector<4x4xbf16>
    %cst_47 = arith.constant dense<0.000000e+00> : vector<324x4xf32>
    %72 = tpu.matmul %69, %71, %cst_47 {dimension_numbers = #tpu.dot_dimension_numbers<[1], [0], [0], [1], [0, 0, 1, 1], [], []>} : vector<324x4xbf16>, vector<4x4xbf16>, vector<324x4xf32> -> vector<324x4xf32>
    %73 = arith.addf %68, %72 : vector<324x4xf32>
    %74 = vector.extract_strided_slice %62 {offsets = [15, 0], sizes = [324, 4], strides = [1, 1]} : vector<388x4xbf16> to vector<324x4xbf16>
    %c2_48 = arith.constant 2 : index
    %c0_49 = arith.constant 0 : index
    %c0_50 = arith.constant 0 : index
    %75 = vector.load %arg5[%c2_48, %c0_49, %c0_50] : memref<9x4x4xbf16, #tpu.memory_space<vmem>>, vector<1x4x4xbf16>
    %76 = vector.shape_cast %75 : vector<1x4x4xbf16> to vector<4x4xbf16>
    %cst_51 = arith.constant dense<0.000000e+00> : vector<324x4xf32>
    %77 = tpu.matmul %74, %76, %cst_51 {dimension_numbers = #tpu.dot_dimension_numbers<[1], [0], [0], [1], [0, 0, 1, 1], [], []>} : vector<324x4xbf16>, vector<4x4xbf16>, vector<324x4xf32> -> vector<324x4xf32>
    %78 = arith.addf %73, %77 : vector<324x4xf32>
    %79 = vector.extract_strided_slice %62 {offsets = [31, 0], sizes = [324, 4], strides = [1, 1]} : vector<388x4xbf16> to vector<324x4xbf16>
    %c3_52 = arith.constant 3 : index
    %c0_53 = arith.constant 0 : index
    %c0_54 = arith.constant 0 : index
    %80 = vector.load %arg5[%c3_52, %c0_53, %c0_54] : memref<9x4x4xbf16, #tpu.memory_space<vmem>>, vector<1x4x4xbf16>
    %81 = vector.shape_cast %80 : vector<1x4x4xbf16> to vector<4x4xbf16>
    %cst_55 = arith.constant dense<0.000000e+00> : vector<324x4xf32>
    %82 = tpu.matmul %79, %81, %cst_55 {dimension_numbers = #tpu.dot_dimension_numbers<[1], [0], [0], [1], [0, 0, 1, 1], [], []>} : vector<324x4xbf16>, vector<4x4xbf16>, vector<324x4xf32> -> vector<324x4xf32>
    %83 = arith.addf %78, %82 : vector<324x4xf32>
    %84 = vector.extract_strided_slice %62 {offsets = [32, 0], sizes = [324, 4], strides = [1, 1]} : vector<388x4xbf16> to vector<324x4xbf16>
    %c4_56 = arith.constant 4 : index
    %c0_57 = arith.constant 0 : index
    %c0_58 = arith.constant 0 : index
    %85 = vector.load %arg5[%c4_56, %c0_57, %c0_58] : memref<9x4x4xbf16, #tpu.memory_space<vmem>>, vector<1x4x4xbf16>
    %86 = vector.shape_cast %85 : vector<1x4x4xbf16> to vector<4x4xbf16>
    %cst_59 = arith.constant dense<0.000000e+00> : vector<324x4xf32>
    %87 = tpu.matmul %84, %86, %cst_59 {dimension_numbers = #tpu.dot_dimension_numbers<[1], [0], [0], [1], [0, 0, 1, 1], [], []>} : vector<324x4xbf16>, vector<4x4xbf16>, vector<324x4xf32> -> vector<324x4xf32>
    %88 = arith.addf %83, %87 : vector<324x4xf32>
    %89 = vector.extract_strided_slice %62 {offsets = [33, 0], sizes = [324, 4], strides = [1, 1]} : vector<388x4xbf16> to vector<324x4xbf16>
    %c5_60 = arith.constant 5 : index
    %c0_61 = arith.constant 0 : index
    %c0_62 = arith.constant 0 : index
    %90 = vector.load %arg5[%c5_60, %c0_61, %c0_62] : memref<9x4x4xbf16, #tpu.memory_space<vmem>>, vector<1x4x4xbf16>
    %91 = vector.shape_cast %90 : vector<1x4x4xbf16> to vector<4x4xbf16>
    %cst_63 = arith.constant dense<0.000000e+00> : vector<324x4xf32>
    %92 = tpu.matmul %89, %91, %cst_63 {dimension_numbers = #tpu.dot_dimension_numbers<[1], [0], [0], [1], [0, 0, 1, 1], [], []>} : vector<324x4xbf16>, vector<4x4xbf16>, vector<324x4xf32> -> vector<324x4xf32>
    %93 = arith.addf %88, %92 : vector<324x4xf32>
    %94 = vector.extract_strided_slice %62 {offsets = [49, 0], sizes = [324, 4], strides = [1, 1]} : vector<388x4xbf16> to vector<324x4xbf16>
    %c6_64 = arith.constant 6 : index
    %c0_65 = arith.constant 0 : index
    %c0_66 = arith.constant 0 : index
    %95 = vector.load %arg5[%c6_64, %c0_65, %c0_66] : memref<9x4x4xbf16, #tpu.memory_space<vmem>>, vector<1x4x4xbf16>
    %96 = vector.shape_cast %95 : vector<1x4x4xbf16> to vector<4x4xbf16>
    %cst_67 = arith.constant dense<0.000000e+00> : vector<324x4xf32>
    %97 = tpu.matmul %94, %96, %cst_67 {dimension_numbers = #tpu.dot_dimension_numbers<[1], [0], [0], [1], [0, 0, 1, 1], [], []>} : vector<324x4xbf16>, vector<4x4xbf16>, vector<324x4xf32> -> vector<324x4xf32>
    %98 = arith.addf %93, %97 : vector<324x4xf32>
    %99 = vector.extract_strided_slice %62 {offsets = [50, 0], sizes = [324, 4], strides = [1, 1]} : vector<388x4xbf16> to vector<324x4xbf16>
    %c7_68 = arith.constant 7 : index
    %c0_69 = arith.constant 0 : index
    %c0_70 = arith.constant 0 : index
    %100 = vector.load %arg5[%c7_68, %c0_69, %c0_70] : memref<9x4x4xbf16, #tpu.memory_space<vmem>>, vector<1x4x4xbf16>
    %101 = vector.shape_cast %100 : vector<1x4x4xbf16> to vector<4x4xbf16>
    %cst_71 = arith.constant dense<0.000000e+00> : vector<324x4xf32>
    %102 = tpu.matmul %99, %101, %cst_71 {dimension_numbers = #tpu.dot_dimension_numbers<[1], [0], [0], [1], [0, 0, 1, 1], [], []>} : vector<324x4xbf16>, vector<4x4xbf16>, vector<324x4xf32> -> vector<324x4xf32>
    %103 = arith.addf %98, %102 : vector<324x4xf32>
    %104 = vector.extract_strided_slice %62 {offsets = [51, 0], sizes = [324, 4], strides = [1, 1]} : vector<388x4xbf16> to vector<324x4xbf16>
    %c8_72 = arith.constant 8 : index
    %c0_73 = arith.constant 0 : index
    %c0_74 = arith.constant 0 : index
    %105 = vector.load %arg5[%c8_72, %c0_73, %c0_74] : memref<9x4x4xbf16, #tpu.memory_space<vmem>>, vector<1x4x4xbf16>
    %106 = vector.shape_cast %105 : vector<1x4x4xbf16> to vector<4x4xbf16>
    %cst_75 = arith.constant dense<0.000000e+00> : vector<324x4xf32>
    %107 = tpu.matmul %104, %106, %cst_75 {dimension_numbers = #tpu.dot_dimension_numbers<[1], [0], [0], [1], [0, 0, 1, 1], [], []>} : vector<324x4xbf16>, vector<4x4xbf16>, vector<324x4xf32> -> vector<324x4xf32>
    %108 = arith.addf %103, %107 : vector<324x4xf32>
    %c0_76 = arith.constant 0 : index
    %c0_77 = arith.constant 0 : index
    %109 = vector.load %arg6[%c0_76, %c0_77] : memref<1x4xf32, #tpu.memory_space<vmem>>, vector<1x4xf32>
    %110 = vector.broadcast %109 : vector<1x4xf32> to vector<324x4xf32>
    %111 = arith.addf %108, %110 : vector<324x4xf32>
    %112 = vector.extract_strided_slice %4 {offsets = [32, 0], sizes = [324, 4], strides = [1, 1]} : vector<388x4xf32> to vector<324x4xf32>
    %113 = arith.addf %111, %112 : vector<324x4xf32>
    %cst_78 = arith.constant 0.000000e+00 : f32
    %114 = vector.broadcast %cst_78 : f32 to vector<324x4xf32>
    %115 = arith.maximumf %113, %114 : vector<324x4xf32>
    %c0_79 = arith.constant 0 : index
    %c0_80 = arith.constant 0 : index
    %c0_81 = arith.constant 0 : index
    %116 = vector.load %arg7[%c0_79, %c0_80, %c0_81] : memref<1x324x4xf32, #tpu.memory_space<vmem>>, vector<1x324x4xf32>
    %117 = vector.shape_cast %116 : vector<1x324x4xf32> to vector<324x4xf32>
    %118 = vector.shape_cast %115 : vector<324x4xf32> to vector<1x324x4xf32>
    tpu.vector_store %arg7[%c0_79, %c0_80, %c0_81], %118 {strides = array<i32>} : memref<1x324x4xf32, #tpu.memory_space<vmem>>, vector<1x324x4xf32>,
    return
  }
  func.func @transform_0(%arg0: i32) -> (i32, i32, i32) {
    %c0_i32 = arith.constant 0 : i32
    %c0_i32_0 = arith.constant 0 : i32
    %c0_i32_1 = arith.constant 0 : i32
    return %arg0, %c0_i32, %c0_i32_0 : i32, i32, i32
  }
  func.func @transform_1(%arg0: i32) -> (i32, i32) {
    %c0_i32 = arith.constant 0 : i32
    %c0_i32_0 = arith.constant 0 : i32
    %c0_i32_1 = arith.constant 0 : i32
    return %c0_i32, %c0_i32_0 : i32, i32
  }
  func.func @transform_2(%arg0: i32) -> (i32, i32, i32) {
    %c0_i32 = arith.constant 0 : i32
    %c0_i32_0 = arith.constant 0 : i32
    %c0_i32_1 = arith.constant 0 : i32
    %c0_i32_2 = arith.constant 0 : i32
    return %c0_i32, %c0_i32_0, %c0_i32_1 : i32, i32, i32
  }
  func.func @transform_3(%arg0: i32) -> (i32, i32) {
    %c0_i32 = arith.constant 0 : i32
    %c0_i32_0 = arith.constant 0 : i32
    %c0_i32_1 = arith.constant 0 : i32
    return %c0_i32, %c0_i32_0 : i32, i32
  }
  func.func @transform_4(%arg0: i32) -> (i32, i32, i32) {
    %c0_i32 = arith.constant 0 : i32
    %c0_i32_0 = arith.constant 0 : i32
    %c0_i32_1 = arith.constant 0 : i32
    %c0_i32_2 = arith.constant 0 : i32
    return %c0_i32, %c0_i32_0, %c0_i32_1 : i32, i32, i32
  }
  func.func @transform_5(%arg0: i32) -> (i32, i32) {
    %c0_i32 = arith.constant 0 : i32
    %c0_i32_0 = arith.constant 0 : i32
    %c0_i32_1 = arith.constant 0 : i32
    return %c0_i32, %c0_i32_0 : i32, i32
  }
  func.func @transform_6(%arg0: i32) -> (i32, i32, i32) {
    %c0_i32 = arith.constant 0 : i32
    %c0_i32_0 = arith.constant 0 : i32
    %c0_i32_1 = arith.constant 0 : i32
    return %arg0, %c0_i32, %c0_i32_0 : i32, i32, i32
  }
}

</mosaic_0001>

<bundles_post_ra>
// kernel: tpu_custom_call.1
= control target key start
LH: loop header
LB: loop body
LE: loop exit
PB: predicated region body
PF: predicated region fallthrough
CT: control target
= control target key end

     0   :  { %s7009_s21 = smov 0   ;;  %s10519_s0 = inlined_call_operand.vmem [shape: f32[2,388,4], index: 0, kind: input, shape index: {}]   ;;  %s10520_s1 = inlined_call_operand.vmem [shape: f32[324,1], index: 1, kind: input, shape index: {}]   ;;  %s10521_s2 = inlined_call_operand.vmem [shape: bf16[9,4,4], index: 2, kind: input, shape index: {}]   ;;  %s10522_s3 = inlined_call_operand.vmem [shape: f32[1,4], index: 3, kind: input, shape index: {}]   ;;  %s10523_s4 = inlined_call_operand.vmem [shape: bf16[9,4,4], index: 4, kind: input, shape index: {}]   ;;  %s10524_s5 = inlined_call_operand.vmem [shape: f32[1,4], index: 5, kind: input, shape index: {}]   ;;  %s10525_s6 = inlined_call_operand.vmem [shape: f32[2,324,4], index: 6, kind: output, shape index: {}]  }
   0x1 LB: > { %s6230_s22 = sadd.s32 4294967295, %s6970_s21   ;;  %p6234_p0 = scmp.ge.s32.totalorder %s6970_s21, 1  ;;  %s6970_s21 = sphi %s7009_s21, %s16_s21  }
   0x2   : > { %p212_p1 = scmp.lt.s32.totalorder %s6970_s21, 3 }
   0x4   : > { %p213_p2 = pnand %p6234_p0, %p212_p1 }
   0x6   : > { %216 = sbr.rel (%p213_p2) target bundleno = 1864 (0x748), region = 44 }
   0xb   : > { %p242_p3 = scmp.lt.s32.totalorder %s6230_s22, 1  ;;  %p6237_p4 = scmp.ne.s32.totalorder %s6230_s22, 0 }
   0xd   : > { %s243_s23 = scalar_select %p242_p3, %s6230_s22, 1 }
   0xe   : > { %256 = sbr.rel (%p6237_p4) target bundleno = 66 (0x42), region = 48 }
   0xf   : > { %s6884_s24 = smul.u32 392, %s243_s23 }
  0x10   : > { %s6885_s25 = smul.u32 328, %s243_s23 }
  0x11   : > { %s7020_s28 = scalar_lea.vmem %s10519_s0, %s6884_s24 }
  0x12   : > { %s7025_s7 = scalar_lea.vmem %s10525_s6, %s6885_s25 }
  0x13   : > { %vm257_vm0 = vcmask 27648   ;;  %v6972_v0 = vmov 0  }
  0x14   : > { %259 = vst.msk [vmem:[#allocation2 + $0x4] sm:$0xf] %vm257_vm0, %v6972_v0 }
  0x15   : > { %260 = vst.msk [vmem:[#allocation2 + $0x8] sm:$0xf] %vm257_vm0, %v6972_v0 }
  0x16   : > { %261 = vst.msk [vmem:[#allocation2 + $0xc] sm:$0xf] %vm257_vm0, %v6972_v0 }
  0x17   : > { %262 = vst.msk [vmem:[#allocation2 + $0x10] sm:$0xf] %vm257_vm0, %v6972_v0 }
  0x18   : > { %263 = vst.msk [vmem:[#allocation2 + $0x14] sm:$0xf] %vm257_vm0, %v6972_v0 }
  0x19   : > { %264 = vst.msk [vmem:[#allocation2 + $0x18] sm:$0xf] %vm257_vm0, %v6972_v0 }
  0x1a   : > { %265 = vst.msk [vmem:[#allocation2 + $0x1c] sm:$0xf] %vm257_vm0, %v6972_v0 }
  0x1b   : > { %266 = vst.msk [vmem:[#allocation2 + $0x20] sm:$0xf] %vm257_vm0, %v6972_v0 }
  0x1c   : > { %267 = vst.msk [vmem:[#allocation2 + $0x24] sm:$0xf] %vm257_vm0, %v6972_v0 }
  0x1d   : > { %268 = vst.msk [vmem:[#allocation2 + $0x28] sm:$0xf] %vm257_vm0, %v6972_v0 }
  0x1e   : > { %269 = vst.msk [vmem:[#allocation2 + $0x2c] sm:$0xf] %vm257_vm0, %v6972_v0 }
  0x1f   : > { %270 = vst.msk [vmem:[#allocation2 + $0x30] sm:$0xf] %vm257_vm0, %v6972_v0 }
  0x20   : > { %271 = vst.msk [vmem:[#allocation2 + $0x34] sm:$0xf] %vm257_vm0, %v6972_v0 }
  0x21   : > { %272 = vst.msk [vmem:[#allocation2 + $0x38] sm:$0xf] %vm257_vm0, %v6972_v0 }
  0x22   : > { %273 = vst.msk [vmem:[#allocation2 + $0x3c] sm:$0xf] %vm257_vm0, %v6972_v0 }
  0x23   : > { %274 = vst.msk [vmem:[#allocation2 + $0x40] sm:$0xf] %vm257_vm0, %v6972_v0 }
  0x24   : > { %275 = vst.msk [vmem:[#allocation2 + $0x44] sm:$0xf] %vm257_vm0, %v6972_v0 }
  0x25   : > { %276 = vst.msk [vmem:[#allocation2 + $0x48] sm:$0xf] %vm257_vm0, %v6972_v0 }
  0x26   : > { %277 = vst.msk [vmem:[#allocation2 + $0x4c] sm:$0xf] %vm257_vm0, %v6972_v0 }
  0x27   : > { %278 = vst.msk [vmem:[#allocation2 + $0x50] sm:$0xf] %vm257_vm0, %v6972_v0 }
  0x28   : > { %279 = vst.msk [vmem:[#allocation2 + $0x54] sm:$0xf] %vm257_vm0, %v6972_v0 }
  0x29   : > { %280 = vst.msk [vmem:[#allocation2 + $0x58] sm:$0xf] %vm257_vm0, %v6972_v0 }
  0x2a   : > { %281 = vst.msk [vmem:[#allocation2 + $0x5c] sm:$0xf] %vm257_vm0, %v6972_v0 }
  0x2b   : > { %282 = vst.msk [vmem:[#allocation2 + $0x60] sm:$0xf] %vm257_vm0, %v6972_v0 }
  0x2c   : > { %283 = vst.msk [vmem:[#allocation2 + $0x64] sm:$0xf] %vm257_vm0, %v6972_v0 }
  0x2d   : > { %284 = vst.msk [vmem:[#allocation2 + $0x68] sm:$0xf] %vm257_vm0, %v6972_v0 }
  0x2e   : > { %285 = vst.msk [vmem:[#allocation2 + $0x6c] sm:$0xf] %vm257_vm0, %v6972_v0 }
  0x2f   : > { %286 = vst.msk [vmem:[#allocation2 + $0x70] sm:$0xf] %vm257_vm0, %v6972_v0 }
  0x30   : > { %287 = vst.msk [vmem:[#allocation2 + $0x74] sm:$0xf] %vm257_vm0, %v6972_v0 }
  0x31   : > { %288 = vst.msk [vmem:[#allocation2 + $0x78] sm:$0xf] %vm257_vm0, %v6972_v0 }
  0x32   : > { %289 = vst.msk [vmem:[#allocation2 + $0x7c] sm:$0xf] %vm257_vm0, %v6972_v0 }
  0x33   : > { %290 = vst.msk [vmem:[#allocation2 + $0x80] sm:$0xf] %vm257_vm0, %v6972_v0 }
  0x34   : > { %291 = vst.msk [vmem:[#allocation2 + $0x84] sm:$0xf] %vm257_vm0, %v6972_v0 }
  0x35   : > { %292 = vst.msk [vmem:[#allocation2 + $0x88] sm:$0xf] %vm257_vm0, %v6972_v0 }
  0x36   : > { %293 = vst.msk [vmem:[#allocation2 + $0x8c] sm:$0xf] %vm257_vm0, %v6972_v0 }
  0x37   : > { %294 = vst.msk [vmem:[#allocation2 + $0x90] sm:$0xf] %vm257_vm0, %v6972_v0 }
  0x38   : > { %295 = vst.msk [vmem:[#allocation2 + $0x94] sm:$0xf] %vm257_vm0, %v6972_v0 }
  0x39   : > { %296 = vst.msk [vmem:[#allocation2 + $0x98] sm:$0xf] %vm257_vm0, %v6972_v0 }
  0x3a   : > { %297 = vst.msk [vmem:[#allocation2 + $0x9c] sm:$0xf] %vm257_vm0, %v6972_v0 }
  0x3b   : > { %298 = vst.msk [vmem:[#allocation2 + $0xa0] sm:$0xf] %vm257_vm0, %v6972_v0 }
  0x3c   : > { %299 = vst.msk [vmem:[#allocation2 + $0xa4] sm:$0xf] %vm257_vm0, %v6972_v0 }
  0x3d   : > { %300 = vst.msk [vmem:[#allocation2 + $0xa8] sm:$0xf] %vm257_vm0, %v6972_v0 }
  0x3e   : > { %301 = vst.msk [vmem:[#allocation2 + $0xac] sm:$0xf] %vm257_vm0, %v6972_v0 }
  0x3f   : > { %302 = vst.msk [vmem:[#allocation2 + $0xb0] sm:$0xf] %vm257_vm0, %v6972_v0 }
  0x40   : > { %303 = vst.msk [vmem:[#allocation2 + $0xb4] sm:$0xf] %vm257_vm0, %v6972_v0 }
  0x41   : > { %304 = vst.msk [vmem:[#allocation2 + $0xb8] sm:$0xf] %vm257_vm0, %v6972_v0 }
  0x42 PF: > { %v6238_v1 = vld [vmem:[%s10521_s2 + $0x2] sm:$0x3]  ;;  %vm655_vm1 = vcmask 1041408   ;;  %v308_v2 = vld [vmem:[%s7020_s28 + $0x8] sm:$0xff]  ;;  %v309_v3 = vld [vmem:[%s7020_s28 + $0x10] sm:$0xff]  ;;  %vm549_vm2 = vcmask 1044480  }
  0x43   : > { %v657_v4 = vsel %vm655_vm1, %v6238_v1, 0  ;;  %v310_v5 = vld [vmem:[%s7020_s28 + $0x18] sm:$0xff]  ;;  %v311_v6 = vld [vmem:[%s7020_s28 + $0x20] sm:$0xff]  ;;  %v354_v7 = vpack.c.bf16 %v308_v2, %v308_v2  ;;  %v355_v8 = vpack.c.bf16 %v309_v3, %v309_v3  ;;  %vm591_vm3 = vcmask 31744   ;;  %v332_v13 = vld [vmem:[%s7020_s28 + $0xc8] sm:$0xff] }
  0x44   : > { %v330_v9 = vld [vmem:[%s7020_s28 + $0xb8] sm:$0xff]  ;;  %666 = vmatpush.bf16.msra.mxu0 %v657_v4  ;;  %6843 = vmatpush.bf16.msra.mxu2 %v657_v4  ;;  %v356_v10 = vpack.c.bf16 %v310_v5, %v310_v5  ;;  %v357_v11 = vpack.c.bf16 %v311_v6, %v311_v6  ;;  %v331_v12 = vld [vmem:[%s7020_s28 + $0xc0] sm:$0xff]  ;;  %v333_v14 = vld [vmem:[%s7020_s28 + $0xd0] sm:$0xff]  ;;  %v378_v19 = vpack.c.bf16 %v332_v13, %v332_v13  ;;  %vm772_vm4 = vsmask.f32 5376 }
  0x45   : > { %v376_v15 = vpack.c.bf16 %v330_v9, %v330_v9  ;;  %v486_v16 = vunpack.c.l.b16 %v354_v7  ;;  %v487_v17 = vunpack.c.l.b16 %v355_v8  ;;  %v377_v18 = vpack.c.bf16 %v331_v12, %v331_v12  ;;  %v6325_v20 = vld [vmem:[%s10521_s2 + $0x8] sm:$0x3]  ;;  %v441_v21 = vld [vmem:[%s10521_s2] sm:$0x3]  ;;  %v6281_v22 = vld [vmem:[%s10521_s2 + $0x4] sm:$0x3] }
  0x46   : > { %v488_v23 = vunpack.c.l.b16 %v356_v10  ;;  %v7094_v24 = vunpack.c.l.b16 %v357_v11  ;;  %v379_v25 = vpack.c.bf16 %v333_v14, %v333_v14  ;;  %v510_v29 = vunpack.c.l.b16 %v378_v19  ;;  %v6303_v47 = vld [vmem:[%s10521_s2 + $0x6] sm:$0x3]  ;;  %v312_v52 = vld [vmem:[%s7020_s28 + $0x28] sm:$0xff]  ;;  %v313_v53 = vld [vmem:[%s7020_s28 + $0x30] sm:$0xff] }
  0x47   : > { %v7096_v26 = vunpack.c.l.b16 %v376_v15  ;;  %v7098_v27 = vpack.c.b16 %v487_v17, %v486_v16  ;;  %v509_v28 = vunpack.c.l.b16 %v377_v18  ;;  %v1712_v30 = vsel %vm655_vm1, %v6325_v20, 0  ;;  %v334_v58 = vld [vmem:[%s7020_s28 + $0xd8] sm:$0xff]  ;;  %v335_v59 = vld [vmem:[%s7020_s28 + $0xe0] sm:$0xff]  ;;  %v336_v9 = vld [vmem:[%s7020_s28 + $0xe8] sm:$0xff] }
  0x48   : > { %v7102_v31 = vpack.c.b16 %v7094_v24, %v488_v23  ;;  %v7104_v32 = vunpack.c.l.b16 %v379_v25  ;;  %1721 = vmatpush.bf16.msrb.mxu0 %v1712_v30  ;;  %v1025_v33 = vsel %vm655_vm1, %v441_v21, 0  ;;  %v1290_v34 = vsel %vm655_vm1, %v6281_v22, 0  ;;  %v314_v0 = vld [vmem:[%s7020_s28 + $0x38] sm:$0xff]  ;;  %v315_v25 = vld [vmem:[%s7020_s28 + $0x40] sm:$0xff] }
  0x49   : > { %v550_v35 = vrot.slane %v7098_v27, 3  ;;  %v7110_v36 = vpack.c.b16 %v509_v28, %v7096_v26  ;;  %v7112_v37 = vpack.c.b16 %v510_v29, %v509_v28  ;;  %1034 = vmatpush.bf16.msra.mxu1 %v1025_v33  ;;  %6844 = vmatpush.bf16.msra.mxu3 %v1025_v33  ;;  %v10561_v38 = vshrl.u32 %v7098_v27, 16 }
  0x4a   : > { %v551_v39 = vrot.slane %v7102_v31, 3  ;;  %v7117_v40 = vpack.c.b16 %v7104_v32, %v510_v29  ;;  %v10559_v41 = vshll.u32 %v7098_v27, 16  ;;  %v10556_v42 = vshrl.u32 %v7102_v31, 16  ;;  %1299 = vmatpush.bf16.msrb.mxu2 %v1290_v34  ;;  %v337_v34 = vld [vmem:[%s7020_s28 + $0xf0] sm:$0xff] }
  0x4b   : > { %v10551_v43 = vrot.slane %v7110_v36, 3  ;;  %v776_v44 = vrot.slane %v10561_v38, 2  ;;  %v10552_v45 = vshll.u32 %v7102_v31, 16  ;;  %v10535_v46 = vshrl.u32 %v7110_v36, 16 }
  0x4c   : > { %v552_v48 = vsel %vm549_vm2, %v550_v35, %v551_v39  ;;  %v573_v49 = vrot.slane %v7117_v40, 3  ;;  %v779_v50 = vrot.slane %v10559_v41, 3  ;;  %v784_v51 = vrot.slane %v10556_v42, 2 }
  0x4d   : > { %6239 = vmatmul.msk.bf16.vlgmr.msra.gmra.mxu0 %vm591_vm3, %v552_v48  ;;  %v787_v54 = vrot.slane %v10552_v45, 3  ;;  %v874_v55 = vrot.slane %v10535_v46, 2  ;;  %v10534_v56 = vshll.u32 %v7110_v36, 16  ;;  %v10533_v57 = vshrl.u32 %v7117_v40, 16 }
  0x4e   : > { %v574_v60 = vsel %vm549_vm2, %v10551_v43, %v573_v49  ;;  %v780_v61 = vor.u32 %v779_v50, %v776_v44  ;;  %v10532_v62 = vshll.u32 %v7117_v40, 16  ;;  %v1469_v63 = vsel %vm655_vm1, %v6303_v47, 0 }
  0x4f   : > { %6250 = vmatmul.msk.bf16.vlgmr.msra.gmra.mxu2 %vm591_vm3, %v574_v60  ;;  %v788_v1 = vor.u32 %v787_v54, %v784_v51  ;;  %v877_v2 = vrot.slane %v10534_v56, 3  ;;  %v883_v3 = vrot.slane %v10533_v57, 2  ;;  %1478 = vmatpush.bf16.msrb.mxu3 %v1469_v63  ;;  %v358_v4 = vpack.c.bf16 %v312_v52, %v312_v52  ;;  %v338_v63 = vld [vmem:[%s7020_s28 + $0xf8] sm:$0xff] }
  0x50   : > { %v886_v5 = vrot.slane %v10532_v62, 3  ;;  %v359_v6 = vpack.c.bf16 %v313_v53, %v313_v53  ;;  %v380_v7 = vpack.c.bf16 %v334_v58, %v334_v58  ;;  %v381_v8 = vpack.c.bf16 %v335_v59, %v335_v59  ;;  %v316_v59 = vld [vmem:[%s7020_s28 + $0x48] sm:$0xff] }
  0x51   : > { %v789_v10 = vsel %vm772_vm4, %v780_v61, %v788_v1  ;;  %v7165_v11 = vor.u32 %v877_v2, %v874_v55  ;;  %v7167_v12 = vunpack.c.l.b16 %v358_v4  ;;  %v360_v13 = vpack.c.bf16 %v314_v0, %v314_v0 }
  0x52   : > { %6260 = vmatmul.msk.bf16.vlgmr.msra.gmra.mxu1 %vm591_vm3, %v789_v10  ;;  %v887_v14 = vor.u32 %v886_v5, %v883_v3  ;;  %v491_v15 = vunpack.c.l.b16 %v359_v6  ;;  %v512_v16 = vunpack.c.l.b16 %v380_v7  ;;  %v513_v17 = vunpack.c.l.b16 %v381_v8 }
  0x53   : > { %v492_v18 = vunpack.c.l.b16 %v360_v13  ;;  %v382_v19 = vpack.c.bf16 %v336_v9, %v336_v9  ;;  %v383_v52 = vpack.c.bf16 %v337_v34, %v337_v34  ;;  %v362_v2 = vpack.c.bf16 %v316_v59, %v316_v59 }
  0x54   : > { %v888_v20 = vsel %vm772_vm4, %v7165_v11, %v887_v14  ;;  %v7173_v21 = vpack.c.b16 %v491_v15, %v7167_v12  ;;  %v7175_v22 = vpack.c.b16 %v513_v17, %v512_v16  ;;  %v7178_v23 = vpack.c.b16 %v512_v16, %v7104_v32  ;;  %v317_v16 = vld [vmem:[%s7020_s28 + $0x50] sm:$0xff] }
  0x55   : > { %6271 = vmatmul.msk.bf16.vlgmr.msra.gmra.mxu3 %vm591_vm3, %v888_v20  ;;  %v7182_v28 = vpack.c.b16 %v492_v18, %v491_v15  ;;  %v361_v32 = vpack.c.bf16 %v315_v25, %v315_v25  ;;  %v514_v51 = vunpack.c.l.b16 %v382_v19  ;;  %v515_v3 = vunpack.c.l.b16 %v383_v52 }
  0x56   : > { %v553_v29 = vrot.slane %v7173_v21, 3  ;;  %v10549_v30 = vshrl.u32 %v7173_v21, 16  ;;  %v10548_v33 = vshll.u32 %v7173_v21, 16  ;;  %v10531_v35 = vshrl.u32 %v7175_v22, 16 }
  0x57   : > { %v10528_v44 = vshll.u32 %v7175_v22, 16  ;;  %v575_v47 = vrot.slane %v7175_v22, 3  ;;  %v7202_v58 = vpack.c.b16 %v514_v51, %v513_v17  ;;  %v493_v61 = vunpack.c.l.b16 %v361_v32  ;;  %v318_v17 = vld [vmem:[%s7020_s28 + $0x58] sm:$0xff] }
  0x58   : > { %v793_v48 = vrot.slane %v10549_v30, 2  ;;  %v796_v50 = vrot.slane %v10548_v33, 3  ;;  %v554_v53 = vsel %vm549_vm2, %v551_v39, %v553_v29  ;;  %v892_v54 = vrot.slane %v10531_v35, 2 }
  0x59   : > { %v895_v55 = vrot.slane %v10528_v44, 3  ;;  %v576_v0 = vsel %vm549_vm2, %v573_v49, %v575_v47  ;;  %v384_v4 = vpack.c.bf16 %v338_v63, %v338_v63  ;;  %v7212_v6 = vpack.c.b16 %v493_v61, %v492_v18 }
  0x5a   : > { %v797_v60 = vor.u32 %v796_v50, %v793_v48  ;;  %v494_v7 = vunpack.c.l.b16 %v362_v2  ;;  %v7218_v10 = vpack.c.b16 %v515_v3, %v514_v51  ;;  %v363_v32 = vpack.c.bf16 %v317_v16, %v317_v16  ;;  %v340_v50 = vld [vmem:[%s7020_s28 + $0x108] sm:$0xff] }
  0x5b   : > { %v896_v39 = vor.u32 %v895_v55, %v892_v54  ;;  %v516_v8 = vunpack.c.l.b16 %v384_v4  ;;  %v10544_v15 = vshrl.u32 %v7212_v6, 16  ;;  %v555_v18 = vrot.slane %v7212_v6, 3 }
  0x5c   : > { %v798_v5 = vsel %vm772_vm4, %v788_v1, %v797_v60  ;;  %v7214_v9 = vpack.c.b16 %v494_v7, %v493_v61  ;;  %v10542_v1 = vshll.u32 %v7212_v6, 16  ;;  %v10527_v19 = vshrl.u32 %v7218_v10, 16 }
  0x5d   : > { %6240 = vmatmul.msk.bf16.gmra.mxu0 %vm591_vm3, %v554_v53  ;;  %v897_v49 = vsel %vm772_vm4, %v887_v14, %v896_v39  ;;  %v7220_v13 = vpack.c.b16 %v516_v8, %v515_v3  ;;  %v10526_v20 = vshll.u32 %v7218_v10, 16  ;;  %v339_v14 = vld [vmem:[%s7020_s28 + $0x100] sm:$0xff]  ;;  %v802_v25 = vrot.slane %v10544_v15, 2 }
  0x5e   : > { %v805_v34 = vrot.slane %v10542_v1, 3  ;;  %v364_v48 = vpack.c.bf16 %v318_v17, %v318_v17  ;;  %v577_v51 = vrot.slane %v7218_v10, 3  ;;  %v385_v52 = vpack.c.bf16 %v339_v14, %v339_v14 }
  0x5f   : > { %6251 = vmatmul.msk.bf16.gmra.mxu2 %vm591_vm3, %v576_v0  ;;  %v386_v53 = vpack.c.bf16 %v340_v50, %v340_v50  ;;  %v556_v54 = vsel %vm549_vm2, %v553_v29, %v555_v18  ;;  %v901_v55 = vrot.slane %v10527_v19, 2  ;;  %v904_v59 = vrot.slane %v10526_v20, 3 }
  0x60   : > { %v806_v61 = vor.u32 %v805_v34, %v802_v25  ;;  %v495_v63 = vunpack.c.l.b16 %v363_v32  ;;  %v496_v0 = vunpack.c.l.b16 %v364_v48  ;;  %v578_v2 = vsel %vm549_vm2, %v575_v47, %v577_v51  ;;  %v319_v32 = vld [vmem:[%s7020_s28 + $0x60] sm:$0xff]  ;;  %v320_v48 = vld [vmem:[%s7020_s28 + $0x68] sm:$0xff] }
  0x61   : > { %v517_v3 = vunpack.c.l.b16 %v385_v52  ;;  %v905_v29 = vor.u32 %v904_v59, %v901_v55  ;;  %v341_v52 = vld [vmem:[%s7020_s28 + $0x110] sm:$0xff]  ;;  %v342_v55 = vld [vmem:[%s7020_s28 + $0x118] sm:$0xff]  ;;  %vm1142_vm5 = vsmask.f32 4352  ;;  %vm1870_vm6 = vsmask.f32 7424 }
  0x62   : > { %6261 = vmatmul.msk.bf16.gmra.mxu1 %vm591_vm3, %v798_v5  ;;  %v7244_v4 = vpack.c.b16 %v496_v0, %v495_v63  ;;  %v518_v5 = vunpack.c.l.b16 %v386_v53  ;;  %v7248_v16 = vpack.c.b16 %v495_v63, %v494_v7  ;;  %v365_v53 = vpack.c.bf16 %v319_v32, %v319_v32 }
  0x63   : > { %v906_v47 = vsel %vm772_vm4, %v896_v39, %v905_v29  ;;  %v7254_v14 = vpack.c.b16 %v517_v3, %v516_v8  ;;  %v387_v63 = vpack.c.bf16 %v341_v52, %v341_v52  ;;  %vm2693_vm7 = vsmask.f32 6400 }
  0x64   : > { %10717 = vst [vmem:[#allocation3_spill] sm:$0xff] %v7244_v4  ;;  %v7250_v17 = vpack.c.b16 %v518_v5, %v517_v3  ;;  %v10541_v25 = vshrl.u32 %v7248_v16, 16  ;;  %v10540_v34 = vshll.u32 %v7248_v16, 16  ;;  %v497_v19 = vunpack.c.l.b16 %v365_v53 }
  0x65   : > { %6272 = vmatmul.msk.bf16.gmra.mxu3 %vm591_vm3, %v897_v49  ;;  %v807_v49 = vsel %vm772_vm4, %v797_v60, %v806_v61  ;;  %v557_v60 = vrot.slane %v7248_v16, 3  ;;  %v10529_v7 = vshrl.u32 %v7254_v14, 16  ;;  %v10530_v50 = vshll.u32 %v7254_v14, 16 }
  0x66   : > { %v811_v39 = vrot.slane %v10541_v25, 2  ;;  %v814_v8 = vrot.slane %v10540_v34, 3  ;;  %v579_v59 = vrot.slane %v7254_v14, 3  ;;  %vm2429_vm8 = vcmask 1046528  }
  0x67   : > { %v558_v3 = vsel %vm549_vm2, %v555_v18, %v557_v60  ;;  %vm3370_vm9 = vcmask 27648   ;;  %vm3411_vm10 = vcmask 25600  }
  0x68   : > { %v815_v20 = vor.u32 %v814_v8, %v811_v39  ;;  %v580_v32 = vsel %vm549_vm2, %v577_v51, %v579_v59 }
  0x6d   : > { %6241 = vmatmul.msk.bf16.gmra.mxu0 %vm591_vm3, %v556_v54  ;;  %v366_v54 = vpack.c.bf16 %v320_v48, %v320_v48  ;;  %v519_v48 = vunpack.c.l.b16 %v387_v63  ;;  %v321_v63 = vld [vmem:[%s7020_s28 + $0x70] sm:$0xff] }
  0x6f   : > { %6252 = vmatmul.msk.bf16.gmra.mxu2 %vm591_vm3, %v578_v2  ;;  %v388_v2 = vpack.c.bf16 %v342_v55, %v342_v55  ;;  %v498_v44 = vunpack.c.l.b16 %v366_v54  ;;  %v7288_v8 = vpack.c.b16 %v519_v48, %v518_v5 }
  0x71   : > { %v7278_v52 = vpack.c.b16 %v498_v44, %v497_v19  ;;  %v520_v55 = vunpack.c.l.b16 %v388_v2  ;;  %v322_v2 = vld [vmem:[%s7020_s28 + $0x78] sm:$0xff] }
  0x72   : > { %6262 = vmatmul.msk.bf16.gmra.mxu1 %vm591_vm3, %v807_v49  ;;  %v910_v49 = vrot.slane %v10529_v7, 2  ;;  %v816_v7 = vsel %vm772_vm4, %v806_v61, %v815_v20  ;;  %v10537_v61 = vshrl.u32 %v7288_v8, 16 }
  0x73   : > { %10718 = vst [vmem:[#allocation4_spill] sm:$0xff] %v7278_v52  ;;  %v7284_v39 = vpack.c.b16 %v520_v55, %v519_v48 }
  0x74   : > { %v919_v62 = vrot.slane %v10537_v61, 2 }
  0x75   : > { %6273 = vmatmul.msk.bf16.gmra.mxu3 %vm591_vm3, %v906_v47  ;;  %v913_v47 = vrot.slane %v10530_v50, 3  ;;  %v7282_v50 = vpack.c.b16 %v497_v19, %v496_v0  ;;  %v10538_v0 = vshll.u32 %v7288_v8, 16 }
  0x77   : > { %v914_v18 = vor.u32 %v913_v47, %v910_v49  ;;  %v10536_v53 = vshrl.u32 %v7282_v50, 16  ;;  %v10539_v54 = vshll.u32 %v7282_v50, 16  ;;  %v559_v19 = vrot.slane %v7282_v50, 3  ;;  %v344_v47 = vld [vmem:[%s7020_s28 + $0x128] sm:$0xff] }
  0x78   : > { %v368_v49 = vpack.c.bf16 %v322_v2, %v322_v2  ;;  %v922_v57 = vrot.slane %v10538_v0, 3 }
  0x79   : > { %v915_v51 = vsel %vm772_vm4, %v905_v29, %v914_v18  ;;  %v820_v29 = vrot.slane %v10536_v53, 2  ;;  %v823_v5 = vrot.slane %v10539_v54, 3  ;;  %v560_v35 = vsel %vm549_vm2, %v557_v60, %v559_v19 }
  0x7a   : > { %v500_v53 = vunpack.c.l.b16 %v368_v49  ;;  %v923_v60 = vor.u32 %v922_v57, %v919_v62  ;;  %v323_v62 = vld [vmem:[%s7020_s28 + $0x80] sm:$0xff] }
  0x7b   : > { %v824_v56 = vor.u32 %v823_v5, %v820_v29  ;;  %v369_v49 = vpack.c.bf16 %v323_v62, %v323_v62 }
  0x7d   : > { %6242 = vmatmul.msk.bf16.gmra.mxu0 %vm591_vm3, %v558_v3  ;;  %v367_v3 = vpack.c.bf16 %v321_v63, %v321_v63  ;;  %v825_v61 = vsel %vm772_vm4, %v815_v20, %v824_v56 }
  0x7f   : > { %6253 = vmatmul.msk.bf16.gmra.mxu2 %vm591_vm3, %v580_v32  ;;  %v581_v32 = vrot.slane %v7288_v8, 3  ;;  %v499_v46 = vunpack.c.l.b16 %v367_v3  ;;  %v324_v3 = vld [vmem:[%s7020_s28 + $0x88] sm:$0xff] }
  0x81   : > { %v582_v63 = vsel %vm549_vm2, %v579_v59, %v581_v32  ;;  %v7316_v0 = vpack.c.b16 %v499_v46, %v498_v44 }
  0x82   : > { %6263 = vmatmul.msk.bf16.gmra.mxu1 %vm591_vm3, %v816_v7  ;;  %v343_v7 = vld [vmem:[%s7020_s28 + $0x120] sm:$0xff] }
  0x83   : > { %v389_v48 = vpack.c.bf16 %v343_v7, %v343_v7  ;;  %v7312_v7 = vpack.c.b16 %v500_v53, %v499_v46  ;;  %v10543_v5 = vshrl.u32 %v7316_v0, 16  ;;  %v10545_v57 = vshll.u32 %v7316_v0, 16 }
  0x84   : > { %v561_v46 = vrot.slane %v7316_v0, 3 }
  0x85   : > { %6274 = vmatmul.msk.bf16.gmra.mxu3 %vm591_vm3, %v915_v51  ;;  %v390_v51 = vpack.c.bf16 %v344_v47, %v344_v47  ;;  %v521_v2 = vunpack.c.l.b16 %v389_v48  ;;  %10719 = vst [vmem:[#allocation5_spill] sm:$0xff] %v7312_v7  ;;  %v370_v48 = vpack.c.bf16 %v324_v3, %v324_v3 }
  0x86   : > { %v562_v54 = vsel %vm549_vm2, %v559_v19, %v561_v46 }
  0x87   : > { %v522_v47 = vunpack.c.l.b16 %v390_v51  ;;  %v7322_v59 = vpack.c.b16 %v521_v2, %v520_v55  ;;  %v832_v55 = vrot.slane %v10545_v57, 3  ;;  %v346_v51 = vld [vmem:[%s7020_s28 + $0x138] sm:$0xff]  ;;  %v502_v15 = vunpack.c.l.b16 %v370_v48 }
  0x89   : > { %v7318_v29 = vpack.c.b16 %v522_v47, %v521_v2  ;;  %v10546_v44 = vshrl.u32 %v7322_v59, 16  ;;  %v10547_v20 = vshll.u32 %v7322_v59, 16 }
  0x8b   : > { %v928_v34 = vrot.slane %v10546_v44, 2  ;;  %v931_v25 = vrot.slane %v10547_v20, 3 }
  0x8d   : > { %6243 = vmatmul.msk.bf16.gmra.mxu0 %vm591_vm3, %v560_v35  ;;  %v924_v35 = vsel %vm772_vm4, %v914_v18, %v923_v60  ;;  %v829_v18 = vrot.slane %v10543_v5, 2  ;;  %v501_v5 = vunpack.c.l.b16 %v369_v49  ;;  %v932_v19 = vor.u32 %v931_v25, %v928_v34  ;;  %v325_v34 = vld [vmem:[%s7020_s28 + $0x90] sm:$0xff]  ;;  %v347_v49 = vld [vmem:[%s7020_s28 + $0x140] sm:$0xff] }
  0x8f   : > { %6254 = vmatmul.msk.bf16.gmra.mxu2 %vm591_vm3, %v582_v63  ;;  %v583_v63 = vrot.slane %v7322_v59, 3  ;;  %v833_v1 = vor.u32 %v832_v55, %v829_v18  ;;  %v7346_v57 = vpack.c.b16 %v502_v15, %v501_v5  ;;  %v7350_v44 = vpack.c.b16 %v501_v5, %v500_v53 }
  0x91   : > { %v584_v62 = vsel %vm549_vm2, %v581_v32, %v583_v63  ;;  %10720 = vst [vmem:[#allocation6_spill] sm:$0xff] %v7346_v57  ;;  %v10550_v55 = vshrl.u32 %v7350_v44, 16  ;;  %v10553_v25 = vshll.u32 %v7350_v44, 16 }
  0x92   : > { %6264 = vmatmul.msk.bf16.gmra.mxu1 %vm591_vm3, %v825_v61  ;;  %v345_v61 = vld [vmem:[%s7020_s28 + $0x130] sm:$0xff] }
  0x93   : > { %v391_v2 = vpack.c.bf16 %v345_v61, %v345_v61  ;;  %v838_v48 = vrot.slane %v10550_v55, 2 }
  0x95   : > { %6275 = vmatmul.msk.bf16.gmra.mxu3 %vm591_vm3, %v924_v35  ;;  %v392_v35 = vpack.c.bf16 %v346_v51, %v346_v51  ;;  %v523_v3 = vunpack.c.l.b16 %v391_v2  ;;  %v834_v51 = vsel %vm772_vm4, %v824_v56, %v833_v1  ;;  %v563_v56 = vrot.slane %v7350_v44, 3  ;;  %v326_v2 = vld [vmem:[%s7020_s28 + $0x98] sm:$0xff] }
  0x97   : > { %v524_v61 = vunpack.c.l.b16 %v392_v35  ;;  %v7356_v32 = vpack.c.b16 %v523_v3, %v522_v47  ;;  %v841_v47 = vrot.slane %v10553_v25, 3  ;;  %v348_v35 = vld [vmem:[%s7020_s28 + $0x148] sm:$0xff]  ;;  %v564_v20 = vsel %vm549_vm2, %v561_v46, %v563_v56 }
  0x99   : > { %v7352_v18 = vpack.c.b16 %v524_v61, %v523_v3  ;;  %v10554_v53 = vshrl.u32 %v7356_v32, 16  ;;  %v10555_v5 = vshll.u32 %v7356_v32, 16  ;;  %v372_v3 = vpack.c.bf16 %v326_v2, %v326_v2 }
  0x9a   : > { %v842_v55 = vor.u32 %v841_v47, %v838_v48 }
  0x9b   : > { %v937_v33 = vrot.slane %v10554_v53, 2  ;;  %v940_v30 = vrot.slane %v10555_v5, 3  ;;  %v504_v45 = vunpack.c.l.b16 %v372_v3 }
  0x9c   : > { %v843_v46 = vsel %vm772_vm4, %v833_v1, %v842_v55 }
  0x9d   : > { %6244 = vmatmul.msk.bf16.gmra.mxu0 %vm591_vm3, %v562_v54  ;;  %v933_v54 = vsel %vm772_vm4, %v923_v60, %v932_v19  ;;  %v371_v60 = vpack.c.bf16 %v325_v34, %v325_v34 }
  0x9f   : > { %6255 = vmatmul.msk.bf16.gmra.mxu2 %vm591_vm3, %v584_v62  ;;  %v585_v62 = vrot.slane %v7356_v32, 3  ;;  %v503_v43 = vunpack.c.l.b16 %v371_v60 }
  0xa1   : > { %v586_v34 = vsel %vm549_vm2, %v583_v63, %v585_v62  ;;  %v7380_v2 = vpack.c.b16 %v504_v45, %v503_v43  ;;  %v7384_v53 = vpack.c.b16 %v503_v43, %v502_v15 }
  0xa2   : > { %6265 = vmatmul.msk.bf16.gmra.mxu1 %vm591_vm3, %v834_v51  ;;  %v393_v51 = vpack.c.bf16 %v347_v49, %v347_v49 }
  0xa3   : > { %10721 = vst [vmem:[#allocation7_spill] sm:$0xff] %v7380_v2  ;;  %v10557_v47 = vshrl.u32 %v7384_v53, 16  ;;  %v565_v1 = vrot.slane %v7384_v53, 3 }
  0xa4   : > { %v525_v25 = vunpack.c.l.b16 %v393_v51  ;;  %v328_v51 = vld [vmem:[%s7020_s28 + $0xa8] sm:$0xff] }
  0xa5   : > { %6276 = vmatmul.msk.bf16.gmra.mxu3 %vm591_vm3, %v933_v54  ;;  %v394_v54 = vpack.c.bf16 %v348_v35, %v348_v35  ;;  %v941_v35 = vor.u32 %v940_v30, %v937_v33  ;;  %v10558_v30 = vshll.u32 %v7384_v53, 16  ;;  %v327_v33 = vld [vmem:[%s7020_s28 + $0xa0] sm:$0xff]  ;;  %v847_v60 = vrot.slane %v10557_v47, 2 }
  0xa6   : > { %v374_v47 = vpack.c.bf16 %v328_v51, %v328_v51 }
  0xa7   : > { %v526_v49 = vunpack.c.l.b16 %v394_v54  ;;  %v942_v63 = vsel %vm772_vm4, %v932_v19, %v941_v35  ;;  %v373_v19 = vpack.c.bf16 %v327_v33, %v327_v33  ;;  %v566_v54 = vsel %vm549_vm2, %v563_v56, %v565_v1 }
  0xa8   : > { %v506_v38 = vunpack.c.l.b16 %v374_v47 }
  0xa9   : > { %v7386_v48 = vpack.c.b16 %v526_v49, %v525_v25  ;;  %v505_v42 = vunpack.c.l.b16 %v373_v19 }
  0xab   : > { %10722 = vst [vmem:[#allocation8_spill] sm:$0xff] %v7386_v48 }
  0xad   : > { %6245 = vmatmul.msk.bf16.gmra.mxu0 %vm591_vm3, %v564_v20  ;;  %v7390_v20 = vpack.c.b16 %v525_v25, %v524_v61  ;;  %v850_v61 = vrot.slane %v10558_v30, 3  ;;  %v349_v25 = vld [vmem:[%s7020_s28 + $0x150] sm:$0xff] }
  0xaf   : > { %6256 = vmatmul.msk.bf16.gmra.mxu2 %vm591_vm3, %v586_v34  ;;  %v10560_v43 = vshrl.u32 %v7390_v20, 16  ;;  %v10562_v15 = vshll.u32 %v7390_v20, 16  ;;  %v587_v3 = vrot.slane %v7390_v20, 3  ;;  %v851_v5 = vor.u32 %v850_v61, %v847_v60 }
  0xb1   : > { %v946_v34 = vrot.slane %v10560_v43, 2  ;;  %v588_v30 = vsel %vm549_vm2, %v585_v62, %v587_v3  ;;  %v852_v56 = vsel %vm772_vm4, %v842_v55, %v851_v5  ;;  %v7417_v43 = vpack.c.b16 %v505_v42, %v504_v45  ;;  %v6347_v45 = vld [vmem:[%s10521_s2 + $0xa] sm:$0x3] }
  0xb2   : > { %6266 = vmatmul.msk.bf16.gmra.mxu1 %vm591_vm3, %v843_v46  ;;  %v949_v46 = vrot.slane %v10562_v15, 3  ;;  %v7419_v15 = vpack.c.b16 %v506_v38, %v505_v42 }
  0xb3   : > { %v10563_v61 = vshrl.u32 %v7417_v43, 16  ;;  %v10564_v19 = vshll.u32 %v7417_v43, 16  ;;  %v567_v42 = vrot.slane %v7417_v43, 3 }
  0xb4   : > { %v950_v33 = vor.u32 %v949_v46, %v946_v34 }
  0xb5   : > { %6277 = vmatmul.msk.bf16.gmra.mxu3 %vm591_vm3, %v942_v63  ;;  %v395_v63 = vpack.c.bf16 %v349_v25, %v349_v25  ;;  %v329_v25 = vld [vmem:[%s7020_s28 + $0xb0] sm:$0xff]  ;;  %v856_v47 = vrot.slane %v10563_v61, 2  ;;  %v568_v46 = vsel %vm549_vm2, %v565_v1, %v567_v42 }
  0xb6   : > { %v951_v60 = vsel %vm772_vm4, %v941_v35, %v950_v33  ;;  %v375_v51 = vpack.c.bf16 %v329_v25, %v329_v25 }
  0xb7   : > { %v7413_v41 = vunpack.c.l.b16 %v395_v63 }
  0xb9   : > { %10723 = vst [vmem:[#allocation9_spill] sm:$0xff] %v7413_v41  ;;  %v7424_v62 = vpack.c.b16 %v7413_v41, %v526_v49  ;;  %v2081_v49 = vsel %vm655_vm1, %v6347_v45, 0  ;;  %v7447_v45 = vunpack.c.l.b16 %v375_v51 }
  0xba   : > { %2090 = vmatpush.bf16.msrb.mxu1 %v2081_v49 }
  0xbb   : > { %10724 = vst [vmem:[#allocation10_spill] sm:$0xff] %v7424_v62  ;;  %v10565_v55 = vshrl.u32 %v7424_v62, 16  ;;  %v10567_v35 = vshll.u32 %v7424_v62, 16  ;;  %v7454_v1 = vpack.c.b16 %v7447_v45, %v506_v38 }
  0xbd   : > { %6246 = vmatmul.msk.bf16.gmra.mxu0 %vm591_vm3, %v566_v54  ;;  %v589_v54 = vrot.slane %v7424_v62, 3  ;;  %v955_v63 = vrot.slane %v10565_v55, 2  ;;  %v10571_v51 = vshll.u32 %v7454_v1, 16  ;;  %v569_v38 = vrot.slane %v7454_v1, 3 }
  0xbf   : > { %6257 = vmatmul.msk.bf16.gmra.mxu2 %vm591_vm3, %v588_v30  ;;  %v859_v30 = vrot.slane %v10564_v19, 3  ;;  %v590_v61 = vsel %vm549_vm2, %v587_v3, %v589_v54  ;;  %v10570_v3 = vshrl.u32 %v7454_v1, 16 }
  0xc2   : > { %6267 = vmatmul.msk.bf16.gmra.mxu1 %vm591_vm3, %v852_v56  ;;  %v958_v56 = vrot.slane %v10567_v35, 3 }
  0xc4   : > { %v959_v25 = vor.u32 %v958_v56, %v955_v63 }
  0xc5   : > { %6278 = vmatmul.msk.bf16.gmra.mxu3 %vm591_vm3, %v951_v60  ;;  %v860_v60 = vor.u32 %v859_v30, %v856_v47 }
  0xc6   : > { %v960_v47 = vsel %vm772_vm4, %v950_v33, %v959_v25  ;;  %v868_v33 = vrot.slane %v10571_v51, 3 }
  0xc7   : > { %v861_v19 = vsel %vm772_vm4, %v851_v5, %v860_v60  ;;  %v6369_v5 = vld [vmem:[%s10521_s2 + $0xc] sm:$0x3] }
  0xca   : > { %v668_v34 = vpop.f32.mrf.mxu0 }
  0xcd   : > { %6247 = vmatmul.msk.bf16.gmra.mxu0 %vm591_vm3, %v568_v46 }
  0xcf   : > { %6258 = vmatmul.msk.bf16.gmra.mxu2 %vm591_vm3, %v590_v61  ;;  %v1036_v49 = vpop.f32.mrf.mxu1  ;;  %v2271_v61 = vsel %vm655_vm1, %v6369_v5, 0  ;;  %v570_v5 = vsel %vm549_vm2, %v567_v42, %v569_v38  ;;  %v6413_v42 = vld [vmem:[%s10521_s2 + $0x10] sm:$0x3] }
  0xd0   : > { %v7456_v55 = vadd.f32 %v1036_v49, %v668_v34  ;;  %2280 = vmatpush.bf16.msra.mxu2 %v2271_v61  ;;  %v6391_v49 = vld [vmem:[%s10521_s2 + $0xe] sm:$0x3] }
  0xd1   : > { %v2535_v62 = vsel %vm655_vm1, %v6391_v49, 0  ;;  %v10729_v49 = vshrl.u32 %v7102_v31, 16 }
  0xd2   : > { %v723_v41 = vpop.f32.mrf.mxu2  ;;  %6268 = vmatmul.msk.bf16.gmra.mxu1 %vm591_vm3, %v861_v19  ;;  %v670_v30 = vpop.f32.mrf.mxu0  ;;  %v865_v19 = vrot.slane %v10570_v3, 2  ;;  %2544 = vmatpush.bf16.msra.mxu3 %v2535_v62 }
  0xd4   : > { %v869_v3 = vor.u32 %v868_v33, %v865_v19  ;;  %v2841_v19 = vsel %vm655_vm1, %v6413_v42, 0 }
  0xd5   : > { %6279 = vmatmul.msk.bf16.gmra.mxu3 %vm591_vm3, %v960_v47  ;;  %2850 = vmatpush.bf16.msra.mxu0 %v2841_v19 }
  0xd7   : > { %v1038_v34 = vpop.f32.mrf.mxu1 }
  0xd8   : > { %v1091_v46 = vpop.f32.mrf.mxu3  ;;  %v7472_v63 = vadd.f32 %v1038_v34, %v670_v30 }
  0xd9   : > { %v7474_v56 = vadd.f32 %v1091_v46, %v723_v41  ;;  %v870_v41 = vsel %vm772_vm4, %v860_v60, %v869_v3  ;;  %v10728_v60 = vshll.u32 %v7098_v27, 16 }
  0xda   : > { %v725_v47 = vpop.f32.mrf.mxu2  ;;  %v673_v35 = vpop.f32.mrf.mxu0 }
  0xdb   : > { %10725 = vst [vmem:[#allocation11_spill] sm:$0xff] %v7474_v56 }
  0xdd   : > { %6248 = vmatmul.msk.bf16.gmra.mxu0 %vm591_vm3, %v570_v5  ;;  %v10730_v5 = vshll.u32 %v7102_v31, 16  ;;  %v10732_v31 = vshrl.u32 %v7173_v21, 16 }
  0xdf   : > { %6259 = vmatmul.msk.bf16.gmra.mxu2 %vm591_vm3, %v589_v54  ;;  %v1041_v30 = vpop.f32.mrf.mxu1  ;;  %v10727_v54 = vshrl.u32 %v7098_v27, 16 }
  0xe0   : > { %v1093_v61 = vpop.f32.mrf.mxu3  ;;  %v7484_v34 = vadd.f32 %v1041_v30, %v673_v35  ;;  %v1144_v35 = vrot.slane %v10728_v60, 4  ;;  %v1147_v30 = vrot.slane %v10730_v5, 4  ;;  %v10731_v60 = vrot.slane %v7110_v36, 3 }
  0xe1   : > { %v7486_v46 = vadd.f32 %v1093_v61, %v725_v47  ;;  %v1143_v33 = vrot.slane %v10727_v54, 3  ;;  %v1146_v47 = vrot.slane %v10729_v49, 3  ;;  %v1150_v5 = vrot.slane %v10732_v31, 3 }
  0xe2   : > { %v728_v51 = vpop.f32.mrf.mxu2  ;;  %6269 = vmatmul.msk.bf16.gmra.mxu1 %vm591_vm3, %v870_v41  ;;  %v675_v62 = vpop.f32.mrf.mxu0  ;;  %v572_v49 = vsel %vm549_vm2, %v569_v38, %v10731_v60  ;;  %v1627_v38 = vpack.c.b16 %v7167_v12, %v7094_v24 }
  0xe3   : > { %10726 = vst [vmem:[#allocation12_spill] sm:$0xff] %v7486_v46  ;;  %v1145_v42 = vor.u32 %v1144_v35, %v1143_v33  ;;  %v1148_v19 = vor.u32 %v1147_v30, %v1146_v47  ;;  %v879_v35 = vsel %vm772_vm4, %v869_v3, %v7165_v11  ;;  %v10573_v3 = vshll.u32 %v7182_v28, 16 }
  0xe5   : > { %6280 = vmatmul.msk.bf16.gmra.mxu3 %vm591_vm3, %v959_v25  ;;  %v10733_v25 = vshll.u32 %v7173_v21, 16 }
  0xe7   : > { %v1043_v61 = vpop.f32.mrf.mxu1  ;;  %v1151_v48 = vrot.slane %v10733_v25, 4 }
  0xe8   : > { %v1096_v41 = vpop.f32.mrf.mxu3  ;;  %v7502_v46 = vadd.f32 %v1043_v61, %v675_v62  ;;  %v1149_v62 = vsel %vm1142_vm5, %v1145_v42, %v1148_v19  ;;  %v1873_v42 = vshll.u32 %v1627_v38, 16 }
  0xe9   : > { %v7504_v56 = vadd.f32 %v1096_v41, %v728_v51  ;;  %v1152_v33 = vor.u32 %v1151_v48, %v1150_v5  ;;  %v10735_v5 = vshrl.u32 %v7212_v6, 16 }
  0xea   : > { %v730_v54 = vpop.f32.mrf.mxu2  ;;  %v678_v27 = vpop.f32.mrf.mxu0  ;;  %v1875_v11 = vrot.slane %v1873_v42, 1 }
  0xeb   : > { %v1153_v41 = vsel %vm1142_vm5, %v1148_v19, %v1152_v33  ;;  %v1154_v25 = vrot.slane %v10735_v5, 3  ;;  %v10736_v19 = vshll.u32 %v7212_v6, 16  ;;  %v10575_v5 = vshrl.u32 %v7182_v28, 16 }
  0xed   : > { %6249 = vmatmul.msk.bf16.gmra.mxu0 %vm591_vm3, %v572_v49  ;;  %v1871_v49 = vshrl.u32 %v1627_v38, 16 }
  0xef   : > { %6282 = vmatmul.msk.bf16.vlgmr.msrb.gmra.mxu2 %vm591_vm3, %v1149_v62  ;;  %v1046_v51 = vpop.f32.mrf.mxu1  ;;  %v1155_v62 = vrot.slane %v10736_v19, 4 }
  0xf0   : > { %v1098_v47 = vpop.f32.mrf.mxu3  ;;  %v7520_v30 = vadd.f32 %v1046_v51, %v678_v27  ;;  %v1876_v51 = vor.u32 %v1875_v11, %v1871_v49 }
  0xf1   : > { %v7522_v61 = vadd.f32 %v1098_v47, %v730_v54  ;;  %v1156_v47 = vor.u32 %v1155_v62, %v1154_v25 }
  0xf2   : > { %v733_v21 = vpop.f32.mrf.mxu2  ;;  %6270 = vmatmul.msk.bf16.gmra.mxu1 %vm591_vm3, %v879_v35  ;;  %v680_v48 = vpop.f32.mrf.mxu0  ;;  %v1879_v35 = vrot.slane %v10573_v3, 1 }
  0xf3   : > { %v1157_v49 = vsel %vm1142_vm5, %v1152_v33, %v1156_v47 }
  0xf5   : > { %6304 = vmatmul.msk.bf16.vlgmr.msrb.gmra.mxu3 %vm591_vm3, %v1153_v41 }
  0xf7   : > { %v1048_v60 = vpop.f32.mrf.mxu1 }
  0xf8   : > { %v1101_v24 = vpop.f32.mrf.mxu3  ;;  %v7528_v12 = vadd.f32 %v1048_v60, %v680_v48  ;;  %v1880_v48 = vsel %vm1870_vm6, %v1876_v51, %v1879_v35  ;;  %v10739_v51 = vshrl.u32 %v7248_v16, 16 }
  0xf9   : > { %v7530_v27 = vadd.f32 %v1101_v24, %v733_v21 }
  0xfa   : > { %v735_v54 = vpop.f32.mrf.mxu2  ;;  %v683_v31 = vpop.f32.mrf.mxu0  ;;  %v1158_v33 = vrot.slane %v10739_v51, 3 }
  0xfb   : > { %10734 = vst [vmem:[#allocation13_spill] sm:$0xff] %v7530_v27 }
  0xfd   : > { %6326 = vmatmul.msk.bf16.vlgmr.msrb.gmra.mxu0 %vm591_vm3, %v1627_v38 }
  0xff   : > { %6283 = vmatmul.msk.bf16.gmra.mxu2 %vm591_vm3, %v1153_v41  ;;  %v1051_v21 = vpop.f32.mrf.mxu1  ;;  %v10574_v41 = vshll.u32 %v7214_v9, 16 }
 0x100   : > { %v1103_v42 = vpop.f32.mrf.mxu3  ;;  %v7541_v60 = vadd.f32 %v1051_v21, %v683_v31  ;;  %v10740_v21 = vshll.u32 %v7248_v16, 16 }
 0x101   : > { %v7543_v24 = vadd.f32 %v1103_v42, %v735_v54  ;;  %v1883_v42 = vor.u32 %v10575_v5, %v1879_v35  ;;  %v1886_v3 = vrot.slane %v10574_v41, 1 }
 0x102   : > { %v738_v6 = vpop.f32.mrf.mxu2  ;;  %6348 = vmatmul.msk.bf16.vlgmr.msrb.gmra.mxu1 %vm591_vm3, %v1880_v48  ;;  %v685_v11 = vpop.f32.mrf.mxu0  ;;  %v1159_v48 = vrot.slane %v10740_v21, 4 }
 0x103   : > { %10737 = vst [vmem:[#allocation14_spill] sm:$0xff] %v7543_v24 }
 0x105   : > { %6305 = vmatmul.msk.bf16.gmra.mxu3 %vm591_vm3, %v1157_v49 }
 0x107   : > { %v1053_v38 = vpop.f32.mrf.mxu1 }
 0x108   : > { %v1106_v25 = vpop.f32.mrf.mxu3  ;;  %v7550_v19 = vadd.f32 %v1053_v38, %v685_v11  ;;  %v1160_v11 = vor.u32 %v1159_v48, %v1158_v33  ;;  %v7566_v38 = vsel %vm1870_vm6, %v1883_v42, %v1886_v3  ;;  %v10576_v48 = vshll.u32 %v7244_v4, 16 }
 0x109   : > { %v7552_v31 = vadd.f32 %v1106_v25, %v738_v6  ;;  %10741 = vst [vmem:[#allocation16_spill] sm:$0xff] %v7566_v38 }
 0x10a   : > { %v740_v54 = vpop.f32.mrf.mxu2  ;;  %v688_v62 = vpop.f32.mrf.mxu0  ;;  %v1161_v35 = vsel %vm1142_vm5, %v1156_v47, %v1160_v11  ;;  %v10744_v47 = vshrl.u32 %v7282_v50, 16  ;;  %v1893_v27 = vrot.slane %v10576_v48, 1 }
 0x10b   : > { %10738 = vst [vmem:[#allocation15_spill] sm:$0xff] %v7552_v31 }
 0x10d   : > { %6327 = vmatmul.msk.bf16.gmra.mxu0 %vm591_vm3, %v7182_v28 }
 0x10f   : > { %6284 = vmatmul.msk.bf16.gmra.mxu2 %vm591_vm3, %v1157_v49  ;;  %v1056_v6 = vpop.f32.mrf.mxu1  ;;  %v10577_v49 = vshrl.u32 %v7214_v9, 16 }
 0x110   : > { %v1108_v25 = vpop.f32.mrf.mxu3  ;;  %v7568_v51 = vadd.f32 %v1056_v6, %v688_v62 }
 0x111   : > { %v7570_v16 = vadd.f32 %v1108_v25, %v740_v54  ;;  %v1162_v25 = vrot.slane %v10744_v47, 3  ;;  %v1890_v24 = vor.u32 %v10577_v49, %v1886_v3 }
 0x112   : > { %v743_v21 = vpop.f32.mrf.mxu2  ;;  %6349 = vmatmul.msk.bf16.gmra.mxu1 %vm591_vm3, %v7566_v38  ;;  %v690_v41 = vpop.f32.mrf.mxu0 }
 0x113   : > { %10742 = vst [vmem:[#allocation17_spill] sm:$0xff] %v7570_v16  ;;  %v10745_v16 = vshll.u32 %v7282_v50, 16 }
 0x115   : > { %6306 = vmatmul.msk.bf16.gmra.mxu3 %vm591_vm3, %v1161_v35  ;;  %v1163_v31 = vrot.slane %v10745_v16, 4 }
 0x117   : > { %v1058_v33 = vpop.f32.mrf.mxu1 }
 0x118   : > { %v1111_v42 = vpop.f32.mrf.mxu3  ;;  %v7578_v5 = vadd.f32 %v1058_v33, %v690_v41  ;;  %v1164_v41 = vor.u32 %v1163_v31, %v1162_v25  ;;  %v7594_v33 = vsel %vm1870_vm6, %v1890_v24, %v1893_v27  ;;  %v10580_v24 = vshll.u32 %v7278_v52, 16 }
 0x119   : > { %v7580_v62 = vadd.f32 %v1111_v42, %v743_v21  ;;  %10746 = vst [vmem:[#allocation19_spill] sm:$0xff] %v7594_v33 }
 0x11a   : > { %v745_v54 = vpop.f32.mrf.mxu2  ;;  %v693_v6 = vpop.f32.mrf.mxu0  ;;  %v1165_v3 = vsel %vm1142_vm5, %v1160_v11, %v1164_v41  ;;  %v10749_v11 = vshrl.u32 %v7316_v0, 16  ;;  %v1900_v38 = vrot.slane %v10580_v24, 1 }
 0x11b   : > { %10743 = vst [vmem:[#allocation18_spill] sm:$0xff] %v7580_v62 }
 0x11d   : > { %6328 = vmatmul.msk.bf16.gmra.mxu0 %vm591_vm3, %v7214_v9 }
 0x11f   : > { %6285 = vmatmul.msk.bf16.gmra.mxu2 %vm591_vm3, %v1161_v35  ;;  %v1061_v21 = vpop.f32.mrf.mxu1  ;;  %v10581_v35 = vshrl.u32 %v7244_v4, 16 }
 0x120   : > { %v1113_v42 = vpop.f32.mrf.mxu3  ;;  %v7596_v47 = vadd.f32 %v1061_v21, %v693_v6 }
 0x121   : > { %v7598_v50 = vadd.f32 %v1113_v42, %v745_v54  ;;  %v1166_v42 = vrot.slane %v10749_v11, 3 }
 0x122   : > { %v748_v16 = vpop.f32.mrf.mxu2  ;;  %6350 = vmatmul.msk.bf16.gmra.mxu1 %vm591_vm3, %v7594_v33  ;;  %v695_v48 = vpop.f32.mrf.mxu0  ;;  %v1897_v33 = vor.u32 %v10581_v35, %v1893_v27 }
 0x123   : > { %10747 = vst [vmem:[#allocation20_spill] sm:$0xff] %v7598_v50  ;;  %v10750_v50 = vshll.u32 %v7316_v0, 16 }
 0x125   : > { %6307 = vmatmul.msk.bf16.gmra.mxu3 %vm591_vm3, %v1165_v3  ;;  %v1167_v62 = vrot.slane %v10750_v50, 4 }
 0x127   : > { %v1063_v31 = vpop.f32.mrf.mxu1 }
 0x128   : > { %v1116_v25 = vpop.f32.mrf.mxu3  ;;  %v7606_v49 = vadd.f32 %v1063_v31, %v695_v48  ;;  %v1168_v48 = vor.u32 %v1167_v62, %v1166_v42  ;;  %v7622_v31 = vsel %vm1870_vm6, %v1897_v33, %v1900_v38  ;;  %v10585_v33 = vshll.u32 %v7312_v7, 16 }
 0x129   : > { %v7608_v6 = vadd.f32 %v1116_v25, %v748_v16  ;;  %10751 = vst [vmem:[#allocation22_spill] sm:$0xff] %v7622_v31 }
 0x12a   : > { %v750_v54 = vpop.f32.mrf.mxu2  ;;  %v698_v21 = vpop.f32.mrf.mxu0  ;;  %v1169_v27 = vsel %vm1142_vm5, %v1164_v41, %v1168_v48  ;;  %v10754_v41 = vshrl.u32 %v7350_v44, 16 }
 0x12b   : > { %10748 = vst [vmem:[#allocation21_spill] sm:$0xff] %v7608_v6 }
 0x12d   : > { %6329 = vmatmul.msk.bf16.gmra.mxu0 %vm591_vm3, %v7244_v4  ;;  %v1907_v4 = vrot.slane %v10585_v33, 1 }
 0x12f   : > { %6286 = vmatmul.msk.bf16.gmra.mxu2 %vm591_vm3, %v1165_v3  ;;  %v1066_v16 = vpop.f32.mrf.mxu1  ;;  %v10586_v3 = vshrl.u32 %v7278_v52, 16 }
 0x130   : > { %v1118_v25 = vpop.f32.mrf.mxu3  ;;  %v7624_v11 = vadd.f32 %v1066_v16, %v698_v21 }
 0x131   : > { %v7626_v0 = vadd.f32 %v1118_v25, %v750_v54  ;;  %v1170_v25 = vrot.slane %v10754_v41, 3 }
 0x132   : > { %v753_v50 = vpop.f32.mrf.mxu2  ;;  %6351 = vmatmul.msk.bf16.gmra.mxu1 %vm591_vm3, %v7622_v31  ;;  %v700_v24 = vpop.f32.mrf.mxu0  ;;  %v1904_v31 = vor.u32 %v10586_v3, %v1900_v38 }
 0x133   : > { %10752 = vst [vmem:[#allocation23_spill] sm:$0xff] %v7626_v0  ;;  %v10755_v0 = vshll.u32 %v7350_v44, 16 }
 0x135   : > { %6308 = vmatmul.msk.bf16.gmra.mxu3 %vm591_vm3, %v1169_v27  ;;  %v1171_v6 = vrot.slane %v10755_v0, 4 }
 0x137   : > { %v1068_v62 = vpop.f32.mrf.mxu1 }
 0x138   : > { %v1121_v42 = vpop.f32.mrf.mxu3  ;;  %v7634_v35 = vadd.f32 %v1068_v62, %v700_v24  ;;  %v1172_v24 = vor.u32 %v1171_v6, %v1170_v25  ;;  %v7650_v62 = vsel %vm1870_vm6, %v1904_v31, %v1907_v4  ;;  %v10590_v31 = vshll.u32 %v7346_v57, 16 }
 0x139   : > { %v7636_v21 = vadd.f32 %v1121_v42, %v753_v50  ;;  %10756 = vst [vmem:[#allocation25_spill] sm:$0xff] %v7650_v62 }
 0x13a   : > { %v755_v54 = vpop.f32.mrf.mxu2  ;;  %v703_v16 = vpop.f32.mrf.mxu0  ;;  %v1173_v38 = vsel %vm1142_vm5, %v1168_v48, %v1172_v24  ;;  %v10759_v48 = vshrl.u32 %v7384_v53, 16 }
 0x13b   : > { %10753 = vst [vmem:[#allocation24_spill] sm:$0xff] %v7636_v21 }
 0x13d   : > { %6330 = vmatmul.msk.bf16.gmra.mxu0 %vm591_vm3, %v7278_v52  ;;  %v1914_v52 = vrot.slane %v10590_v31, 1 }
 0x13f   : > { %6287 = vmatmul.msk.bf16.gmra.mxu2 %vm591_vm3, %v1169_v27  ;;  %v1071_v50 = vpop.f32.mrf.mxu1  ;;  %v10591_v27 = vshrl.u32 %v7312_v7, 16 }
 0x140   : > { %v1123_v42 = vpop.f32.mrf.mxu3  ;;  %v7652_v41 = vadd.f32 %v1071_v50, %v703_v16 }
 0x141   : > { %v7654_v44 = vadd.f32 %v1123_v42, %v755_v54  ;;  %v1174_v42 = vrot.slane %v10759_v48, 3 }
 0x142   : > { %v758_v0 = vpop.f32.mrf.mxu2  ;;  %6352 = vmatmul.msk.bf16.gmra.mxu1 %vm591_vm3, %v7650_v62  ;;  %v705_v33 = vpop.f32.mrf.mxu0  ;;  %v1911_v62 = vor.u32 %v10591_v27, %v1907_v4 }
 0x143   : > { %10757 = vst [vmem:[#allocation26_spill] sm:$0xff] %v7654_v44  ;;  %v10760_v44 = vshll.u32 %v7384_v53, 16 }
 0x145   : > { %6309 = vmatmul.msk.bf16.gmra.mxu3 %vm591_vm3, %v1173_v38  ;;  %v1175_v21 = vrot.slane %v10760_v44, 4 }
 0x147   : > { %v1073_v6 = vpop.f32.mrf.mxu1 }
 0x148   : > { %v1126_v25 = vpop.f32.mrf.mxu3  ;;  %v7662_v3 = vadd.f32 %v1073_v6, %v705_v33  ;;  %v1176_v33 = vor.u32 %v1175_v21, %v1174_v42  ;;  %v7678_v6 = vsel %vm1870_vm6, %v1911_v62, %v1914_v52  ;;  %v10595_v62 = vshll.u32 %v7380_v2, 16 }
 0x149   : > { %v7664_v16 = vadd.f32 %v1126_v25, %v758_v0  ;;  %10761 = vst [vmem:[#allocation28_spill] sm:$0xff] %v7678_v6 }
 0x14a   : > { %v760_v54 = vpop.f32.mrf.mxu2  ;;  %v708_v50 = vpop.f32.mrf.mxu0  ;;  %v1177_v4 = vsel %vm1142_vm5, %v1172_v24, %v1176_v33  ;;  %v10764_v24 = vshrl.u32 %v7417_v43, 16 }
 0x14b   : > { %10758 = vst [vmem:[#allocation27_spill] sm:$0xff] %v7664_v16 }
 0x14d   : > { %6331 = vmatmul.msk.bf16.gmra.mxu0 %vm591_vm3, %v7312_v7  ;;  %v1921_v7 = vrot.slane %v10595_v62, 1 }
 0x14f   : > { %6288 = vmatmul.msk.bf16.gmra.mxu2 %vm591_vm3, %v1173_v38  ;;  %v1076_v0 = vpop.f32.mrf.mxu1  ;;  %v10596_v38 = vshrl.u32 %v7346_v57, 16 }
 0x150   : > { %v1128_v25 = vpop.f32.mrf.mxu3  ;;  %v7680_v48 = vadd.f32 %v1076_v0, %v708_v50 }
 0x151   : > { %v7682_v53 = vadd.f32 %v1128_v25, %v760_v54  ;;  %v1178_v25 = vrot.slane %v10764_v24, 3 }
 0x152   : > { %v763_v44 = vpop.f32.mrf.mxu2  ;;  %6353 = vmatmul.msk.bf16.gmra.mxu1 %vm591_vm3, %v7678_v6  ;;  %v710_v31 = vpop.f32.mrf.mxu0  ;;  %v1918_v6 = vor.u32 %v10596_v38, %v1914_v52 }
 0x153   : > { %10762 = vst [vmem:[#allocation29_spill] sm:$0xff] %v7682_v53  ;;  %v10765_v53 = vshll.u32 %v7417_v43, 16 }
 0x155   : > { %6310 = vmatmul.msk.bf16.gmra.mxu3 %vm591_vm3, %v1177_v4  ;;  %v1179_v16 = vrot.slane %v10765_v53, 4 }
 0x157   : > { %v1078_v21 = vpop.f32.mrf.mxu1 }
 0x158   : > { %v1131_v42 = vpop.f32.mrf.mxu3  ;;  %v7690_v27 = vadd.f32 %v1078_v21, %v710_v31  ;;  %v1180_v31 = vor.u32 %v1179_v16, %v1178_v25  ;;  %v7706_v21 = vsel %vm1870_vm6, %v1918_v6, %v1921_v7  ;;  %v10600_v6 = vshll.u32 %v7419_v15, 16 }
 0x159   : > { %v7692_v50 = vadd.f32 %v1131_v42, %v763_v44  ;;  %10766 = vst [vmem:[#allocation31_spill] sm:$0xff] %v7706_v21 }
 0x15a   : > { %v765_v54 = vpop.f32.mrf.mxu2  ;;  %v713_v0 = vpop.f32.mrf.mxu0  ;;  %v1181_v52 = vsel %vm1142_vm5, %v1176_v33, %v1180_v31  ;;  %v10769_v33 = vshrl.u32 %v7454_v1, 16 }
 0x15b   : > { %10763 = vst [vmem:[#allocation30_spill] sm:$0xff] %v7692_v50 }
 0x15d   : > { %6332 = vmatmul.msk.bf16.gmra.mxu0 %vm591_vm3, %v7346_v57  ;;  %v1928_v57 = vrot.slane %v10600_v6, 1 }
 0x15f   : > { %6289 = vmatmul.msk.bf16.gmra.mxu2 %vm591_vm3, %v1177_v4  ;;  %v1081_v44 = vpop.f32.mrf.mxu1  ;;  %v10601_v4 = vshrl.u32 %v7380_v2, 16 }
 0x160   : > { %v1133_v42 = vpop.f32.mrf.mxu3  ;;  %v7708_v24 = vadd.f32 %v1081_v44, %v713_v0 }
 0x161   : > { %v7710_v43 = vadd.f32 %v1133_v42, %v765_v54  ;;  %v1182_v42 = vrot.slane %v10769_v33, 3  ;;  %v7743_v33 = vpack.c.b16 %v7096_v26, %v7447_v45 }
 0x162   : > { %v768_v53 = vpop.f32.mrf.mxu2  ;;  %6354 = vmatmul.msk.bf16.gmra.mxu1 %vm591_vm3, %v7706_v21  ;;  %v715_v62 = vpop.f32.mrf.mxu0  ;;  %v1925_v21 = vor.u32 %v10601_v4, %v1921_v7  ;;  %v10773_v4 = vshll.u32 %v7110_v36, 16 }
 0x163   : > { %10767 = vst [vmem:[#allocation32_spill] sm:$0xff] %v7710_v43  ;;  %v10770_v43 = vshll.u32 %v7454_v1, 16 }
 0x165   : > { %6311 = vmatmul.msk.bf16.gmra.mxu3 %vm591_vm3, %v1181_v52  ;;  %v1183_v50 = vrot.slane %v10770_v43, 4 }
 0x167   : > { %v1083_v16 = vpop.f32.mrf.mxu1 }
 0x168   : > { %v1136_v25 = vpop.f32.mrf.mxu3  ;;  %v7718_v38 = vadd.f32 %v1083_v16, %v715_v62  ;;  %v1184_v62 = vor.u32 %v1183_v50, %v1182_v42  ;;  %v7734_v16 = vsel %vm1870_vm6, %v1925_v21, %v1928_v57  ;;  %v6435_v21 = vld [vmem:[%s10523_s4 + $0x2] sm:$0x3]  ;;  %v10605_v42 = vshll.u32 %v7743_v33, 16 }
 0x169   : > { %v7720_v0 = vadd.f32 %v1136_v25, %v768_v53  ;;  %10771 = vst [vmem:[#allocation34_spill] sm:$0xff] %v7734_v16 }
 0x16a   : > { %v770_v54 = vpop.f32.mrf.mxu2  ;;  %v718_v44 = vpop.f32.mrf.mxu0  ;;  %v1185_v43 = vsel %vm1142_vm5, %v1180_v31, %v1184_v62  ;;  %v10606_v31 = vshrl.u32 %v7419_v15, 16 }
 0x16b   : > { %10768 = vst [vmem:[#allocation33_spill] sm:$0xff] %v7720_v0  ;;  %v1187_v0 = vrot.slane %v10773_v4, 4 }
 0x16d   : > { %6333 = vmatmul.msk.bf16.gmra.mxu0 %vm591_vm3, %v7380_v2  ;;  %v1932_v2 = vor.u32 %v10606_v31, %v1928_v57 }
 0x16f   : > { %6290 = vmatmul.msk.bf16.gmra.mxu2 %vm591_vm3, %v1181_v52  ;;  %v1086_v53 = vpop.f32.mrf.mxu1  ;;  %v3672_v52 = vsel %vm655_vm1, %v6435_v21, 0 }
 0x170   : > { %v1138_v25 = vpop.f32.mrf.mxu3  ;;  %v7736_v54 = vadd.f32 %v1086_v53, %v718_v44  ;;  %3681 = vmatpush.bf16.msra.mxu1 %v3672_v52  ;;  %v1935_v52 = vrot.slane %v10605_v42, 1  ;;  %v10775_v42 = vshll.u32 %v7117_v40, 16 }
 0x172   : > { %v1301_v1 = vpop.f32.mrf.mxu2  ;;  %6355 = vmatmul.msk.bf16.gmra.mxu1 %vm591_vm3, %v7734_v16  ;;  %v720_v7 = vpop.f32.mrf.mxu0 }
 0x173   : > { %v1405_v50 = vadd.f32 %v1301_v1, %v7456_v55  ;;  %v10772_v1 = vshrl.u32 %v7110_v36, 16 }
 0x175   : > { %6312 = vmatmul.msk.bf16.gmra.mxu3 %vm591_vm3, %v1185_v43  ;;  %v1186_v6 = vrot.slane %v10772_v1, 3 }
 0x177   : > { %v1088_v44 = vpop.f32.mrf.mxu1 }
 0x178   : > { %v1480_v53 = vpop.f32.mrf.mxu3  ;;  %v7753_v25 = vadd.f32 %v1088_v44, %v720_v7  ;;  %v1188_v7 = vor.u32 %v1187_v0, %v1186_v6  ;;  %v7768_v44 = vsel %vm1870_vm6, %v1932_v2, %v1935_v52  ;;  %v10608_v2 = vshrl.u32 %v7743_v33, 16 }
 0x179   : > { %v1584_v26 = vadd.f32 %v1480_v53, %v1405_v50 }
 0x17a   : > { %v1303_v45 = vpop.f32.mrf.mxu2  ;;  %v1723_v55 = vpop.f32.mrf.mxu0  ;;  %v1189_v57 = vsel %vm1142_vm5, %v1184_v62, %v1188_v7 }
 0x17b   : > { %v1406_v21 = vadd.f32 %v1303_v45, %v7472_v63  ;;  %v1827_v16 = vadd.f32 %v1723_v55, %v1584_v26 }
 0x17d   : > { %6334 = vmatmul.msk.bf16.gmra.mxu0 %vm591_vm3, %v7419_v15 }
 0x17f   : > { %6291 = vmatmul.msk.bf16.gmra.mxu2 %vm591_vm3, %v1185_v43  ;;  %v2092_v50 = vpop.f32.mrf.mxu1  ;;  %v10607_v43 = vshll.u32 %v7112_v37, 16 }
 0x180   : > { %v1482_v36 = vpop.f32.mrf.mxu3  ;;  %v7770_v4 = vadd.f32 %v2092_v50, %v1827_v16  ;;  %v10774_v50 = vshrl.u32 %v7117_v40, 16 }
 0x181   : > { %v1585_v63 = vadd.f32 %v1482_v36, %v1406_v21  ;;  %v1942_v31 = vrot.slane %v10607_v43, 1  ;;  %v10777_v43 = vshll.u32 %v7175_v22, 16 }
 0x182   : > { %v1306_v53 = vpop.f32.mrf.mxu2  ;;  %6356 = vmatmul.msk.bf16.gmra.mxu1 %vm591_vm3, %v7768_v44  ;;  %v1725_v26 = vpop.f32.mrf.mxu0  ;;  %v1190_v36 = vrot.slane %v10774_v50, 3  ;;  %v10610_v50 = vshrl.u32 %v7112_v37, 16 }
 0x183   : > { %v1407_v45 = vadd.f32 %v1306_v53, %v7484_v34  ;;  %v1828_v6 = vadd.f32 %v1725_v26, %v1585_v63  ;;  %v1191_v34 = vrot.slane %v10775_v42, 4  ;;  %v1939_v26 = vor.u32 %v10608_v2, %v1935_v52 }
 0x185   : > { %6313 = vmatmul.msk.bf16.gmra.mxu3 %vm591_vm3, %v1189_v57 }
 0x187   : > { %v2094_v0 = vpop.f32.mrf.mxu1 }
 0x188   : > { %v1485_v16 = vpop.f32.mrf.mxu3  ;;  %v7779_v55 = vadd.f32 %v2094_v0, %v1828_v6  ;;  %v7794_v0 = vsel %vm1870_vm6, %v1939_v26, %v1942_v31 }
 0x189   : > { %v1586_v1 = vadd.f32 %v1485_v16, %v1407_v45  ;;  %v1192_v45 = vor.u32 %v1191_v34, %v1190_v36  ;;  %v10609_v36 = vshll.u32 %v7178_v23, 16 }
 0x18a   : > { %v1308_v21 = vpop.f32.mrf.mxu2  ;;  %v1728_v62 = vpop.f32.mrf.mxu0 }
 0x18b   : > { %v1408_v63 = vadd.f32 %v1308_v21, %v7502_v46  ;;  %v1829_v53 = vadd.f32 %v1728_v62, %v1586_v1  ;;  %v1193_v52 = vsel %vm1142_vm5, %v1188_v7, %v1192_v45  ;;  %v1949_v2 = vrot.slane %v10609_v36, 1 }
 0x18c   : > { %v10779_v36 = vshll.u32 %v7218_v10, 16 }
 0x18d   : > { %6335 = vmatmul.msk.bf16.gmra.mxu0 %vm591_vm3, %v7743_v33 }
 0x18f   : > { %6292 = vmatmul.msk.bf16.gmra.mxu2 %vm591_vm3, %v1189_v57  ;;  %v2097_v6 = vpop.f32.mrf.mxu1 }
 0x190   : > { %v1487_v40 = vpop.f32.mrf.mxu3  ;;  %v7796_v42 = vadd.f32 %v2097_v6, %v1829_v53  ;;  %v10776_v6 = vshrl.u32 %v7175_v22, 16 }
 0x191   : > { %v1587_v46 = vadd.f32 %v1487_v40, %v1408_v63 }
 0x192   : > { %v1311_v16 = vpop.f32.mrf.mxu2  ;;  %6357 = vmatmul.msk.bf16.gmra.mxu1 %vm591_vm3, %v7794_v0  ;;  %v1730_v1 = vpop.f32.mrf.mxu0  ;;  %v1194_v40 = vrot.slane %v10776_v6, 3  ;;  %v10612_v6 = vshrl.u32 %v7178_v23, 16 }
 0x193   : > { %v1409_v21 = vadd.f32 %v1311_v16, %v7520_v30  ;;  %v1830_v62 = vadd.f32 %v1730_v1, %v1587_v46  ;;  %v1195_v30 = vrot.slane %v10777_v43, 4  ;;  %v1946_v1 = vor.u32 %v10610_v50, %v1942_v31 }
 0x195   : > { %6314 = vmatmul.msk.bf16.gmra.mxu3 %vm591_vm3, %v1193_v52 }
 0x197   : > { %v2099_v57 = vpop.f32.mrf.mxu1 }
 0x198   : > { %v1490_v34 = vpop.f32.mrf.mxu3  ;;  %v7805_v53 = vadd.f32 %v2099_v57, %v1830_v62  ;;  %v7820_v57 = vsel %vm1870_vm6, %v1946_v1, %v1949_v2 }
 0x199   : > { %v1588_v63 = vadd.f32 %v1490_v34, %v1409_v21  ;;  %v1196_v21 = vor.u32 %v1195_v30, %v1194_v40  ;;  %v10611_v40 = vshll.u32 %v7202_v58, 16 }
 0x19a   : > { %v1313_v26 = vpop.f32.mrf.mxu2  ;;  %v1733_v7 = vpop.f32.mrf.mxu0 }
 0x19b   : > { %v1410_v46 = vadd.f32 %v1313_v26, %v7528_v12  ;;  %v1831_v16 = vadd.f32 %v1733_v7, %v1588_v63  ;;  %v1197_v31 = vsel %vm1142_vm5, %v1192_v45, %v1196_v21  ;;  %v1956_v50 = vrot.slane %v10611_v40, 1 }
 0x19c   : > { %v10781_v40 = vshll.u32 %v7254_v14, 16 }
 0x19d   : > { %6336 = vmatmul.msk.bf16.gmra.mxu0 %vm591_vm3, %v7112_v37 }
 0x19f   : > { %6293 = vmatmul.msk.bf16.gmra.mxu2 %vm591_vm3, %v1193_v52  ;;  %v2102_v62 = vpop.f32.mrf.mxu1 }
 0x1a0   : > { %v1492_v22 = vpop.f32.mrf.mxu3  ;;  %v7822_v43 = vadd.f32 %v2102_v62, %v1831_v16  ;;  %v10778_v62 = vshrl.u32 %v7218_v10, 16 }
 0x1a1   : > { %v1589_v12 = vadd.f32 %v1492_v22, %v1410_v46 }
 0x1a2   : > { %v1316_v34 = vpop.f32.mrf.mxu2  ;;  %6358 = vmatmul.msk.bf16.gmra.mxu1 %vm591_vm3, %v7820_v57  ;;  %v1735_v63 = vpop.f32.mrf.mxu0  ;;  %v1198_v22 = vrot.slane %v10778_v62, 3  ;;  %v10614_v62 = vshrl.u32 %v7202_v58, 16 }
 0x1a3   : > { %v1411_v26 = vadd.f32 %v1316_v34, %v7541_v60  ;;  %v1832_v7 = vadd.f32 %v1735_v63, %v1589_v12  ;;  %v1199_v60 = vrot.slane %v10779_v36, 4  ;;  %v1953_v63 = vor.u32 %v10612_v6, %v1949_v2 }
 0x1a5   : > { %6315 = vmatmul.msk.bf16.gmra.mxu3 %vm591_vm3, %v1197_v31 }
 0x1a7   : > { %v2104_v52 = vpop.f32.mrf.mxu1 }
 0x1a8   : > { %v1495_v30 = vpop.f32.mrf.mxu3  ;;  %v7831_v16 = vadd.f32 %v2104_v52, %v1832_v7  ;;  %v7846_v52 = vsel %vm1870_vm6, %v1953_v63, %v1956_v50 }
 0x1a9   : > { %v1590_v46 = vadd.f32 %v1495_v30, %v1411_v26  ;;  %v1200_v26 = vor.u32 %v1199_v60, %v1198_v22  ;;  %v10613_v22 = vshll.u32 %v7220_v13, 16 }
 0x1aa   : > { %v1318_v1 = vpop.f32.mrf.mxu2  ;;  %v1738_v45 = vpop.f32.mrf.mxu0 }
 0x1ab   : > { %v1412_v12 = vadd.f32 %v1318_v1, %v7550_v19  ;;  %v1833_v34 = vadd.f32 %v1738_v45, %v1590_v46  ;;  %v1201_v2 = vsel %vm1142_vm5, %v1196_v21, %v1200_v26  ;;  %v1963_v6 = vrot.slane %v10613_v22, 1 }
 0x1ac   : > { %v10783_v22 = vshll.u32 %v7288_v8, 16 }
 0x1ad   : > { %6337 = vmatmul.msk.bf16.gmra.mxu0 %vm591_vm3, %v7178_v23 }
 0x1af   : > { %6294 = vmatmul.msk.bf16.gmra.mxu2 %vm591_vm3, %v1197_v31  ;;  %v2107_v7 = vpop.f32.mrf.mxu1 }
 0x1b0   : > { %v1497_v10 = vpop.f32.mrf.mxu3  ;;  %v7848_v36 = vadd.f32 %v2107_v7, %v1833_v34  ;;  %v10780_v7 = vshrl.u32 %v7254_v14, 16 }
 0x1b1   : > { %v1591_v19 = vadd.f32 %v1497_v10, %v1412_v12 }
 0x1b2   : > { %v1321_v30 = vpop.f32.mrf.mxu2  ;;  %6359 = vmatmul.msk.bf16.gmra.mxu1 %vm591_vm3, %v7846_v52  ;;  %v1740_v46 = vpop.f32.mrf.mxu0  ;;  %v1202_v10 = vrot.slane %v10780_v7, 3  ;;  %v10622_v7 = vshrl.u32 %v7220_v13, 16 }
 0x1b3   : > { %v1413_v1 = vadd.f32 %v1321_v30, %v7568_v51  ;;  %v1834_v45 = vadd.f32 %v1740_v46, %v1591_v19  ;;  %v1203_v51 = vrot.slane %v10781_v40, 4  ;;  %v1960_v46 = vor.u32 %v10614_v62, %v1956_v50 }
 0x1b5   : > { %6316 = vmatmul.msk.bf16.gmra.mxu3 %vm591_vm3, %v1201_v2 }
 0x1b7   : > { %v2109_v31 = vpop.f32.mrf.mxu1 }
 0x1b8   : > { %v1500_v60 = vpop.f32.mrf.mxu3  ;;  %v7857_v34 = vadd.f32 %v2109_v31, %v1834_v45  ;;  %v7872_v31 = vsel %vm1870_vm6, %v1960_v46, %v1963_v6 }
 0x1b9   : > { %v1592_v12 = vadd.f32 %v1500_v60, %v1413_v1  ;;  %v1204_v1 = vor.u32 %v1203_v51, %v1202_v10  ;;  %v10615_v10 = vshll.u32 %v7250_v17, 16 }
 0x1ba   : > { %v1323_v63 = vpop.f32.mrf.mxu2  ;;  %v1743_v21 = vpop.f32.mrf.mxu0 }
 0x1bb   : > { %v1414_v19 = vadd.f32 %v1323_v63, %v7578_v5  ;;  %v1835_v30 = vadd.f32 %v1743_v21, %v1592_v12  ;;  %v1205_v50 = vsel %vm1142_vm5, %v1200_v26, %v1204_v1  ;;  %v1970_v62 = vrot.slane %v10615_v10, 1 }
 0x1bd   : > { %6338 = vmatmul.msk.bf16.gmra.mxu0 %vm591_vm3, %v7202_v58 }
 0x1bf   : > { %6295 = vmatmul.msk.bf16.gmra.mxu2 %vm591_vm3, %v1201_v2  ;;  %v2112_v45 = vpop.f32.mrf.mxu1 }
 0x1c0   : > { %v1502_v14 = vpop.f32.mrf.mxu3  ;;  %v7874_v40 = vadd.f32 %v2112_v45, %v1835_v30  ;;  %v10782_v45 = vshrl.u32 %v7288_v8, 16 }
 0x1c1   : > { %v1593_v5 = vadd.f32 %v1502_v14, %v1414_v19 }
 0x1c2   : > { %v1326_v60 = vpop.f32.mrf.mxu2  ;;  %6360 = vmatmul.msk.bf16.gmra.mxu1 %vm591_vm3, %v7872_v31  ;;  %v1745_v12 = vpop.f32.mrf.mxu0  ;;  %v1206_v14 = vrot.slane %v10782_v45, 3  ;;  %v10617_v45 = vshrl.u32 %v7250_v17, 16 }
 0x1c3   : > { %v1415_v63 = vadd.f32 %v1326_v60, %v7596_v47  ;;  %v1836_v21 = vadd.f32 %v1745_v12, %v1593_v5  ;;  %v1207_v47 = vrot.slane %v10783_v22, 4  ;;  %v1967_v12 = vor.u32 %v10622_v7, %v1963_v6 }
 0x1c5   : > { %6317 = vmatmul.msk.bf16.gmra.mxu3 %vm591_vm3, %v1205_v50 }
 0x1c7   : > { %v2114_v2 = vpop.f32.mrf.mxu1 }
 0x1c8   : > { %v1505_v51 = vpop.f32.mrf.mxu3  ;;  %v7883_v30 = vadd.f32 %v2114_v2, %v1836_v21  ;;  %v7898_v2 = vsel %vm1870_vm6, %v1967_v12, %v1970_v62  ;;  %v6973_v12 = vmov 0  }
 0x1c9   : > { %v1594_v19 = vadd.f32 %v1505_v51, %v1415_v63  ;;  %v1208_v63 = vor.u32 %v1207_v47, %v1206_v14  ;;  %v10616_v14 = vshll.u32 %v7284_v39, 16  ;;  %6896 = vset.pattern.permute.xlu0 %v6973_v12  ;;  %6897 = vset.pattern.permute.xlu1 %v6973_v12 }
 0x1ca   : > { %v1328_v46 = vpop.f32.mrf.mxu2  ;;  %v1748_v26 = vpop.f32.mrf.mxu0  ;;  %6898 = vset.pattern.permute.xlu2 %v6973_v12 }
 0x1cb   : > { %v1416_v5 = vadd.f32 %v1328_v46, %v7606_v49  ;;  %v1837_v60 = vadd.f32 %v1748_v26, %v1594_v19  ;;  %v1209_v6 = vsel %vm1142_vm5, %v1204_v1, %v1208_v63  ;;  %v400_v1 = vld [vmem:[%s10520_s1] sm:$0xff] }
 0x1cc   : > { %3085 = vperm.xlu0 %6896, %v400_v1  }
 0x1cd   : > { %6339 = vmatmul.msk.bf16.gmra.mxu0 %vm591_vm3, %v7220_v13 }
 0x1cf   : > { %6296 = vmatmul.msk.bf16.gmra.mxu2 %vm591_vm3, %v1205_v50  ;;  %v2117_v21 = vpop.f32.mrf.mxu1 }
 0x1d0   : > { %v1507_v8 = vpop.f32.mrf.mxu3  ;;  %v7900_v22 = vadd.f32 %v2117_v21, %v1837_v60 }
 0x1d1   : > { %v1595_v49 = vadd.f32 %v1507_v8, %v1416_v5  ;;  %v10784_v8 = vshrl.u32 %v7322_v59, 16 }
 0x1d2   : > { %v1331_v51 = vpop.f32.mrf.mxu2  ;;  %6361 = vmatmul.msk.bf16.gmra.mxu1 %vm591_vm3, %v7898_v2  ;;  %v1750_v19 = vpop.f32.mrf.mxu0 }
 0x1d3   : > { %v1417_v46 = vadd.f32 %v1331_v51, %v7624_v11  ;;  %v1838_v26 = vadd.f32 %v1750_v19, %v1595_v49  ;;  %v1210_v49 = vrot.slane %v10784_v8, 3  ;;  %v10785_v51 = vshll.u32 %v7322_v59, 16 }
 0x1d5   : > { %6318 = vmatmul.msk.bf16.gmra.mxu3 %vm591_vm3, %v1209_v6  ;;  %v1211_v19 = vrot.slane %v10785_v51, 4 }
 0x1d7   : > { %v2119_v50 = vpop.f32.mrf.mxu1  ;;  %v1212_v10 = vor.u32 %v1211_v19, %v1210_v49  ;;  %v10619_v19 = vshrl.u32 %v7284_v39, 16 }
 0x1d8   : > { %v1510_v47 = vpop.f32.mrf.mxu3  ;;  %v7909_v60 = vadd.f32 %v2119_v50, %v1838_v26  ;;  %v1974_v50 = vor.u32 %v10617_v45, %v1970_v62  ;;  %v401_v62 = vld [vmem:[%s10520_s1 + $0x8] sm:$0xff] }
 0x1d9   : > { %v1596_v5 = vadd.f32 %v1510_v47, %v1417_v46  ;;  %v1977_v47 = vrot.slane %v10616_v14, 1  ;;  %3090 = vperm.xlu0 %6896, %v401_v62   ;;  %v10786_v62 = vshrl.u32 %v7356_v32, 16 }
 0x1da   : > { %v1333_v11 = vpop.f32.mrf.mxu2  ;;  %v1753_v21 = vpop.f32.mrf.mxu0 }
 0x1db   : > { %v1418_v26 = vadd.f32 %v1333_v11, %v7634_v35  ;;  %v1839_v46 = vadd.f32 %v1753_v21, %v1596_v5  ;;  %v7927_v59 = vsel %vm1870_vm6, %v1974_v50, %v1977_v47  ;;  %v1213_v11 = vsel %vm1142_vm5, %v1208_v63, %v1212_v10  ;;  %v402_v63 = vld [vmem:[%s10520_s1 + $0x10] sm:$0xff] }
 0x1dc   : > { %3095 = vperm.xlu1 %6897, %v402_v63  }
 0x1dd   : > { %6340 = vmatmul.msk.bf16.gmra.mxu0 %vm591_vm3, %v7250_v17 }
 0x1df   : > { %6297 = vmatmul.msk.bf16.gmra.mxu2 %vm591_vm3, %v1209_v6  ;;  %v2122_v8 = vpop.f32.mrf.mxu1 }
 0x1e0   : > { %v1512_v12 = vpop.f32.mrf.mxu3  ;;  %v7929_v1 = vadd.f32 %v2122_v8, %v1839_v46 }
 0x1e1   : > { %v1597_v35 = vadd.f32 %v1512_v12, %v1418_v26  ;;  %v10618_v26 = vshll.u32 %v7318_v29, 16 }
 0x1e2   : > { %v1336_v5 = vpop.f32.mrf.mxu2  ;;  %6362 = vmatmul.msk.bf16.gmra.mxu1 %vm591_vm3, %v7927_v59  ;;  %v1755_v21 = vpop.f32.mrf.mxu0 }
 0x1e3   : > { %v1419_v6 = vadd.f32 %v1336_v5, %v7652_v41  ;;  %v1840_v49 = vadd.f32 %v1755_v21, %v1597_v35  ;;  %v406_v41 = vld [vmem:[%s10520_s1 + $0x30] sm:$0xff]  ;;  %v1214_v5 = vrot.slane %v10786_v62, 3  ;;  %v10787_v21 = vshll.u32 %v7356_v32, 16 }
 0x1e4   : > { %3115 = vperm.xlu0 %6896, %v406_v41  }
 0x1e5   : > { %6319 = vmatmul.msk.bf16.gmra.mxu3 %vm591_vm3, %v1213_v11  ;;  %v1215_v14 = vrot.slane %v10787_v21, 4 }
 0x1e7   : > { %v2124_v51 = vpop.f32.mrf.mxu1  ;;  %v1216_v45 = vor.u32 %v1215_v14, %v1214_v5 }
 0x1e8   : > { %v1515_v46 = vpop.f32.mrf.mxu3  ;;  %v7941_v50 = vadd.f32 %v2124_v51, %v1840_v49  ;;  %v1981_v51 = vor.u32 %v10619_v19, %v1977_v47  ;;  %v403_v47 = vld [vmem:[%s10520_s1 + $0x18] sm:$0xff] }
 0x1e9   : > { %v1598_v8 = vadd.f32 %v1515_v46, %v1419_v6  ;;  %v1984_v46 = vrot.slane %v10618_v26, 1  ;;  %v1217_v14 = vsel %vm1142_vm5, %v1212_v10, %v1216_v45  ;;  %3100 = vperm.xlu1 %6897, %v403_v47  }
 0x1ea   : > { %v1338_v12 = vpop.f32.mrf.mxu2  ;;  %v1758_v35 = vpop.f32.mrf.mxu0 }
 0x1eb   : > { %v1420_v6 = vadd.f32 %v1338_v12, %v7662_v3  ;;  %v1841_v49 = vadd.f32 %v1758_v35, %v1598_v8  ;;  %v7962_v32 = vsel %vm1870_vm6, %v1981_v51, %v1984_v46  ;;  %v409_v8 = vld [vmem:[%s10520_s1 + $0x48] sm:$0xff] }
 0x1ec   : > { %3130 = vperm.xlu0 %6896, %v409_v8   ;;  %v10790_v8 = vshrl.u32 %v7390_v20, 16 }
 0x1ed   : > { %6341 = vmatmul.msk.bf16.gmra.mxu0 %vm591_vm3, %v7284_v39 }
 0x1ef   : > { %6298 = vmatmul.msk.bf16.gmra.mxu2 %vm591_vm3, %v1213_v11  ;;  %v2127_v62 = vpop.f32.mrf.mxu1 }
 0x1f0   : > { %v1517_v63 = vpop.f32.mrf.mxu3  ;;  %v7964_v41 = vadd.f32 %v2127_v62, %v1841_v49  ;;  %v10620_v49 = vshll.u32 %v7352_v18, 16 }
 0x1f1   : > { %v1599_v3 = vadd.f32 %v1517_v63, %v1420_v6  ;;  %v10621_v6 = vshrl.u32 %v7318_v29, 16  ;;  %v407_v63 = vld [vmem:[%s10520_s1 + $0x38] sm:$0xff] }
 0x1f2   : > { %10788 = vst [vmem:[#allocation35_spill] sm:$0xff] %v7964_v41  ;;  %v1341_v12 = vpop.f32.mrf.mxu2  ;;  %6363 = vmatmul.msk.bf16.gmra.mxu1 %vm591_vm3, %v7962_v32  ;;  %v1760_v11 = vpop.f32.mrf.mxu0  ;;  %3120 = vperm.xlu1 %6897, %v407_v63  }
 0x1f3   : > { %v1421_v35 = vadd.f32 %v1341_v12, %v7680_v48  ;;  %v1842_v5 = vadd.f32 %v1760_v11, %v1599_v3  ;;  %v412_v48 = vld [vmem:[%s10520_s1 + $0x60] sm:$0xff]  ;;  %v1218_v12 = vrot.slane %v10790_v8, 3  ;;  %v10791_v11 = vshll.u32 %v7390_v20, 16 }
 0x1f4   : > { %3145 = vperm.xlu0 %6896, %v412_v48  }
 0x1f5   : > { %6320 = vmatmul.msk.bf16.gmra.mxu3 %vm591_vm3, %v1217_v14  ;;  %v1219_v26 = vrot.slane %v10791_v11, 4 }
 0x1f7   : > { %v2129_v21 = vpop.f32.mrf.mxu1  ;;  %v1220_v19 = vor.u32 %v1219_v26, %v1218_v12  ;;  %v415_v26 = vld [vmem:[%s10520_s1 + $0x78] sm:$0xff] }
 0x1f8   : > { %v1520_v51 = vpop.f32.mrf.mxu3  ;;  %v7979_v62 = vadd.f32 %v2129_v21, %v1842_v5  ;;  %v1988_v21 = vor.u32 %v10621_v6, %v1984_v46  ;;  %v410_v46 = vld [vmem:[%s10520_s1 + $0x50] sm:$0xff] }
 0x1f9   : > { %v1600_v10 = vadd.f32 %v1520_v51, %v1421_v35  ;;  %v1991_v51 = vrot.slane %v10620_v49, 1 }
 0x1fa   : > { %10789 = vst [vmem:[#allocation36_spill] sm:$0xff] %v7979_v62  ;;  %v1343_v3 = vpop.f32.mrf.mxu2  ;;  %v1763_v47 = vpop.f32.mrf.mxu0  ;;  %3135 = vperm.xlu1 %6897, %v410_v46   ;;  %v413_v46 = vld [vmem:[%s10520_s1 + $0x68] sm:$0xff] }
 0x1fb   : > { %v1422_v5 = vadd.f32 %v1343_v3, %v7690_v27  ;;  %v1843_v35 = vadd.f32 %v1763_v47, %v1600_v10  ;;  %v8000_v20 = vsel %vm1870_vm6, %v1988_v21, %v1991_v51 }
 0x1fc   : > { %3160 = vperm.xlu0 %6896, %v415_v26  }
 0x1fd   : > { %6342 = vmatmul.msk.bf16.gmra.mxu0 %vm591_vm3, %v7318_v29 }
 0x1ff   : > { %6299 = vmatmul.msk.bf16.gmra.mxu2 %vm591_vm3, %v1217_v14  ;;  %v2132_v8 = vpop.f32.mrf.mxu1  ;;  %v1221_v14 = vsel %vm1142_vm5, %v1216_v45, %v1220_v19 }
 0x200   : > { %v1522_v63 = vpop.f32.mrf.mxu3  ;;  %v8002_v27 = vadd.f32 %v2132_v8, %v1843_v35  ;;  %v10793_v35 = vld [vmem:[#allocation8_spill] sm:$0xff]  ;;  %v350_v8 = vld [vmem:[%s7020_s28 + $0x158] sm:$0xff] }
 0x201   : > { %v1601_v10 = vadd.f32 %v1522_v63, %v1422_v5  ;;  %v351_v63 = vld [vmem:[%s7020_s28 + $0x160] sm:$0xff]  ;;  %v10799_v62 = vshll.u32 %v10793_v35, 16 }
 0x202   : > { %10792 = vst [vmem:[#allocation37_spill] sm:$0xff] %v8002_v27  ;;  %v1346_v48 = vpop.f32.mrf.mxu2  ;;  %6364 = vmatmul.msk.bf16.gmra.mxu1 %vm591_vm3, %v8000_v20  ;;  %v1765_v3 = vpop.f32.mrf.mxu0  ;;  %v396_v27 = vpack.c.bf16 %v350_v8, %v350_v8  ;;  %3150 = vperm.xlu1 %6897, %v413_v46  }
 0x203   : > { %v1423_v47 = vadd.f32 %v1346_v48, %v7708_v24  ;;  %v1844_v12 = vadd.f32 %v1765_v3, %v1601_v10  ;;  %v418_v24 = vld [vmem:[%s10520_s1 + $0x90] sm:$0xff]  ;;  %v10795_v48 = vld [vmem:[#allocation10_spill] sm:$0xff]  ;;  %v1998_v41 = vrot.slane %v10799_v62, 1 }
 0x204   : > { %v10796_v3 = vshrl.u32 %v10795_v48, 16  ;;  %v10797_v21 = vshll.u32 %v10795_v48, 16  ;;  %3175 = vperm.xlu0 %6896, %v418_v24   ;;  %v1450_v48 = vunpack.c.l.b16 %v396_v27  ;;  %v416_v62 = vld [vmem:[%s10520_s1 + $0x80] sm:$0xff] }
 0x205   : > { %6321 = vmatmul.msk.bf16.gmra.mxu3 %vm591_vm3, %v1221_v14 }
 0x206   : > { %v1222_v7 = vrot.slane %v10796_v3, 3  ;;  %v1223_v5 = vrot.slane %v10797_v21, 4 }
 0x207   : > { %v2134_v11 = vpop.f32.mrf.mxu1 }
 0x208   : > { %v1525_v49 = vpop.f32.mrf.mxu3  ;;  %v8019_v45 = vadd.f32 %v2134_v11, %v1844_v12  ;;  %v397_v12 = vpack.c.bf16 %v351_v63, %v351_v63  ;;  %v10798_v11 = vshrl.u32 %v7352_v18, 16  ;;  %v8038_v3 = vor.u32 %v1223_v5, %v1222_v7  ;;  %v421_v7 = vld [vmem:[%s10520_s1 + $0xa8] sm:$0xff] }
 0x209   : > { %v1602_v6 = vadd.f32 %v1525_v49, %v1423_v47 }
 0x20a   : > { %10794 = vst [vmem:[#allocation8_spill] sm:$0xff] %v8019_v45  ;;  %v1348_v10 = vpop.f32.mrf.mxu2  ;;  %v1768_v26 = vpop.f32.mrf.mxu0  ;;  %v1995_v45 = vor.u32 %v10798_v11, %v1991_v51  ;;  %v8040_v21 = vunpack.c.l.b16 %v397_v12  ;;  %3165 = vperm.xlu1 %6897, %v416_v62  }
 0x20b   : > { %v1424_v49 = vadd.f32 %v1348_v10, %v7718_v38  ;;  %v1845_v47 = vadd.f32 %v1768_v26, %v1602_v6  ;;  %v10803_v10 = vld [vmem:[#allocation9_spill] sm:$0xff] }
 0x20c   : > { %10800 = vst [vmem:[#allocation10_spill] sm:$0xff] %v8040_v21  ;;  %v8044_v38 = vsel %vm1870_vm6, %v1995_v45, %v1998_v41  ;;  %v1452_v45 = vpack.c.b16 %v8040_v21, %v1450_v48  ;;  %v8063_v26 = vpack.c.b16 %v1450_v48, %v10803_v10  ;;  %3190 = vperm.xlu0 %6896, %v421_v7   ;;  %v419_v48 = vld [vmem:[%s10520_s1 + $0x98] sm:$0xff] }
 0x20d   : > { %6343 = vmatmul.msk.bf16.gmra.mxu0 %vm591_vm3, %v7352_v18 }
 0x20e   : > { %v1454_v12 = vshrl.u32 %v1452_v45, 16  ;;  %v10623_v11 = vshll.u32 %v8063_v26, 16 }
 0x20f   : > { %6300 = vmatmul.msk.bf16.gmra.mxu2 %vm591_vm3, %v1221_v14  ;;  %v2137_v8 = vpop.f32.mrf.mxu1  ;;  %v1225_v14 = vsel %vm1142_vm5, %v1220_v19, %v8038_v3 }
 0x210   : > { %v1527_v6 = vpop.f32.mrf.mxu3  ;;  %v8046_v51 = vadd.f32 %v2137_v8, %v1845_v47  ;;  %v10624_v47 = vshrl.u32 %v10793_v35, 16 }
 0x211   : > { %v1603_v63 = vadd.f32 %v1527_v6, %v1424_v49  ;;  %v1457_v49 = vshll.u32 %v1452_v45, 16 }
 0x212   : > { %10801 = vst [vmem:[#allocation38_spill] sm:$0xff] %v8046_v51  ;;  %v1351_v27 = vpop.f32.mrf.mxu2  ;;  %6365 = vmatmul.msk.bf16.gmra.mxu1 %vm591_vm3, %v8044_v38  ;;  %v1770_v5 = vpop.f32.mrf.mxu0  ;;  %3180 = vperm.xlu1 %6897, %v419_v48   ;;  %v2002_v10 = vor.u32 %v10624_v47, %v1998_v41  ;;  %v405_v41 = vld [vmem:[%s10520_s1 + $0x28] sm:$0xff]  ;;  %v422_v48 = vld [vmem:[%s10520_s1 + $0xb0] sm:$0xff]  ;;  %v10813_v47 = vshrl.u32 %v7214_v9, 16 }
 0x213   : > { %v1425_v46 = vadd.f32 %v1351_v27, %v7736_v54  ;;  %v8060_v24 = vadd.f32 %v1770_v5, %v1603_v63  ;;  %v404_v54 = vld [vmem:[%s10520_s1 + $0x20] sm:$0xff]  ;;  %v1456_v27 = vrot.slane %v1454_v12, 3  ;;  %v1459_v5 = vrot.slane %v1457_v49, 4 }
 0x214   : > { %v424_v63 = vld [vmem:[%s10520_s1 + $0xc0] sm:$0xff]  ;;  %3105 = vperm.xlu2 %6898, %v404_v54  }
 0x215   : > { %10802 = vst [vmem:[#allocation39_spill] sm:$0xff] %v8060_v24  ;;  %6322 = vmatmul.msk.bf16.gmra.mxu3 %vm591_vm3, %v1225_v14  ;;  %3205 = vperm.xlu0 %6896, %v424_v63  }
 0x217   : > { %v8066_v19 = vpop.f32.mrf.mxu1 }
 0x218   : > { %10804 = vst [vmem:[#allocation9_spill] sm:$0xff] %v8066_v19  ;;  %v1530_v8 = vpop.f32.mrf.mxu3  ;;  %v8086_v19 = vor.u32 %v1459_v5, %v1456_v27  ;;  %v10807_v27 = vld [vmem:[#allocation11_spill] sm:$0xff] }
 0x219   : > { %v1604_v6 = vadd.f32 %v1530_v8, %v1425_v46  ;;  %v2005_v8 = vrot.slane %v10623_v11, 1 }
 0x21a   : > { %v1353_v62 = vpop.f32.mrf.mxu2  ;;  %v1773_v7 = vpop.f32.mrf.mxu0  ;;  %3195 = vperm.xlu1 %6897, %v422_v48   ;;  %v430_v48 = vld [vmem:[%s10520_s1 + $0xf0] sm:$0xff] }
 0x21b   : > { %v1426_v45 = vadd.f32 %v1353_v62, %v7753_v25  ;;  %v1847_v46 = vadd.f32 %v1773_v7, %v1604_v6  ;;  %v8090_v49 = vsel %vm1870_vm6, %v2002_v10, %v2005_v8  ;;  %v1461_v62 = vsel %vm1142_vm5, %v8038_v3, %v8086_v19 }
 0x21c   : > { %10805 = vst [vmem:[#allocation40_spill] sm:$0xff] %v8090_v49  ;;  %3110 = vperm.xlu2 %6898, %v405_v41  }
 0x21d   : > { %6344 = vmatmul.msk.bf16.gmra.mxu0 %vm591_vm3, %v10793_v35 }
 0x21f   : > { %6301 = vmatmul.msk.bf16.gmra.mxu2 %vm591_vm3, %v1225_v14  ;;  %v2142_v12 = vpop.f32.mrf.mxu1  ;;  %v427_v14 = vld [vmem:[%s10520_s1 + $0xd8] sm:$0xff] }
 0x220   : > { %v1532_v25 = vpop.f32.mrf.mxu3  ;;  %v8092_v6 = vadd.f32 %v2142_v12, %v1847_v46  ;;  %v8113_v46 = vpack.c.b16 %v8040_v21, %v8040_v21  ;;  %3220 = vperm.xlu0 %6896, %v427_v14   ;;  %v10810_v14 = vshll.u32 %v7182_v28, 16  ;;  %v2697_v12 = vrot.slane %v10813_v47, 1 }
 0x221   : > { %v1605_v54 = vadd.f32 %v1532_v25, %v1426_v45  ;;  %v10815_v21 = vshrl.u32 %v8063_v26, 16 }
 0x222   : > { %10806 = vst [vmem:[#allocation41_spill] sm:$0xff] %v8092_v6  ;;  %v1356_v63 = vpop.f32.mrf.mxu2  ;;  %6366 = vmatmul.msk.bf16.gmra.mxu1 %vm591_vm3, %v8090_v49  ;;  %v1775_v7 = vpop.f32.mrf.mxu0  ;;  %v2010_v25 = vshll.u32 %v8113_v46, 16  ;;  %v10814_v6 = vld [vmem:[#allocation12_spill] sm:$0xff] }
 0x223   : > { %v1427_v5 = vadd.f32 %v1356_v63, %v10807_v27  ;;  %v8109_v45 = vadd.f32 %v1775_v7, %v1605_v54  ;;  %v408_v54 = vld [vmem:[%s10520_s1 + $0x40] sm:$0xff]  ;;  %v425_v63 = vld [vmem:[%s10520_s1 + $0xc8] sm:$0xff]  ;;  %v10811_v7 = vshrl.u32 %v7182_v28, 16  ;;  %v8140_v49 = vor.u32 %v10815_v21, %v2005_v8 }
 0x224   : > { %3125 = vperm.xlu2 %6898, %v408_v54   ;;  %3210 = vperm.xlu1 %6897, %v425_v63  }
 0x225   : > { %10808 = vst [vmem:[#allocation11_spill] sm:$0xff] %v8109_v45  ;;  %6323 = vmatmul.msk.bf16.gmra.mxu3 %vm591_vm3, %v1461_v62  ;;  %v2695_v62 = vrot.slane %v10810_v14, 2  ;;  %v2694_v27 = vrot.slane %v10811_v7, 1  ;;  %v2012_v14 = vrot.slane %v2010_v25, 1  ;;  %v433_v25 = vld [vmem:[%s10520_s1 + $0x108] sm:$0xff] }
 0x227   : > { %v8116_v10 = vpop.f32.mrf.mxu1  ;;  %v2696_v7 = vor.u32 %v2695_v62, %v2694_v27  ;;  %v414_v27 = vld [vmem:[%s10520_s1 + $0x70] sm:$0xff] }
 0x228   : > { %10809 = vst [vmem:[#allocation42_spill] sm:$0xff] %v8116_v10  ;;  %v1535_v11 = vpop.f32.mrf.mxu3  ;;  %3235 = vperm.xlu0 %6896, %v430_v48  }
 0x229   : > { %v1606_v41 = vadd.f32 %v1535_v11, %v1427_v5  ;;  %v10812_v11 = vshll.u32 %v7214_v9, 16 }
 0x22a   : > { %v1358_v10 = vpop.f32.mrf.mxu2  ;;  %v1778_v45 = vpop.f32.mrf.mxu0 }
 0x22b   : > { %v2698_v5 = vrot.slane %v10812_v11, 2  ;;  %v1428_v24 = vadd.f32 %v1358_v10, %v10814_v6  ;;  %v1849_v51 = vadd.f32 %v1778_v45, %v1606_v41  ;;  %v2013_v6 = vsel %vm1870_vm6, %v8140_v49, %v2012_v14 }
 0x22d   : > { %6345 = vmatmul.msk.bf16.gmra.mxu0 %vm591_vm3, %v8063_v26  ;;  %v8144_v11 = vor.u32 %v2698_v5, %v2697_v12  ;;  %v411_v12 = vld [vmem:[%s10520_s1 + $0x58] sm:$0xff] }
 0x22e   : > { %3140 = vperm.xlu2 %6898, %v411_v12   ;;  %v431_v5 = vld [vmem:[%s10520_s1 + $0xf8] sm:$0xff]  ;;  %v2430_v12 = vrot.slane %v7182_v28, 1 }
 0x22f   : > { %6302 = vmatmul.msk.bf16.gmra.mxu2 %vm591_vm3, %v8038_v3  ;;  %v2147_v47 = vpop.f32.mrf.mxu1  ;;  %v2700_v8 = vsel %vm2693_vm7, %v2696_v7, %v8144_v11  ;;  %v428_v3 = vld [vmem:[%s10520_s1 + $0xe0] sm:$0xff]  ;;  %v439_v28 = vld [vmem:[%s10520_s1 + $0x138] sm:$0xff] }
 0x230   : > { %v1537_v45 = vpop.f32.mrf.mxu3  ;;  %v8150_v21 = vadd.f32 %v2147_v47, %v1849_v51  ;;  %3225 = vperm.xlu1 %6897, %v428_v3   ;;  %3250 = vperm.xlu0 %6896, %v433_v25   ;;  %v2431_v3 = vrot.slane %v7214_v9, 1  ;;  %v10816_v25 = vld [vmem:[#allocation16_spill] sm:$0xff] }
 0x231   : > { %v1607_v10 = vadd.f32 %v1537_v45, %v1428_v24 }
 0x232   : > { %v1361_v41 = vpop.f32.mrf.mxu2  ;;  %6367 = vmatmul.msk.bf16.gmra.mxu1 %vm591_vm3, %v2013_v6  ;;  %v1780_v51 = vpop.f32.mrf.mxu0 }
 0x233   : > { %v1429_v54 = vadd.f32 %v1361_v41, %v7504_v56  ;;  %v8165_v24 = vadd.f32 %v1780_v51, %v1607_v10  ;;  %v436_v56 = vld [vmem:[%s10520_s1 + $0x120] sm:$0xff] }
 0x235   : > { %6324 = vmatmul.msk.bf16.gmra.mxu3 %vm591_vm3, %v8086_v19  ;;  %v2014_v19 = vshrl.u32 %v8113_v46, 16 }
 0x236   : > { %3155 = vperm.xlu2 %6898, %v414_v27   ;;  %v10817_v27 = vld [vmem:[#allocation13_spill] sm:$0xff] }
 0x237   : > { %v8169_v63 = vpop.f32.mrf.mxu1  ;;  %v2016_v10 = vor.u32 %v2014_v19, %v2012_v14  ;;  %v2432_v14 = vsel %vm2429_vm8, %v2430_v12, %v2431_v3 }
 0x238   : > { %v1540_v48 = vpop.f32.mrf.mxu3  ;;  %3240 = vperm.xlu1 %6897, %v431_v5   ;;  %3265 = vperm.xlu0 %6896, %v436_v56  }
 0x239   : > { %v1608_v62 = vadd.f32 %v1540_v48, %v1429_v54  ;;  %v417_v48 = vld [vmem:[%s10520_s1 + $0x88] sm:$0xff] }
 0x23a   : > { %v1363_v7 = vpop.f32.mrf.mxu2  ;;  %v1783_v47 = vpop.f32.mrf.mxu0 }
 0x23b   : > { %v1430_v6 = vadd.f32 %v1363_v7, %v7522_v61  ;;  %v1851_v45 = vadd.f32 %v1783_v47, %v1608_v62 }
 0x23d   : > { %6346 = vmatmul.msk.bf16.gmra.mxu0 %vm591_vm3, %v8113_v46  ;;  %v434_v46 = vld [vmem:[%s10520_s1 + $0x110] sm:$0xff] }
 0x23e   : > { %3170 = vperm.xlu2 %6898, %v417_v48  }
 0x23f   : > { %6370 = vmatmul.msk.bf16.vlgmr.msra.gmra.mxu2 %vm591_vm3, %v10816_v25  ;;  %v2152_v41 = vpop.f32.mrf.mxu1  ;;  %v10820_v25 = vld [vmem:[#allocation14_spill] sm:$0xff] }
 0x240   : > { %v1542_v51 = vpop.f32.mrf.mxu3  ;;  %v8188_v54 = vadd.f32 %v2152_v41, %v1851_v45  ;;  %3255 = vperm.xlu1 %6897, %v434_v46   ;;  %3280 = vperm.xlu0 %6896, %v439_v28   ;;  %v437_v45 = vld [vmem:[%s10520_s1 + $0x128] sm:$0xff] }
 0x241   : > { %v1609_v61 = vadd.f32 %v1542_v51, %v1430_v6  ;;  %v420_v6 = vld [vmem:[%s10520_s1 + $0xa0] sm:$0xff] }
 0x242   : > { %v1366_v9 = vpop.f32.mrf.mxu2  ;;  %6368 = vmatmul.msk.bf16.gmra.mxu1 %vm591_vm3, %v2016_v10  ;;  %v1785_v62 = vpop.f32.mrf.mxu0  ;;  %v10822_v46 = vld [vmem:[#allocation19_spill] sm:$0xff] }
 0x243   : > { %v1431_v5 = vadd.f32 %v1366_v9, %v10817_v27  ;;  %v8202_v56 = vadd.f32 %v1785_v62, %v1609_v61  ;;  %v10821_v61 = vld [vmem:[#allocation3_spill] sm:$0xff]  ;;  %v423_v27 = vld [vmem:[%s10520_s1 + $0xb8] sm:$0xff] }
 0x244   : > { %v2433_v48 = vrot.slane %v10821_v61, 1 }
 0x245   : > { %10818 = vst [vmem:[#allocation12_spill] sm:$0xff] %v8202_v56  ;;  %6392 = vmatmul.msk.bf16.vlgmr.msra.gmra.mxu3 %vm591_vm3, %v2432_v14 }
 0x246   : > { %3185 = vperm.xlu2 %6898, %v420_v6   ;;  %v10824_v6 = vshrl.u32 %v10821_v61, 16 }
 0x247   : > { %v8205_v7 = vpop.f32.mrf.mxu1 }
 0x248   : > { %10819 = vst [vmem:[#allocation16_spill] sm:$0xff] %v8205_v7  ;;  %v1545_v47 = vpop.f32.mrf.mxu3  ;;  %3270 = vperm.xlu1 %6897, %v437_v45   ;;  %v2701_v45 = vrot.slane %v10824_v6, 1  ;;  %v426_v6 = vld [vmem:[%s10520_s1 + $0xd0] sm:$0xff]  ;;  %v10856_v7 = vld [vmem:[#allocation26_spill] sm:$0xff] }
 0x249   : > { %v1610_v19 = vadd.f32 %v1545_v47, %v1431_v5  ;;  %v440_v5 = vld [vmem:[%s10520_s1 + $0x140] sm:$0xf] }
 0x24a   : > { %v1368_v10 = vpop.f32.mrf.mxu2  ;;  %v1788_v12 = vpop.f32.mrf.mxu0 }
 0x24b   : > { %v1432_v41 = vadd.f32 %v1368_v10, %v10820_v25  ;;  %v1853_v51 = vadd.f32 %v1788_v12, %v1610_v19  ;;  %v10825_v10 = vshll.u32 %v10821_v61, 16  ;;  %v10826_v25 = vld [vmem:[#allocation15_spill] sm:$0xff] }
 0x24d   : > { %6414 = vmatmul.msk.bf16.vlgmr.msra.gmra.mxu0 %vm591_vm3, %v2700_v8  ;;  %v2434_v8 = vsel %vm2429_vm8, %v2431_v3, %v2433_v48  ;;  %v2702_v12 = vrot.slane %v10825_v10, 2 }
 0x24e   : > { %3200 = vperm.xlu2 %6898, %v423_v27  }
 0x24f   : > { %6371 = vmatmul.msk.bf16.gmra.mxu2 %vm591_vm3, %v10822_v46  ;;  %v2157_v28 = vpop.f32.mrf.mxu1  ;;  %v2703_v46 = vor.u32 %v2702_v12, %v2701_v45  ;;  %v10831_v45 = vld [vmem:[#allocation22_spill] sm:$0xff] }
 0x250   : > { %v1547_v9 = vpop.f32.mrf.mxu3  ;;  %v8218_v14 = vadd.f32 %v2157_v28, %v1853_v51  ;;  %3285 = vperm.xlu1 %6897, %v440_v5  }
 0x251   : > { %v1611_v62 = vadd.f32 %v1547_v9, %v1432_v41  ;;  %v2704_v27 = vsel %vm2693_vm7, %v8144_v11, %v2703_v46  ;;  %v429_v11 = vld [vmem:[%s10520_s1 + $0xe8] sm:$0xff] }
 0x252   : > { %10823 = vst [vmem:[#allocation13_spill] sm:$0xff] %v8218_v14  ;;  %v1371_v47 = vpop.f32.mrf.mxu2  ;;  %v1790_v19 = vpop.f32.mrf.mxu0 }
 0x253   : > { %v1433_v41 = vadd.f32 %v1371_v47, %v10826_v25  ;;  %v8232_v51 = vadd.f32 %v1790_v19, %v1611_v62  ;;  %v10829_v62 = vld [vmem:[#allocation17_spill] sm:$0xff] }
 0x255   : > { %10827 = vst [vmem:[#allocation14_spill] sm:$0xff] %v8232_v51  ;;  %6393 = vmatmul.msk.bf16.gmra.mxu3 %vm591_vm3, %v2434_v8  ;;  %v10830_v8 = vld [vmem:[#allocation4_spill] sm:$0xff] }
 0x256   : > { %3215 = vperm.xlu2 %6898, %v426_v6   ;;  %v2435_v19 = vrot.slane %v10830_v8, 1  ;;  %v10833_v6 = vshrl.u32 %v10830_v8, 16 }
 0x257   : > { %v8235_v28 = vpop.f32.mrf.mxu1 }
 0x258   : > { %10828 = vst [vmem:[#allocation3_spill] sm:$0xff] %v8235_v28  ;;  %v1550_v9 = vpop.f32.mrf.mxu3 }
 0x259   : > { %v1612_v3 = vadd.f32 %v1550_v9, %v1433_v41 }
 0x25a   : > { %v1373_v14 = vpop.f32.mrf.mxu2  ;;  %v1793_v61 = vpop.f32.mrf.mxu0 }
 0x25b   : > { %v1434_v47 = vadd.f32 %v1373_v14, %v10829_v62  ;;  %v1855_v5 = vadd.f32 %v1793_v61, %v1612_v3  ;;  %v2436_v14 = vsel %vm2429_vm8, %v2433_v48, %v2435_v19  ;;  %v2705_v61 = vrot.slane %v10833_v6, 1  ;;  %v432_v48 = vld [vmem:[%s10520_s1 + $0x100] sm:$0xff] }
 0x25d   : > { %6415 = vmatmul.msk.bf16.gmra.mxu0 %vm591_vm3, %v2704_v27  ;;  %v10834_v27 = vshll.u32 %v10830_v8, 16 }
 0x25e   : > { %3230 = vperm.xlu2 %6898, %v429_v11   ;;  %v10838_v11 = vld [vmem:[#allocation20_spill] sm:$0xff] }
 0x25f   : > { %6372 = vmatmul.msk.bf16.gmra.mxu2 %vm591_vm3, %v10831_v45  ;;  %v2162_v10 = vpop.f32.mrf.mxu1  ;;  %v2706_v62 = vrot.slane %v10834_v27, 2  ;;  %v10835_v45 = vld [vmem:[#allocation18_spill] sm:$0xff] }
 0x260   : > { %v1552_v12 = vpop.f32.mrf.mxu3  ;;  %v8247_v25 = vadd.f32 %v2162_v10, %v1855_v5 }
 0x261   : > { %v1613_v41 = vadd.f32 %v1552_v12, %v1434_v47  ;;  %v2707_v47 = vor.u32 %v2706_v62, %v2705_v61  ;;  %v10840_v61 = vld [vmem:[#allocation25_spill] sm:$0xff] }
 0x262   : > { %10832 = vst [vmem:[#allocation19_spill] sm:$0xff] %v8247_v25  ;;  %v1376_v9 = vpop.f32.mrf.mxu2  ;;  %v1795_v3 = vpop.f32.mrf.mxu0 }
 0x263   : > { %v1435_v28 = vadd.f32 %v1376_v9, %v10835_v45  ;;  %v8258_v5 = vadd.f32 %v1795_v3, %v1613_v41  ;;  %v2708_v8 = vsel %vm2693_vm7, %v2703_v46, %v2707_v47  ;;  %v435_v46 = vld [vmem:[%s10520_s1 + $0x118] sm:$0xff] }
 0x265   : > { %10836 = vst [vmem:[#allocation15_spill] sm:$0xff] %v8258_v5  ;;  %6394 = vmatmul.msk.bf16.gmra.mxu3 %vm591_vm3, %v2436_v14  ;;  %v10839_v14 = vld [vmem:[#allocation5_spill] sm:$0xff] }
 0x266   : > { %3245 = vperm.xlu2 %6898, %v432_v48   ;;  %v2437_v3 = vrot.slane %v10839_v14, 1 }
 0x267   : > { %v8261_v10 = vpop.f32.mrf.mxu1 }
 0x268   : > { %10837 = vst [vmem:[#allocation17_spill] sm:$0xff] %v8261_v10  ;;  %v1555_v12 = vpop.f32.mrf.mxu3  ;;  %v2438_v48 = vsel %vm2429_vm8, %v2435_v19, %v2437_v3  ;;  %v438_v19 = vld [vmem:[%s10520_s1 + $0x130] sm:$0xff] }
 0x269   : > { %v1614_v25 = vadd.f32 %v1555_v12, %v1435_v28 }
 0x26a   : > { %v1378_v6 = vpop.f32.mrf.mxu2  ;;  %v1798_v51 = vpop.f32.mrf.mxu0 }
 0x26b   : > { %v1436_v9 = vadd.f32 %v1378_v6, %v10838_v11  ;;  %v1857_v41 = vadd.f32 %v1798_v51, %v1614_v25  ;;  %v10842_v25 = vshrl.u32 %v10839_v14, 16 }
 0x26d   : > { %6416 = vmatmul.msk.bf16.gmra.mxu0 %vm591_vm3, %v2708_v8  ;;  %v2709_v6 = vrot.slane %v10842_v25, 1  ;;  %v10843_v8 = vshll.u32 %v10839_v14, 16 }
 0x26e   : > { %3260 = vperm.xlu2 %6898, %v435_v46   ;;  %v10847_v46 = vld [vmem:[#allocation23_spill] sm:$0xff] }
 0x26f   : > { %6373 = vmatmul.msk.bf16.gmra.mxu2 %vm591_vm3, %v10840_v61  ;;  %v2167_v28 = vpop.f32.mrf.mxu1  ;;  %v2710_v11 = vrot.slane %v10843_v8, 2  ;;  %v10844_v61 = vld [vmem:[#allocation21_spill] sm:$0xff] }
 0x270   : > { %v1557_v27 = vpop.f32.mrf.mxu3  ;;  %v8272_v62 = vadd.f32 %v2167_v28, %v1857_v41 }
 0x271   : > { %v1615_v45 = vadd.f32 %v1557_v27, %v1436_v9  ;;  %v2711_v9 = vor.u32 %v2710_v11, %v2709_v6  ;;  %v10849_v6 = vld [vmem:[#allocation28_spill] sm:$0xff] }
 0x272   : > { %10841 = vst [vmem:[#allocation4_spill] sm:$0xff] %v8272_v62  ;;  %v1381_v12 = vpop.f32.mrf.mxu2  ;;  %v1800_v51 = vpop.f32.mrf.mxu0 }
 0x273   : > { %v1437_v10 = vadd.f32 %v1381_v12, %v10844_v61  ;;  %v8283_v41 = vadd.f32 %v1800_v51, %v1615_v45  ;;  %v2712_v14 = vsel %vm2693_vm7, %v2707_v47, %v2711_v9 }
 0x275   : > { %10845 = vst [vmem:[#allocation22_spill] sm:$0xff] %v8283_v41  ;;  %6395 = vmatmul.msk.bf16.gmra.mxu3 %vm591_vm3, %v2438_v48  ;;  %v10848_v48 = vld [vmem:[#allocation6_spill] sm:$0xff] }
 0x276   : > { %3275 = vperm.xlu2 %6898, %v438_v19   ;;  %v2439_v51 = vrot.slane %v10848_v48, 1  ;;  %v10851_v19 = vshrl.u32 %v10848_v48, 16 }
 0x277   : > { %v8286_v28 = vpop.f32.mrf.mxu1 }
 0x278   : > { %10846 = vst [vmem:[#allocation18_spill] sm:$0xff] %v8286_v28  ;;  %v1560_v27 = vpop.f32.mrf.mxu3  ;;  %v2440_v28 = vsel %vm2429_vm8, %v2437_v3, %v2439_v51 }
 0x279   : > { %v1616_v62 = vadd.f32 %v1560_v27, %v1437_v10 }
 0x27a   : > { %v1383_v25 = vpop.f32.mrf.mxu2  ;;  %v1803_v5 = vpop.f32.mrf.mxu0 }
 0x27b   : > { %v1438_v12 = vadd.f32 %v1383_v25, %v10847_v46  ;;  %v1859_v45 = vadd.f32 %v1803_v5, %v1616_v62  ;;  %v2713_v25 = vrot.slane %v10851_v19, 1  ;;  %v10852_v5 = vshll.u32 %v10848_v48, 16  ;;  %v10857_v48 = vld [vmem:[#allocation7_spill] sm:$0xff] }
 0x27d   : > { %6417 = vmatmul.msk.bf16.gmra.mxu0 %vm591_vm3, %v2712_v14  ;;  %v2714_v62 = vrot.slane %v10852_v5, 2  ;;  %v10853_v14 = vld [vmem:[#allocation24_spill] sm:$0xff] }
 0x27f   : > { %6374 = vmatmul.msk.bf16.gmra.mxu2 %vm591_vm3, %v10849_v6  ;;  %v2172_v10 = vpop.f32.mrf.mxu1  ;;  %v2715_v6 = vor.u32 %v2714_v62, %v2713_v25 }
 0x280   : > { %v1562_v8 = vpop.f32.mrf.mxu3  ;;  %v8297_v11 = vadd.f32 %v2172_v10, %v1859_v45 }
 0x281   : > { %v1617_v61 = vadd.f32 %v1562_v8, %v1438_v12 }
 0x282   : > { %10850 = vst [vmem:[#allocation20_spill] sm:$0xff] %v8297_v11  ;;  %v1386_v27 = vpop.f32.mrf.mxu2  ;;  %v1805_v47 = vpop.f32.mrf.mxu0  ;;  %v2716_v11 = vsel %vm2693_vm7, %v2711_v9, %v2715_v6  ;;  %v10860_v9 = vshrl.u32 %v10857_v48, 16 }
 0x283   : > { %v1439_v46 = vadd.f32 %v1386_v27, %v10853_v14  ;;  %v8305_v41 = vadd.f32 %v1805_v47, %v1617_v61  ;;  %v2441_v27 = vrot.slane %v10857_v48, 1  ;;  %v10858_v61 = vld [vmem:[#allocation31_spill] sm:$0xff] }
 0x285   : > { %10854 = vst [vmem:[#allocation5_spill] sm:$0xff] %v8305_v41  ;;  %6396 = vmatmul.msk.bf16.gmra.mxu3 %vm591_vm3, %v2440_v28  ;;  %v2442_v14 = vsel %vm2429_vm8, %v2439_v51, %v2441_v27 }
 0x287   : > { %v8308_v45 = vpop.f32.mrf.mxu1 }
 0x288   : > { %10855 = vst [vmem:[#allocation25_spill] sm:$0xff] %v8308_v45  ;;  %v1565_v12 = vpop.f32.mrf.mxu3  ;;  %v10864_v45 = vld [vmem:[#allocation29_spill] sm:$0xff] }
 0x289   : > { %v1618_v10 = vadd.f32 %v1565_v12, %v1439_v46  ;;  %v10861_v12 = vshll.u32 %v10857_v48, 16  ;;  %v2443_v48 = vrot.slane %v7419_v15, 1 }
 0x28a   : > { %v1388_v8 = vpop.f32.mrf.mxu2  ;;  %v1808_v3 = vpop.f32.mrf.mxu0 }
 0x28b   : > { %v1440_v19 = vadd.f32 %v1388_v8, %v10856_v7  ;;  %v1861_v56 = vadd.f32 %v1808_v3, %v1618_v10  ;;  %v2717_v7 = vrot.slane %v10860_v9, 1  ;;  %v10862_v10 = vld [vmem:[#allocation27_spill] sm:$0xff] }
 0x28d   : > { %6418 = vmatmul.msk.bf16.gmra.mxu0 %vm591_vm3, %v2716_v11  ;;  %v2718_v11 = vrot.slane %v10861_v12, 2 }
 0x28f   : > { %6375 = vmatmul.msk.bf16.gmra.mxu2 %vm591_vm3, %v10858_v61  ;;  %v2177_v28 = vpop.f32.mrf.mxu1  ;;  %v2719_v61 = vor.u32 %v2718_v11, %v2717_v7  ;;  %v2444_v11 = vsel %vm2429_vm8, %v2441_v27, %v2443_v48 }
 0x290   : > { %v1567_v47 = vpop.f32.mrf.mxu3  ;;  %v8316_v25 = vadd.f32 %v2177_v28, %v1861_v56 }
 0x291   : > { %v1619_v5 = vadd.f32 %v1567_v47, %v1440_v19 }
 0x292   : > { %10859 = vst [vmem:[#allocation21_spill] sm:$0xff] %v8316_v25  ;;  %v1391_v62 = vpop.f32.mrf.mxu2  ;;  %v1810_v46 = vpop.f32.mrf.mxu0  ;;  %v2720_v25 = vsel %vm2693_vm7, %v2715_v6, %v2719_v61  ;;  %v10867_v6 = vshrl.u32 %v7419_v15, 16 }
 0x293   : > { %v1441_v8 = vadd.f32 %v1391_v62, %v10862_v10  ;;  %v8324_v3 = vadd.f32 %v1810_v46, %v1619_v5  ;;  %v10865_v5 = vld [vmem:[#allocation34_spill] sm:$0xff] }
 0x295   : > { %6397 = vmatmul.msk.bf16.gmra.mxu3 %vm591_vm3, %v2442_v14 }
 0x297   : > { %v8327_v56 = vpop.f32.mrf.mxu1 }
 0x298   : > { %10863 = vst [vmem:[#allocation23_spill] sm:$0xff] %v8327_v56  ;;  %v1570_v19 = vpop.f32.mrf.mxu3 }
 0x299   : > { %v1620_v28 = vadd.f32 %v1570_v19, %v1441_v8  ;;  %v10868_v8 = vshll.u32 %v7419_v15, 16  ;;  %v10869_v19 = vld [vmem:[#allocation30_spill] sm:$0xff]  ;;  %v2445_v15 = vrot.slane %v7743_v33, 1 }
 0x29a   : > { %v1393_v47 = vpop.f32.mrf.mxu2  ;;  %v1813_v51 = vpop.f32.mrf.mxu0 }
 0x29b   : > { %v1442_v9 = vadd.f32 %v1393_v47, %v10864_v45  ;;  %v1863_v41 = vadd.f32 %v1813_v51, %v1620_v28  ;;  %v2721_v45 = vrot.slane %v10867_v6, 1 }
 0x29d   : > { %6419 = vmatmul.msk.bf16.gmra.mxu0 %vm591_vm3, %v2720_v25  ;;  %v2722_v25 = vrot.slane %v10868_v8, 2  ;;  %v2446_v8 = vsel %vm2429_vm8, %v2443_v48, %v2445_v15 }
 0x29f   : > { %6376 = vmatmul.msk.bf16.gmra.mxu2 %vm591_vm3, %v10865_v5  ;;  %v2182_v62 = vpop.f32.mrf.mxu1  ;;  %v2723_v51 = vor.u32 %v2722_v25, %v2721_v45 }
 0x2a0   : > { %v1572_v14 = vpop.f32.mrf.mxu3  ;;  %v8335_v46 = vadd.f32 %v2182_v62, %v1863_v41 }
 0x2a1   : > { %v1621_v7 = vadd.f32 %v1572_v14, %v1442_v9  ;;  %v2724_v14 = vsel %vm2693_vm7, %v2719_v61, %v2723_v51  ;;  %v10871_v61 = vshrl.u32 %v7743_v33, 16 }
 0x2a2   : > { %10866 = vst [vmem:[#allocation6_spill] sm:$0xff] %v8335_v46  ;;  %v1396_v12 = vpop.f32.mrf.mxu2  ;;  %v1815_v10 = vpop.f32.mrf.mxu0  ;;  %v10870_v46 = vld [vmem:[#allocation32_spill] sm:$0xff] }
 0x2a3   : > { %v1443_v28 = vadd.f32 %v1396_v12, %v10869_v19  ;;  %v8343_v47 = vadd.f32 %v1815_v10, %v1621_v7  ;;  %v10872_v19 = vshll.u32 %v7743_v33, 16  ;;  %v3459_v33 = vld [vmem:[%s10523_s4] sm:$0x3] }
 0x2a5   : > { %6398 = vmatmul.msk.bf16.gmra.mxu3 %vm591_vm3, %v2444_v11 }
 0x2a7   : > { %v8346_v41 = vpop.f32.mrf.mxu1 }
 0x2a8   : > { %v1575_v9 = vpop.f32.mrf.mxu3 }
 0x2a9   : > { %v1622_v5 = vadd.f32 %v1575_v9, %v1443_v28  ;;  %v2726_v28 = vrot.slane %v10872_v19, 2  ;;  %v10873_v9 = vld [vmem:[#allocation33_spill] sm:$0xff] }
 0x2aa   : > { %v1398_v62 = vpop.f32.mrf.mxu2  ;;  %v1818_v27 = vpop.f32.mrf.mxu0 }
 0x2ab   : > { %v1444_v6 = vadd.f32 %v1398_v62, %v10870_v46  ;;  %v1865_v56 = vadd.f32 %v1818_v27, %v1622_v5  ;;  %v2725_v46 = vrot.slane %v10871_v61, 1 }
 0x2ad   : > { %6420 = vmatmul.msk.bf16.gmra.mxu0 %vm591_vm3, %v2724_v14 }
 0x2af   : > { %6377 = vmatmul.msk.bf16.gmra.mxu2 %vm591_vm3, %v7768_v44  ;;  %v2187_v7 = vpop.f32.mrf.mxu1  ;;  %v2727_v44 = vor.u32 %v2726_v28, %v2725_v46 }
 0x2b0   : > { %v1577_v12 = vpop.f32.mrf.mxu3  ;;  %v8354_v11 = vadd.f32 %v2187_v7, %v1865_v56 }
 0x2b1   : > { %v1623_v10 = vadd.f32 %v1577_v12, %v1444_v6  ;;  %v2728_v7 = vsel %vm2693_vm7, %v2723_v51, %v2727_v44 }
 0x2b2   : > { %v1401_v45 = vpop.f32.mrf.mxu2  ;;  %v1820_v25 = vpop.f32.mrf.mxu0 }
 0x2b3   : > { %v1445_v5 = vadd.f32 %v1401_v45, %v10873_v9  ;;  %v8362_v62 = vadd.f32 %v1820_v25, %v1623_v10  ;;  %v6482_v10 = vld [vmem:[%s10523_s4 + $0x4] sm:$0x3]  ;;  %v2447_v45 = vrot.slane %v7112_v37, 1 }
 0x2b4   : > { %v4303_v25 = vsel %vm655_vm1, %v6482_v10, 0 }
 0x2b5   : > { %6399 = vmatmul.msk.bf16.gmra.mxu3 %vm591_vm3, %v2446_v8  ;;  %v4039_v8 = vsel %vm655_vm1, %v3459_v33, 0  ;;  %v2448_v28 = vsel %vm2429_vm8, %v2445_v15, %v2447_v45 }
 0x2b6   : > { %4312 = vmatpush.bf16.msrb.mxu3 %v4303_v25  ;;  %4048 = vmatpush.bf16.msrb.mxu2 %v4039_v8 }
 0x2b7   : > { %v8365_v56 = vpop.f32.mrf.mxu1 }
 0x2b8   : > { %v1580_v27 = vpop.f32.mrf.mxu3 }
 0x2b9   : > { %v1624_v14 = vadd.f32 %v1580_v27, %v1445_v5  ;;  %v10875_v5 = vshrl.u32 %v7112_v37, 16 }
 0x2ba   : > { %v1403_v6 = vpop.f32.mrf.mxu2  ;;  %v1823_v48 = vpop.f32.mrf.mxu0 }
 0x2bb   : > { %v1867_v12 = vadd.f32 %v1823_v48, %v1624_v14  ;;  %v2729_v27 = vrot.slane %v10875_v5, 1  ;;  %v10876_v14 = vshll.u32 %v7112_v37, 16  ;;  %v8396_v37 = vld [vmem:[%s10522_s3] ss:$0 sm:$0xff] }
 0x2bd   : > { %6421 = vmatmul.msk.bf16.gmra.mxu0 %vm591_vm3, %v2728_v7  ;;  %v2730_v6 = vrot.slane %v10876_v14, 2 }
 0x2bf   : > { %6378 = vmatmul.msk.bf16.gmra.mxu2 %vm591_vm3, %v7794_v0  ;;  %v2192_v51 = vpop.f32.mrf.mxu1  ;;  %v6504_v0 = vld [vmem:[%s10523_s4 + $0x6] sm:$0x3]  ;;  %v2731_v48 = vor.u32 %v2730_v6, %v2729_v27 }
 0x2c0   : > { %v1582_v61 = vpop.f32.mrf.mxu3  ;;  %v8380_v46 = vadd.f32 %v2192_v51, %v1867_v12  ;;  %v4482_v7 = vsel %vm655_vm1, %v6504_v0, 0 }
 0x2c1   : > { %4491 = vmatpush.bf16.msrb.mxu0 %v4482_v7  ;;  %v2732_v51 = vsel %vm2693_vm7, %v2727_v44, %v2731_v48 }
 0x2c2   : > { %10874 = vst [vmem:[#allocation28_spill] sm:$0xff] %v8380_v46  ;;  %v2282_v19 = vpop.f32.mrf.mxu2  ;;  %v1825_v9 = vpop.f32.mrf.mxu0 }
 0x2c3   : > { %v2386_v12 = vadd.f32 %v2282_v19, %v7770_v4  ;;  %v6526_v4 = vld [vmem:[%s10523_s4 + $0x8] sm:$0x3]  ;;  %v3086_v19 = vpop.permute.xlu0 %3085  ;;  %v10627_v9 = vrot.slane %v7178_v23, 1 }
 0x2c4   : > { %v4725_v5 = vsel %vm655_vm1, %v6526_v4, 0 }
 0x2c5   : > { %6400 = vmatmul.msk.bf16.gmra.mxu3 %vm591_vm3, %v2448_v28  ;;  %4734 = vmatpush.bf16.msrb.mxu1 %v4725_v5 }
 0x2c7   : > { %v2194_v15 = vpop.f32.mrf.mxu1 }
 0x2c8   : > { %v2546_v33 = vpop.f32.mrf.mxu3 }
 0x2c9   : > { %v2650_v10 = vadd.f32 %v2546_v33, %v2386_v12  ;;  %v2450_v12 = vsel %vm2429_vm8, %v2447_v45, %v10627_v9  ;;  %v10877_v33 = vshrl.u32 %v7178_v23, 16 }
 0x2ca   : > { %v2284_v8 = vpop.f32.mrf.mxu2  ;;  %v2852_v25 = vpop.f32.mrf.mxu0 }
 0x2cb   : > { %v2956_v61 = vadd.f32 %v2852_v25, %v2650_v10  ;;  %v2387_v27 = vadd.f32 %v2284_v8, %v7779_v55  ;;  %v2733_v10 = vrot.slane %v10877_v33, 1  ;;  %v10878_v55 = vshll.u32 %v7178_v23, 16 }
 0x2cd   : > { %v3001_v28 = vadd.f32 %v8396_v37, %v2956_v61  ;;  %6422 = vmatmul.msk.bf16.gmra.mxu0 %vm591_vm3, %v2732_v51  ;;  %v2734_v8 = vrot.slane %v10878_v55, 2 }
 0x2cf   : > { %v3042_v14 = vmax.f32 %v3001_v28, 0.0  ;;  %6379 = vmatmul.msk.bf16.gmra.mxu2 %vm591_vm3, %v7820_v57  ;;  %v6638_v57 = vld [vmem:[#allocation2 + $0x4] sm:$0xff]  ;;  %v8419_v28 = vor.u32 %v2734_v8, %v2733_v10 }
 0x2d0   : > { %v2548_v44 = vpop.f32.mrf.mxu3  ;;  %v3791_v5 = vshll.u32 %v6638_v57, 16  ;;  %v3567_v8 = vrot.slane %v6638_v57, 3 }
 0x2d1   : > { %v3288_v6 = vmul.f32 %v3086_v19, %v3042_v14  ;;  %v2651_v0 = vadd.f32 %v2548_v44, %v2387_v27  ;;  %v3788_v19 = vshrl.u32 %v6638_v57, 16  ;;  %v3091_v27 = vpop.permute.xlu0 %3090 }
 0x2d2   : > { %v2287_v7 = vpop.f32.mrf.mxu2  ;;  %v2854_v15 = vpop.f32.mrf.mxu0 }
 0x2d3   : > { %v3329_v25 = vpack.c.bf16 %v3288_v6, %v3288_v6  ;;  %v2957_v51 = vadd.f32 %v2854_v15, %v2651_v0  ;;  %v2388_v45 = vadd.f32 %v2287_v7, %v7796_v42  ;;  %v2736_v15 = vsel %vm2693_vm7, %v2731_v48, %v8419_v28 }
 0x2d4   : > { %v4156_v42 = vrot.slane %v3788_v19, 3  ;;  %v4157_v7 = vrot.slane %v3791_v5, 4 }
 0x2d5   : > { %3371 = vst.msk [vmem:[#allocation2 + $0x10] sm:$0xf] %vm3370_vm9, %v3329_v25  ;;  %6401 = vmatmul.msk.bf16.gmra.mxu3 %vm591_vm3, %v2450_v12  ;;  %v3002_v61 = vadd.f32 %v8396_v37, %v2957_v51  ;;  %v3790_v25 = vrot.slane %v3788_v19, 2  ;;  %v3793_v51 = vrot.slane %v3791_v5, 3 }
 0x2d7   : > { %v3043_v4 = vmax.f32 %v3002_v61, 0.0  ;;  %v3794_v19 = vor.u32 %v3793_v51, %v3790_v25  ;;  %v10881_v51 = vshrl.u32 %v7202_v58, 16 }
 0x2d8   : > { %v2551_v14 = vpop.f32.mrf.mxu3 }
 0x2d9   : > { %v3289_v44 = vmul.f32 %v3091_v27, %v3043_v4  ;;  %v2652_v33 = vadd.f32 %v2551_v14, %v2388_v45  ;;  %v3096_v45 = vpop.permute.xlu1 %3095 }
 0x2da   : > { %v2289_v6 = vpop.f32.mrf.mxu2  ;;  %v2857_v0 = vpop.f32.mrf.mxu0 }
 0x2db   : > { %v3330_v55 = vpack.c.bf16 %v3289_v44, %v3289_v44  ;;  %v2958_v12 = vadd.f32 %v2857_v0, %v2652_v33  ;;  %v2389_v44 = vadd.f32 %v2289_v6, %v7805_v53  ;;  %v10879_v53 = vrot.slane %v7202_v58, 1 }
 0x2dc   : > { %v8424_v10 = vld [vmem:[#allocation2 + $0xc] sm:$0xff]   ;;  %v10880_v6 = vrot.slane %v7178_v23, 1 }
 0x2dd   : > { %3372 = vst.msk [vmem:[#allocation2 + $0x14] sm:$0xf] %vm3370_vm9, %v3330_v55  ;;  %v3003_v61 = vadd.f32 %v8396_v37, %v2958_v12  ;;  %6423 = vmatmul.msk.bf16.gmra.mxu0 %vm591_vm3, %v2736_v15  ;;  %v3568_v48 = vrot.slane %v8424_v10, 3  ;;  %v3796_v27 = vshrl.u32 %v8424_v10, 16  ;;  %v3799_v14 = vshll.u32 %v8424_v10, 16 }
 0x2de   : > { %v4158_v55 = vor.u32 %v4157_v7, %v4156_v42 }
 0x2df   : > { %v3044_v57 = vmax.f32 %v3003_v61, 0.0  ;;  %6380 = vmatmul.msk.bf16.gmra.mxu2 %vm591_vm3, %v7846_v52  ;;  %v3569_v33 = vsel %vm549_vm2, %v3567_v8, %v3568_v48  ;;  %v3798_v0 = vrot.slane %v3796_v27, 2  ;;  %v3801_v15 = vrot.slane %v3799_v14, 3 }
 0x2e0   : > { %v2553_v5 = vpop.f32.mrf.mxu3  ;;  %6440 = vmatmul.msk.bf16.vlgmr.msra.gmra.mxu1 %vm591_vm3, %v3569_v33  ;;  %v4159_v4 = vrot.slane %v3796_v27, 3  ;;  %v4160_v46 = vrot.slane %v3799_v14, 4  ;;  %v2452_v52 = vsel %vm2429_vm8, %v10880_v6, %v10879_v53  ;;  %v2737_v8 = vrot.slane %v10881_v51, 1 }
 0x2e1   : > { %v3290_v12 = vmul.f32 %v3096_v45, %v3044_v57  ;;  %v2653_v9 = vadd.f32 %v2553_v5, %v2389_v44  ;;  %v10882_v61 = vshll.u32 %v7202_v58, 16  ;;  %v3802_v7 = vor.u32 %v3801_v15, %v3798_v0  ;;  %v3101_v15 = vpop.permute.xlu1 %3100 }
 0x2e2   : > { %v2292_v10 = vpop.f32.mrf.mxu2  ;;  %v2859_v25 = vpop.f32.mrf.mxu0  ;;  %v4161_v57 = vor.u32 %v4160_v46, %v4159_v4 }
 0x2e3   : > { %v2738_v42 = vrot.slane %v10882_v61, 2  ;;  %v3331_v45 = vpack.c.bf16 %v3290_v12, %v3290_v12  ;;  %v2959_v44 = vadd.f32 %v2859_v25, %v2653_v9  ;;  %v8448_v27 = vsel %vm772_vm4, %v3794_v19, %v3802_v7 }
 0x2e4   : > { %v8454_v14 = vsel %vm1142_vm5, %v4158_v55, %v4161_v57  ;;  %v2390_v33 = vadd.f32 %v2292_v10, %v7822_v43  ;;  %v3106_v43 = vpop.permute.xlu2 %3105  ;;  %v2453_v10 = vrot.slane %v7220_v13, 1 }
 0x2e5   : > { %3373 = vst.msk [vmem:[#allocation2 + $0x18] sm:$0xf] %vm3370_vm9, %v3331_v45  ;;  %6402 = vmatmul.msk.bf16.gmra.mxu3 %vm591_vm3, %v2452_v52  ;;  %v3004_v23 = vadd.f32 %v8396_v37, %v2959_v44  ;;  %v8456_v5 = vor.u32 %v2738_v42, %v2737_v8 }
 0x2e7   : > { %v3045_v0 = vmax.f32 %v3004_v23, 0.0  ;;  %v2740_v53 = vsel %vm2693_vm7, %v8419_v28, %v8456_v5 }
 0x2e8   : > { %v2556_v9 = vpop.f32.mrf.mxu3 }
 0x2e9   : > { %v3291_v46 = vmul.f32 %v3101_v15, %v3045_v0  ;;  %v2654_v4 = vadd.f32 %v2556_v9, %v2390_v33 }
 0x2ea   : > { %v2294_v19 = vpop.f32.mrf.mxu2  ;;  %v2862_v12 = vpop.f32.mrf.mxu0 }
 0x2eb   : > { %v3332_v6 = vpack.c.bf16 %v3291_v46, %v3291_v46  ;;  %v2960_v52 = vadd.f32 %v2862_v12, %v2654_v4  ;;  %v2391_v28 = vadd.f32 %v2294_v19, %v7831_v16  ;;  %v10883_v16 = vrot.slane %v7202_v58, 1 }
 0x2ec   : > { %v8462_v25 = vld [vmem:[#allocation2 + $0x14] sm:$0xff]  }
 0x2ed   : > { %3374 = vst.msk [vmem:[#allocation2 + $0x1c] sm:$0xf] %vm3370_vm9, %v3332_v6  ;;  %v3005_v55 = vadd.f32 %v8396_v37, %v2960_v52  ;;  %6424 = vmatmul.msk.bf16.gmra.mxu0 %vm591_vm3, %v2740_v53  ;;  %v3570_v51 = vrot.slane %v8462_v25, 3  ;;  %v3805_v8 = vshrl.u32 %v8462_v25, 16  ;;  %v3808_v61 = vshll.u32 %v8462_v25, 16 }
 0x2ee   : > { %v2454_v19 = vsel %vm2429_vm8, %v10883_v16, %v2453_v10 }
 0x2ef   : > { %v3046_v42 = vmax.f32 %v3005_v55, 0.0  ;;  %6381 = vmatmul.msk.bf16.gmra.mxu2 %vm591_vm3, %v7872_v31  ;;  %v3571_v44 = vsel %vm549_vm2, %v3568_v48, %v3570_v51  ;;  %v3807_v23 = vrot.slane %v3805_v8, 2  ;;  %v3810_v33 = vrot.slane %v3808_v61, 3 }
 0x2f0   : > { %v2558_v45 = vpop.f32.mrf.mxu3  ;;  %6441 = vmatmul.msk.bf16.gmra.mxu1 %vm591_vm3, %v3571_v44  ;;  %v4163_v9 = vrot.slane %v3805_v8, 3  ;;  %v4164_v46 = vrot.slane %v3808_v61, 4  ;;  %v10884_v31 = vshrl.u32 %v7220_v13, 16  ;;  %v10885_v48 = vshll.u32 %v7220_v13, 16 }
 0x2f1   : > { %v3292_v0 = vmul.f32 %v3106_v43, %v3046_v42  ;;  %v2655_v15 = vadd.f32 %v2558_v45, %v2391_v28  ;;  %v3811_v52 = vor.u32 %v3810_v33, %v3807_v23 }
 0x2f2   : > { %v2297_v4 = vpop.f32.mrf.mxu2  ;;  %v2864_v12 = vpop.f32.mrf.mxu0  ;;  %v2741_v53 = vrot.slane %v10884_v31, 1  ;;  %v2742_v6 = vrot.slane %v10885_v48, 2  ;;  %v4165_v43 = vor.u32 %v4164_v46, %v4163_v9 }
 0x2f3   : > { %v3333_v25 = vpack.c.bf16 %v3292_v0, %v3292_v0  ;;  %v2961_v55 = vadd.f32 %v2864_v12, %v2655_v15  ;;  %v8486_v8 = vsel %vm772_vm4, %v3802_v7, %v3811_v52  ;;  %v2392_v7 = vadd.f32 %v2297_v4, %v7848_v36  ;;  %v3111_v15 = vpop.permute.xlu2 %3110 }
 0x2f4   : > { %v8488_v61 = vld [vmem:[#allocation2 + $0x18] sm:$0xff]   ;;  %v8494_v28 = vsel %vm1142_vm5, %v4161_v57, %v4165_v43  ;;  %v8498_v44 = vor.u32 %v2742_v6, %v2741_v53  ;;  %v2455_v6 = vrot.slane %v7250_v17, 1 }
 0x2f5   : > { %10886 = vst [vmem:[#allocation24_spill] sm:$0xff] %v8488_v61  ;;  %6403 = vmatmul.msk.bf16.gmra.mxu3 %vm591_vm3, %v2454_v19  ;;  %v3006_v58 = vadd.f32 %v8396_v37, %v2961_v55  ;;  %v10637_v42 = vshll.u32 %v8488_v61, 16  ;;  %v10629_v45 = vshrl.u32 %v8488_v61, 16 }
 0x2f6   : > { %3375 = vst.msk [vmem:[#allocation2 + $0x20] sm:$0xf] %vm3370_vm9, %v3333_v25  ;;  %v2744_v36 = vsel %vm2693_vm7, %v8456_v5, %v8498_v44 }
 0x2f7   : > { %v3047_v23 = vmax.f32 %v3006_v58, 0.0  ;;  %v8503_v33 = vrot.slane %v10629_v45, 1  ;;  %v8507_v0 = vrot.slane %v10637_v42, 2 }
 0x2f8   : > { %v2561_v57 = vpop.f32.mrf.mxu3 }
 0x2f9   : > { %v3293_v9 = vmul.f32 %v3111_v15, %v3047_v23  ;;  %v2656_v46 = vadd.f32 %v2561_v57, %v2392_v7  ;;  %v5706_v16 = vor.u32 %v8507_v0, %v8503_v33  ;;  %v3116_v23 = vpop.permute.xlu0 %3115 }
 0x2fa   : > { %v2299_v19 = vpop.f32.mrf.mxu2  ;;  %v2867_v12 = vpop.f32.mrf.mxu0 }
 0x2fb   : > { %v3334_v4 = vpack.c.bf16 %v3293_v9, %v3293_v9  ;;  %v2962_v31 = vadd.f32 %v2867_v12, %v2656_v46  ;;  %v2393_v5 = vadd.f32 %v2299_v19, %v7857_v34  ;;  %v2456_v34 = vsel %vm2429_vm8, %v2453_v10, %v2455_v6 }
 0x2fc   : > { %v10887_v19 = vshrl.u32 %v7250_v17, 16 }
 0x2fd   : > { %v8514_v53 = vld [vmem:[#allocation2 + $0x1c] sm:$0xff]   ;;  %3376 = vst.msk [vmem:[#allocation2 + $0x24] sm:$0xf] %vm3370_vm9, %v3334_v4  ;;  %v3007_v48 = vadd.f32 %v8396_v37, %v2962_v31  ;;  %6425 = vmatmul.msk.bf16.gmra.mxu0 %vm591_vm3, %v2744_v36 }
 0x2fe   : > { %v3572_v25 = vrot.slane %v8514_v53, 3  ;;  %v3814_v55 = vshrl.u32 %v8514_v53, 16  ;;  %v3817_v58 = vshll.u32 %v8514_v53, 16  ;;  %v2745_v31 = vrot.slane %v10887_v19, 1 }
 0x2ff   : > { %v3048_v7 = vmax.f32 %v3007_v48, 0.0  ;;  %6382 = vmatmul.msk.bf16.gmra.mxu2 %vm591_vm3, %v7898_v2  ;;  %v10891_v53 = vshrl.u32 %v7284_v39, 16 }
 0x300   : > { %v2563_v33 = vpop.f32.mrf.mxu3  ;;  %v3573_v0 = vsel %vm549_vm2, %v3570_v51, %v3572_v25  ;;  %v3816_v15 = vrot.slane %v3814_v55, 2  ;;  %v3819_v57 = vrot.slane %v3817_v58, 3  ;;  %v4167_v12 = vrot.slane %v3814_v55, 3 }
 0x301   : > { %v3294_v9 = vmul.f32 %v3116_v23, %v3048_v7  ;;  %v2657_v46 = vadd.f32 %v2563_v33, %v2393_v5  ;;  %6442 = vmatmul.msk.bf16.gmra.mxu1 %vm591_vm3, %v3573_v0  ;;  %v4168_v36 = vrot.slane %v3817_v58, 4  ;;  %v10888_v51 = vshll.u32 %v7250_v17, 16 }
 0x302   : > { %v2302_v4 = vpop.f32.mrf.mxu2  ;;  %v2869_v2 = vpop.f32.mrf.mxu0  ;;  %v3820_v7 = vor.u32 %v3819_v57, %v3816_v15 }
 0x303   : > { %v2746_v48 = vrot.slane %v10888_v51, 2  ;;  %v3335_v5 = vpack.c.bf16 %v3294_v9, %v3294_v9  ;;  %v2963_v23 = vadd.f32 %v2869_v2, %v2657_v46  ;;  %v4169_v33 = vor.u32 %v4168_v36, %v4167_v12  ;;  %v3121_v36 = vpop.permute.xlu1 %3120 }
 0x304   : > { %v8540_v55 = vsel %vm772_vm4, %v3811_v52, %v3820_v7  ;;  %v8542_v58 = vld [vmem:[#allocation2 + $0x20] sm:$0xff]   ;;  %v2394_v52 = vadd.f32 %v2302_v4, %v7874_v40 }
 0x305   : > { %10889 = vst [vmem:[#allocation26_spill] sm:$0xff] %v8542_v58  ;;  %6404 = vmatmul.msk.bf16.gmra.mxu3 %vm591_vm3, %v2456_v34  ;;  %v3008_v13 = vadd.f32 %v8396_v37, %v2963_v23  ;;  %v8548_v10 = vsel %vm1142_vm5, %v4165_v43, %v4169_v33  ;;  %v10636_v0 = vshll.u32 %v8542_v58, 16  ;;  %v10628_v15 = vshrl.u32 %v8542_v58, 16 }
 0x306   : > { %3377 = vst.msk [vmem:[#allocation2 + $0x28] sm:$0xf] %vm3370_vm9, %v3335_v5  ;;  %v8552_v57 = vor.u32 %v2746_v48, %v2745_v31 }
 0x307   : > { %v3049_v9 = vmax.f32 %v3008_v13, 0.0  ;;  %v5707_v46 = vrot.slane %v10628_v15, 1  ;;  %v5708_v12 = vrot.slane %v10636_v0, 2  ;;  %v2749_v15 = vrot.slane %v10891_v53, 1 }
 0x308   : > { %v2566_v34 = vpop.f32.mrf.mxu3  ;;  %v2748_v31 = vsel %vm2693_vm7, %v8498_v44, %v8552_v57 }
 0x309   : > { %v3295_v2 = vmul.f32 %v3121_v36, %v3049_v9  ;;  %v2658_v43 = vadd.f32 %v2566_v34, %v2394_v52  ;;  %v5709_v19 = vor.u32 %v5708_v12, %v5707_v46  ;;  %v2457_v52 = vrot.slane %v7284_v39, 1  ;;  %v3126_v36 = vpop.permute.xlu2 %3125 }
 0x30a   : > { %v2304_v51 = vpop.f32.mrf.mxu2  ;;  %v2872_v5 = vpop.f32.mrf.mxu0 }
 0x30b   : > { %v3336_v48 = vpack.c.bf16 %v3295_v2, %v3295_v2  ;;  %v2964_v40 = vadd.f32 %v2872_v5, %v2658_v43  ;;  %v8563_v4 = vsel %vm2693_vm7, %v5706_v16, %v5709_v19  ;;  %v2395_v12 = vadd.f32 %v2304_v51, %v7883_v30 }
 0x30c   : > { %10890 = vst [vmem:[#allocation7_spill] sm:$0xff] %v8563_v4 }
 0x30d   : > { %v8565_v23 = vld [vmem:[#allocation2 + $0x24] sm:$0xff]   ;;  %3378 = vst.msk [vmem:[#allocation2 + $0x2c] sm:$0xf] %vm3370_vm9, %v3336_v48  ;;  %v3009_v13 = vadd.f32 %v8396_v37, %v2964_v40  ;;  %6426 = vmatmul.msk.bf16.gmra.mxu0 %vm591_vm3, %v2748_v31 }
 0x30e   : > { %v3574_v9 = vrot.slane %v8565_v23, 3  ;;  %v3823_v46 = vshrl.u32 %v8565_v23, 16  ;;  %v3826_v44 = vshll.u32 %v8565_v23, 16  ;;  %v10895_v23 = vshrl.u32 %v7318_v29, 16 }
 0x30f   : > { %v3050_v16 = vmax.f32 %v3009_v13, 0.0  ;;  %6383 = vmatmul.msk.bf16.gmra.mxu2 %vm591_vm3, %v7927_v59  ;;  %v2458_v59 = vsel %vm2429_vm8, %v2455_v6, %v2457_v52 }
 0x310   : > { %v2568_v34 = vpop.f32.mrf.mxu3  ;;  %v3575_v2 = vsel %vm549_vm2, %v3572_v25, %v3574_v9  ;;  %v3825_v43 = vrot.slane %v3823_v46, 2  ;;  %v3828_v5 = vrot.slane %v3826_v44, 3  ;;  %v4171_v40 = vrot.slane %v3823_v46, 3 }
 0x311   : > { %v3296_v31 = vmul.f32 %v3126_v36, %v3050_v16  ;;  %v2659_v48 = vadd.f32 %v2568_v34, %v2395_v12  ;;  %6443 = vmatmul.msk.bf16.gmra.mxu1 %vm591_vm3, %v3575_v2  ;;  %v4172_v30 = vrot.slane %v3826_v44, 4  ;;  %v10892_v25 = vshll.u32 %v7284_v39, 16 }
 0x312   : > { %v2307_v51 = vpop.f32.mrf.mxu2  ;;  %v2874_v13 = vpop.f32.mrf.mxu0  ;;  %v3829_v16 = vor.u32 %v3828_v5, %v3825_v43 }
 0x313   : > { %v2750_v45 = vrot.slane %v10892_v25, 2  ;;  %v3337_v12 = vpack.c.bf16 %v3296_v31, %v3296_v31  ;;  %v2965_v36 = vadd.f32 %v2874_v13, %v2659_v48  ;;  %v4173_v34 = vor.u32 %v4172_v30, %v4171_v40  ;;  %v3131_v30 = vpop.permute.xlu0 %3130 }
 0x314   : > { %v8593_v46 = vsel %vm772_vm4, %v3820_v7, %v3829_v16  ;;  %v8595_v44 = vld [vmem:[#allocation2 + $0x28] sm:$0xff]   ;;  %v2396_v7 = vadd.f32 %v2307_v51, %v7900_v22 }
 0x315   : > { %10893 = vst [vmem:[#allocation31_spill] sm:$0xff] %v8595_v44  ;;  %6405 = vmatmul.msk.bf16.gmra.mxu3 %vm591_vm3, %v2458_v59  ;;  %v3010_v17 = vadd.f32 %v8396_v37, %v2965_v36  ;;  %v8601_v6 = vsel %vm1142_vm5, %v4169_v33, %v4173_v34  ;;  %v10631_v2 = vshll.u32 %v8595_v44, 16  ;;  %v10630_v43 = vshrl.u32 %v8595_v44, 16 }
 0x316   : > { %3379 = vst.msk [vmem:[#allocation2 + $0x30] sm:$0xf] %vm3370_vm9, %v3337_v12  ;;  %v8605_v5 = vor.u32 %v2750_v45, %v2749_v15 }
 0x317   : > { %v3051_v31 = vmax.f32 %v3010_v17, 0.0  ;;  %v5711_v48 = vrot.slane %v10630_v43, 1  ;;  %v5712_v40 = vrot.slane %v10631_v2, 2  ;;  %v2753_v43 = vrot.slane %v10895_v23, 1 }
 0x318   : > { %v2571_v59 = vpop.f32.mrf.mxu3  ;;  %v2752_v45 = vsel %vm2693_vm7, %v8552_v57, %v8605_v5 }
 0x319   : > { %v3297_v13 = vmul.f32 %v3131_v30, %v3051_v31  ;;  %v2660_v33 = vadd.f32 %v2571_v59, %v2396_v7  ;;  %v5713_v15 = vor.u32 %v5712_v40, %v5711_v48  ;;  %v2459_v7 = vrot.slane %v7318_v29, 1 }
 0x31a   : > { %v2309_v53 = vpop.f32.mrf.mxu2  ;;  %v2877_v25 = vpop.f32.mrf.mxu0 }
 0x31b   : > { %v3338_v12 = vpack.c.bf16 %v3297_v13, %v3297_v13  ;;  %v2966_v22 = vadd.f32 %v2877_v25, %v2660_v33  ;;  %v8618_v36 = vsel %vm2693_vm7, %v5709_v19, %v5713_v15  ;;  %v2397_v40 = vadd.f32 %v2309_v53, %v7909_v60  ;;  %v3136_v19 = vpop.permute.xlu1 %3135 }
 0x31c   : > { %10894 = vst [vmem:[#allocation27_spill] sm:$0xff] %v8618_v36 }
 0x31d   : > { %v8615_v51 = vld [vmem:[#allocation2 + $0x2c] sm:$0xff]   ;;  %3380 = vst.msk [vmem:[#allocation2 + $0x34] sm:$0xf] %vm3370_vm9, %v3338_v12  ;;  %v3011_v17 = vadd.f32 %v8396_v37, %v2966_v22  ;;  %6427 = vmatmul.msk.bf16.gmra.mxu0 %vm591_vm3, %v2752_v45 }
 0x31e   : > { %v3576_v31 = vrot.slane %v8615_v51, 3  ;;  %v3832_v57 = vshrl.u32 %v8615_v51, 16  ;;  %v3835_v48 = vshll.u32 %v8615_v51, 16  ;;  %v10899_v51 = vshrl.u32 %v7352_v18, 16 }
 0x31f   : > { %v3052_v30 = vmax.f32 %v3011_v17, 0.0  ;;  %6384 = vmatmul.msk.bf16.gmra.mxu2 %vm591_vm3, %v7962_v32  ;;  %v2460_v32 = vsel %vm2429_vm8, %v2457_v52, %v2459_v7 }
 0x320   : > { %v2573_v59 = vpop.f32.mrf.mxu3  ;;  %v3577_v13 = vsel %vm549_vm2, %v3574_v9, %v3576_v31  ;;  %v3834_v33 = vrot.slane %v3832_v57, 2  ;;  %v3837_v25 = vrot.slane %v3835_v48, 3  ;;  %v4175_v22 = vrot.slane %v3832_v57, 3 }
 0x321   : > { %v3298_v45 = vmul.f32 %v3136_v19, %v3052_v30  ;;  %v2661_v12 = vadd.f32 %v2573_v59, %v2397_v40  ;;  %6444 = vmatmul.msk.bf16.gmra.mxu1 %vm591_vm3, %v3577_v13  ;;  %v4176_v60 = vrot.slane %v3835_v48, 4  ;;  %v10896_v9 = vshll.u32 %v7318_v29, 16 }
 0x322   : > { %v2312_v53 = vpop.f32.mrf.mxu2  ;;  %v2879_v17 = vpop.f32.mrf.mxu0  ;;  %v3838_v30 = vor.u32 %v3837_v25, %v3834_v33 }
 0x323   : > { %v2754_v2 = vrot.slane %v10896_v9, 2  ;;  %v3339_v40 = vpack.c.bf16 %v3298_v45, %v3298_v45  ;;  %v2967_v19 = vadd.f32 %v2879_v17, %v2661_v12  ;;  %v4177_v59 = vor.u32 %v4176_v60, %v4175_v22  ;;  %v3141_v60 = vpop.permute.xlu2 %3140 }
 0x324   : > { %v8646_v57 = vsel %vm772_vm4, %v3829_v16, %v3838_v30  ;;  %v8648_v48 = vld [vmem:[#allocation2 + $0x30] sm:$0xff]   ;;  %v2398_v16 = vadd.f32 %v2312_v53, %v7929_v1 }
 0x325   : > { %10897 = vst [vmem:[#allocation29_spill] sm:$0xff] %v8648_v48  ;;  %6406 = vmatmul.msk.bf16.gmra.mxu3 %vm591_vm3, %v2460_v32  ;;  %v3012_v39 = vadd.f32 %v8396_v37, %v2967_v19  ;;  %v8654_v52 = vsel %vm1142_vm5, %v4173_v34, %v4177_v59  ;;  %v10633_v13 = vshll.u32 %v8648_v48, 16  ;;  %v10632_v33 = vshrl.u32 %v8648_v48, 16 }
 0x326   : > { %3381 = vst.msk [vmem:[#allocation2 + $0x38] sm:$0xf] %vm3370_vm9, %v3339_v40  ;;  %v8658_v25 = vor.u32 %v2754_v2, %v2753_v43 }
 0x327   : > { %v3053_v45 = vmax.f32 %v3012_v39, 0.0  ;;  %v5715_v12 = vrot.slane %v10632_v33, 1  ;;  %v5716_v22 = vrot.slane %v10633_v13, 2  ;;  %v2757_v33 = vrot.slane %v10899_v51, 1 }
 0x328   : > { %v2576_v32 = vpop.f32.mrf.mxu3  ;;  %v2756_v2 = vsel %vm2693_vm7, %v8605_v5, %v8658_v25 }
 0x329   : > { %v3299_v17 = vmul.f32 %v3141_v60, %v3053_v45  ;;  %v2662_v34 = vadd.f32 %v2576_v32, %v2398_v16  ;;  %v5717_v43 = vor.u32 %v5716_v22, %v5715_v12  ;;  %v2461_v16 = vrot.slane %v7352_v18, 1 }
 0x32a   : > { %v2314_v23 = vpop.f32.mrf.mxu2  ;;  %v2882_v9 = vpop.f32.mrf.mxu0 }
 0x32b   : > { %v3340_v40 = vpack.c.bf16 %v3299_v17, %v3299_v17  ;;  %v2968_v1 = vadd.f32 %v2882_v9, %v2662_v34  ;;  %v8671_v19 = vsel %vm2693_vm7, %v5713_v15, %v5717_v43  ;;  %v2399_v22 = vadd.f32 %v2314_v23, %v7941_v50  ;;  %v3146_v15 = vpop.permute.xlu0 %3145 }
 0x32c   : > { %10898 = vst [vmem:[#allocation34_spill] sm:$0xff] %v8671_v19 }
 0x32d   : > { %v8668_v53 = vld [vmem:[#allocation2 + $0x34] sm:$0xff]   ;;  %3382 = vst.msk [vmem:[#allocation2 + $0x3c] sm:$0xf] %vm3370_vm9, %v3340_v40  ;;  %v3013_v39 = vadd.f32 %v8396_v37, %v2968_v1  ;;  %6428 = vmatmul.msk.bf16.gmra.mxu0 %vm591_vm3, %v2756_v2 }
 0x32e   : > { %v3578_v45 = vrot.slane %v8668_v53, 3  ;;  %v3841_v5 = vshrl.u32 %v8668_v53, 16  ;;  %v3844_v12 = vshll.u32 %v8668_v53, 16  ;;  %v10905_v53 = vshrl.u32 %v10793_v35, 16 }
 0x32f   : > { %v3054_v60 = vmax.f32 %v3013_v39, 0.0  ;;  %6385 = vmatmul.msk.bf16.gmra.mxu2 %vm591_vm3, %v8000_v20  ;;  %v2462_v20 = vsel %vm2429_vm8, %v2459_v7, %v2461_v16 }
 0x330   : > { %v2578_v32 = vpop.f32.mrf.mxu3  ;;  %v3579_v17 = vsel %vm549_vm2, %v3576_v31, %v3578_v45  ;;  %v3843_v34 = vrot.slane %v3841_v5, 2  ;;  %v3846_v9 = vrot.slane %v3844_v12, 3  ;;  %v4179_v1 = vrot.slane %v3841_v5, 3 }
 0x331   : > { %v3300_v2 = vmul.f32 %v3146_v15, %v3054_v60  ;;  %v2663_v40 = vadd.f32 %v2578_v32, %v2399_v22  ;;  %6445 = vmatmul.msk.bf16.gmra.mxu1 %vm591_vm3, %v3579_v17  ;;  %v4180_v50 = vrot.slane %v3844_v12, 4  ;;  %v10900_v31 = vshll.u32 %v7352_v18, 16 }
 0x332   : > { %v2317_v23 = vpop.f32.mrf.mxu2  ;;  %v2884_v39 = vpop.f32.mrf.mxu0  ;;  %v8698_v60 = vor.u32 %v3846_v9, %v3843_v34 }
 0x333   : > { %v2758_v13 = vrot.slane %v10900_v31, 2  ;;  %v3341_v22 = vpack.c.bf16 %v3300_v2, %v3300_v2  ;;  %v2969_v15 = vadd.f32 %v2884_v39, %v2663_v40  ;;  %v8700_v5 = vor.u32 %v4180_v50, %v4179_v1 }
 0x334   : > { %v8704_v12 = vsel %vm772_vm4, %v3838_v30, %v8698_v60  ;;  %v8706_v29 = vld [vmem:[#allocation2 + $0x38] sm:$0xff]   ;;  %v10902_v30 = vld [vmem:[#allocation35_spill] sm:$0xff] }
 0x335   : > { %10901 = vst [vmem:[#allocation30_spill] sm:$0xff] %v8706_v29  ;;  %6407 = vmatmul.msk.bf16.gmra.mxu3 %vm591_vm3, %v2462_v20  ;;  %v3014_v7 = vadd.f32 %v8396_v37, %v2969_v15  ;;  %v8713_v32 = vsel %vm1142_vm5, %v4177_v59, %v8700_v5  ;;  %v10635_v17 = vshll.u32 %v8706_v29, 16  ;;  %v10634_v34 = vshrl.u32 %v8706_v29, 16  ;;  %v3151_v20 = vpop.permute.xlu1 %3150 }
 0x336   : > { %3383 = vst.msk [vmem:[#allocation2 + $0x40] sm:$0xf] %vm3370_vm9, %v3341_v22  ;;  %v8717_v9 = vor.u32 %v2758_v13, %v2757_v33  ;;  %v2400_v2 = vadd.f32 %v2317_v23, %v10902_v30 }
 0x337   : > { %v3055_v40 = vmax.f32 %v3014_v7, 0.0  ;;  %v5719_v1 = vrot.slane %v10634_v34, 1  ;;  %v5720_v50 = vrot.slane %v10635_v17, 2  ;;  %v2761_v17 = vrot.slane %v10905_v53, 1 }
 0x338   : > { %v2581_v39 = vpop.f32.mrf.mxu3  ;;  %v2760_v13 = vsel %vm2693_vm7, %v8658_v25, %v8717_v9 }
 0x339   : > { %v3301_v51 = vmul.f32 %v3151_v20, %v3055_v40  ;;  %v2664_v59 = vadd.f32 %v2581_v39, %v2400_v2  ;;  %v8727_v33 = vor.u32 %v5720_v50, %v5719_v1  ;;  %v2463_v40 = vrot.slane %v10793_v35, 1  ;;  %v10904_v50 = vld [vmem:[#allocation36_spill] sm:$0xff] }
 0x33a   : > { %v2319_v31 = vpop.f32.mrf.mxu2  ;;  %v2887_v22 = vpop.f32.mrf.mxu0 }
 0x33b   : > { %v3342_v23 = vpack.c.bf16 %v3301_v51, %v3301_v51  ;;  %v2970_v15 = vadd.f32 %v2887_v22, %v2664_v59  ;;  %v8733_v30 = vsel %vm2693_vm7, %v5717_v43, %v8727_v33  ;;  %v2401_v20 = vadd.f32 %v2319_v31, %v10904_v50  ;;  %v3156_v51 = vpop.permute.xlu2 %3155 }
 0x33c   : > { %10903 = vst [vmem:[#allocation32_spill] sm:$0xff] %v8733_v30  ;;  %v10915_v30 = vshll.u32 %v8063_v26, 16 }
 0x33d   : > { %v8729_v7 = vld [vmem:[#allocation2 + $0x3c] sm:$0xff]   ;;  %3384 = vst.msk [vmem:[#allocation2 + $0x44] sm:$0xf] %vm3370_vm9, %v3342_v23  ;;  %v3015_v2 = vadd.f32 %v8396_v37, %v2970_v15  ;;  %6429 = vmatmul.msk.bf16.gmra.mxu0 %vm591_vm3, %v2760_v13 }
 0x33e   : > { %v10638_v25 = vrot.slane %v8729_v7, 3  ;;  %v3850_v1 = vshrl.u32 %v8729_v7, 16  ;;  %v3853_v43 = vshll.u32 %v8729_v7, 16 }
 0x33f   : > { %v3056_v39 = vmax.f32 %v3015_v2, 0.0  ;;  %6386 = vmatmul.msk.bf16.gmra.mxu2 %vm591_vm3, %v8044_v38  ;;  %v2464_v38 = vsel %vm2429_vm8, %v2461_v16, %v2463_v40  ;;  %v352_v16 = vld [vmem:[%s7020_s28 + $0x168] sm:$0xff] }
 0x340   : > { %v2583_v59 = vpop.f32.mrf.mxu3  ;;  %v3581_v22 = vsel %vm549_vm2, %v3578_v45, %v10638_v25  ;;  %v3852_v13 = vrot.slane %v3850_v1, 2  ;;  %v3855_v31 = vrot.slane %v3853_v43, 3  ;;  %v4183_v2 = vrot.slane %v3850_v1, 3 }
 0x341   : > { %v3302_v23 = vmul.f32 %v3156_v51, %v3056_v39  ;;  %v2665_v15 = vadd.f32 %v2583_v59, %v2401_v20  ;;  %6446 = vmatmul.msk.bf16.gmra.mxu1 %vm591_vm3, %v3581_v22  ;;  %v10906_v45 = vshll.u32 %v10793_v35, 16  ;;  %v4184_v20 = vrot.slane %v3853_v43, 4 }
 0x342   : > { %v2322_v50 = vpop.f32.mrf.mxu2  ;;  %v2889_v34 = vpop.f32.mrf.mxu0  ;;  %v8760_v22 = vor.u32 %v3855_v31, %v3852_v13 }
 0x343   : > { %v2762_v39 = vrot.slane %v10906_v45, 2  ;;  %v3343_v51 = vpack.c.bf16 %v3302_v23, %v3302_v23  ;;  %v2971_v59 = vadd.f32 %v2889_v34, %v2665_v15  ;;  %v8762_v1 = vor.u32 %v4184_v20, %v4183_v2  ;;  %v10908_v15 = vld [vmem:[#allocation37_spill] sm:$0xff]  ;;  %v3161_v45 = vpop.permute.xlu0 %3160 }
 0x344   : > { %v8764_v0 = vld [vmem:[#allocation2 + $0x40] sm:$0xff]   ;;  %v8773_v53 = vsel %vm772_vm4, %v8698_v60, %v8760_v22  ;;  %v2402_v31 = vadd.f32 %v2322_v50, %v10908_v15  ;;  %v10641_v15 = vrot.slane %v8063_v26, 1 }
 0x345   : > { %10907 = vst [vmem:[#allocation33_spill] sm:$0xff] %v8764_v0  ;;  %6408 = vmatmul.msk.bf16.gmra.mxu3 %vm591_vm3, %v2464_v38  ;;  %v3016_v18 = vadd.f32 %v8396_v37, %v2971_v59  ;;  %v10640_v34 = vshll.u32 %v8764_v0, 16  ;;  %v10639_v43 = vshrl.u32 %v8764_v0, 16  ;;  %v8777_v13 = vor.u32 %v2762_v39, %v2761_v17 }
 0x346   : > { %3385 = vst.msk [vmem:[#allocation2 + $0x48] sm:$0xf] %vm3370_vm9, %v3343_v51  ;;  %v8782_v23 = vsel %vm1142_vm5, %v8700_v5, %v8762_v1  ;;  %v398_v51 = vpack.c.bf16 %v352_v16, %v352_v16 }
 0x347   : > { %v3057_v2 = vmax.f32 %v3016_v18, 0.0  ;;  %v5723_v38 = vrot.slane %v10639_v43, 1  ;;  %v5724_v60 = vrot.slane %v10640_v34, 2  ;;  %v2764_v5 = vsel %vm2693_vm7, %v8717_v9, %v8777_v13 }
 0x348   : > { %v2586_v20 = vpop.f32.mrf.mxu3  ;;  %v2241_v34 = vunpack.c.l.b16 %v398_v51 }
 0x349   : > { %v3303_v59 = vmul.f32 %v3161_v45, %v3057_v2  ;;  %v2666_v17 = vadd.f32 %v2586_v20, %v2402_v31  ;;  %v8792_v25 = vor.u32 %v5724_v60, %v5723_v38  ;;  %v10910_v2 = vld [vmem:[#allocation8_spill] sm:$0xff] }
 0x34a   : > { %v2324_v39 = vpop.f32.mrf.mxu2  ;;  %v2892_v42 = vpop.f32.mrf.mxu0  ;;  %v10911_v60 = vld [vmem:[#allocation40_spill] sm:$0xff] }
 0x34b   : > { %v3344_v50 = vpack.c.bf16 %v3303_v59, %v3303_v59  ;;  %v2972_v18 = vadd.f32 %v2892_v42, %v2666_v17  ;;  %v8800_v16 = vsel %vm2693_vm7, %v8727_v33, %v8792_v25  ;;  %v2403_v42 = vadd.f32 %v2324_v39, %v10910_v2  ;;  %v3166_v33 = vpop.permute.xlu1 %3165 }
 0x34c   : > { %10909 = vst [vmem:[#allocation35_spill] sm:$0xff] %v8800_v16  ;;  %v2466_v59 = vsel %vm2429_vm8, %v2463_v40, %v10641_v15  ;;  %v10912_v17 = vrot.slane %v8729_v7, 3  ;;  %v10914_v40 = vshrl.u32 %v8063_v26, 16  ;;  %v2766_v7 = vrot.slane %v10915_v30, 2 }
 0x34d   : > { %v8795_v43 = vld [vmem:[#allocation2 + $0x44] sm:$0xff]   ;;  %3386 = vst.msk [vmem:[#allocation2 + $0x4c] sm:$0xf] %vm3370_vm9, %v3344_v50  ;;  %v3017_v31 = vadd.f32 %v8396_v37, %v2972_v18  ;;  %6430 = vmatmul.msk.bf16.gmra.mxu0 %vm591_vm3, %v2764_v5  ;;  %v10913_v5 = vld [vmem:[#allocation10_spill] sm:$0xff] }
 0x34e   : > { %v10642_v9 = vrot.slane %v8795_v43, 3  ;;  %v3859_v45 = vshrl.u32 %v8795_v43, 16  ;;  %v3862_v20 = vshll.u32 %v8795_v43, 16  ;;  %v8822_v50 = vpack.c.b16 %v2241_v34, %v10913_v5 }
 0x34f   : > { %v3058_v38 = vmax.f32 %v3017_v31, 0.0  ;;  %6387 = vmatmul.msk.bf16.gmra.mxu2 %vm591_vm3, %v10911_v60  ;;  %v2765_v15 = vrot.slane %v10914_v40, 1 }
 0x350   : > { %v2588_v51 = vpop.f32.mrf.mxu3  ;;  %v3583_v39 = vsel %vm549_vm2, %v10912_v17, %v10642_v9  ;;  %v3861_v2 = vrot.slane %v3859_v45, 2  ;;  %v3864_v60 = vrot.slane %v3862_v20, 3  ;;  %v4187_v19 = vrot.slane %v3859_v45, 3 }
 0x351   : > { %v3304_v18 = vmul.f32 %v3166_v33, %v3058_v38  ;;  %v2667_v31 = vadd.f32 %v2588_v51, %v2403_v42  ;;  %6447 = vmatmul.msk.bf16.gmra.mxu1 %vm591_vm3, %v3583_v39  ;;  %v4188_v17 = vrot.slane %v3862_v20, 4  ;;  %v2246_v42 = vshll.u32 %v8822_v50, 16  ;;  %v353_v39 = vld [vmem:[%s7020_s28 + $0x170] sm:$0xff] }
 0x352   : > { %v2327_v16 = vpop.f32.mrf.mxu2  ;;  %v2894_v35 = vpop.f32.mrf.mxu0  ;;  %v8829_v5 = vor.u32 %v3864_v60, %v3861_v2 }
 0x353   : > { %v3345_v9 = vpack.c.bf16 %v3304_v18, %v3304_v18  ;;  %v2973_v34 = vadd.f32 %v2894_v35, %v2667_v31  ;;  %v8832_v38 = vor.u32 %v4188_v17, %v4187_v19  ;;  %v8847_v19 = vor.u32 %v2766_v7, %v2765_v15  ;;  %v3171_v60 = vpop.permute.xlu2 %3170 }
 0x354   : > { %v8834_v33 = vld [vmem:[#allocation2 + $0x48] sm:$0xff]   ;;  %v8843_v30 = vsel %vm772_vm4, %v8760_v22, %v8829_v5  ;;  %v8859_v40 = vrot.slane %v2246_v42, 1  ;;  %v399_v15 = vpack.c.bf16 %v353_v39, %v353_v39 }
 0x355   : > { %10916 = vst [vmem:[#allocation36_spill] sm:$0xff] %v8834_v33  ;;  %6409 = vmatmul.msk.bf16.gmra.mxu3 %vm591_vm3, %v2466_v59  ;;  %v3018_v51 = vadd.f32 %v8396_v37, %v2973_v34  ;;  %v10644_v45 = vshll.u32 %v8834_v33, 16  ;;  %v10643_v20 = vshrl.u32 %v8834_v33, 16  ;;  %v10917_v59 = vld [vmem:[#allocation38_spill] sm:$0xff]  ;;  %v10923_v33 = vrot.slane %v8063_v26, 1 }
 0x356   : > { %3387 = vst.msk [vmem:[#allocation2 + $0x50] sm:$0xf] %vm3370_vm9, %v3345_v9  ;;  %v8852_v9 = vsel %vm1142_vm5, %v8762_v1, %v8832_v38  ;;  %v2404_v18 = vadd.f32 %v2327_v16, %v10917_v59  ;;  %v2768_v1 = vsel %vm2693_vm7, %v8777_v13, %v8847_v19  ;;  %v2242_v4 = vunpack.c.l.b16 %v399_v15  ;;  %v8919_v26 = vld [vmem:[%s10522_s3] ss:$0 sm:$0xff] }
 0x357   : > { %v3059_v31 = vmax.f32 %v3018_v51, 0.0  ;;  %v5727_v2 = vrot.slane %v10643_v20, 1  ;;  %v5728_v22 = vrot.slane %v10644_v45, 2  ;;  %v2249_v20 = vsel %vm1870_vm6, %v8140_v49, %v8859_v40 }
 0x358   : > { %v2591_v35 = vpop.f32.mrf.mxu3 }
 0x359   : > { %v3305_v7 = vmul.f32 %v3171_v60, %v3059_v31  ;;  %v2668_v17 = vadd.f32 %v2591_v35, %v2404_v18  ;;  %v8864_v16 = vor.u32 %v5728_v22, %v5727_v2  ;;  %v10919_v18 = vld [vmem:[#allocation39_spill] sm:$0xff]  ;;  %v10920_v31 = vld [vmem:[#allocation9_spill] sm:$0xff]  ;;  %v2250_v22 = vshrl.u32 %v8822_v50, 16 }
 0x35a   : > { %v2329_v34 = vpop.f32.mrf.mxu2  ;;  %v2897_v36 = vpop.f32.mrf.mxu0  ;;  %v2215_v60 = vadd.f32 %v10920_v31, %v10919_v18 }
 0x35b   : > { %v3346_v51 = vpack.c.bf16 %v3305_v7, %v3305_v7  ;;  %v2974_v59 = vadd.f32 %v2897_v36, %v2668_v17  ;;  %v8874_v39 = vsel %vm2693_vm7, %v8792_v25, %v8864_v16  ;;  %v3176_v17 = vpop.permute.xlu0 %3175  ;;  %v2769_v29 = vrot.slane %v2250_v22, 1 }
 0x35c   : > { %10918 = vst [vmem:[#allocation37_spill] sm:$0xff] %v8874_v39  ;;  %v2405_v15 = vadd.f32 %v2329_v34, %v2215_v60 }
 0x35d   : > { %v8869_v45 = vld [vmem:[#allocation2 + $0x4c] sm:$0xff]   ;;  %3388 = vst.msk [vmem:[#allocation2 + $0x54] sm:$0xf] %vm3370_vm9, %v3346_v51  ;;  %v3019_v13 = vadd.f32 %v8396_v37, %v2974_v59  ;;  %6431 = vmatmul.msk.bf16.gmra.mxu0 %vm591_vm3, %v2768_v1  ;;  %v8882_v49 = vpop.f32.mrf.mxu1  ;;  %v10921_v1 = vrot.slane %v8795_v43, 3  ;;  %v8894_v59 = vpack.c.b16 %v2242_v4, %v2242_v4 }
 0x35e   : > { %v10651_v2 = vrot.slane %v8869_v45, 3  ;;  %v3868_v25 = vshrl.u32 %v8869_v45, 16  ;;  %v3871_v35 = vshll.u32 %v8869_v45, 16 }
 0x35f   : > { %v3060_v7 = vmax.f32 %v3019_v13, 0.0  ;;  %6388 = vmatmul.msk.bf16.gmra.mxu2 %vm591_vm3, %v2249_v20  ;;  %v10922_v20 = vrot.slane %v8822_v50, 1 }
 0x360   : > { %v2593_v37 = vpop.f32.mrf.mxu3  ;;  %v3585_v51 = vsel %vm549_vm2, %v10921_v1, %v10651_v2  ;;  %v3870_v18 = vrot.slane %v3868_v25, 2  ;;  %v3873_v31 = vrot.slane %v3871_v35, 3  ;;  %v4191_v34 = vrot.slane %v3868_v25, 3 }
 0x361   : > { %v3306_v36 = vmul.f32 %v3176_v17, %v3060_v7  ;;  %v2669_v39 = vadd.f32 %v2593_v37, %v2405_v15  ;;  %6448 = vmatmul.msk.bf16.gmra.mxu1 %vm591_vm3, %v3585_v51  ;;  %v4192_v60 = vrot.slane %v3871_v35, 4  ;;  %v2468_v0 = vsel %vm2429_vm8, %v10923_v33, %v10922_v20 }
 0x362   : > { %v2332_v13 = vpop.f32.mrf.mxu2  ;;  %v2899_v43 = vpop.f32.mrf.mxu0  ;;  %v2770_v1 = vrot.slane %v2246_v42, 2  ;;  %v8902_v4 = vor.u32 %v3873_v31, %v3870_v18  ;;  %v2254_v15 = vshll.u32 %v8894_v59, 16  ;;  %v2252_v31 = vor.u32 %v2250_v22, %v8859_v40  ;;  %v10928_v22 = vld [vmem:[#allocation11_spill] sm:$0xff] }
 0x363   : > { %v3347_v2 = vpack.c.bf16 %v3306_v36, %v3306_v36  ;;  %v2975_v48 = vadd.f32 %v2899_v43, %v2669_v39  ;;  %v8904_v7 = vor.u32 %v4192_v60, %v4191_v34  ;;  %v3181_v18 = vpop.permute.xlu1 %3180 }
 0x364   : > { %v8910_v25 = vsel %vm772_vm4, %v8829_v5, %v8902_v4  ;;  %v8912_v35 = vld [vmem:[#allocation2 + $0x50] sm:$0xff]   ;;  %v8939_v34 = vrot.slane %v2254_v15, 1 }
 0x365   : > { %10924 = vst [vmem:[#allocation8_spill] sm:$0xff] %v8912_v35  ;;  %6410 = vmatmul.msk.bf16.gmra.mxu3 %vm591_vm3, %v2468_v0  ;;  %v3020_v42 = vadd.f32 %v8919_v26, %v2975_v48  ;;  %v8925_v33 = vsel %vm1142_vm5, %v8832_v38, %v8904_v7  ;;  %v10655_v5 = vshll.u32 %v8912_v35, 16  ;;  %v10654_v39 = vshrl.u32 %v8912_v35, 16  ;;  %v8929_v36 = vpop.f32.mrf.mxu1  ;;  %v10926_v0 = vld [vmem:[#allocation41_spill] sm:$0xff] }
 0x366   : > { %3389 = vst.msk [vmem:[#allocation2 + $0x58] sm:$0xf] %vm3370_vm9, %v3347_v2  ;;  %v8931_v2 = vor.u32 %v2770_v1, %v2769_v29  ;;  %v2406_v17 = vadd.f32 %v2332_v13, %v10926_v0 }
 0x367   : > { %10925 = vst [vmem:[#allocation40_spill] sm:$0xff] %v8929_v36  ;;  %v3061_v37 = vmax.f32 %v3020_v42, 0.0  ;;  %v5731_v51 = vrot.slane %v10654_v39, 1  ;;  %v5732_v48 = vrot.slane %v10655_v5, 2  ;;  %v2257_v39 = vsel %vm1870_vm6, %v2252_v31, %v8939_v34 }
 0x368   : > { %v2596_v38 = vpop.f32.mrf.mxu3  ;;  %v2772_v13 = vsel %vm2693_vm7, %v8847_v19, %v8931_v2 }
 0x369   : > { %v3307_v60 = vmul.f32 %v3181_v18, %v3061_v37  ;;  %v2670_v20 = vadd.f32 %v2596_v38, %v2406_v17  ;;  %v8944_v1 = vor.u32 %v5732_v48, %v5731_v51  ;;  %v10929_v17 = vld [vmem:[#allocation42_spill] sm:$0xff]  ;;  %v2258_v38 = vshrl.u32 %v8894_v59, 16 }
 0x36a   : > { %v2334_v43 = vpop.f32.mrf.mxu2  ;;  %v2902_v29 = vpop.f32.mrf.mxu0  ;;  %v2217_v37 = vadd.f32 %v10929_v17, %v10928_v22 }
 0x36b   : > { %v3348_v42 = vpack.c.bf16 %v3307_v60, %v3307_v60  ;;  %v2976_v0 = vadd.f32 %v2902_v29, %v2670_v20  ;;  %v8953_v40 = vsel %vm2693_vm7, %v8864_v16, %v8944_v1  ;;  %v3186_v29 = vpop.permute.xlu2 %3185  ;;  %v2773_v61 = vrot.slane %v2258_v38, 1 }
 0x36c   : > { %10927 = vst [vmem:[#allocation10_spill] sm:$0xff] %v8953_v40  ;;  %v2407_v60 = vadd.f32 %v2334_v43, %v2217_v37  ;;  %v10932_v37 = vrot.slane %v8894_v59, 1 }
 0x36d   : > { %v8948_v5 = vld [vmem:[#allocation2 + $0x54] sm:$0xff]   ;;  %3390 = vst.msk [vmem:[#allocation2 + $0x5c] sm:$0xf] %vm3370_vm9, %v3348_v42  ;;  %v3021_v19 = vadd.f32 %v8919_v26, %v2976_v0  ;;  %6432 = vmatmul.msk.bf16.gmra.mxu0 %vm591_vm3, %v2772_v13  ;;  %v8961_v48 = vpop.f32.mrf.mxu1  ;;  %v10931_v13 = vrot.slane %v8869_v45, 3  ;;  %v2774_v45 = vrot.slane %v2254_v15, 2 }
 0x36e   : > { %10930 = vst [vmem:[#allocation38_spill] sm:$0xff] %v8961_v48  ;;  %v10664_v18 = vrot.slane %v8948_v5, 3  ;;  %v3877_v16 = vshrl.u32 %v8948_v5, 16  ;;  %v3880_v31 = vshll.u32 %v8948_v5, 16 }
 0x36f   : > { %v3062_v20 = vmax.f32 %v3021_v19, 0.0  ;;  %6389 = vmatmul.msk.bf16.gmra.mxu2 %vm591_vm3, %v2257_v39  ;;  %v10933_v39 = vrot.slane %v8822_v50, 1 }
 0x370   : > { %v2598_v42 = vpop.f32.mrf.mxu3  ;;  %v3587_v0 = vsel %vm549_vm2, %v10931_v13, %v10664_v18  ;;  %v3879_v22 = vrot.slane %v3877_v16, 2  ;;  %v3882_v17 = vrot.slane %v3880_v31, 3  ;;  %v4195_v51 = vrot.slane %v3877_v16, 3 }
 0x371   : > { %v3308_v40 = vmul.f32 %v3186_v29, %v3062_v20  ;;  %v2671_v35 = vadd.f32 %v2598_v42, %v2407_v60  ;;  %6449 = vmatmul.msk.bf16.gmra.mxu1 %vm591_vm3, %v3587_v0  ;;  %v4196_v44 = vrot.slane %v3880_v31, 4  ;;  %v2470_v19 = vsel %vm2429_vm8, %v10933_v39, %v10932_v37  ;;  %v3191_v20 = vpop.permute.xlu0 %3190 }
 0x372   : > { %v2337_v43 = vpop.f32.mrf.mxu2  ;;  %v2904_v58 = vpop.f32.mrf.mxu0  ;;  %v3883_v48 = vor.u32 %v3882_v17, %v3879_v22 }
 0x373   : > { %v3349_v13 = vpack.c.bf16 %v3308_v40, %v3308_v40  ;;  %v2977_v18 = vadd.f32 %v2904_v58, %v2671_v35  ;;  %v4197_v36 = vor.u32 %v4196_v44, %v4195_v51  ;;  %v2408_v35 = vadd.f32 %v2337_v43, %v8150_v21 }
 0x374   : > { %v8981_v16 = vsel %vm772_vm4, %v8902_v4, %v3883_v48  ;;  %v8983_v60 = vld [vmem:[#allocation2 + $0x58] sm:$0xff]   ;;  %v8996_v4 = vor.u32 %v2774_v45, %v2773_v61  ;;  %v2260_v43 = vor.u32 %v2258_v38, %v8939_v34  ;;  %v2219_v45 = vadd.f32 %v8169_v63, %v8165_v24 }
 0x375   : > { %10934 = vst [vmem:[#allocation39_spill] sm:$0xff] %v8983_v60  ;;  %6411 = vmatmul.msk.bf16.gmra.mxu3 %vm591_vm3, %v2470_v19  ;;  %v3022_v50 = vadd.f32 %v8919_v26, %v2977_v18  ;;  %v8990_v31 = vsel %vm1142_vm5, %v8904_v7, %v4197_v36  ;;  %v10670_v15 = vshll.u32 %v8983_v60, 16  ;;  %v10666_v58 = vshrl.u32 %v8983_v60, 16  ;;  %v8994_v44 = vpop.f32.mrf.mxu1 }
 0x376   : > { %3391 = vst.msk [vmem:[#allocation2 + $0x60] sm:$0xf] %vm3370_vm9, %v3349_v13  ;;  %v2776_v61 = vsel %vm2693_vm7, %v8931_v2, %v8996_v4  ;;  %v10936_v63 = vrot.slane %v8948_v5, 3 }
 0x377   : > { %v3063_v40 = vmax.f32 %v3022_v50, 0.0  ;;  %v5735_v51 = vrot.slane %v10666_v58, 1  ;;  %v5736_v18 = vrot.slane %v10670_v15, 2 }
 0x378   : > { %v2601_v7 = vpop.f32.mrf.mxu3 }
 0x379   : > { %v3309_v29 = vmul.f32 %v3191_v20, %v3063_v40  ;;  %v2672_v42 = vadd.f32 %v2601_v7, %v2408_v35  ;;  %v5737_v17 = vor.u32 %v5736_v18, %v5735_v51  ;;  %v3196_v40 = vpop.permute.xlu1 %3195 }
 0x37a   : > { %v2339_v0 = vpop.f32.mrf.mxu2  ;;  %v2907_v22 = vpop.f32.mrf.mxu0 }
 0x37b   : > { %v3350_v37 = vpack.c.bf16 %v3309_v29, %v3309_v29  ;;  %v2978_v21 = vadd.f32 %v2907_v22, %v2672_v42  ;;  %v9011_v19 = vsel %vm2693_vm7, %v8944_v1, %v5737_v17  ;;  %v2409_v35 = vadd.f32 %v2339_v0, %v2219_v45 }
 0x37c   : > { %10935 = vst [vmem:[#allocation9_spill] sm:$0xff] %v9011_v19 }
 0x37d   : > { %v9007_v39 = vld [vmem:[#allocation2 + $0x5c] sm:$0xff]   ;;  %3392 = vst.msk [vmem:[#allocation2 + $0x64] sm:$0xf] %vm3370_vm9, %v3350_v37  ;;  %v3023_v13 = vadd.f32 %v8919_v26, %v2978_v21  ;;  %6433 = vmatmul.msk.bf16.gmra.mxu0 %vm591_vm3, %v2776_v61 }
 0x37e   : > { %v9018_v2 = vpop.f32.mrf.mxu1  ;;  %v3588_v50 = vrot.slane %v9007_v39, 3  ;;  %v3886_v34 = vshrl.u32 %v9007_v39, 16  ;;  %v3889_v38 = vshll.u32 %v9007_v39, 16 }
 0x37f   : > { %v3064_v1 = vmax.f32 %v3023_v13, 0.0  ;;  %6390 = vmatmul.msk.bf16.gmra.mxu2 %vm591_vm3, %v2260_v43  ;;  %v10938_v13 = vrot.slane %v8894_v59, 1 }
 0x380   : > { %v2603_v24 = vpop.f32.mrf.mxu3  ;;  %v3589_v51 = vsel %vm549_vm2, %v10936_v63, %v3588_v50  ;;  %v3888_v18 = vrot.slane %v3886_v34, 2  ;;  %v3891_v20 = vrot.slane %v3889_v38, 3  ;;  %v4199_v7 = vrot.slane %v3886_v34, 3 }
 0x381   : > { %v3310_v29 = vmul.f32 %v3196_v40, %v3064_v1  ;;  %v2673_v42 = vadd.f32 %v2603_v24, %v2409_v35  ;;  %6450 = vmatmul.msk.bf16.gmra.mxu1 %vm591_vm3, %v3589_v51  ;;  %v4200_v22 = vrot.slane %v3889_v38, 4  ;;  %v3201_v51 = vpop.permute.xlu2 %3200 }
 0x382   : > { %v2342_v61 = vpop.f32.mrf.mxu2  ;;  %v2909_v37 = vpop.f32.mrf.mxu0  ;;  %v3892_v0 = vor.u32 %v3891_v20, %v3888_v18 }
 0x383   : > { %v3351_v21 = vpack.c.bf16 %v3310_v29, %v3310_v29  ;;  %v2979_v39 = vadd.f32 %v2909_v37, %v2673_v42  ;;  %v4201_v43 = vor.u32 %v4200_v22, %v4199_v7 }
 0x384   : > { %v9029_v45 = vsel %vm772_vm4, %v3883_v48, %v3892_v0  ;;  %v9031_v5 = vld [vmem:[#allocation2 + $0x60] sm:$0xff]   ;;  %v2410_v48 = vadd.f32 %v2342_v61, %v8188_v54  ;;  %v10940_v61 = vld [vmem:[#allocation12_spill] sm:$0xff] }
 0x385   : > { %10937 = vst [vmem:[#allocation41_spill] sm:$0xff] %v9031_v5  ;;  %6412 = vmatmul.msk.bf16.gmra.mxu3 %vm591_vm3, %v10938_v13  ;;  %v3024_v34 = vadd.f32 %v8919_v26, %v2979_v39  ;;  %v9039_v38 = vsel %vm1142_vm5, %v4197_v36, %v4201_v43  ;;  %v10667_v35 = vshll.u32 %v9031_v5, 16  ;;  %v10665_v1 = vshrl.u32 %v9031_v5, 16  ;;  %v10941_v39 = vld [vmem:[#allocation16_spill] sm:$0xff] }
 0x386   : > { %3393 = vst.msk [vmem:[#allocation2 + $0x68] sm:$0xf] %vm3370_vm9, %v3351_v21  ;;  %v9043_v40 = vpop.f32.mrf.mxu1  ;;  %v2221_v13 = vadd.f32 %v10941_v39, %v10940_v61 }
 0x387   : > { %v3065_v24 = vmax.f32 %v3024_v34, 0.0  ;;  %v5739_v63 = vrot.slane %v10665_v1, 1  ;;  %v5740_v59 = vrot.slane %v10667_v35, 2 }
 0x388   : > { %v2606_v18 = vpop.f32.mrf.mxu3 }
 0x389   : > { %v3311_v20 = vmul.f32 %v3201_v51, %v3065_v24  ;;  %v2674_v36 = vadd.f32 %v2606_v18, %v2410_v48  ;;  %v5741_v42 = vor.u32 %v5740_v59, %v5739_v63  ;;  %v3206_v18 = vpop.permute.xlu0 %3205 }
 0x38a   : > { %v2344_v7 = vpop.f32.mrf.mxu2  ;;  %v2912_v29 = vpop.f32.mrf.mxu0 }
 0x38b   : > { %v3352_v22 = vpack.c.bf16 %v3311_v20, %v3311_v20  ;;  %v2980_v37 = vadd.f32 %v2912_v29, %v2674_v36  ;;  %v9053_v54 = vsel %vm2693_vm7, %v5737_v17, %v5741_v42  ;;  %v2411_v17 = vadd.f32 %v2344_v7, %v2221_v13 }
 0x38c   : > { %10939 = vst [vmem:[#allocation11_spill] sm:$0xff] %v9053_v54 }
 0x38d   : > { %v9050_v21 = vld [vmem:[#allocation2 + $0x64] sm:$0xff]   ;;  %3394 = vst.msk [vmem:[#allocation2 + $0x6c] sm:$0xf] %vm3370_vm9, %v3352_v22  ;;  %v3025_v34 = vadd.f32 %v8919_v26, %v2980_v37  ;;  %6434 = vmatmul.msk.bf16.gmra.mxu0 %vm591_vm3, %v8996_v4 }
 0x38e   : > { %v9061_v48 = vpop.f32.mrf.mxu1  ;;  %v3590_v24 = vrot.slane %v9050_v21, 3  ;;  %v3895_v63 = vshrl.u32 %v9050_v21, 16  ;;  %v3898_v59 = vshll.u32 %v9050_v21, 16 }
 0x38f   : > { %v3066_v51 = vmax.f32 %v3025_v34, 0.0  ;;  %6461 = vmatmul.msk.bf16.vlgmr.msrb.gmra.mxu2 %vm591_vm3, %v8448_v27 }
 0x390   : > { %v2608_v20 = vpop.f32.mrf.mxu3  ;;  %v3591_v36 = vsel %vm549_vm2, %v3588_v50, %v3590_v24  ;;  %v3897_v29 = vrot.slane %v3895_v63, 2  ;;  %v3900_v22 = vrot.slane %v3898_v59, 3  ;;  %v4203_v4 = vrot.slane %v3895_v63, 3 }
 0x391   : > { %v3312_v37 = vmul.f32 %v3206_v18, %v3066_v51  ;;  %v2675_v61 = vadd.f32 %v2608_v20, %v2411_v17  ;;  %6451 = vmatmul.msk.bf16.gmra.mxu1 %vm591_vm3, %v3591_v36  ;;  %v4204_v39 = vrot.slane %v3898_v59, 4  ;;  %v3211_v36 = vpop.permute.xlu1 %3210 }
 0x392   : > { %v2347_v1 = vpop.f32.mrf.mxu2  ;;  %v2914_v58 = vpop.f32.mrf.mxu0  ;;  %v3901_v21 = vor.u32 %v3900_v22, %v3897_v29 }
 0x393   : > { %v3353_v7 = vpack.c.bf16 %v3312_v37, %v3312_v37  ;;  %v2981_v13 = vadd.f32 %v2914_v58, %v2675_v61  ;;  %v4205_v34 = vor.u32 %v4204_v39, %v4203_v4 }
 0x394   : > { %v9071_v27 = vsel %vm772_vm4, %v3892_v0, %v3901_v21  ;;  %v9073_v35 = vld [vmem:[#allocation2 + $0x68] sm:$0xff]   ;;  %v10943_v0 = vld [vmem:[#allocation13_spill] sm:$0xff] }
 0x395   : > { %10942 = vst [vmem:[#allocation42_spill] sm:$0xff] %v9073_v35  ;;  %6483 = vmatmul.msk.bf16.vlgmr.msrb.gmra.mxu3 %vm591_vm3, %v8454_v14  ;;  %v3026_v50 = vadd.f32 %v8919_v26, %v2981_v13  ;;  %v9080_v63 = vsel %vm1142_vm5, %v4201_v43, %v4205_v34  ;;  %v10669_v59 = vshll.u32 %v9073_v35, 16  ;;  %v10668_v58 = vshrl.u32 %v9073_v35, 16 }
 0x396   : > { %3395 = vst.msk [vmem:[#allocation2 + $0x70] sm:$0xf] %vm3370_vm9, %v3353_v7  ;;  %v9084_v17 = vpop.f32.mrf.mxu1  ;;  %v2412_v51 = vadd.f32 %v2347_v1, %v10943_v0  ;;  %v10946_v0 = vld [vmem:[#allocation3_spill] sm:$0xff] }
 0x397   : > { %v3067_v18 = vmax.f32 %v3026_v50, 0.0  ;;  %v5743_v20 = vrot.slane %v10668_v58, 1  ;;  %v5744_v14 = vrot.slane %v10669_v59, 2  ;;  %v10945_v50 = vld [vmem:[#allocation14_spill] sm:$0xff] }
 0x398   : > { %v2611_v29 = vpop.f32.mrf.mxu3  ;;  %v2223_v58 = vadd.f32 %v10946_v0, %v10945_v50 }
 0x399   : > { %v3313_v22 = vmul.f32 %v3211_v36, %v3067_v18  ;;  %v2676_v43 = vadd.f32 %v2611_v29, %v2412_v51  ;;  %v5745_v61 = vor.u32 %v5744_v14, %v5743_v20  ;;  %v3216_v29 = vpop.permute.xlu2 %3215 }
 0x39a   : > { %v2349_v4 = vpop.f32.mrf.mxu2  ;;  %v2917_v37 = vpop.f32.mrf.mxu0 }
 0x39b   : > { %v3354_v39 = vpack.c.bf16 %v3313_v22, %v3313_v22  ;;  %v2982_v7 = vadd.f32 %v2917_v37, %v2676_v43  ;;  %v9094_v1 = vsel %vm2693_vm7, %v5741_v42, %v5745_v61  ;;  %v2413_v42 = vadd.f32 %v2349_v4, %v2223_v58 }
 0x39c   : > { %10944 = vst [vmem:[#allocation12_spill] sm:$0xff] %v9094_v1 }
 0x39d   : > { %v9091_v13 = vld [vmem:[#allocation2 + $0x6c] sm:$0xff]   ;;  %3396 = vst.msk [vmem:[#allocation2 + $0x74] sm:$0xf] %vm3370_vm9, %v3354_v39  ;;  %v3027_v59 = vadd.f32 %v8919_v26, %v2982_v7  ;;  %6505 = vmatmul.msk.bf16.vlgmr.msrb.gmra.mxu0 %vm591_vm3, %v8494_v28 }
 0x39e   : > { %v9102_v51 = vpop.f32.mrf.mxu1  ;;  %v3592_v18 = vrot.slane %v9091_v13, 3  ;;  %v3904_v20 = vshrl.u32 %v9091_v13, 16  ;;  %v3907_v14 = vshll.u32 %v9091_v13, 16 }
 0x39f   : > { %v3068_v36 = vmax.f32 %v3027_v59, 0.0  ;;  %6462 = vmatmul.msk.bf16.gmra.mxu2 %vm591_vm3, %v8486_v8 }
 0x3a0   : > { %v2613_v22 = vpop.f32.mrf.mxu3  ;;  %v3593_v43 = vsel %vm549_vm2, %v3590_v24, %v3592_v18  ;;  %v3906_v37 = vrot.slane %v3904_v20, 2  ;;  %v3909_v39 = vrot.slane %v3907_v14, 3  ;;  %v4207_v7 = vrot.slane %v3904_v20, 3 }
 0x3a1   : > { %v3314_v50 = vmul.f32 %v3216_v29, %v3068_v36  ;;  %v2677_v0 = vadd.f32 %v2613_v22, %v2413_v42  ;;  %6452 = vmatmul.msk.bf16.gmra.mxu1 %vm591_vm3, %v3593_v43  ;;  %v4208_v15 = vrot.slane %v3907_v14, 4  ;;  %v3221_v22 = vpop.permute.xlu0 %3220 }
 0x3a2   : > { %v2352_v1 = vpop.f32.mrf.mxu2  ;;  %v2919_v54 = vpop.f32.mrf.mxu0  ;;  %v3910_v13 = vor.u32 %v3909_v39, %v3906_v37 }
 0x3a3   : > { %v3355_v58 = vpack.c.bf16 %v3314_v50, %v3314_v50  ;;  %v2983_v59 = vadd.f32 %v2919_v54, %v2677_v0  ;;  %v4209_v4 = vor.u32 %v4208_v15, %v4207_v7 }
 0x3a4   : > { %v9112_v8 = vsel %vm772_vm4, %v3901_v21, %v3910_v13  ;;  %v9114_v19 = vld [vmem:[#allocation2 + $0x70] sm:$0xff]   ;;  %v10948_v21 = vld [vmem:[#allocation19_spill] sm:$0xff] }
 0x3a5   : > { %10947 = vst [vmem:[#allocation16_spill] sm:$0xff] %v9114_v19  ;;  %6484 = vmatmul.msk.bf16.gmra.mxu3 %vm591_vm3, %v8494_v28  ;;  %v3028_v24 = vadd.f32 %v8919_v26, %v2983_v59  ;;  %v9121_v20 = vsel %vm1142_vm5, %v4205_v34, %v4209_v4  ;;  %v10672_v14 = vshll.u32 %v9114_v19, 16  ;;  %v10671_v54 = vshrl.u32 %v9114_v19, 16 }
 0x3a6   : > { %3397 = vst.msk [vmem:[#allocation2 + $0x78] sm:$0xf] %vm3370_vm9, %v3355_v58  ;;  %v9125_v15 = vpop.f32.mrf.mxu1  ;;  %v2414_v42 = vadd.f32 %v2352_v1, %v10948_v21  ;;  %v10951_v21 = vld [vmem:[#allocation17_spill] sm:$0xff] }
 0x3a7   : > { %v3069_v36 = vmax.f32 %v3028_v24, 0.0  ;;  %v5747_v29 = vrot.slane %v10671_v54, 1  ;;  %v5748_v28 = vrot.slane %v10672_v14, 2  ;;  %v10950_v24 = vld [vmem:[#allocation15_spill] sm:$0xff] }
 0x3a8   : > { %v2616_v43 = vpop.f32.mrf.mxu3  ;;  %v2225_v54 = vadd.f32 %v10951_v21, %v10950_v24 }
 0x3a9   : > { %v3315_v37 = vmul.f32 %v3221_v22, %v3069_v36  ;;  %v2678_v34 = vadd.f32 %v2616_v43, %v2414_v42  ;;  %v5749_v50 = vor.u32 %v5748_v28, %v5747_v29  ;;  %v3226_v43 = vpop.permute.xlu1 %3225 }
 0x3aa   : > { %v2354_v39 = vpop.f32.mrf.mxu2  ;;  %v2922_v7 = vpop.f32.mrf.mxu0 }
 0x3ab   : > { %v3356_v0 = vpack.c.bf16 %v3315_v37, %v3315_v37  ;;  %v2984_v58 = vadd.f32 %v2922_v7, %v2678_v34  ;;  %v9135_v1 = vsel %vm2693_vm7, %v5745_v61, %v5749_v50  ;;  %v2415_v61 = vadd.f32 %v2354_v39, %v2225_v54 }
 0x3ac   : > { %10949 = vst [vmem:[#allocation13_spill] sm:$0xff] %v9135_v1 }
 0x3ad   : > { %v9132_v59 = vld [vmem:[#allocation2 + $0x74] sm:$0xff]   ;;  %3398 = vst.msk [vmem:[#allocation2 + $0x7c] sm:$0xf] %vm3370_vm9, %v3356_v0  ;;  %v3029_v14 = vadd.f32 %v8919_v26, %v2984_v58  ;;  %6506 = vmatmul.msk.bf16.gmra.mxu0 %vm591_vm3, %v8548_v10 }
 0x3ae   : > { %v9143_v42 = vpop.f32.mrf.mxu1  ;;  %v3594_v36 = vrot.slane %v9132_v59, 3  ;;  %v3913_v29 = vshrl.u32 %v9132_v59, 16  ;;  %v3916_v28 = vshll.u32 %v9132_v59, 16 }
 0x3af   : > { %v3070_v22 = vmax.f32 %v3029_v14, 0.0  ;;  %6463 = vmatmul.msk.bf16.gmra.mxu2 %vm591_vm3, %v8540_v55 }
 0x3b0   : > { %v2618_v37 = vpop.f32.mrf.mxu3  ;;  %v3595_v34 = vsel %vm549_vm2, %v3592_v18, %v3594_v36  ;;  %v3915_v7 = vrot.slane %v3913_v29, 2  ;;  %v3918_v0 = vrot.slane %v3916_v28, 3  ;;  %v4211_v58 = vrot.slane %v3913_v29, 3 }
 0x3b1   : > { %v3316_v24 = vmul.f32 %v3226_v43, %v3070_v22  ;;  %v2679_v21 = vadd.f32 %v2618_v37, %v2415_v61  ;;  %6453 = vmatmul.msk.bf16.gmra.mxu1 %vm591_vm3, %v3595_v34  ;;  %v4212_v1 = vrot.slane %v3916_v28, 4  ;;  %v3231_v37 = vpop.permute.xlu2 %3230 }
 0x3b2   : > { %v2357_v19 = vpop.f32.mrf.mxu2  ;;  %v2924_v35 = vpop.f32.mrf.mxu0  ;;  %v3919_v59 = vor.u32 %v3918_v0, %v3915_v7 }
 0x3b3   : > { %v3357_v54 = vpack.c.bf16 %v3316_v24, %v3316_v24  ;;  %v2985_v14 = vadd.f32 %v2924_v35, %v2679_v21  ;;  %v4213_v39 = vor.u32 %v4212_v1, %v4211_v58 }
 0x3b4   : > { %v9153_v55 = vsel %vm772_vm4, %v3910_v13, %v3919_v59  ;;  %v9155_v5 = vld [vmem:[#allocation2 + $0x78] sm:$0xff]   ;;  %v10953_v13 = vld [vmem:[#allocation4_spill] sm:$0xff] }
 0x3b5   : > { %10952 = vst [vmem:[#allocation14_spill] sm:$0xff] %v9155_v5  ;;  %6485 = vmatmul.msk.bf16.gmra.mxu3 %vm591_vm3, %v8548_v10  ;;  %v3030_v18 = vadd.f32 %v8919_v26, %v2985_v14  ;;  %v9162_v29 = vsel %vm1142_vm5, %v4209_v4, %v4213_v39  ;;  %v10680_v28 = vshll.u32 %v9155_v5, 16  ;;  %v10679_v35 = vshrl.u32 %v9155_v5, 16 }
 0x3b6   : > { %3399 = vst.msk [vmem:[#allocation2 + $0x80] sm:$0xf] %vm3370_vm9, %v3357_v54  ;;  %v9166_v1 = vpop.f32.mrf.mxu1  ;;  %v2416_v61 = vadd.f32 %v2357_v19, %v10953_v13  ;;  %v10956_v13 = vld [vmem:[#allocation18_spill] sm:$0xff] }
 0x3b7   : > { %v3071_v22 = vmax.f32 %v3030_v18, 0.0  ;;  %v5751_v43 = vrot.slane %v10679_v35, 1  ;;  %v5752_v10 = vrot.slane %v10680_v28, 2  ;;  %v10955_v18 = vld [vmem:[#allocation22_spill] sm:$0xff] }
 0x3b8   : > { %v2621_v34 = vpop.f32.mrf.mxu3  ;;  %v2227_v35 = vadd.f32 %v10956_v13, %v10955_v18 }
 0x3b9   : > { %v3317_v7 = vmul.f32 %v3231_v37, %v3071_v22  ;;  %v2680_v4 = vadd.f32 %v2621_v34, %v2416_v61  ;;  %v5753_v24 = vor.u32 %v5752_v10, %v5751_v43  ;;  %v3236_v34 = vpop.permute.xlu0 %3235 }
 0x3ba   : > { %v2359_v0 = vpop.f32.mrf.mxu2  ;;  %v2927_v58 = vpop.f32.mrf.mxu0 }
 0x3bb   : > { %v3358_v21 = vpack.c.bf16 %v3317_v7, %v3317_v7  ;;  %v2986_v54 = vadd.f32 %v2927_v58, %v2680_v4  ;;  %v9176_v19 = vsel %vm2693_vm7, %v5749_v50, %v5753_v24  ;;  %v2417_v50 = vadd.f32 %v2359_v0, %v2227_v35 }
 0x3bc   : > { %10954 = vst [vmem:[#allocation3_spill] sm:$0xff] %v9176_v19 }
 0x3bd   : > { %v9173_v14 = vld [vmem:[#allocation2 + $0x7c] sm:$0xff]   ;;  %3400 = vst.msk [vmem:[#allocation2 + $0x84] sm:$0xf] %vm3370_vm9, %v3358_v21  ;;  %v3031_v28 = vadd.f32 %v8919_v26, %v2986_v54  ;;  %6507 = vmatmul.msk.bf16.gmra.mxu0 %vm591_vm3, %v8601_v6 }
 0x3be   : > { %v9184_v61 = vpop.f32.mrf.mxu1  ;;  %v3596_v22 = vrot.slane %v9173_v14, 3  ;;  %v3922_v43 = vshrl.u32 %v9173_v14, 16  ;;  %v3925_v10 = vshll.u32 %v9173_v14, 16 }
 0x3bf   : > { %10957 = vst [vmem:[#allocation19_spill] sm:$0xff] %v9184_v61  ;;  %v3072_v37 = vmax.f32 %v3031_v28, 0.0  ;;  %6464 = vmatmul.msk.bf16.gmra.mxu2 %vm591_vm3, %v8593_v46 }
 0x3c0   : > { %v2623_v7 = vpop.f32.mrf.mxu3  ;;  %v3597_v4 = vsel %vm549_vm2, %v3594_v36, %v3596_v22  ;;  %v3924_v58 = vrot.slane %v3922_v43, 2  ;;  %v3927_v21 = vrot.slane %v3925_v10, 3  ;;  %v4215_v54 = vrot.slane %v3922_v43, 3 }
 0x3c1   : > { %v3318_v18 = vmul.f32 %v3236_v34, %v3072_v37  ;;  %v2681_v13 = vadd.f32 %v2623_v7, %v2417_v50  ;;  %6454 = vmatmul.msk.bf16.gmra.mxu1 %vm591_vm3, %v3597_v4  ;;  %v4216_v19 = vrot.slane %v3925_v10, 4  ;;  %v3241_v7 = vpop.permute.xlu1 %3240 }
 0x3c2   : > { %v2362_v5 = vpop.f32.mrf.mxu2  ;;  %v2929_v60 = vpop.f32.mrf.mxu0  ;;  %v3928_v14 = vor.u32 %v3927_v21, %v3924_v58 }
 0x3c3   : > { %v3359_v35 = vpack.c.bf16 %v3318_v18, %v3318_v18  ;;  %v2987_v28 = vadd.f32 %v2929_v60, %v2681_v13  ;;  %v4217_v0 = vor.u32 %v4216_v19, %v4215_v54 }
 0x3c4   : > { %v9194_v46 = vsel %vm772_vm4, %v3919_v59, %v3928_v14  ;;  %v9196_v61 = vld [vmem:[#allocation2 + $0x80] sm:$0xff]   ;;  %v10960_v59 = vld [vmem:[#allocation20_spill] sm:$0xff] }
 0x3c5   : > { %10958 = vst [vmem:[#allocation15_spill] sm:$0xff] %v9196_v61  ;;  %6486 = vmatmul.msk.bf16.gmra.mxu3 %vm591_vm3, %v8601_v6  ;;  %v3032_v36 = vadd.f32 %v8919_v26, %v2987_v28  ;;  %v9203_v43 = vsel %vm1142_vm5, %v4213_v39, %v4217_v0  ;;  %v10686_v10 = vshll.u32 %v9196_v61, 16  ;;  %v10685_v60 = vshrl.u32 %v9196_v61, 16 }
 0x3c6   : > { %3401 = vst.msk [vmem:[#allocation2 + $0x88] sm:$0xf] %vm3370_vm9, %v3359_v35  ;;  %v9207_v19 = vpop.f32.mrf.mxu1  ;;  %v2418_v50 = vadd.f32 %v2362_v5, %v10960_v59  ;;  %v10963_v59 = vld [vmem:[#allocation25_spill] sm:$0xff] }
 0x3c7   : > { %10959 = vst [vmem:[#allocation17_spill] sm:$0xff] %v9207_v19  ;;  %v3073_v37 = vmax.f32 %v3032_v36, 0.0  ;;  %v5755_v34 = vrot.slane %v10685_v60, 1  ;;  %v5756_v6 = vrot.slane %v10686_v10, 2  ;;  %v10962_v36 = vld [vmem:[#allocation5_spill] sm:$0xff] }
 0x3c8   : > { %v2626_v4 = vpop.f32.mrf.mxu3  ;;  %v2229_v60 = vadd.f32 %v10963_v59, %v10962_v36 }
 0x3c9   : > { %v3319_v58 = vmul.f32 %v3241_v7, %v3073_v37  ;;  %v2682_v39 = vadd.f32 %v2626_v4, %v2418_v50  ;;  %v5757_v18 = vor.u32 %v5756_v6, %v5755_v34  ;;  %v3246_v4 = vpop.permute.xlu2 %3245 }
 0x3ca   : > { %v2364_v21 = vpop.f32.mrf.mxu2  ;;  %v2932_v54 = vpop.f32.mrf.mxu0 }
 0x3cb   : > { %v3360_v13 = vpack.c.bf16 %v3319_v58, %v3319_v58  ;;  %v2988_v35 = vadd.f32 %v2932_v54, %v2682_v39  ;;  %v9217_v5 = vsel %vm2693_vm7, %v5753_v24, %v5757_v18  ;;  %v2419_v24 = vadd.f32 %v2364_v21, %v2229_v60 }
 0x3cc   : > { %10961 = vst [vmem:[#allocation4_spill] sm:$0xff] %v9217_v5 }
 0x3cd   : > { %v9214_v28 = vld [vmem:[#allocation2 + $0x84] sm:$0xff]   ;;  %3402 = vst.msk [vmem:[#allocation2 + $0x8c] sm:$0xf] %vm3370_vm9, %v3360_v13  ;;  %v3033_v10 = vadd.f32 %v8919_v26, %v2988_v35  ;;  %6508 = vmatmul.msk.bf16.gmra.mxu0 %vm591_vm3, %v8654_v52 }
 0x3ce   : > { %v9225_v50 = vpop.f32.mrf.mxu1  ;;  %v3598_v37 = vrot.slane %v9214_v28, 3  ;;  %v3931_v34 = vshrl.u32 %v9214_v28, 16  ;;  %v3934_v6 = vshll.u32 %v9214_v28, 16 }
 0x3cf   : > { %10964 = vst [vmem:[#allocation22_spill] sm:$0xff] %v9225_v50  ;;  %v3074_v7 = vmax.f32 %v3033_v10, 0.0  ;;  %6465 = vmatmul.msk.bf16.gmra.mxu2 %vm591_vm3, %v8646_v57 }
 0x3d0   : > { %v2628_v58 = vpop.f32.mrf.mxu3  ;;  %v3599_v39 = vsel %vm549_vm2, %v3596_v22, %v3598_v37  ;;  %v3933_v54 = vrot.slane %v3931_v34, 2  ;;  %v3936_v13 = vrot.slane %v3934_v6, 3  ;;  %v4219_v35 = vrot.slane %v3931_v34, 3 }
 0x3d1   : > { %v3320_v36 = vmul.f32 %v3246_v4, %v3074_v7  ;;  %v2683_v59 = vadd.f32 %v2628_v58, %v2419_v24  ;;  %6455 = vmatmul.msk.bf16.gmra.mxu1 %vm591_vm3, %v3599_v39  ;;  %v4220_v5 = vrot.slane %v3934_v6, 4  ;;  %v3251_v58 = vpop.permute.xlu0 %3250 }
 0x3d2   : > { %v2367_v61 = vpop.f32.mrf.mxu2  ;;  %v2934_v50 = vpop.f32.mrf.mxu0  ;;  %v3937_v28 = vor.u32 %v3936_v13, %v3933_v54 }
 0x3d3   : > { %v3361_v60 = vpack.c.bf16 %v3320_v36, %v3320_v36  ;;  %v2989_v10 = vadd.f32 %v2934_v50, %v2683_v59  ;;  %v4221_v21 = vor.u32 %v4220_v5, %v4219_v35 }
 0x3d4   : > { %v9235_v57 = vsel %vm772_vm4, %v3928_v14, %v3937_v28  ;;  %v9237_v19 = vld [vmem:[#allocation2 + $0x88] sm:$0xff]   ;;  %v10966_v14 = vld [vmem:[#allocation21_spill] sm:$0xff] }
 0x3d5   : > { %10965 = vst [vmem:[#allocation18_spill] sm:$0xff] %v9237_v19  ;;  %6487 = vmatmul.msk.bf16.gmra.mxu3 %vm591_vm3, %v8654_v52  ;;  %v3034_v22 = vadd.f32 %v8919_v26, %v2989_v10  ;;  %v9244_v34 = vsel %vm1142_vm5, %v4217_v0, %v4221_v21  ;;  %v10690_v6 = vshll.u32 %v9237_v19, 16  ;;  %v10689_v50 = vshrl.u32 %v9237_v19, 16 }
 0x3d6   : > { %3403 = vst.msk [vmem:[#allocation2 + $0x90] sm:$0xf] %vm3370_vm9, %v3361_v60  ;;  %v9248_v5 = vpop.f32.mrf.mxu1  ;;  %v2420_v24 = vadd.f32 %v2367_v61, %v10966_v14 }
 0x3d7   : > { %v3075_v7 = vmax.f32 %v3034_v22, 0.0  ;;  %v5759_v4 = vrot.slane %v10689_v50, 1  ;;  %v5760_v52 = vrot.slane %v10690_v6, 2  ;;  %v10968_v22 = vld [vmem:[#allocation23_spill] sm:$0xff] }
 0x3d8   : > { %v2631_v39 = vpop.f32.mrf.mxu3  ;;  %v2231_v14 = vadd.f32 %v10968_v22, %v8324_v3  ;;  %v3256_v3 = vpop.permute.xlu1 %3255 }
 0x3d9   : > { %v3321_v54 = vmul.f32 %v3251_v58, %v3075_v7  ;;  %v2684_v0 = vadd.f32 %v2631_v39, %v2420_v24  ;;  %v5761_v36 = vor.u32 %v5760_v52, %v5759_v4 }
 0x3da   : > { %v2369_v13 = vpop.f32.mrf.mxu2  ;;  %v2937_v35 = vpop.f32.mrf.mxu0 }
 0x3db   : > { %v3362_v59 = vpack.c.bf16 %v3321_v54, %v3321_v54  ;;  %v2990_v60 = vadd.f32 %v2937_v35, %v2684_v0  ;;  %v9258_v61 = vsel %vm2693_vm7, %v5757_v18, %v5761_v36  ;;  %v2421_v18 = vadd.f32 %v2369_v13, %v2231_v14 }
 0x3dc   : > { %10967 = vst [vmem:[#allocation20_spill] sm:$0xff] %v9258_v61 }
 0x3dd   : > { %v9255_v10 = vld [vmem:[#allocation2 + $0x8c] sm:$0xff]   ;;  %3404 = vst.msk [vmem:[#allocation2 + $0x94] sm:$0xf] %vm3370_vm9, %v3362_v59  ;;  %v3035_v50 = vadd.f32 %v8919_v26, %v2990_v60  ;;  %6509 = vmatmul.msk.bf16.gmra.mxu0 %vm591_vm3, %v8713_v32 }
 0x3de   : > { %v9266_v24 = vpop.f32.mrf.mxu1  ;;  %v3600_v7 = vrot.slane %v9255_v10, 3  ;;  %v3940_v4 = vshrl.u32 %v9255_v10, 16  ;;  %v3943_v52 = vshll.u32 %v9255_v10, 16 }
 0x3df   : > { %10969 = vst [vmem:[#allocation5_spill] sm:$0xff] %v9266_v24  ;;  %v3076_v58 = vmax.f32 %v3035_v50, 0.0  ;;  %6466 = vmatmul.msk.bf16.gmra.mxu2 %vm591_vm3, %v8704_v12 }
 0x3e0   : > { %v2633_v39 = vpop.f32.mrf.mxu3  ;;  %v3601_v54 = vsel %vm549_vm2, %v3598_v37, %v3600_v7  ;;  %v3942_v0 = vrot.slane %v3940_v4, 2  ;;  %v3945_v35 = vrot.slane %v3943_v52, 3  ;;  %v4223_v59 = vrot.slane %v3940_v4, 3 }
 0x3e1   : > { %v3322_v60 = vmul.f32 %v3256_v3, %v3076_v58  ;;  %v2685_v22 = vadd.f32 %v2633_v39, %v2421_v18  ;;  %6456 = vmatmul.msk.bf16.gmra.mxu1 %vm591_vm3, %v3601_v54  ;;  %v4224_v6 = vrot.slane %v3943_v52, 4  ;;  %v3261_v39 = vpop.permute.xlu2 %3260 }
 0x3e2   : > { %v2372_v61 = vpop.f32.mrf.mxu2  ;;  %v2939_v19 = vpop.f32.mrf.mxu0  ;;  %v3946_v10 = vor.u32 %v3945_v35, %v3942_v0 }
 0x3e3   : > { %v3363_v13 = vpack.c.bf16 %v3322_v60, %v3322_v60  ;;  %v2991_v50 = vadd.f32 %v2939_v19, %v2685_v22  ;;  %v4225_v14 = vor.u32 %v4224_v6, %v4223_v59 }
 0x3e4   : > { %v9276_v12 = vsel %vm772_vm4, %v3937_v28, %v3946_v10  ;;  %v9278_v24 = vld [vmem:[#allocation2 + $0x90] sm:$0xff]   ;;  %v10971_v28 = vld [vmem:[#allocation6_spill] sm:$0xff] }
 0x3e5   : > { %10970 = vst [vmem:[#allocation25_spill] sm:$0xff] %v9278_v24  ;;  %6488 = vmatmul.msk.bf16.gmra.mxu3 %vm591_vm3, %v8713_v32  ;;  %v3036_v37 = vadd.f32 %v8919_v26, %v2991_v50  ;;  %v9285_v4 = vsel %vm1142_vm5, %v4221_v21, %v4225_v14  ;;  %v10694_v52 = vshll.u32 %v9278_v24, 16  ;;  %v10693_v19 = vshrl.u32 %v9278_v24, 16 }
 0x3e6   : > { %3405 = vst.msk [vmem:[#allocation2 + $0x98] sm:$0xf] %vm3370_vm9, %v3363_v13  ;;  %v9289_v6 = vpop.f32.mrf.mxu1  ;;  %v2422_v18 = vadd.f32 %v2372_v61, %v10971_v28 }
 0x3e7   : > { %v3077_v58 = vmax.f32 %v3036_v37, 0.0  ;;  %v5763_v3 = vrot.slane %v10693_v19, 1  ;;  %v5764_v32 = vrot.slane %v10694_v52, 2  ;;  %v2233_v37 = vadd.f32 %v8346_v41, %v8343_v47  ;;  %v3266_v47 = vpop.permute.xlu0 %3265 }
 0x3e8   : > { %v2636_v54 = vpop.f32.mrf.mxu3 }
 0x3e9   : > { %v3323_v0 = vmul.f32 %v3261_v39, %v3077_v58  ;;  %v2686_v21 = vadd.f32 %v2636_v54, %v2422_v18  ;;  %v5765_v60 = vor.u32 %v5764_v32, %v5763_v3 }
 0x3ea   : > { %v2374_v35 = vpop.f32.mrf.mxu2  ;;  %v2942_v59 = vpop.f32.mrf.mxu0 }
 0x3eb   : > { %v3364_v22 = vpack.c.bf16 %v3323_v0, %v3323_v0  ;;  %v2992_v13 = vadd.f32 %v2942_v59, %v2686_v21  ;;  %v9299_v61 = vsel %vm2693_vm7, %v5761_v36, %v5765_v60  ;;  %v2423_v36 = vadd.f32 %v2374_v35, %v2233_v37 }
 0x3ec   : > { %10972 = vst [vmem:[#allocation21_spill] sm:$0xff] %v9299_v61 }
 0x3ed   : > { %v9296_v50 = vld [vmem:[#allocation2 + $0x94] sm:$0xff]   ;;  %3406 = vst.msk [vmem:[#allocation2 + $0x9c] sm:$0xf] %vm3370_vm9, %v3364_v22  ;;  %v3037_v28 = vadd.f32 %v8919_v26, %v2992_v13  ;;  %6510 = vmatmul.msk.bf16.gmra.mxu0 %vm591_vm3, %v8782_v23 }
 0x3ee   : > { %v9307_v18 = vpop.f32.mrf.mxu1  ;;  %v3602_v58 = vrot.slane %v9296_v50, 3  ;;  %v3949_v3 = vshrl.u32 %v9296_v50, 16  ;;  %v3952_v32 = vshll.u32 %v9296_v50, 16 }
 0x3ef   : > { %v3078_v39 = vmax.f32 %v3037_v28, 0.0  ;;  %6467 = vmatmul.msk.bf16.gmra.mxu2 %vm591_vm3, %v8773_v53 }
 0x3f0   : > { %v2638_v41 = vpop.f32.mrf.mxu3  ;;  %v3603_v54 = vsel %vm549_vm2, %v3600_v7, %v3602_v58  ;;  %v3951_v0 = vrot.slane %v3949_v3, 2  ;;  %v3954_v21 = vrot.slane %v3952_v32, 3  ;;  %v4227_v59 = vrot.slane %v3949_v3, 3 }
 0x3f1   : > { %v3324_v22 = vmul.f32 %v3266_v47, %v3078_v39  ;;  %v2687_v13 = vadd.f32 %v2638_v41, %v2423_v36  ;;  %6457 = vmatmul.msk.bf16.gmra.mxu1 %vm591_vm3, %v3603_v54  ;;  %v4228_v19 = vrot.slane %v3952_v32, 4  ;;  %v3271_v47 = vpop.permute.xlu1 %3270 }
 0x3f2   : > { %v2377_v52 = vpop.f32.mrf.mxu2  ;;  %v2944_v61 = vpop.f32.mrf.mxu0  ;;  %v3955_v50 = vor.u32 %v3954_v21, %v3951_v0 }
 0x3f3   : > { %v3365_v35 = vpack.c.bf16 %v3324_v22, %v3324_v22  ;;  %v2993_v37 = vadd.f32 %v2944_v61, %v2687_v13  ;;  %v4229_v53 = vor.u32 %v4228_v19, %v4227_v59 }
 0x3f4   : > { %v9317_v28 = vsel %vm772_vm4, %v3946_v10, %v3955_v50  ;;  %v9319_v24 = vld [vmem:[#allocation2 + $0x98] sm:$0xff]   ;;  %v2424_v10 = vadd.f32 %v2377_v52, %v8354_v11  ;;  %v2235_v52 = vadd.f32 %v8365_v56, %v8362_v62  ;;  %v3276_v62 = vpop.permute.xlu2 %3275 }
 0x3f5   : > { %10973 = vst [vmem:[#allocation23_spill] sm:$0xff] %v9319_v24  ;;  %6489 = vmatmul.msk.bf16.gmra.mxu3 %vm591_vm3, %v8782_v23  ;;  %v3038_v7 = vadd.f32 %v8919_v26, %v2993_v37  ;;  %v10698_v3 = vshll.u32 %v9319_v24, 16  ;;  %v10697_v32 = vshrl.u32 %v9319_v24, 16  ;;  %v9330_v61 = vsel %vm1142_vm5, %v4225_v14, %v4229_v53 }
 0x3f6   : > { %3407 = vst.msk [vmem:[#allocation2 + $0xa0] sm:$0xf] %vm3370_vm9, %v3365_v35  ;;  %v9327_v36 = vpop.f32.mrf.mxu1 }
 0x3f7   : > { %v3079_v19 = vmax.f32 %v3038_v7, 0.0  ;;  %v5767_v39 = vrot.slane %v10697_v32, 1  ;;  %v5768_v23 = vrot.slane %v10698_v3, 2 }
 0x3f8   : > { %v2641_v41 = vpop.f32.mrf.mxu3 }
 0x3f9   : > { %v3325_v54 = vmul.f32 %v3271_v47, %v3079_v19  ;;  %v2688_v0 = vadd.f32 %v2641_v41, %v2424_v10  ;;  %v9337_v22 = vor.u32 %v5768_v23, %v5767_v39 }
 0x3fa   : > { %v2379_v21 = vpop.f32.mrf.mxu2  ;;  %v2947_v59 = vpop.f32.mrf.mxu0 }
 0x3fb   : > { %v3366_v13 = vpack.c.bf16 %v3325_v54, %v3325_v54  ;;  %v2994_v14 = vadd.f32 %v2947_v59, %v2688_v0  ;;  %v9343_v11 = vsel %vm2693_vm7, %v5765_v60, %v9337_v22  ;;  %v2425_v60 = vadd.f32 %v2379_v21, %v2235_v52 }
 0x3fc   : > { %10974 = vst [vmem:[#allocation6_spill] sm:$0xff] %v9343_v11 }
 0x3fd   : > { %v9339_v35 = vld [vmem:[#allocation2 + $0x9c] sm:$0xff]   ;;  %3408 = vst.msk [vmem:[#allocation2 + $0xa4] sm:$0xf] %vm3370_vm9, %v3366_v13  ;;  %v3039_v37 = vadd.f32 %v8919_v26, %v2994_v14  ;;  %6511 = vmatmul.msk.bf16.gmra.mxu0 %vm591_vm3, %v8852_v9 }
 0x3fe   : > { %v9351_v7 = vpop.f32.mrf.mxu1  ;;  %v3604_v10 = vrot.slane %v9339_v35, 3  ;;  %v3958_v19 = vshrl.u32 %v9339_v35, 16  ;;  %v3961_v39 = vshll.u32 %v9339_v35, 16 }
 0x3ff   : > { %v3080_v23 = vmax.f32 %v3039_v37, 0.0  ;;  %6468 = vmatmul.msk.bf16.gmra.mxu2 %vm591_vm3, %v8843_v30 }
 0x400   : > { %v2643_v56 = vpop.f32.mrf.mxu3  ;;  %v3605_v26 = vsel %vm549_vm2, %v3602_v58, %v3604_v10  ;;  %v3960_v47 = vrot.slane %v3958_v19, 2  ;;  %v3963_v41 = vrot.slane %v3961_v39, 3  ;;  %v4231_v54 = vrot.slane %v3958_v19, 3  ;;  %v6902_v19 = vld [vmem:[%s10522_s3] ss:$0 sm:$0xff] }
 0x401   : > { %v3326_v0 = vmul.f32 %v3276_v62, %v3080_v23  ;;  %v2689_v59 = vadd.f32 %v2643_v56, %v2425_v60  ;;  %6458 = vmatmul.msk.bf16.gmra.mxu1 %vm591_vm3, %v3605_v26  ;;  %v4232_v13 = vrot.slane %v3961_v39, 4  ;;  %v10976_v56 = vld [vmem:[#allocation28_spill] sm:$0xff] }
 0x402   : > { %v2382_v14 = vpop.f32.mrf.mxu2  ;;  %v2949_v21 = vpop.f32.mrf.mxu0  ;;  %v9362_v52 = vor.u32 %v3963_v41, %v3960_v47 }
 0x403   : > { %v3367_v37 = vpack.c.bf16 %v3326_v0, %v3326_v0  ;;  %v2995_v30 = vadd.f32 %v2949_v21, %v2689_v59  ;;  %v9364_v32 = vor.u32 %v4232_v13, %v4231_v54  ;;  %v2426_v26 = vadd.f32 %v2382_v14, %v10976_v56  ;;  %v3281_v54 = vpop.permute.xlu0 %3280  ;;  %v6548_v13 = vld [vmem:[%s10523_s4 + $0xa] sm:$0x3] }
 0x404   : > { %v9368_v3 = vsel %vm772_vm4, %v3955_v50, %v9362_v52  ;;  %v9370_v58 = vld [vmem:[#allocation2 + $0xa0] sm:$0xff]  }
 0x405   : > { %10975 = vst [vmem:[#allocation43_spill] sm:$0xff] %v9370_v58  ;;  %6490 = vmatmul.msk.bf16.gmra.mxu3 %vm591_vm3, %v8852_v9  ;;  %v3040_v39 = vadd.f32 %v6902_v19, %v2995_v30  ;;  %v9380_v60 = vsel %vm1142_vm5, %v4229_v53, %v9364_v32  ;;  %v10700_v23 = vshll.u32 %v9370_v58, 16  ;;  %v10699_v50 = vshrl.u32 %v9370_v58, 16 }
 0x406   : > { %3409 = vst.msk [vmem:[#allocation2 + $0xa8] sm:$0xf] %vm3370_vm9, %v3367_v37  ;;  %v9384_v62 = vpop.f32.mrf.mxu1  ;;  %v5093_v30 = vsel %vm655_vm1, %v6548_v13, 0  ;;  %v3286_v13 = vpop.permute.xlu1 %3285 }
 0x407   : > { %v3081_v47 = vmax.f32 %v3040_v39, 0.0  ;;  %v5771_v9 = vrot.slane %v10699_v50, 1  ;;  %v5772_v41 = vrot.slane %v10700_v23, 2  ;;  %5102 = vmatpush.bf16.msra.mxu2 %v5093_v30  ;;  %v6570_v50 = vld [vmem:[%s10523_s4 + $0xc] sm:$0x3] }
 0x408   : > { %v2646_v0 = vpop.f32.mrf.mxu3 }
 0x409   : > { %v3327_v59 = vmul.f32 %v3281_v54, %v3081_v47  ;;  %v2690_v53 = vadd.f32 %v2646_v0, %v2426_v26  ;;  %v9395_v14 = vor.u32 %v5772_v41, %v5771_v9  ;;  %v5283_v26 = vsel %vm655_vm1, %v6570_v50, 0  ;;  %v3458_v47 = vld [vmem:[#allocation2 + $0xb8] sm:$0xf] }
 0x40a   : > { %v2384_v21 = vpop.f32.mrf.mxu2  ;;  %v2952_v37 = vpop.f32.mrf.mxu0  ;;  %5292 = vmatpush.bf16.msra.mxu3 %v5283_v26 }
 0x40b   : > { %v3368_v39 = vpack.c.bf16 %v3327_v59, %v3327_v59  ;;  %v2996_v56 = vadd.f32 %v2952_v37, %v2690_v53  ;;  %v9406_v54 = vsel %vm2693_vm7, %v9337_v22, %v9395_v14  ;;  %v5254_v22 = vunpack.c.l.b16 %v3458_v47  ;;  %v6592_v47 = vld [vmem:[%s10523_s4 + $0xe] sm:$0x3] }
 0x40c   : > { %10977 = vst [vmem:[#allocation28_spill] sm:$0xff] %v9406_v54 }
 0x40d   : > { %v9400_v23 = vld [vmem:[#allocation2 + $0xa4] sm:$0xff]   ;;  %3410 = vst.msk [vmem:[#allocation2 + $0xac] sm:$0xf] %vm3370_vm9, %v3368_v39  ;;  %v3041_v9 = vadd.f32 %v6902_v19, %v2996_v56  ;;  %6512 = vmatmul.msk.bf16.gmra.mxu0 %vm591_vm3, %v8925_v33 }
 0x40e   : > { %v9411_v41 = vpop.f32.mrf.mxu1  ;;  %v3606_v0 = vrot.slane %v9400_v23, 3  ;;  %v3967_v59 = vshrl.u32 %v9400_v23, 16  ;;  %v3970_v50 = vshll.u32 %v9400_v23, 16 }
 0x40f   : > { %v3082_v53 = vmax.f32 %v3041_v9, 0.0  ;;  %6469 = vmatmul.msk.bf16.gmra.mxu2 %vm591_vm3, %v8910_v25 }
 0x410   : > { %v2648_v21 = vpop.f32.mrf.mxu3  ;;  %v3607_v19 = vsel %vm549_vm2, %v3604_v10, %v3606_v0  ;;  %v3969_v37 = vrot.slane %v3967_v59, 2  ;;  %v3972_v30 = vrot.slane %v3970_v50, 3  ;;  %v4235_v39 = vrot.slane %v3967_v59, 3 }
 0x411   : > { %v3328_v56 = vmul.f32 %v3286_v13, %v3082_v53  ;;  %6459 = vmatmul.msk.bf16.gmra.mxu1 %vm591_vm3, %v3607_v19  ;;  %v4236_v26 = vrot.slane %v3970_v50, 4  ;;  %v5546_v10 = vsel %vm655_vm1, %v6592_v47, 0  ;;  %v9437_v53 = vpack.c.b16 %v5254_v22, %v5254_v22  ;;  %v6614_v13 = vld [vmem:[%s10523_s4 + $0x10] sm:$0x3] }
 0x412   : > { %v4050_v23 = vpop.f32.mrf.mxu2  ;;  %v2954_v9 = vpop.f32.mrf.mxu0  ;;  %v9422_v54 = vor.u32 %v3972_v30, %v3969_v37  ;;  %5555 = vmatpush.bf16.msra.mxu0 %v5546_v10  ;;  %v5851_v22 = vsel %vm655_vm1, %v6614_v13, 0 }
 0x413   : > { %v3369_v25 = vpack.c.bf16 %v3328_v56, %v3328_v56  ;;  %v9427_v35 = vor.u32 %v4236_v26, %v4235_v39  ;;  %10978 = vst [vmem:[#allocation44_spill] sm:$0xff] %v9437_v53  ;;  %5860 = vmatpush.bf16.msra.mxu1 %v5851_v22  ;;  %v10702_v56 = vshll.u32 %v9437_v53, 16 }
 0x414   : > { %v9433_v59 = vsel %vm772_vm4, %v9362_v52, %v9422_v54  ;;  %v9435_v50 = vld [vmem:[#allocation2 + $0xa8] sm:$0xff]  }
 0x415   : > { %3412 = vst.msk [vmem:[#allocation2 + $0xb0] sm:$0x3] %vm3411_vm10, %v3369_v25  ;;  %6491 = vmatmul.msk.bf16.gmra.mxu3 %vm591_vm3, %v8925_v33  ;;  %v9447_v21 = vsel %vm1142_vm5, %v9364_v32, %v9427_v35  ;;  %v10704_v52 = vshll.u32 %v9435_v50, 16  ;;  %v10703_v37 = vshrl.u32 %v9435_v50, 16  ;;  %v4051_v33 = vadd.f32 %v4050_v23, %v8882_v49 }
 0x416   : > { %v9450_v19 = vpop.f32.mrf.mxu1  ;;  %v10701_v32 = vshrl.u32 %v9437_v53, 16  ;;  %v5784_v22 = vrot.slane %v10702_v56, 2 }
 0x417   : > { %v5776_v30 = vrot.slane %v10704_v52, 2  ;;  %v5775_v26 = vrot.slane %v10703_v37, 1 }
 0x418   : > { %v4314_v39 = vpop.f32.mrf.mxu3  ;;  %v5783_v23 = vrot.slane %v10701_v32, 1 }
 0x419   : > { %v4418_v9 = vadd.f32 %v4314_v39, %v4051_v33  ;;  %v5777_v10 = vor.u32 %v5776_v30, %v5775_v26  ;;  %v10981_v26 = vld [vmem:[#allocation40_spill] sm:$0xff] }
 0x41a   : > { %v4052_v25 = vpop.f32.mrf.mxu2  ;;  %v4493_v47 = vpop.f32.mrf.mxu0  ;;  %v9486_v56 = vor.u32 %v5784_v22, %v5783_v23  ;;  %v10985_v22 = vld [vmem:[#allocation38_spill] sm:$0xff] }
 0x41b   : > { %v9461_v13 = vadd.f32 %v4493_v47, %v4418_v9  ;;  %v9467_v49 = vsel %vm2693_vm7, %v9395_v14, %v5777_v10  ;;  %v4053_v9 = vadd.f32 %v4052_v25, %v10981_v26 }
 0x41c   : > { %v9463_v11 = vld [vmem:[#allocation2 + $0xb0] sm:$0xff]   ;;  %10980 = vst [vmem:[#allocation46_spill] sm:$0xff] %v9467_v49 }
 0x41d   : > { %10979 = vst [vmem:[#allocation45_spill] sm:$0xff] %v9463_v11  ;;  %6513 = vmatmul.msk.bf16.gmra.mxu0 %vm591_vm3, %v8990_v31  ;;  %v10710_v33 = vshll.u32 %v9463_v11, 16  ;;  %v10709_v30 = vshrl.u32 %v9463_v11, 16 }
 0x41e   : > { %v9477_v39 = vpop.f32.mrf.mxu1  ;;  %10982 = vst [vmem:[#allocation40_spill] sm:$0xff] %v9486_v56 }
 0x41f   : > { %6470 = vmatmul.msk.bf16.gmra.mxu2 %vm591_vm3, %v8981_v16  ;;  %v5779_v47 = vrot.slane %v10709_v30, 1  ;;  %v5780_v32 = vrot.slane %v10710_v33, 2  ;;  %v9552_v33 = vld [vmem:[#allocation2 + $0x20] sm:$0xff]  }
 0x420   : > { %v4316_v14 = vpop.f32.mrf.mxu3 }
 0x421   : > { %v4419_v37 = vadd.f32 %v4316_v14, %v4053_v9  ;;  %6460 = vmatmul.msk.bf16.gmra.mxu1 %vm591_vm3, %v3606_v0  ;;  %v5781_v53 = vor.u32 %v5780_v32, %v5779_v47 }
 0x422   : > { %v4055_v52 = vpop.f32.mrf.mxu2  ;;  %v4495_v49 = vpop.f32.mrf.mxu0 }
 0x423   : > { %v9489_v58 = vadd.f32 %v4495_v49, %v4419_v37  ;;  %v9492_v25 = vsel %vm2693_vm7, %v5777_v10, %v5781_v53  ;;  %v9496_v16 = vsel %vm2693_vm7, %v5781_v53, %v9486_v56  ;;  %v4056_v26 = vadd.f32 %v4055_v52, %v10985_v22  ;;  %v9512_v49 = vld [vmem:[#allocation2 + $0x10] sm:$0xff]   ;;  %v9572_v56 = vld [vmem:[#allocation2 + $0x28] sm:$0xff]  }
 0x424   : > { %10983 = vst [vmem:[#allocation47_spill] sm:$0xff] %v9492_v25 }
 0x425   : > { %10984 = vst [vmem:[#allocation48_spill] sm:$0xff] %v9496_v16  ;;  %6492 = vmatmul.msk.bf16.gmra.mxu3 %vm591_vm3, %v8990_v31  ;;  %v9592_v16 = vld [vmem:[#allocation2 + $0x30] sm:$0xff]  }
 0x426   : > { %v9500_v23 = vpop.f32.mrf.mxu1 }
 0x428   : > { %v4319_v0 = vpop.f32.mrf.mxu3 }
 0x429   : > { %v4420_v9 = vadd.f32 %v4319_v0, %v4056_v26 }
 0x42a   : > { %v4057_v14 = vpop.f32.mrf.mxu2  ;;  %v4498_v32 = vpop.f32.mrf.mxu0 }
 0x42b   : > { %v9503_v37 = vadd.f32 %v4498_v32, %v4420_v9  ;;  %v4058_v53 = vadd.f32 %v4057_v14, %v8994_v44 }
 0x42d   : > { %6514 = vmatmul.msk.bf16.gmra.mxu0 %vm591_vm3, %v9039_v38 }
 0x42e   : > { %v9507_v10 = vpop.f32.mrf.mxu1 }
 0x42f   : > { %6471 = vmatmul.msk.bf16.gmra.mxu2 %vm591_vm3, %v9029_v45 }
 0x430   : > { %v4321_v31 = vpop.f32.mrf.mxu3 }
 0x431   : > { %v4421_v52 = vadd.f32 %v4321_v31, %v4058_v53  ;;  %6527 = vmatmul.msk.bf16.vlgmr.msrb.gmra.mxu1 %vm591_vm3, %v9512_v49 }
 0x432   : > { %v4060_v47 = vpop.f32.mrf.mxu2  ;;  %v4500_v22 = vpop.f32.mrf.mxu0 }
 0x433   : > { %v9516_v26 = vadd.f32 %v4500_v22, %v4421_v52  ;;  %v4061_v44 = vadd.f32 %v4060_v47, %v9018_v2  ;;  %v9532_v22 = vld [vmem:[#allocation2 + $0x18] sm:$0xff]  }
 0x435   : > { %6493 = vmatmul.msk.bf16.gmra.mxu3 %vm591_vm3, %v9039_v38 }
 0x436   : > { %v9520_v0 = vpop.f32.mrf.mxu1 }
 0x438   : > { %v4324_v9 = vpop.f32.mrf.mxu3 }
 0x439   : > { %v4422_v45 = vadd.f32 %v4324_v9, %v4061_v44 }
 0x43a   : > { %v4062_v14 = vpop.f32.mrf.mxu2  ;;  %v4503_v32 = vpop.f32.mrf.mxu0 }
 0x43b   : > { %v9523_v30 = vadd.f32 %v4503_v32, %v4422_v45  ;;  %v4063_v31 = vadd.f32 %v4062_v14, %v9043_v40 }
 0x43d   : > { %6515 = vmatmul.msk.bf16.gmra.mxu0 %vm591_vm3, %v9080_v63 }
 0x43e   : > { %v9527_v53 = vpop.f32.mrf.mxu1 }
 0x43f   : > { %6472 = vmatmul.msk.bf16.gmra.mxu2 %vm591_vm3, %v9071_v27 }
 0x440   : > { %v4326_v38 = vpop.f32.mrf.mxu3 }
 0x441   : > { %v4423_v52 = vadd.f32 %v4326_v38, %v4063_v31  ;;  %6528 = vmatmul.msk.bf16.gmra.mxu1 %vm591_vm3, %v9532_v22 }
 0x442   : > { %v4065_v2 = vpop.f32.mrf.mxu2  ;;  %v4505_v47 = vpop.f32.mrf.mxu0 }
 0x443   : > { %v9536_v44 = vadd.f32 %v4505_v47, %v4423_v52  ;;  %v4066_v40 = vadd.f32 %v4065_v2, %v9061_v48 }
 0x445   : > { %6494 = vmatmul.msk.bf16.gmra.mxu3 %vm591_vm3, %v9080_v63 }
 0x446   : > { %v9540_v9 = vpop.f32.mrf.mxu1 }
 0x448   : > { %v4329_v45 = vpop.f32.mrf.mxu3 }
 0x449   : > { %v4424_v27 = vadd.f32 %v4329_v45, %v4066_v40 }
 0x44a   : > { %v4067_v14 = vpop.f32.mrf.mxu2  ;;  %v4508_v32 = vpop.f32.mrf.mxu0 }
 0x44b   : > { %v9543_v31 = vadd.f32 %v4508_v32, %v4424_v27  ;;  %v4068_v52 = vadd.f32 %v4067_v14, %v9084_v17 }
 0x44d   : > { %6516 = vmatmul.msk.bf16.gmra.mxu0 %vm591_vm3, %v9121_v20 }
 0x44e   : > { %v9547_v38 = vpop.f32.mrf.mxu1 }
 0x44f   : > { %6473 = vmatmul.msk.bf16.gmra.mxu2 %vm591_vm3, %v9112_v8 }
 0x450   : > { %v4331_v63 = vpop.f32.mrf.mxu3 }
 0x451   : > { %v4425_v47 = vadd.f32 %v4331_v63, %v4068_v52  ;;  %6529 = vmatmul.msk.bf16.gmra.mxu1 %vm591_vm3, %v9552_v33 }
 0x452   : > { %v4070_v48 = vpop.f32.mrf.mxu2  ;;  %v4510_v2 = vpop.f32.mrf.mxu0 }
 0x453   : > { %v9556_v40 = vadd.f32 %v4510_v2, %v4425_v47  ;;  %v4071_v17 = vadd.f32 %v4070_v48, %v9102_v51 }
 0x455   : > { %6495 = vmatmul.msk.bf16.gmra.mxu3 %vm591_vm3, %v9121_v20 }
 0x456   : > { %v9560_v45 = vpop.f32.mrf.mxu1 }
 0x458   : > { %v4334_v27 = vpop.f32.mrf.mxu3 }
 0x459   : > { %v4426_v8 = vadd.f32 %v4334_v27, %v4071_v17 }
 0x45a   : > { %v4072_v14 = vpop.f32.mrf.mxu2  ;;  %v4513_v32 = vpop.f32.mrf.mxu0 }
 0x45b   : > { %v9563_v52 = vadd.f32 %v4513_v32, %v4426_v8  ;;  %v4073_v47 = vadd.f32 %v4072_v14, %v9125_v15 }
 0x45d   : > { %6517 = vmatmul.msk.bf16.gmra.mxu0 %vm591_vm3, %v9162_v29 }
 0x45e   : > { %v9567_v63 = vpop.f32.mrf.mxu1 }
 0x45f   : > { %6474 = vmatmul.msk.bf16.gmra.mxu2 %vm591_vm3, %v9153_v55 }
 0x460   : > { %v4336_v20 = vpop.f32.mrf.mxu3 }
 0x461   : > { %v4427_v2 = vadd.f32 %v4336_v20, %v4073_v47  ;;  %6530 = vmatmul.msk.bf16.gmra.mxu1 %vm591_vm3, %v9572_v56 }
 0x462   : > { %v4075_v51 = vpop.f32.mrf.mxu2  ;;  %v4515_v48 = vpop.f32.mrf.mxu0 }
 0x463   : > { %v9576_v17 = vadd.f32 %v4515_v48, %v4427_v2  ;;  %v4076_v15 = vadd.f32 %v4075_v51, %v9143_v42 }
 0x465   : > { %6496 = vmatmul.msk.bf16.gmra.mxu3 %vm591_vm3, %v9162_v29 }
 0x466   : > { %v9580_v27 = vpop.f32.mrf.mxu1 }
 0x468   : > { %v4339_v8 = vpop.f32.mrf.mxu3 }
 0x469   : > { %v4428_v55 = vadd.f32 %v4339_v8, %v4076_v15 }
 0x46a   : > { %v4077_v14 = vpop.f32.mrf.mxu2  ;;  %v4518_v32 = vpop.f32.mrf.mxu0 }
 0x46b   : > { %v9583_v47 = vadd.f32 %v4518_v32, %v4428_v55  ;;  %v4078_v2 = vadd.f32 %v4077_v14, %v9166_v1  ;;  %v10987_v1 = vld [vmem:[#allocation19_spill] sm:$0xff] }
 0x46d   : > { %6518 = vmatmul.msk.bf16.gmra.mxu0 %vm591_vm3, %v9203_v43 }
 0x46e   : > { %v9587_v20 = vpop.f32.mrf.mxu1 }
 0x46f   : > { %6475 = vmatmul.msk.bf16.gmra.mxu2 %vm591_vm3, %v9194_v46 }
 0x470   : > { %v4341_v29 = vpop.f32.mrf.mxu3 }
 0x471   : > { %v4429_v48 = vadd.f32 %v4341_v29, %v4078_v2  ;;  %6531 = vmatmul.msk.bf16.gmra.mxu1 %vm591_vm3, %v9592_v16 }
 0x472   : > { %v4080_v42 = vpop.f32.mrf.mxu2  ;;  %v4520_v51 = vpop.f32.mrf.mxu0 }
 0x473   : > { %v9596_v15 = vadd.f32 %v4520_v51, %v4429_v48  ;;  %v4081_v55 = vadd.f32 %v4080_v42, %v10987_v1  ;;  %v10989_v48 = vld [vmem:[#allocation17_spill] sm:$0xff] }
 0x475   : > { %6497 = vmatmul.msk.bf16.gmra.mxu3 %vm591_vm3, %v9203_v43 }
 0x476   : > { %v9600_v8 = vpop.f32.mrf.mxu1 }
 0x477   : > { %10986 = vst [vmem:[#allocation38_spill] sm:$0xff] %v9600_v8  ;;  %v9612_v8 = vld [vmem:[#allocation2 + $0x38] sm:$0xff]  }
 0x478   : > { %v4344_v14 = vpop.f32.mrf.mxu3 }
 0x479   : > { %v4430_v46 = vadd.f32 %v4344_v14, %v4081_v55 }
 0x47a   : > { %v4082_v32 = vpop.f32.mrf.mxu2  ;;  %v4523_v2 = vpop.f32.mrf.mxu0 }
 0x47b   : > { %v9603_v29 = vadd.f32 %v4523_v2, %v4430_v46  ;;  %v4083_v51 = vadd.f32 %v4082_v32, %v10989_v48  ;;  %v10991_v46 = vld [vmem:[#allocation22_spill] sm:$0xff] }
 0x47d   : > { %6519 = vmatmul.msk.bf16.gmra.mxu0 %vm591_vm3, %v9244_v34 }
 0x47e   : > { %v9607_v25 = vpop.f32.mrf.mxu1 }
 0x47f   : > { %10988 = vst [vmem:[#allocation19_spill] sm:$0xff] %v9607_v25  ;;  %6476 = vmatmul.msk.bf16.gmra.mxu2 %vm591_vm3, %v9235_v57 }
 0x480   : > { %v4346_v43 = vpop.f32.mrf.mxu3 }
 0x481   : > { %v4431_v24 = vadd.f32 %v4346_v43, %v4083_v51  ;;  %6532 = vmatmul.msk.bf16.gmra.mxu1 %vm591_vm3, %v9612_v8 }
 0x482   : > { %v4085_v42 = vpop.f32.mrf.mxu2  ;;  %v4525_v1 = vpop.f32.mrf.mxu0 }
 0x483   : > { %v9616_v55 = vadd.f32 %v4525_v1, %v4431_v24  ;;  %v4086_v32 = vadd.f32 %v4085_v42, %v10991_v46 }
 0x485   : > { %6498 = vmatmul.msk.bf16.gmra.mxu3 %vm591_vm3, %v9244_v34 }
 0x486   : > { %v9620_v14 = vpop.f32.mrf.mxu1 }
 0x487   : > { %10990 = vst [vmem:[#allocation17_spill] sm:$0xff] %v9620_v14  ;;  %v9632_v14 = vld [vmem:[#allocation2 + $0x40] sm:$0xff]  }
 0x488   : > { %v4349_v2 = vpop.f32.mrf.mxu3 }
 0x489   : > { %v4432_v57 = vadd.f32 %v4349_v2, %v4086_v32 }
 0x48a   : > { %v4087_v48 = vpop.f32.mrf.mxu2  ;;  %v4528_v51 = vpop.f32.mrf.mxu0 }
 0x48b   : > { %v9623_v43 = vadd.f32 %v4528_v51, %v4432_v57  ;;  %v4088_v24 = vadd.f32 %v4087_v48, %v9248_v5  ;;  %v10994_v5 = vld [vmem:[#allocation5_spill] sm:$0xff] }
 0x48d   : > { %6520 = vmatmul.msk.bf16.gmra.mxu0 %vm591_vm3, %v9285_v4 }
 0x48e   : > { %v9627_v25 = vpop.f32.mrf.mxu1 }
 0x48f   : > { %10992 = vst [vmem:[#allocation22_spill] sm:$0xff] %v9627_v25  ;;  %6477 = vmatmul.msk.bf16.gmra.mxu2 %vm591_vm3, %v9276_v12 }
 0x490   : > { %v4351_v34 = vpop.f32.mrf.mxu3 }
 0x491   : > { %v4433_v1 = vadd.f32 %v4351_v34, %v4088_v24  ;;  %6533 = vmatmul.msk.bf16.gmra.mxu1 %vm591_vm3, %v9632_v14 }
 0x492   : > { %v4090_v42 = vpop.f32.mrf.mxu2  ;;  %v4530_v46 = vpop.f32.mrf.mxu0 }
 0x493   : > { %v9636_v32 = vadd.f32 %v4530_v46, %v4433_v1  ;;  %v4091_v57 = vadd.f32 %v4090_v42, %v10994_v5 }
 0x495   : > { %6499 = vmatmul.msk.bf16.gmra.mxu3 %vm591_vm3, %v9285_v4 }
 0x496   : > { %v9640_v2 = vpop.f32.mrf.mxu1 }
 0x497   : > { %10993 = vst [vmem:[#allocation49_spill] sm:$0xff] %v9640_v2  ;;  %v9652_v2 = vld [vmem:[#allocation2 + $0x48] sm:$0xff]  }
 0x498   : > { %v4354_v48 = vpop.f32.mrf.mxu3 }
 0x499   : > { %v4434_v12 = vadd.f32 %v4354_v48, %v4091_v57 }
 0x49a   : > { %v4092_v51 = vpop.f32.mrf.mxu2  ;;  %v4533_v24 = vpop.f32.mrf.mxu0 }
 0x49b   : > { %v9643_v34 = vadd.f32 %v4533_v24, %v4434_v12  ;;  %v4093_v1 = vadd.f32 %v4092_v51, %v9289_v6 }
 0x49d   : > { %6521 = vmatmul.msk.bf16.gmra.mxu0 %vm591_vm3, %v9330_v61 }
 0x49e   : > { %v9647_v25 = vpop.f32.mrf.mxu1 }
 0x49f   : > { %10995 = vst [vmem:[#allocation5_spill] sm:$0xff] %v9647_v25  ;;  %6478 = vmatmul.msk.bf16.gmra.mxu2 %vm591_vm3, %v9317_v28 }
 0x4a0   : > { %v4356_v4 = vpop.f32.mrf.mxu3 }
 0x4a1   : > { %v4435_v46 = vadd.f32 %v4356_v4, %v4093_v1  ;;  %6534 = vmatmul.msk.bf16.gmra.mxu1 %vm591_vm3, %v9652_v2 }
 0x4a2   : > { %v4095_v42 = vpop.f32.mrf.mxu2  ;;  %v4535_v5 = vpop.f32.mrf.mxu0 }
 0x4a3   : > { %v9656_v57 = vadd.f32 %v4535_v5, %v4435_v46  ;;  %v4096_v6 = vadd.f32 %v4095_v42, %v9307_v18  ;;  %v9671_v42 = vld [vmem:[#allocation2 + $0x50] sm:$0xff]  }
 0x4a5   : > { %6500 = vmatmul.msk.bf16.gmra.mxu3 %vm591_vm3, %v9330_v61 }
 0x4a6   : > { %v3785_v48 = vpop.f32.mrf.mxu1 }
 0x4a8   : > { %v4359_v12 = vpop.f32.mrf.mxu3 }
 0x4a9   : > { %v4436_v51 = vadd.f32 %v4359_v12, %v4096_v6 }
 0x4aa   : > { %v4097_v28 = vpop.f32.mrf.mxu2  ;;  %v4538_v24 = vpop.f32.mrf.mxu0 }
 0x4ab   : > { %v9661_v1 = vadd.f32 %v4538_v24, %v4436_v51  ;;  %v4098_v25 = vadd.f32 %v4097_v28, %v9327_v36 }
 0x4ad   : > { %6522 = vmatmul.msk.bf16.gmra.mxu0 %vm591_vm3, %v9380_v60 }
 0x4ae   : > { %v4736_v4 = vpop.f32.mrf.mxu1 }
 0x4af   : > { %6479 = vmatmul.msk.bf16.gmra.mxu2 %vm591_vm3, %v9368_v3  ;;  %v9669_v61 = vadd.f32 %v4736_v4, %v9461_v13  ;;  %v6718_v4 = vunpack.c.h.b16 %v9435_v50 }
 0x4b0   : > { %v4361_v46 = vpop.f32.mrf.mxu3 }
 0x4b1   : > { %v4437_v18 = vadd.f32 %v4361_v46, %v4098_v25  ;;  %6535 = vmatmul.msk.bf16.gmra.mxu1 %vm591_vm3, %v9671_v42  ;;  %v9684_v25 = vunpack.c.l.b16 %v9463_v11 }
 0x4b2   : > { %v4100_v5 = vpop.f32.mrf.mxu2  ;;  %v4540_v48 = vpop.f32.mrf.mxu0 }
 0x4b3   : > { %v9675_v6 = vadd.f32 %v4540_v48, %v4437_v18  ;;  %v4101_v3 = vadd.f32 %v4100_v5, %v9351_v7  ;;  %10996 = vst [vmem:[#allocation50_spill] sm:$0xff] %v9684_v25  ;;  %v4465_v18 = vpack.c.b16 %v9684_v25, %v6718_v4 }
 0x4b5   : > { %6501 = vmatmul.msk.bf16.gmra.mxu3 %vm591_vm3, %v9380_v60  ;;  %v4467_v48 = vshrl.u32 %v4465_v18, 16 }
 0x4b6   : > { %v4738_v36 = vpop.f32.mrf.mxu1 }
 0x4b7   : > { %v9681_v13 = vadd.f32 %v4738_v36, %v9489_v58  ;;  %v4470_v36 = vshll.u32 %v4465_v18, 16 }
 0x4b8   : > { %v4364_v12 = vpop.f32.mrf.mxu3 }
 0x4b9   : > { %v4438_v51 = vadd.f32 %v4364_v12, %v4101_v3  ;;  %v9698_v12 = vld [vmem:[#allocation2 + $0x58] sm:$0xff]  }
 0x4ba   : > { %v4102_v28 = vpop.f32.mrf.mxu2  ;;  %v4543_v24 = vpop.f32.mrf.mxu0 }
 0x4bb   : > { %v9687_v46 = vadd.f32 %v4543_v24, %v4438_v51  ;;  %v4103_v58 = vadd.f32 %v4102_v28, %v9384_v62  ;;  %v4469_v62 = vrot.slane %v4467_v48, 3  ;;  %v4472_v28 = vrot.slane %v4470_v36, 4 }
 0x4bd   : > { %6523 = vmatmul.msk.bf16.gmra.mxu0 %vm591_vm3, %v9447_v21 }
 0x4be   : > { %v4741_v7 = vpop.f32.mrf.mxu1 }
 0x4bf   : > { %6480 = vmatmul.msk.bf16.gmra.mxu2 %vm591_vm3, %v9433_v59  ;;  %v9696_v60 = vadd.f32 %v4741_v7, %v9503_v37 }
 0x4c0   : > { %v4366_v5 = vpop.f32.mrf.mxu3 }
 0x4c1   : > { %10997 = vst [vmem:[#allocation51_spill] sm:$0xff] %v9696_v60  ;;  %v4439_v3 = vadd.f32 %v4366_v5, %v4103_v58  ;;  %6536 = vmatmul.msk.bf16.gmra.mxu1 %vm591_vm3, %v9698_v12  ;;  %v4473_v58 = vor.u32 %v4472_v28, %v4469_v62  ;;  %v4885_v28 = vshll.u32 %v9512_v49, 16 }
 0x4c2   : > { %v4105_v51 = vpop.f32.mrf.mxu2  ;;  %v4545_v24 = vpop.f32.mrf.mxu0 }
 0x4c3   : > { %v9702_v4 = vadd.f32 %v4545_v24, %v4439_v3  ;;  %v4106_v37 = vadd.f32 %v4105_v51, %v9411_v41  ;;  %v4474_v48 = vsel %vm1142_vm5, %v9427_v35, %v4473_v58  ;;  %v9721_v51 = vld [vmem:[#allocation2 + $0x60] sm:$0xff]  }
 0x4c5   : > { %6502 = vmatmul.msk.bf16.gmra.mxu3 %vm591_vm3, %v9447_v21 }
 0x4c6   : > { %v4743_v59 = vpop.f32.mrf.mxu1 }
 0x4c7   : > { %v9708_v18 = vadd.f32 %v4743_v59, %v9516_v26 }
 0x4c8   : > { %v4369_v7 = vpop.f32.mrf.mxu3 }
 0x4c9   : > { %v4440_v5 = vadd.f32 %v4369_v7, %v4106_v37  ;;  %v4883_v7 = vshrl.u32 %v9512_v49, 16  ;;  %v11000_v49 = vld [vmem:[#allocation26_spill] sm:$0xff] }
 0x4ca   : > { %v4107_v11 = vpop.f32.mrf.mxu2  ;;  %v4548_v60 = vpop.f32.mrf.mxu0 }
 0x4cb   : > { %v9710_v25 = vadd.f32 %v4548_v60, %v4440_v5  ;;  %v4108_v21 = vadd.f32 %v4107_v11, %v9450_v19  ;;  %v10998_v5 = vld [vmem:[#allocation24_spill] sm:$0xff] }
 0x4cd   : > { %6524 = vmatmul.msk.bf16.gmra.mxu0 %vm591_vm3, %v4474_v48  ;;  %v10999_v48 = vshll.u32 %v10998_v5, 16 }
 0x4ce   : > { %v4746_v36 = vpop.f32.mrf.mxu1 }
 0x4cf   : > { %6481 = vmatmul.msk.bf16.gmra.mxu2 %vm591_vm3, %v9422_v54  ;;  %v9719_v41 = vadd.f32 %v4746_v36, %v9523_v30  ;;  %v4887_v30 = vrot.slane %v4885_v28, 1  ;;  %v4891_v36 = vrot.slane %v10999_v48, 1  ;;  %v11001_v28 = vshll.u32 %v11000_v49, 16 }
 0x4d0   : > { %v4371_v26 = vpop.f32.mrf.mxu3 }
 0x4d1   : > { %v4441_v3 = vadd.f32 %v4371_v26, %v4108_v21  ;;  %6537 = vmatmul.msk.bf16.gmra.mxu1 %vm591_vm3, %v9721_v51 }
 0x4d2   : > { %v4110_v60 = vpop.f32.mrf.mxu2  ;;  %v4550_v24 = vpop.f32.mrf.mxu0 }
 0x4d3   : > { %v9725_v62 = vadd.f32 %v4550_v24, %v4441_v3  ;;  %v4111_v54 = vadd.f32 %v4110_v60, %v9477_v39  ;;  %v4888_v24 = vor.u32 %v4887_v30, %v4883_v7 }
 0x4d5   : > { %6503 = vmatmul.msk.bf16.gmra.mxu3 %vm591_vm3, %v9427_v35  ;;  %v4892_v35 = vsel %vm1870_vm6, %v4888_v24, %v4891_v36 }
 0x4d6   : > { %v4748_v11 = vpop.f32.mrf.mxu1 }
 0x4d7   : > { %v9732_v19 = vadd.f32 %v4748_v11, %v9536_v44  ;;  %v4898_v11 = vrot.slane %v11001_v28, 1 }
 0x4d8   : > { %v4374_v59 = vpop.f32.mrf.mxu3 }
 0x4d9   : > { %v4442_v37 = vadd.f32 %v4374_v59, %v4111_v54 }
 0x4da   : > { %v4112_v21 = vpop.f32.mrf.mxu2  ;;  %v4553_v26 = vpop.f32.mrf.mxu0 }
 0x4db   : > { %v9737_v3 = vadd.f32 %v4553_v26, %v4442_v37  ;;  %v4113_v44 = vadd.f32 %v4112_v21, %v9500_v23  ;;  %v9748_v37 = vld [vmem:[#allocation2 + $0x68] sm:$0xff]  }
 0x4dd   : > { %6525 = vmatmul.msk.bf16.gmra.mxu0 %vm591_vm3, %v4473_v58  ;;  %v11002_v58 = vshrl.u32 %v10998_v5, 16  ;;  %v5441_v5 = vrot.slane %v9532_v22, 1 }
 0x4de   : > { %v4751_v39 = vpop.f32.mrf.mxu1 }
 0x4df   : > { %6549 = vmatmul.msk.bf16.vlgmr.msra.gmra.mxu2 %vm591_vm3, %v4892_v35  ;;  %v9744_v60 = vadd.f32 %v4751_v39, %v9543_v31  ;;  %v4895_v30 = vor.u32 %v11002_v58, %v4891_v36  ;;  %v5442_v35 = vrot.slane %v9552_v33, 1 }
 0x4e0   : > { %v4376_v54 = vpop.f32.mrf.mxu3 }
 0x4e1   : > { %v4443_v59 = vadd.f32 %v4376_v54, %v4113_v44  ;;  %6538 = vmatmul.msk.bf16.gmra.mxu1 %vm591_vm3, %v9748_v37  ;;  %v4899_v31 = vsel %vm1870_vm6, %v4895_v30, %v4898_v11  ;;  %v11003_v30 = vld [vmem:[#allocation31_spill] sm:$0xff] }
 0x4e2   : > { %v4115_v7 = vpop.f32.mrf.mxu2  ;;  %v4555_v23 = vpop.f32.mrf.mxu0 }
 0x4e3   : > { %v9754_v48 = vadd.f32 %v4555_v23, %v4443_v59  ;;  %v4116_v26 = vadd.f32 %v4115_v7, %v9507_v10  ;;  %v5443_v59 = vsel %vm2429_vm8, %v5441_v5, %v5442_v35  ;;  %v11004_v7 = vshll.u32 %v11003_v30, 16 }
 0x4e5   : > { %6571 = vmatmul.msk.bf16.vlgmr.msra.gmra.mxu3 %vm591_vm3, %v4899_v31  ;;  %v4905_v22 = vrot.slane %v11004_v7, 1 }
 0x4e6   : > { %v4753_v21 = vpop.f32.mrf.mxu1 }
 0x4e7   : > { %v9760_v24 = vadd.f32 %v4753_v21, %v9556_v40  ;;  %v9775_v21 = vld [vmem:[#allocation2 + $0x70] sm:$0xff]  }
 0x4e8   : > { %v4379_v39 = vpop.f32.mrf.mxu3 }
 0x4e9   : > { %v4444_v44 = vadd.f32 %v4379_v39, %v4116_v26  ;;  %v11005_v39 = vshrl.u32 %v11000_v49, 16 }
 0x4ea   : > { %v4117_v36 = vpop.f32.mrf.mxu2  ;;  %v4558_v28 = vpop.f32.mrf.mxu0 }
 0x4eb   : > { %v9764_v54 = vadd.f32 %v4558_v28, %v4444_v44  ;;  %v4118_v10 = vadd.f32 %v4117_v36, %v9520_v0  ;;  %v4902_v44 = vor.u32 %v11005_v39, %v4898_v11 }
 0x4ed   : > { %6593 = vmatmul.msk.bf16.vlgmr.msra.gmra.mxu0 %vm591_vm3, %v5443_v59  ;;  %v5444_v59 = vrot.slane %v9572_v56, 1  ;;  %v11006_v56 = vld [vmem:[#allocation29_spill] sm:$0xff] }
 0x4ee   : > { %v4756_v58 = vpop.f32.mrf.mxu1 }
 0x4ef   : > { %6550 = vmatmul.msk.bf16.gmra.mxu2 %vm591_vm3, %v4899_v31  ;;  %v9771_v40 = vadd.f32 %v4756_v58, %v9563_v52  ;;  %v4906_v52 = vsel %vm1870_vm6, %v4902_v44, %v4905_v22  ;;  %v5445_v7 = vsel %vm2429_vm8, %v5442_v35, %v5444_v59 }
 0x4f0   : > { %v4381_v33 = vpop.f32.mrf.mxu3 }
 0x4f1   : > { %v4445_v23 = vadd.f32 %v4381_v33, %v4118_v10  ;;  %6539 = vmatmul.msk.bf16.gmra.mxu1 %vm591_vm3, %v9775_v21 }
 0x4f2   : > { %v4120_v26 = vpop.f32.mrf.mxu2  ;;  %v4560_v0 = vpop.f32.mrf.mxu0 }
 0x4f3   : > { %v9781_v5 = vadd.f32 %v4560_v0, %v4445_v23  ;;  %v4121_v36 = vadd.f32 %v4120_v26, %v9527_v53  ;;  %v11007_v26 = vshll.u32 %v11006_v56, 16 }
 0x4f5   : > { %6572 = vmatmul.msk.bf16.gmra.mxu3 %vm591_vm3, %v4906_v52  ;;  %v4912_v44 = vrot.slane %v11007_v26, 1 }
 0x4f6   : > { %v4758_v31 = vpop.f32.mrf.mxu1 }
 0x4f7   : > { %v9787_v28 = vadd.f32 %v4758_v31, %v9576_v17  ;;  %v9801_v31 = vld [vmem:[#allocation2 + $0x78] sm:$0xff]  }
 0x4f8   : > { %v4384_v58 = vpop.f32.mrf.mxu3 }
 0x4f9   : > { %v4446_v10 = vadd.f32 %v4384_v58, %v4121_v36  ;;  %v11008_v36 = vshrl.u32 %v11003_v30, 16 }
 0x4fa   : > { %v4122_v33 = vpop.f32.mrf.mxu2  ;;  %v4563_v49 = vpop.f32.mrf.mxu0 }
 0x4fb   : > { %v9790_v11 = vadd.f32 %v4563_v49, %v4446_v10  ;;  %v4123_v39 = vadd.f32 %v4122_v33, %v9540_v9  ;;  %v4909_v58 = vor.u32 %v11008_v36, %v4905_v22 }
 0x4fd   : > { %6594 = vmatmul.msk.bf16.gmra.mxu0 %vm591_vm3, %v5445_v7  ;;  %v5446_v7 = vrot.slane %v9592_v16, 1  ;;  %v11009_v16 = vld [vmem:[#allocation30_spill] sm:$0xff] }
 0x4fe   : > { %v4761_v23 = vpop.f32.mrf.mxu1 }
 0x4ff   : > { %6551 = vmatmul.msk.bf16.gmra.mxu2 %vm591_vm3, %v4906_v52  ;;  %v9797_v53 = vadd.f32 %v4761_v23, %v9583_v47  ;;  %v4913_v47 = vsel %vm1870_vm6, %v4909_v58, %v4912_v44  ;;  %v5447_v26 = vsel %vm2429_vm8, %v5444_v59, %v5446_v7 }
 0x500   : > { %v4386_v17 = vpop.f32.mrf.mxu3 }
 0x501   : > { %v4447_v0 = vadd.f32 %v4386_v17, %v4123_v39  ;;  %6540 = vmatmul.msk.bf16.gmra.mxu1 %vm591_vm3, %v9801_v31 }
 0x502   : > { %v4125_v35 = vpop.f32.mrf.mxu2  ;;  %v4565_v9 = vpop.f32.mrf.mxu0 }
 0x503   : > { %v9807_v10 = vadd.f32 %v4565_v9, %v4447_v0  ;;  %v4126_v33 = vadd.f32 %v4125_v35, %v9547_v38  ;;  %v11010_v35 = vshll.u32 %v11009_v16, 16 }
 0x505   : > { %6573 = vmatmul.msk.bf16.gmra.mxu3 %vm591_vm3, %v4913_v47  ;;  %v4919_v58 = vrot.slane %v11010_v35, 1 }
 0x506   : > { %v4763_v52 = vpop.f32.mrf.mxu1 }
 0x507   : > { %v9813_v49 = vadd.f32 %v4763_v52, %v9596_v15  ;;  %v9827_v52 = vld [vmem:[#allocation2 + $0x80] sm:$0xff]  }
 0x508   : > { %v4389_v23 = vpop.f32.mrf.mxu3 }
 0x509   : > { %v4448_v39 = vadd.f32 %v4389_v23, %v4126_v33  ;;  %v11011_v33 = vshrl.u32 %v11006_v56, 16 }
 0x50a   : > { %v4127_v17 = vpop.f32.mrf.mxu2  ;;  %v4568_v30 = vpop.f32.mrf.mxu0 }
 0x50b   : > { %v9816_v22 = vadd.f32 %v4568_v30, %v4448_v39  ;;  %v4128_v36 = vadd.f32 %v4127_v17, %v9560_v45  ;;  %v4916_v23 = vor.u32 %v11011_v33, %v4912_v44 }
 0x50d   : > { %6595 = vmatmul.msk.bf16.gmra.mxu0 %vm591_vm3, %v5447_v26  ;;  %v5448_v26 = vrot.slane %v9612_v8, 1  ;;  %v11012_v8 = vld [vmem:[#allocation33_spill] sm:$0xff] }
 0x50e   : > { %v4766_v0 = vpop.f32.mrf.mxu1 }
 0x50f   : > { %6552 = vmatmul.msk.bf16.gmra.mxu2 %vm591_vm3, %v4913_v47  ;;  %v9823_v38 = vadd.f32 %v4766_v0, %v9603_v29  ;;  %v4920_v29 = vsel %vm1870_vm6, %v4916_v23, %v4919_v58  ;;  %v5449_v35 = vsel %vm2429_vm8, %v5446_v7, %v5448_v26 }
 0x510   : > { %v4391_v15 = vpop.f32.mrf.mxu3 }
 0x511   : > { %v4449_v9 = vadd.f32 %v4391_v15, %v4128_v36  ;;  %6541 = vmatmul.msk.bf16.gmra.mxu1 %vm591_vm3, %v9827_v52 }
 0x512   : > { %v4130_v59 = vpop.f32.mrf.mxu2  ;;  %v4570_v45 = vpop.f32.mrf.mxu0 }
 0x513   : > { %v9833_v39 = vadd.f32 %v4570_v45, %v4449_v9  ;;  %v4131_v17 = vadd.f32 %v4130_v59, %v9567_v63  ;;  %v11013_v59 = vshll.u32 %v11012_v8, 16 }
 0x515   : > { %6574 = vmatmul.msk.bf16.gmra.mxu3 %vm591_vm3, %v4920_v29  ;;  %v4926_v23 = vrot.slane %v11013_v59, 1 }
 0x516   : > { %v4768_v47 = vpop.f32.mrf.mxu1 }
 0x517   : > { %v9839_v30 = vadd.f32 %v4768_v47, %v9616_v55  ;;  %v9853_v47 = vld [vmem:[#allocation2 + $0x88] sm:$0xff]  }
 0x518   : > { %v4394_v0 = vpop.f32.mrf.mxu3 }
 0x519   : > { %v4450_v36 = vadd.f32 %v4394_v0, %v4131_v17  ;;  %v11014_v17 = vshrl.u32 %v11009_v16, 16 }
 0x51a   : > { %v4132_v15 = vpop.f32.mrf.mxu2  ;;  %v4573_v56 = vpop.f32.mrf.mxu0 }
 0x51b   : > { %v9842_v44 = vadd.f32 %v4573_v56, %v4450_v36  ;;  %v4133_v33 = vadd.f32 %v4132_v15, %v9580_v27  ;;  %v4923_v0 = vor.u32 %v11014_v17, %v4919_v58  ;;  %v11015_v17 = vld [vmem:[#allocation38_spill] sm:$0xff] }
 0x51d   : > { %6596 = vmatmul.msk.bf16.gmra.mxu0 %vm591_vm3, %v5449_v35  ;;  %v5450_v35 = vrot.slane %v9632_v14, 1  ;;  %v11017_v14 = vld [vmem:[#allocation36_spill] sm:$0xff] }
 0x51e   : > { %v4771_v9 = vpop.f32.mrf.mxu1 }
 0x51f   : > { %6553 = vmatmul.msk.bf16.gmra.mxu2 %vm591_vm3, %v4920_v29  ;;  %v9849_v63 = vadd.f32 %v4771_v9, %v9623_v43  ;;  %v4927_v43 = vsel %vm1870_vm6, %v4923_v0, %v4926_v23  ;;  %v5451_v59 = vsel %vm2429_vm8, %v5448_v26, %v5450_v35 }
 0x520   : > { %v4396_v55 = vpop.f32.mrf.mxu3 }
 0x521   : > { %v4451_v45 = vadd.f32 %v4396_v55, %v4133_v33  ;;  %6542 = vmatmul.msk.bf16.gmra.mxu1 %vm591_vm3, %v9853_v47 }
 0x522   : > { %v4135_v7 = vpop.f32.mrf.mxu2  ;;  %v4575_v27 = vpop.f32.mrf.mxu0 }
 0x523   : > { %v9859_v36 = vadd.f32 %v4575_v27, %v4451_v45  ;;  %v4136_v15 = vadd.f32 %v4135_v7, %v9587_v20  ;;  %v11018_v7 = vshll.u32 %v11017_v14, 16 }
 0x525   : > { %6575 = vmatmul.msk.bf16.gmra.mxu3 %vm591_vm3, %v4927_v43  ;;  %v4933_v27 = vrot.slane %v11018_v7, 1 }
 0x526   : > { %v4773_v29 = vpop.f32.mrf.mxu1 }
 0x527   : > { %v9865_v56 = vadd.f32 %v4773_v29, %v9636_v32 }
 0x528   : > { %v4399_v9 = vpop.f32.mrf.mxu3 }
 0x529   : > { %v4452_v33 = vadd.f32 %v4399_v9, %v4136_v15  ;;  %v9879_v15 = vld [vmem:[#allocation2 + $0x90] sm:$0xff]   ;;  %v11019_v9 = vshrl.u32 %v11012_v8, 16 }
 0x52a   : > { %v4137_v55 = vpop.f32.mrf.mxu2  ;;  %v4578_v16 = vpop.f32.mrf.mxu0 }
 0x52b   : > { %v9868_v58 = vadd.f32 %v4578_v16, %v4452_v33  ;;  %v4138_v0 = vadd.f32 %v4137_v55, %v11015_v17  ;;  %v4930_v33 = vor.u32 %v11019_v9, %v4926_v23 }
 0x52d   : > { %6597 = vmatmul.msk.bf16.gmra.mxu0 %vm591_vm3, %v5451_v59  ;;  %v11020_v59 = vld [vmem:[#allocation19_spill] sm:$0xff] }
 0x52e   : > { %v4776_v45 = vpop.f32.mrf.mxu1 }
 0x52f   : > { %6554 = vmatmul.msk.bf16.gmra.mxu2 %vm591_vm3, %v4927_v43  ;;  %v9875_v20 = vadd.f32 %v4776_v45, %v9643_v34  ;;  %v4934_v34 = vsel %vm1870_vm6, %v4930_v33, %v4933_v27  ;;  %v11022_v33 = vld [vmem:[#allocation17_spill] sm:$0xff] }
 0x530   : > { %v4401_v32 = vpop.f32.mrf.mxu3 }
 0x531   : > { %11016 = vst [vmem:[#allocation24_spill] sm:$0xff] %v9875_v20  ;;  %v4453_v29 = vadd.f32 %v4401_v32, %v4138_v0  ;;  %6543 = vmatmul.msk.bf16.gmra.mxu1 %vm591_vm3, %v9879_v15  ;;  %v5452_v0 = vrot.slane %v9652_v2, 1  ;;  %v11024_v2 = vld [vmem:[#allocation8_spill] sm:$0xff] }
 0x532   : > { %v4140_v26 = vpop.f32.mrf.mxu2  ;;  %v4580_v55 = vpop.f32.mrf.mxu0 }
 0x533   : > { %v9885_v16 = vadd.f32 %v4580_v55, %v4453_v29  ;;  %v4141_v45 = vadd.f32 %v4140_v26, %v11020_v59  ;;  %v5453_v29 = vsel %vm2429_vm8, %v5450_v35, %v5452_v0 }
 0x535   : > { %6576 = vmatmul.msk.bf16.gmra.mxu3 %vm591_vm3, %v4934_v34 }
 0x536   : > { %v4778_v43 = vpop.f32.mrf.mxu1 }
 0x537   : > { %v9891_v17 = vadd.f32 %v4778_v43, %v9656_v57  ;;  %v11025_v43 = vshll.u32 %v11024_v2, 16 }
 0x538   : > { %v4404_v32 = vpop.f32.mrf.mxu3 }
 0x539   : > { %11021 = vst [vmem:[#allocation26_spill] sm:$0xff] %v9891_v17  ;;  %v4454_v7 = vadd.f32 %v4404_v32, %v4141_v45  ;;  %v4940_v59 = vrot.slane %v11025_v43, 1  ;;  %v9905_v32 = vld [vmem:[#allocation2 + $0x98] sm:$0xff]  }
 0x53a   : > { %v4142_v20 = vpop.f32.mrf.mxu2  ;;  %v4583_v8 = vpop.f32.mrf.mxu0 }
 0x53b   : > { %v9894_v23 = vadd.f32 %v4583_v8, %v4454_v7  ;;  %v4143_v55 = vadd.f32 %v4142_v20, %v11022_v33  ;;  %v11026_v7 = vshrl.u32 %v11017_v14, 16 }
 0x53d   : > { %6598 = vmatmul.msk.bf16.gmra.mxu0 %vm591_vm3, %v5453_v29  ;;  %v4937_v8 = vor.u32 %v11026_v7, %v4933_v27 }
 0x53e   : > { %v4781_v9 = vpop.f32.mrf.mxu1 }
 0x53f   : > { %6555 = vmatmul.msk.bf16.gmra.mxu2 %vm591_vm3, %v4934_v34  ;;  %v9901_v57 = vadd.f32 %v4781_v9, %v9661_v1  ;;  %v4941_v1 = vsel %vm1870_vm6, %v4937_v8, %v4940_v59  ;;  %v11027_v9 = vld [vmem:[#allocation22_spill] sm:$0xff]  ;;  %v11029_v8 = vld [vmem:[#allocation49_spill] sm:$0xff] }
 0x540   : > { %v4406_v26 = vpop.f32.mrf.mxu3 }
 0x541   : > { %11023 = vst [vmem:[#allocation31_spill] sm:$0xff] %v9901_v57  ;;  %v4455_v45 = vadd.f32 %v4406_v26, %v4143_v55  ;;  %6544 = vmatmul.msk.bf16.gmra.mxu1 %vm591_vm3, %v9905_v32  ;;  %v5454_v26 = vrot.slane %v9671_v42, 1  ;;  %v11031_v42 = vld [vmem:[#allocation39_spill] sm:$0xff] }
 0x542   : > { %v4145_v35 = vpop.f32.mrf.mxu2  ;;  %v4585_v20 = vpop.f32.mrf.mxu0 }
 0x543   : > { %v9911_v29 = vadd.f32 %v4585_v20, %v4455_v45  ;;  %v4146_v33 = vadd.f32 %v4145_v35, %v11027_v9  ;;  %v5455_v45 = vsel %vm2429_vm8, %v5452_v0, %v5454_v26 }
 0x545   : > { %6577 = vmatmul.msk.bf16.gmra.mxu3 %vm591_vm3, %v4941_v1 }
 0x546   : > { %v4783_v34 = vpop.f32.mrf.mxu1 }
 0x547   : > { %v9917_v55 = vadd.f32 %v4783_v34, %v9675_v6  ;;  %v11032_v34 = vshll.u32 %v11031_v42, 16 }
 0x548   : > { %v4409_v43 = vpop.f32.mrf.mxu3 }
 0x549   : > { %11028 = vst [vmem:[#allocation29_spill] sm:$0xff] %v9917_v55  ;;  %v4456_v57 = vadd.f32 %v4409_v43, %v4146_v33  ;;  %v4947_v9 = vrot.slane %v11032_v34, 1  ;;  %v9931_v43 = vld [vmem:[#allocation2 + $0xa0] sm:$0xff]  }
 0x54a   : > { %v4147_v17 = vpop.f32.mrf.mxu2  ;;  %v4588_v14 = vpop.f32.mrf.mxu0 }
 0x54b   : > { %v9920_v27 = vadd.f32 %v4588_v14, %v4456_v57  ;;  %v4148_v20 = vadd.f32 %v4147_v17, %v11029_v8  ;;  %v11033_v57 = vshrl.u32 %v11024_v2, 16 }
 0x54d   : > { %6599 = vmatmul.msk.bf16.gmra.mxu0 %vm591_vm3, %v5455_v45  ;;  %v4944_v14 = vor.u32 %v11033_v57, %v4940_v59 }
 0x54e   : > { %v4786_v7 = vpop.f32.mrf.mxu1 }
 0x54f   : > { %6556 = vmatmul.msk.bf16.gmra.mxu2 %vm591_vm3, %v4941_v1  ;;  %v9927_v6 = vadd.f32 %v4786_v7, %v9687_v46  ;;  %v4948_v46 = vsel %vm1870_vm6, %v4944_v14, %v4947_v9  ;;  %v11034_v7 = vld [vmem:[#allocation5_spill] sm:$0xff] }
 0x550   : > { %v4411_v35 = vpop.f32.mrf.mxu3  ;;  %v11035_v14 = vld [vmem:[#allocation41_spill] sm:$0xff] }
 0x551   : > { %11030 = vst [vmem:[#allocation30_spill] sm:$0xff] %v9927_v6  ;;  %v4457_v33 = vadd.f32 %v4411_v35, %v4148_v20  ;;  %6545 = vmatmul.msk.bf16.gmra.mxu1 %vm591_vm3, %v9931_v43  ;;  %v5456_v35 = vrot.slane %v9698_v12, 1 }
 0x552   : > { %v4150_v0 = vpop.f32.mrf.mxu2  ;;  %v4590_v17 = vpop.f32.mrf.mxu0 }
 0x553   : > { %v9937_v45 = vadd.f32 %v4590_v17, %v4457_v33  ;;  %v4151_v8 = vadd.f32 %v4150_v0, %v11034_v7  ;;  %v5457_v33 = vsel %vm2429_vm8, %v5454_v26, %v5456_v35  ;;  %v11036_v17 = vshll.u32 %v11035_v14, 16 }
 0x555   : > { %6578 = vmatmul.msk.bf16.gmra.mxu3 %vm591_vm3, %v4948_v46  ;;  %v4954_v12 = vrot.slane %v11036_v17, 1 }
 0x556   : > { %v4788_v1 = vpop.f32.mrf.mxu1 }
 0x557   : > { %v9943_v20 = vadd.f32 %v4788_v1, %v9702_v4 }
 0x558   : > { %v4414_v34 = vpop.f32.mrf.mxu3 }
 0x559   : > { %v4458_v6 = vadd.f32 %v4414_v34, %v4151_v8  ;;  %v5458_v34 = vrot.slane %v9721_v51, 1 }
 0x55a   : > { %v4152_v55 = vpop.f32.mrf.mxu2  ;;  %v4593_v2 = vpop.f32.mrf.mxu0 }
 0x55b   : > { %v9946_v59 = vadd.f32 %v4593_v2, %v4458_v6  ;;  %v11037_v6 = vshrl.u32 %v11031_v42, 16 }
 0x55d   : > { %6600 = vmatmul.msk.bf16.gmra.mxu0 %vm591_vm3, %v5457_v33  ;;  %v4951_v1 = vor.u32 %v11037_v6, %v4947_v9 }
 0x55e   : > { %v4791_v57 = vpop.f32.mrf.mxu1 }
 0x55f   : > { %6557 = vmatmul.msk.bf16.gmra.mxu2 %vm591_vm3, %v4948_v46  ;;  %v9952_v0 = vadd.f32 %v4791_v57, %v9710_v25  ;;  %v4955_v8 = vsel %vm1870_vm6, %v4951_v1, %v4954_v12  ;;  %v11039_v1 = vld [vmem:[#allocation42_spill] sm:$0xff] }
 0x560   : > { %v4416_v4 = vpop.f32.mrf.mxu3 }
 0x561   : > { %6546 = vmatmul.msk.bf16.gmra.mxu1 %vm591_vm3, %v9435_v50 }
 0x562   : > { %v5104_v55 = vpop.f32.mrf.mxu2  ;;  %v4595_v26 = vpop.f32.mrf.mxu0 }
 0x563   : > { %v5208_v7 = vadd.f32 %v5104_v55, %v9669_v61  ;;  %v5459_v61 = vsel %vm2429_vm8, %v5456_v35, %v5458_v34  ;;  %v11038_v55 = vld [vmem:[#allocation50_spill] sm:$0xff]  ;;  %v11040_v26 = vshll.u32 %v11039_v1, 16 }
 0x564   : > { %v9978_v51 = vpack.c.b16 %v11038_v55, %v11038_v55 }
 0x565   : > { %6579 = vmatmul.msk.bf16.gmra.mxu3 %vm591_vm3, %v4955_v8 }
 0x566   : > { %v4793_v25 = vpop.f32.mrf.mxu1 }
 0x567   : > { %v9964_v46 = vadd.f32 %v4793_v25, %v9725_v62  ;;  %v11041_v25 = vshrl.u32 %v11035_v14, 16 }
 0x568   : > { %v5294_v2 = vpop.f32.mrf.mxu3 }
 0x569   : > { %v5398_v33 = vadd.f32 %v5294_v2, %v5208_v7  ;;  %v4958_v2 = vor.u32 %v11041_v25, %v4954_v12 }
 0x56a   : > { %v5106_v57 = vpop.f32.mrf.mxu2  ;;  %v5557_v4 = vpop.f32.mrf.mxu0 }
 0x56b   : > { %v5209_v42 = vadd.f32 %v5106_v57, %v9681_v13  ;;  %v9968_v9 = vadd.f32 %v5557_v4, %v5398_v33  ;;  %v4961_v13 = vrot.slane %v11040_v26, 1  ;;  %v11042_v33 = vld [vmem:[#allocation51_spill] sm:$0xff] }
 0x56d   : > { %6601 = vmatmul.msk.bf16.gmra.mxu0 %vm591_vm3, %v5459_v61  ;;  %v4962_v4 = vsel %vm1870_vm6, %v4958_v2, %v4961_v13 }
 0x56e   : > { %v4796_v17 = vpop.f32.mrf.mxu1 }
 0x56f   : > { %6558 = vmatmul.msk.bf16.gmra.mxu2 %vm591_vm3, %v4955_v8  ;;  %v9974_v62 = vadd.f32 %v4796_v17, %v9737_v3 }
 0x570   : > { %v5296_v6 = vpop.f32.mrf.mxu3 }
 0x571   : > { %v5399_v7 = vadd.f32 %v5296_v6, %v5209_v42  ;;  %6547 = vmatmul.msk.bf16.gmra.mxu1 %vm591_vm3, %v9978_v51  ;;  %v5460_v42 = vrot.slane %v9748_v37, 1  ;;  %v11043_v37 = vld [vmem:[#allocation16_spill] sm:$0xff] }
 0x572   : > { %v5109_v35 = vpop.f32.mrf.mxu2  ;;  %v5559_v8 = vpop.f32.mrf.mxu0 }
 0x573   : > { %v5210_v3 = vadd.f32 %v5109_v35, %v11042_v33  ;;  %v9987_v57 = vadd.f32 %v5559_v8, %v5399_v7  ;;  %v5461_v7 = vsel %vm2429_vm8, %v5458_v34, %v5460_v42  ;;  %v11044_v8 = vshll.u32 %v11043_v37, 16 }
 0x575   : > { %6580 = vmatmul.msk.bf16.gmra.mxu3 %vm591_vm3, %v4962_v4  ;;  %v4968_v33 = vrot.slane %v11044_v8, 1 }
 0x576   : > { %v4798_v61 = vpop.f32.mrf.mxu1 }
 0x577   : > { %v9992_v17 = vadd.f32 %v4798_v61, %v9754_v48  ;;  %v11045_v61 = vld [vmem:[#allocation7_spill] sm:$0xff] }
 0x578   : > { %v5299_v55 = vpop.f32.mrf.mxu3 }
 0x579   : > { %v5400_v6 = vadd.f32 %v5299_v55, %v5210_v3  ;;  %v11046_v55 = vshrl.u32 %v11039_v1, 16 }
 0x57a   : > { %v5111_v26 = vpop.f32.mrf.mxu2  ;;  %v5562_v14 = vpop.f32.mrf.mxu0 }
 0x57b   : > { %v5211_v12 = vadd.f32 %v5111_v26, %v9708_v18  ;;  %v9996_v25 = vadd.f32 %v5562_v14, %v5400_v6  ;;  %v4965_v34 = vor.u32 %v11046_v55, %v4961_v13 }
 0x57d   : > { %6602 = vmatmul.msk.bf16.gmra.mxu0 %vm591_vm3, %v5461_v7 }
 0x57e   : > { %v4801_v35 = vpop.f32.mrf.mxu1 }
 0x57f   : > { %6559 = vmatmul.msk.bf16.gmra.mxu2 %vm591_vm3, %v4962_v4  ;;  %v10002_v48 = vadd.f32 %v4801_v35, %v9764_v54  ;;  %v4969_v54 = vsel %vm1870_vm6, %v4965_v34, %v4968_v33 }
 0x580   : > { %v5301_v2 = vpop.f32.mrf.mxu3 }
 0x581   : > { %v5401_v3 = vadd.f32 %v5301_v2, %v5211_v12  ;;  %6615 = vmatmul.msk.bf16.vlgmr.msra.gmra.mxu1 %vm591_vm3, %v11045_v61  ;;  %v5462_v12 = vrot.slane %v9775_v21, 1  ;;  %v11047_v21 = vld [vmem:[#allocation14_spill] sm:$0xff] }
 0x582   : > { %v5114_v18 = vpop.f32.mrf.mxu2  ;;  %v5564_v6 = vpop.f32.mrf.mxu0  ;;  %v11048_v55 = vshll.u32 %v11047_v21, 16 }
 0x583   : > { %v5212_v26 = vadd.f32 %v5114_v18, %v9719_v41  ;;  %v10011_v14 = vadd.f32 %v5564_v6, %v5401_v3  ;;  %v5463_v41 = vsel %vm2429_vm8, %v5460_v42, %v5462_v12 }
 0x584   : > { %v4975_v34 = vrot.slane %v11048_v55, 1 }
 0x585   : > { %6581 = vmatmul.msk.bf16.gmra.mxu3 %vm591_vm3, %v4969_v54 }
 0x586   : > { %v4803_v4 = vpop.f32.mrf.mxu1 }
 0x587   : > { %v10016_v7 = vadd.f32 %v4803_v4, %v9781_v5  ;;  %v11050_v4 = vshrl.u32 %v11043_v37, 16 }
 0x588   : > { %v5304_v35 = vpop.f32.mrf.mxu3 }
 0x589   : > { %v5402_v2 = vadd.f32 %v5304_v35, %v5212_v26  ;;  %v11049_v26 = vld [vmem:[#allocation27_spill] sm:$0xff]  ;;  %v4972_v42 = vor.u32 %v11050_v4, %v4968_v33 }
 0x58a   : > { %v5116_v8 = vpop.f32.mrf.mxu2  ;;  %v5567_v1 = vpop.f32.mrf.mxu0 }
 0x58b   : > { %v5213_v13 = vadd.f32 %v5116_v8, %v9732_v19  ;;  %v10020_v61 = vadd.f32 %v5567_v1, %v5402_v2 }
 0x58d   : > { %6603 = vmatmul.msk.bf16.gmra.mxu0 %vm591_vm3, %v5463_v41 }
 0x58e   : > { %v4806_v3 = vpop.f32.mrf.mxu1 }
 0x58f   : > { %6560 = vmatmul.msk.bf16.gmra.mxu2 %vm591_vm3, %v4969_v54  ;;  %v10026_v5 = vadd.f32 %v4806_v3, %v9790_v11  ;;  %v4976_v11 = vsel %vm1870_vm6, %v4972_v42, %v4975_v34 }
 0x590   : > { %v5306_v18 = vpop.f32.mrf.mxu3 }
 0x591   : > { %v5403_v6 = vadd.f32 %v5306_v18, %v5213_v13  ;;  %6616 = vmatmul.msk.bf16.gmra.mxu1 %vm591_vm3, %v11049_v26  ;;  %v5464_v13 = vrot.slane %v9801_v31, 1  ;;  %v11051_v31 = vld [vmem:[#allocation15_spill] sm:$0xff] }
 0x592   : > { %v5119_v19 = vpop.f32.mrf.mxu2  ;;  %v5569_v35 = vpop.f32.mrf.mxu0 }
 0x593   : > { %v5214_v2 = vadd.f32 %v5119_v19, %v9744_v60  ;;  %v10035_v8 = vadd.f32 %v5569_v35, %v5403_v6  ;;  %v5465_v60 = vsel %vm2429_vm8, %v5462_v12, %v5464_v13  ;;  %v11052_v19 = vshll.u32 %v11051_v31, 16  ;;  %v11053_v35 = vld [vmem:[#allocation34_spill] sm:$0xff] }
 0x595   : > { %6582 = vmatmul.msk.bf16.gmra.mxu3 %vm591_vm3, %v4976_v11  ;;  %v4982_v4 = vrot.slane %v11052_v19, 1 }
 0x596   : > { %v4808_v54 = vpop.f32.mrf.mxu1 }
 0x597   : > { %v10040_v1 = vadd.f32 %v4808_v54, %v9807_v10 }
 0x598   : > { %v5309_v41 = vpop.f32.mrf.mxu3 }
 0x599   : > { %v5404_v3 = vadd.f32 %v5309_v41, %v5214_v2  ;;  %v11054_v2 = vshrl.u32 %v11047_v21, 16 }
 0x59a   : > { %v5121_v18 = vpop.f32.mrf.mxu2  ;;  %v5572_v37 = vpop.f32.mrf.mxu0 }
 0x59b   : > { %v5215_v33 = vadd.f32 %v5121_v18, %v9760_v24  ;;  %v10044_v55 = vadd.f32 %v5572_v37, %v5404_v3  ;;  %v4979_v12 = vor.u32 %v11054_v2, %v4975_v34  ;;  %v5466_v37 = vrot.slane %v9827_v52, 1  ;;  %v11055_v52 = vld [vmem:[#allocation18_spill] sm:$0xff] }
 0x59d   : > { %6604 = vmatmul.msk.bf16.gmra.mxu0 %vm591_vm3, %v5465_v60 }
 0x59e   : > { %v4811_v6 = vpop.f32.mrf.mxu1 }
 0x59f   : > { %6561 = vmatmul.msk.bf16.gmra.mxu2 %vm591_vm3, %v4976_v11  ;;  %v10050_v10 = vadd.f32 %v4811_v6, %v9816_v22  ;;  %v4983_v22 = vsel %vm1870_vm6, %v4979_v12, %v4982_v4  ;;  %v11057_v12 = vld [vmem:[#allocation32_spill] sm:$0xff] }
 0x5a0   : > { %v5311_v26 = vpop.f32.mrf.mxu3 }
 0x5a1   : > { %v5405_v42 = vadd.f32 %v5311_v26, %v5215_v33  ;;  %6617 = vmatmul.msk.bf16.gmra.mxu1 %vm591_vm3, %v11053_v35  ;;  %v11056_v35 = vshll.u32 %v11055_v52, 16 }
 0x5a2   : > { %v5124_v24 = vpop.f32.mrf.mxu2  ;;  %v5574_v54 = vpop.f32.mrf.mxu0 }
 0x5a3   : > { %v5216_v41 = vadd.f32 %v5124_v24, %v9771_v40  ;;  %v10059_v3 = vadd.f32 %v5574_v54, %v5405_v42  ;;  %v5467_v40 = vsel %vm2429_vm8, %v5464_v13, %v5466_v37  ;;  %v4989_v24 = vrot.slane %v11056_v35, 1 }
 0x5a4   : > { %v11058_v54 = vshrl.u32 %v11051_v31, 16 }
 0x5a5   : > { %6583 = vmatmul.msk.bf16.gmra.mxu3 %vm591_vm3, %v4983_v22 }
 0x5a6   : > { %v4813_v11 = vpop.f32.mrf.mxu1  ;;  %v4986_v13 = vor.u32 %v11058_v54, %v4982_v4  ;;  %v11061_v54 = vld [vmem:[#allocation35_spill] sm:$0xff] }
 0x5a7   : > { %v10064_v18 = vadd.f32 %v4813_v11, %v9833_v39 }
 0x5a8   : > { %v5314_v33 = vpop.f32.mrf.mxu3 }
 0x5a9   : > { %v5406_v60 = vadd.f32 %v5314_v33, %v5216_v41 }
 0x5aa   : > { %v5126_v6 = vpop.f32.mrf.mxu2  ;;  %v5577_v21 = vpop.f32.mrf.mxu0 }
 0x5ab   : > { %v5217_v34 = vadd.f32 %v5126_v6, %v9787_v28  ;;  %v10068_v26 = vadd.f32 %v5577_v21, %v5406_v60  ;;  %v5468_v6 = vrot.slane %v9853_v47, 1  ;;  %v11059_v47 = vld [vmem:[#allocation25_spill] sm:$0xff] }
 0x5ad   : > { %6605 = vmatmul.msk.bf16.gmra.mxu0 %vm591_vm3, %v5467_v40 }
 0x5ae   : > { %v4816_v19 = vpop.f32.mrf.mxu1 }
 0x5af   : > { %6562 = vmatmul.msk.bf16.gmra.mxu2 %vm591_vm3, %v4983_v22  ;;  %v10074_v39 = vadd.f32 %v4816_v19, %v9842_v44  ;;  %v4990_v44 = vsel %vm1870_vm6, %v4986_v13, %v4989_v24  ;;  %v11062_v13 = vshrl.u32 %v11055_v52, 16 }
 0x5b0   : > { %v5316_v42 = vpop.f32.mrf.mxu3 }
 0x5b1   : > { %v5407_v2 = vadd.f32 %v5316_v42, %v5217_v34  ;;  %6618 = vmatmul.msk.bf16.gmra.mxu1 %vm591_vm3, %v11057_v12 }
 0x5b2   : > { %v5129_v28 = vpop.f32.mrf.mxu2  ;;  %v5579_v41 = vpop.f32.mrf.mxu0 }
 0x5b3   : > { %v5218_v11 = vadd.f32 %v5129_v28, %v9797_v53  ;;  %v10083_v33 = vadd.f32 %v5579_v41, %v5407_v2  ;;  %v5469_v53 = vsel %vm2429_vm8, %v5466_v37, %v5468_v6  ;;  %v11060_v2 = vshll.u32 %v11059_v47, 16 }
 0x5b4   : > { %v4993_v37 = vor.u32 %v11062_v13, %v4989_v24  ;;  %v11066_v13 = vshrl.u32 %v11059_v47, 16 }
 0x5b5   : > { %6584 = vmatmul.msk.bf16.gmra.mxu3 %vm591_vm3, %v4990_v44  ;;  %v4996_v12 = vrot.slane %v11060_v2, 1 }
 0x5b6   : > { %v4818_v22 = vpop.f32.mrf.mxu1 }
 0x5b7   : > { %v10088_v60 = vadd.f32 %v4818_v22, %v9859_v36 }
 0x5b8   : > { %v5319_v21 = vpop.f32.mrf.mxu3 }
 0x5b9   : > { %v5408_v34 = vadd.f32 %v5319_v21, %v5218_v11 }
 0x5ba   : > { %v5131_v40 = vpop.f32.mrf.mxu2  ;;  %v5582_v31 = vpop.f32.mrf.mxu0 }
 0x5bb   : > { %v5219_v4 = vadd.f32 %v5131_v40, %v9813_v49  ;;  %v10092_v19 = vadd.f32 %v5582_v31, %v5408_v34  ;;  %v5470_v34 = vrot.slane %v9879_v15, 1  ;;  %v11063_v15 = vld [vmem:[#allocation23_spill] sm:$0xff] }
 0x5bc   : > { %v11064_v2 = vshll.u32 %v11063_v15, 16 }
 0x5bd   : > { %6606 = vmatmul.msk.bf16.gmra.mxu0 %vm591_vm3, %v5469_v53 }
 0x5be   : > { %v4821_v42 = vpop.f32.mrf.mxu1 }
 0x5bf   : > { %6563 = vmatmul.msk.bf16.gmra.mxu2 %vm591_vm3, %v4990_v44  ;;  %v10098_v36 = vadd.f32 %v4821_v42, %v9868_v58  ;;  %v4997_v58 = vsel %vm1870_vm6, %v4993_v37, %v4996_v12 }
 0x5c0   : > { %v5321_v35 = vpop.f32.mrf.mxu3 }
 0x5c1   : > { %v5409_v28 = vadd.f32 %v5321_v35, %v5219_v4  ;;  %6619 = vmatmul.msk.bf16.gmra.mxu1 %vm591_vm3, %v11061_v54 }
 0x5c2   : > { %v5134_v49 = vpop.f32.mrf.mxu2  ;;  %v5584_v41 = vpop.f32.mrf.mxu0 }
 0x5c3   : > { %v5220_v11 = vadd.f32 %v5134_v49, %v9823_v38  ;;  %v10107_v22 = vadd.f32 %v5584_v41, %v5409_v28  ;;  %v5471_v38 = vsel %vm2429_vm8, %v5468_v6, %v5470_v34  ;;  %v5003_v28 = vrot.slane %v11064_v2, 1  ;;  %v11065_v49 = vld [vmem:[#allocation37_spill] sm:$0xff] }
 0x5c4   : > { %v5000_v6 = vor.u32 %v11066_v13, %v4996_v12 }
 0x5c5   : > { %6585 = vmatmul.msk.bf16.gmra.mxu3 %vm591_vm3, %v4997_v58 }
 0x5c6   : > { %v4823_v44 = vpop.f32.mrf.mxu1 }
 0x5c7   : > { %v10112_v21 = vadd.f32 %v4823_v44, %v9885_v16 }
 0x5c8   : > { %v5324_v40 = vpop.f32.mrf.mxu3 }
 0x5c9   : > { %v5410_v31 = vadd.f32 %v5324_v40, %v5220_v11  ;;  %v5472_v40 = vrot.slane %v9905_v32, 1  ;;  %v11067_v32 = vld [vmem:[#allocation43_spill] sm:$0xff] }
 0x5ca   : > { %v5136_v4 = vpop.f32.mrf.mxu2  ;;  %v5587_v52 = vpop.f32.mrf.mxu0 }
 0x5cb   : > { %v5221_v24 = vadd.f32 %v5136_v4, %v9839_v30  ;;  %v10116_v53 = vadd.f32 %v5587_v52, %v5410_v31 }
 0x5cd   : > { %6607 = vmatmul.msk.bf16.gmra.mxu0 %vm591_vm3, %v5471_v38 }
 0x5ce   : > { %v4826_v42 = vpop.f32.mrf.mxu1 }
 0x5cf   : > { %6564 = vmatmul.msk.bf16.gmra.mxu2 %vm591_vm3, %v4997_v58  ;;  %v10122_v16 = vadd.f32 %v4826_v42, %v9894_v23  ;;  %v5004_v23 = vsel %vm1870_vm6, %v5000_v6, %v5003_v28  ;;  %v11071_v6 = vld [vmem:[#allocation24_spill] sm:$0xff] }
 0x5d0   : > { %v5326_v35 = vpop.f32.mrf.mxu3 }
 0x5d1   : > { %v5411_v54 = vadd.f32 %v5326_v35, %v5221_v24  ;;  %6620 = vmatmul.msk.bf16.gmra.mxu1 %vm591_vm3, %v11065_v49  ;;  %v11068_v35 = vshll.u32 %v11067_v32, 16  ;;  %v11069_v49 = vld [vmem:[#allocation10_spill] sm:$0xff] }
 0x5d2   : > { %v5139_v30 = vpop.f32.mrf.mxu2  ;;  %v5589_v37 = vpop.f32.mrf.mxu0 }
 0x5d3   : > { %v5222_v41 = vadd.f32 %v5139_v30, %v9849_v63  ;;  %v10131_v11 = vadd.f32 %v5589_v37, %v5411_v54  ;;  %v5473_v63 = vsel %vm2429_vm8, %v5470_v34, %v5472_v40  ;;  %v5010_v2 = vrot.slane %v11068_v35, 1 }
 0x5d4   : > { %v11070_v30 = vshrl.u32 %v11063_v15, 16 }
 0x5d5   : > { %6586 = vmatmul.msk.bf16.gmra.mxu3 %vm591_vm3, %v5004_v23 }
 0x5d6   : > { %v4828_v58 = vpop.f32.mrf.mxu1  ;;  %v5007_v34 = vor.u32 %v11070_v30, %v5003_v28  ;;  %v11072_v28 = vld [vmem:[#allocation26_spill] sm:$0xff] }
 0x5d7   : > { %v10136_v44 = vadd.f32 %v4828_v58, %v9911_v29 }
 0x5d8   : > { %v5329_v31 = vpop.f32.mrf.mxu3 }
 0x5d9   : > { %v5412_v4 = vadd.f32 %v5329_v31, %v5222_v41  ;;  %v5474_v31 = vrot.slane %v9931_v43, 1  ;;  %v11073_v43 = vshll.u32 %v9435_v50, 16 }
 0x5da   : > { %v5141_v52 = vpop.f32.mrf.mxu2  ;;  %v5592_v47 = vpop.f32.mrf.mxu0 }
 0x5db   : > { %v5223_v12 = vadd.f32 %v5141_v52, %v9865_v56  ;;  %v10140_v24 = vadd.f32 %v5592_v47, %v5412_v4 }
 0x5dd   : > { %6608 = vmatmul.msk.bf16.gmra.mxu0 %vm591_vm3, %v5473_v63 }
 0x5de   : > { %v4831_v38 = vpop.f32.mrf.mxu1 }
 0x5df   : > { %6565 = vmatmul.msk.bf16.gmra.mxu2 %vm591_vm3, %v5004_v23  ;;  %v10146_v29 = vadd.f32 %v4831_v38, %v9920_v27  ;;  %v5011_v27 = vsel %vm1870_vm6, %v5007_v34, %v5010_v2  ;;  %v5475_v38 = vsel %vm2429_vm8, %v5472_v40, %v5474_v31  ;;  %v11075_v34 = vshrl.u32 %v11067_v32, 16 }
 0x5e0   : > { %v5331_v42 = vpop.f32.mrf.mxu3 }
 0x5e1   : > { %v5413_v54 = vadd.f32 %v5331_v42, %v5223_v12  ;;  %6621 = vmatmul.msk.bf16.gmra.mxu1 %vm591_vm3, %v11069_v49  ;;  %v5014_v40 = vor.u32 %v11075_v34, %v5010_v2 }
 0x5e2   : > { %v5144_v56 = vpop.f32.mrf.mxu2  ;;  %v5594_v13 = vpop.f32.mrf.mxu0 }
 0x5e3   : > { %v5224_v37 = vadd.f32 %v5144_v56, %v11071_v6  ;;  %v10155_v41 = vadd.f32 %v5594_v13, %v5413_v54  ;;  %v5017_v54 = vrot.slane %v11073_v43, 1  ;;  %v11074_v56 = vld [vmem:[#allocation9_spill] sm:$0xff]  ;;  %v11076_v6 = vld [vmem:[#allocation31_spill] sm:$0xff] }
 0x5e5   : > { %6587 = vmatmul.msk.bf16.gmra.mxu3 %vm591_vm3, %v5011_v27 }
 0x5e6   : > { %v4833_v23 = vpop.f32.mrf.mxu1 }
 0x5e7   : > { %v10160_v58 = vadd.f32 %v4833_v23, %v9937_v45 }
 0x5e8   : > { %v5334_v4 = vpop.f32.mrf.mxu3 }
 0x5e9   : > { %v5414_v52 = vadd.f32 %v5334_v4, %v5224_v37 }
 0x5ea   : > { %v5146_v47 = vpop.f32.mrf.mxu2  ;;  %v5597_v15 = vpop.f32.mrf.mxu0 }
 0x5eb   : > { %v5225_v12 = vadd.f32 %v5146_v47, %v11072_v28  ;;  %v10164_v63 = vadd.f32 %v5597_v15, %v5414_v52  ;;  %v6921_v52 = vld [vmem:[#allocation2 + $0xa8] sm:$0xff]  }
 0x5ec   : > { %v5476_v47 = vrot.slane %v6921_v52, 1 }
 0x5ed   : > { %6609 = vmatmul.msk.bf16.gmra.mxu0 %vm591_vm3, %v5475_v38  ;;  %v11077_v38 = vld [vmem:[#allocation29_spill] sm:$0xff] }
 0x5ee   : > { %v4836_v42 = vpop.f32.mrf.mxu1  ;;  %v5477_v2 = vsel %vm2429_vm8, %v5474_v31, %v5476_v47 }
 0x5ef   : > { %6566 = vmatmul.msk.bf16.gmra.mxu2 %vm591_vm3, %v5011_v27  ;;  %v10170_v45 = vadd.f32 %v4836_v42, %v9946_v59  ;;  %v5018_v59 = vsel %vm1870_vm6, %v5014_v40, %v5017_v54 }
 0x5f0   : > { %v5336_v35 = vpop.f32.mrf.mxu3 }
 0x5f1   : > { %v5415_v49 = vadd.f32 %v5336_v35, %v5225_v12  ;;  %6622 = vmatmul.msk.bf16.gmra.mxu1 %vm591_vm3, %v11074_v56  ;;  %v10191_v35 = vld [vmem:[%s10524_s5] ss:$0 sm:$0xff] }
 0x5f2   : > { %v5149_v30 = vpop.f32.mrf.mxu2  ;;  %v5599_v13 = vpop.f32.mrf.mxu0 }
 0x5f3   : > { %v5226_v37 = vadd.f32 %v5149_v30, %v11076_v6  ;;  %v10179_v23 = vadd.f32 %v5599_v13, %v5415_v49  ;;  %v11078_v30 = vld [vmem:[#allocation45_spill] sm:$0xff]  ;;  %v11080_v6 = vld [vmem:[#allocation11_spill] sm:$0xff] }
 0x5f4   : > { %v11079_v34 = vshll.u32 %v11078_v30, 16 }
 0x5f5   : > { %6588 = vmatmul.msk.bf16.gmra.mxu3 %vm591_vm3, %v5018_v59 }
 0x5f6   : > { %v4838_v27 = vpop.f32.mrf.mxu1  ;;  %v5260_v40 = vrot.slane %v11079_v34, 1 }
 0x5f7   : > { %v11081_v27 = vshrl.u32 %v9435_v50, 16 }
 0x5f8   : > { %v5339_v4 = vpop.f32.mrf.mxu3 }
 0x5f9   : > { %v5416_v15 = vadd.f32 %v5339_v4, %v5226_v37  ;;  %v5021_v4 = vor.u32 %v11081_v27, %v5017_v54  ;;  %v6924_v27 = vld [vmem:[%s7020_s28 + $0x28] sm:$0xff] }
 0x5fa   : > { %v5151_v28 = vpop.f32.mrf.mxu2  ;;  %v5602_v12 = vpop.f32.mrf.mxu0 }
 0x5fb   : > { %v5227_v42 = vadd.f32 %v5151_v28, %v11077_v38  ;;  %v10184_v32 = vadd.f32 %v5602_v12, %v5416_v15  ;;  %v6922_v15 = vld [vmem:[%s7020_s28 + $0x20] sm:$0xff]  ;;  %v5261_v38 = vsel %vm1870_vm6, %v5021_v4, %v5260_v40 }
 0x5fc   : > { %v11082_v28 = vld [vmem:[#allocation30_spill] sm:$0xff] }
 0x5fd   : > { %6610 = vmatmul.msk.bf16.gmra.mxu0 %vm591_vm3, %v5477_v2 }
 0x5fe   : > { %v5862_v43 = vpop.f32.mrf.mxu1 }
 0x5ff   : > { %6567 = vmatmul.msk.bf16.gmra.mxu2 %vm591_vm3, %v5018_v59  ;;  %v5966_v49 = vadd.f32 %v5862_v43, %v9968_v9  ;;  %v5022_v43 = vshll.u32 %v9978_v51, 16 }
 0x600   : > { %v5341_v56 = vpop.f32.mrf.mxu3 }
 0x601   : > { %v5417_v13 = vadd.f32 %v5341_v56, %v5227_v42  ;;  %v6011_v31 = vadd.f32 %v10191_v35, %v5966_v49  ;;  %6623 = vmatmul.msk.bf16.gmra.mxu1 %vm591_vm3, %v11080_v6  ;;  %v6923_v49 = vld [vmem:[#allocation2 + $0xb0] sm:$0xff]  }
 0x602   : > { %v5154_v37 = vpop.f32.mrf.mxu2  ;;  %v5604_v52 = vpop.f32.mrf.mxu0  ;;  %v5478_v56 = vrot.slane %v6923_v49, 1 }
 0x603   : > { %v6052_v59 = vadd.f32 %v6922_v15, %v6011_v31  ;;  %v5228_v9 = vadd.f32 %v5154_v37, %v11082_v28  ;;  %v10204_v12 = vadd.f32 %v5604_v52, %v5417_v13  ;;  %v5024_v37 = vrot.slane %v5022_v43, 1 }
 0x604   : > { %v5479_v28 = vsel %vm2429_vm8, %v5476_v47, %v5478_v56 }
 0x605   : > { %v6093_v42 = vmax.f32 %v6052_v59, 0.0  ;;  %6589 = vmatmul.msk.bf16.gmra.mxu3 %vm591_vm3, %v5261_v38  ;;  %v5025_v38 = vsel %vm1870_vm6, %v5021_v4, %v5024_v37 }
 0x606   : > { %v5864_v2 = vpop.f32.mrf.mxu1 }
 0x607   : > { %6134 = vst.msk [vmem:[%s7025_s7] sm:$0xff] %vm591_vm3, %v6093_v42  ;;  %v5967_v50 = vadd.f32 %v5864_v2, %v9987_v57 }
 0x608   : > { %v5344_v54 = vpop.f32.mrf.mxu3 }
 0x609   : > { %v5418_v34 = vadd.f32 %v5344_v54, %v5228_v9  ;;  %v6012_v13 = vadd.f32 %v10191_v35, %v5967_v50  ;;  %v11084_v50 = vld [vmem:[#allocation44_spill] sm:$0xff] }
 0x60a   : > { %v5156_v31 = vpop.f32.mrf.mxu2  ;;  %v5607_v6 = vpop.f32.mrf.mxu0  ;;  %v11085_v47 = vshll.u32 %v11084_v50, 16 }
 0x60b   : > { %v6053_v52 = vadd.f32 %v6924_v27, %v6012_v13  ;;  %v5229_v15 = vadd.f32 %v5156_v31, %v9943_v20  ;;  %v10215_v59 = vadd.f32 %v5607_v6, %v5418_v34  ;;  %v11083_v20 = vshrl.u32 %v11078_v30, 16  ;;  %v11086_v13 = vld [vmem:[#allocation12_spill] sm:$0xff] }
 0x60c   : > { %v5268_v54 = vrot.slane %v11085_v47, 1  ;;  %v6925_v6 = vld [vmem:[%s7020_s28 + $0x30] sm:$0xff] }
 0x60d   : > { %v6094_v57 = vmax.f32 %v6053_v52, 0.0  ;;  %6611 = vmatmul.msk.bf16.gmra.mxu0 %vm591_vm3, %v5479_v28  ;;  %v5264_v43 = vor.u32 %v11083_v20, %v5260_v40  ;;  %v6926_v20 = vld [vmem:[%s7020_s28 + $0x38] sm:$0xff] }
 0x60e   : > { %v5867_v9 = vpop.f32.mrf.mxu1 }
 0x60f   : > { %6135 = vst.msk [vmem:[%s7025_s7 + $0x8] sm:$0xff] %vm591_vm3, %v6094_v57  ;;  %6568 = vmatmul.msk.bf16.gmra.mxu2 %vm591_vm3, %v5025_v38  ;;  %v5968_v42 = vadd.f32 %v5867_v9, %v9996_v25  ;;  %v5269_v30 = vsel %vm1870_vm6, %v5264_v43, %v5268_v54  ;;  %v5480_v38 = vrot.slane %v11084_v50, 1 }
 0x610   : > { %v5346_v2 = vpop.f32.mrf.mxu3 }
 0x611   : > { %v5419_v49 = vadd.f32 %v5346_v2, %v5229_v15  ;;  %v6013_v34 = vadd.f32 %v10191_v35, %v5968_v42  ;;  %6624 = vmatmul.msk.bf16.gmra.mxu1 %vm591_vm3, %v11086_v13 }
 0x612   : > { %v5159_v4 = vpop.f32.mrf.mxu2  ;;  %v5609_v31 = vpop.f32.mrf.mxu0 }
 0x613   : > { %v6054_v27 = vadd.f32 %v6925_v6, %v6013_v34  ;;  %v5230_v25 = vadd.f32 %v5159_v4, %v9952_v0  ;;  %v10233_v52 = vadd.f32 %v5609_v31, %v5419_v49  ;;  %v5026_v34 = vshrl.u32 %v9978_v51, 16 }
 0x614   : > { %v11087_v51 = vshrl.u32 %v11084_v50, 16 }
 0x615   : > { %v6095_v40 = vmax.f32 %v6054_v27, 0.0  ;;  %6590 = vmatmul.msk.bf16.gmra.mxu3 %vm591_vm3, %v5269_v30  ;;  %v5028_v4 = vor.u32 %v5026_v34, %v5024_v37 }
 0x616   : > { %v5869_v15 = vpop.f32.mrf.mxu1  ;;  %v5272_v30 = vor.u32 %v11087_v51, %v5268_v54  ;;  %v6929_v51 = vld [vmem:[%s7020_s28 + $0x50] sm:$0xff] }
 0x617   : > { %6136 = vst.msk [vmem:[%s7025_s7 + $0x10] sm:$0xff] %vm591_vm3, %v6095_v40  ;;  %v5969_v28 = vadd.f32 %v5869_v15, %v10011_v14  ;;  %v5481_v14 = vsel %vm2429_vm8, %v5478_v56, %v5480_v38  ;;  %v11088_v56 = vld [vmem:[#allocation13_spill] sm:$0xff]  ;;  %v6927_v15 = vld [vmem:[%s7020_s28 + $0x40] sm:$0xff] }
 0x618   : > { %v5349_v57 = vpop.f32.mrf.mxu3 }
 0x619   : > { %v5420_v9 = vadd.f32 %v5349_v57, %v5230_v25  ;;  %v6014_v42 = vadd.f32 %v10191_v35, %v5969_v28 }
 0x61a   : > { %v5161_v0 = vpop.f32.mrf.mxu2  ;;  %v5612_v2 = vpop.f32.mrf.mxu0 }
 0x61b   : > { %v6055_v47 = vadd.f32 %v6926_v20, %v6014_v42  ;;  %v5231_v43 = vadd.f32 %v5161_v0, %v9964_v46  ;;  %v10244_v49 = vadd.f32 %v5612_v2, %v5420_v9 }
 0x61d   : > { %v6096_v13 = vmax.f32 %v6055_v47, 0.0  ;;  %6612 = vmatmul.msk.bf16.gmra.mxu0 %vm591_vm3, %v5481_v14 }
 0x61e   : > { %v5872_v31 = vpop.f32.mrf.mxu1 }
 0x61f   : > { %6137 = vst.msk [vmem:[%s7025_s7 + $0x18] sm:$0xff] %vm591_vm3, %v6096_v13  ;;  %6569 = vmatmul.msk.bf16.gmra.mxu2 %vm591_vm3, %v5028_v4  ;;  %v5970_v6 = vadd.f32 %v5872_v31, %v10020_v61 }
 0x620   : > { %v5351_v46 = vpop.f32.mrf.mxu3 }
 0x621   : > { %v5421_v27 = vadd.f32 %v5351_v46, %v5231_v43  ;;  %v6015_v25 = vadd.f32 %v10191_v35, %v5970_v6  ;;  %6625 = vmatmul.msk.bf16.gmra.mxu1 %vm591_vm3, %v11088_v56  ;;  %v6928_v43 = vld [vmem:[%s7020_s28 + $0x48] sm:$0xff] }
 0x622   : > { %v5164_v37 = vpop.f32.mrf.mxu2  ;;  %v5614_v40 = vpop.f32.mrf.mxu0 }
 0x623   : > { %v6056_v28 = vadd.f32 %v6927_v15, %v6015_v25  ;;  %v5232_v57 = vadd.f32 %v5164_v37, %v9974_v62  ;;  %v10260_v9 = vadd.f32 %v5614_v40, %v5421_v27  ;;  %v11089_v27 = vld [vmem:[#allocation3_spill] sm:$0xff] }
 0x625   : > { %v6097_v61 = vmax.f32 %v6056_v28, 0.0  ;;  %6591 = vmatmul.msk.bf16.gmra.mxu3 %vm591_vm3, %v5272_v30 }
 0x626   : > { %v5874_v42 = vpop.f32.mrf.mxu1 }
 0x627   : > { %6138 = vst.msk [vmem:[%s7025_s7 + $0x20] sm:$0xff] %vm591_vm3, %v6097_v61  ;;  %v5971_v50 = vadd.f32 %v5874_v42, %v10035_v8 }
 0x628   : > { %v5354_v54 = vpop.f32.mrf.mxu3 }
 0x629   : > { %v5422_v0 = vadd.f32 %v5354_v54, %v5232_v57  ;;  %v6016_v2 = vadd.f32 %v10191_v35, %v5971_v50  ;;  %v6930_v50 = vld [vmem:[%s7020_s28 + $0x58] sm:$0xff] }
 0x62a   : > { %v5166_v20 = vpop.f32.mrf.mxu2  ;;  %v5617_v47 = vpop.f32.mrf.mxu0 }
 0x62b   : > { %v6057_v62 = vadd.f32 %v6928_v43, %v6016_v2  ;;  %v5233_v34 = vadd.f32 %v5166_v20, %v9992_v17  ;;  %v10269_v14 = vadd.f32 %v5617_v47, %v5422_v0 }
 0x62d   : > { %v6098_v13 = vmax.f32 %v6057_v62, 0.0  ;;  %6613 = vmatmul.msk.bf16.gmra.mxu0 %vm591_vm3, %v5480_v38 }
 0x62e   : > { %v5877_v4 = vpop.f32.mrf.mxu1 }
 0x62f   : > { %6139 = vst.msk [vmem:[%s7025_s7 + $0x28] sm:$0xff] %vm591_vm3, %v6098_v13  ;;  %v5972_v8 = vadd.f32 %v5877_v4, %v10044_v55 }
 0x630   : > { %v5356_v31 = vpop.f32.mrf.mxu3 }
 0x631   : > { %v5423_v6 = vadd.f32 %v5356_v31, %v5233_v34  ;;  %v6017_v46 = vadd.f32 %v10191_v35, %v5972_v8  ;;  %6626 = vmatmul.msk.bf16.gmra.mxu1 %vm591_vm3, %v11089_v27  ;;  %v11090_v34 = vld [vmem:[#allocation4_spill] sm:$0xff] }
 0x632   : > { %v5169_v17 = vpop.f32.mrf.mxu2  ;;  %v5619_v25 = vpop.f32.mrf.mxu0 }
 0x633   : > { %v6058_v30 = vadd.f32 %v6929_v51, %v6017_v46  ;;  %v5234_v38 = vadd.f32 %v5169_v17, %v10002_v48  ;;  %v10280_v56 = vadd.f32 %v5619_v25, %v5423_v6 }
 0x635   : > { %v6099_v37 = vmax.f32 %v6058_v30, 0.0 }
 0x636   : > { %v5879_v40 = vpop.f32.mrf.mxu1 }
 0x637   : > { %6140 = vst.msk [vmem:[%s7025_s7 + $0x30] sm:$0xff] %vm591_vm3, %v6099_v37  ;;  %v5973_v55 = vadd.f32 %v5879_v40, %v10059_v3  ;;  %v6932_v37 = vld [vmem:[%s7020_s28 + $0x68] sm:$0xff] }
 0x638   : > { %v5359_v15 = vpop.f32.mrf.mxu3 }
 0x639   : > { %v5424_v28 = vadd.f32 %v5359_v15, %v5234_v38  ;;  %v6018_v57 = vadd.f32 %v10191_v35, %v5973_v55 }
 0x63a   : > { %v5171_v61 = vpop.f32.mrf.mxu2  ;;  %v5622_v42 = vpop.f32.mrf.mxu0 }
 0x63b   : > { %v6059_v54 = vadd.f32 %v6930_v50, %v6018_v57  ;;  %v5235_v48 = vadd.f32 %v5171_v61, %v10016_v7  ;;  %v10288_v0 = vadd.f32 %v5622_v42, %v5424_v28  ;;  %v6931_v7 = vld [vmem:[%s7020_s28 + $0x60] sm:$0xff]  ;;  %v11091_v50 = vld [vmem:[#allocation20_spill] sm:$0xff] }
 0x63d   : > { %v6100_v2 = vmax.f32 %v6059_v54, 0.0 }
 0x63e   : > { %v5882_v20 = vpop.f32.mrf.mxu1 }
 0x63f   : > { %6141 = vst.msk [vmem:[%s7025_s7 + $0x38] sm:$0xff] %vm591_vm3, %v6100_v2  ;;  %v5974_v3 = vadd.f32 %v5882_v20, %v10068_v26 }
 0x640   : > { %v5361_v47 = vpop.f32.mrf.mxu3 }
 0x641   : > { %v5425_v43 = vadd.f32 %v5361_v47, %v5235_v48  ;;  %v6019_v62 = vadd.f32 %v10191_v35, %v5974_v3  ;;  %6627 = vmatmul.msk.bf16.gmra.mxu1 %vm591_vm3, %v11090_v34 }
 0x642   : > { %v5174_v13 = vpop.f32.mrf.mxu2  ;;  %v5624_v4 = vpop.f32.mrf.mxu0 }
 0x643   : > { %v6060_v8 = vadd.f32 %v6931_v7, %v6019_v62  ;;  %v5236_v31 = vadd.f32 %v5174_v13, %v10026_v5  ;;  %v10298_v6 = vadd.f32 %v5624_v4, %v5425_v43 }
 0x645   : > { %v6101_v46 = vmax.f32 %v6060_v8, 0.0  ;;  %v6934_v8 = vld [vmem:[%s7020_s28 + $0x78] sm:$0xff] }
 0x646   : > { %v5884_v27 = vpop.f32.mrf.mxu1 }
 0x647   : > { %6142 = vst.msk [vmem:[%s7025_s7 + $0x40] sm:$0xff] %vm591_vm3, %v6101_v46  ;;  %v5975_v26 = vadd.f32 %v5884_v27, %v10083_v33 }
 0x648   : > { %v5364_v17 = vpop.f32.mrf.mxu3 }
 0x649   : > { %v5426_v25 = vadd.f32 %v5364_v17, %v5236_v31  ;;  %v6020_v51 = vadd.f32 %v10191_v35, %v5975_v26 }
 0x64a   : > { %v5176_v30 = vpop.f32.mrf.mxu2  ;;  %v5627_v38 = vpop.f32.mrf.mxu0 }
 0x64b   : > { %v6061_v40 = vadd.f32 %v6932_v37, %v6020_v51  ;;  %v5237_v5 = vadd.f32 %v5176_v30, %v10040_v1  ;;  %v10306_v55 = vadd.f32 %v5627_v38, %v5426_v25  ;;  %v6933_v1 = vld [vmem:[%s7020_s28 + $0x70] sm:$0xff] }
 0x64c   : > { %v11092_v30 = vld [vmem:[#allocation21_spill] sm:$0xff] }
 0x64d   : > { %v6102_v15 = vmax.f32 %v6061_v40, 0.0 }
 0x64e   : > { %v5887_v28 = vpop.f32.mrf.mxu1 }
 0x64f   : > { %6143 = vst.msk [vmem:[%s7025_s7 + $0x48] sm:$0xff] %vm591_vm3, %v6102_v15  ;;  %v5976_v33 = vadd.f32 %v5887_v28, %v10092_v19 }
 0x650   : > { %v5366_v57 = vpop.f32.mrf.mxu3 }
 0x651   : > { %v5427_v61 = vadd.f32 %v5366_v57, %v5237_v5  ;;  %v6021_v42 = vadd.f32 %v10191_v35, %v5976_v33  ;;  %6628 = vmatmul.msk.bf16.gmra.mxu1 %vm591_vm3, %v11091_v50 }
 0x652   : > { %v5179_v54 = vpop.f32.mrf.mxu2  ;;  %v5629_v48 = vpop.f32.mrf.mxu0 }
 0x653   : > { %v6062_v2 = vadd.f32 %v6933_v1, %v6021_v42  ;;  %v5238_v20 = vadd.f32 %v5179_v54, %v10050_v10  ;;  %v10316_v3 = vadd.f32 %v5629_v48, %v5427_v61  ;;  %v6936_v48 = vld [vmem:[%s7020_s28 + $0x88] sm:$0xff] }
 0x655   : > { %v6103_v47 = vmax.f32 %v6062_v2, 0.0 }
 0x656   : > { %v5889_v43 = vpop.f32.mrf.mxu1 }
 0x657   : > { %6144 = vst.msk [vmem:[%s7025_s7 + $0x50] sm:$0xff] %vm591_vm3, %v6103_v47  ;;  %v5977_v19 = vadd.f32 %v5889_v43, %v10107_v22 }
 0x658   : > { %v5369_v62 = vpop.f32.mrf.mxu3 }
 0x659   : > { %v5428_v34 = vadd.f32 %v5369_v62, %v5238_v20  ;;  %v6022_v13 = vadd.f32 %v10191_v35, %v5977_v19 }
 0x65a   : > { %v5181_v4 = vpop.f32.mrf.mxu2  ;;  %v5632_v7 = vpop.f32.mrf.mxu0 }
 0x65b   : > { %v6063_v31 = vadd.f32 %v6934_v8, %v6022_v13  ;;  %v5239_v10 = vadd.f32 %v5181_v4, %v10064_v18  ;;  %v10324_v46 = vadd.f32 %v5632_v7, %v5428_v34  ;;  %v6935_v18 = vld [vmem:[%s7020_s28 + $0x80] sm:$0xff] }
 0x65c   : > { %v11093_v34 = vld [vmem:[#allocation6_spill] sm:$0xff] }
 0x65d   : > { %v6104_v27 = vmax.f32 %v6063_v31, 0.0 }
 0x65e   : > { %v5892_v26 = vpop.f32.mrf.mxu1 }
 0x65f   : > { %6145 = vst.msk [vmem:[%s7025_s7 + $0x58] sm:$0xff] %vm591_vm3, %v6104_v27  ;;  %v5978_v22 = vadd.f32 %v5892_v26, %v10116_v53 }
 0x660   : > { %v5371_v17 = vpop.f32.mrf.mxu3 }
 0x661   : > { %v5429_v25 = vadd.f32 %v5371_v17, %v5239_v10  ;;  %v6023_v51 = vadd.f32 %v10191_v35, %v5978_v22  ;;  %6629 = vmatmul.msk.bf16.gmra.mxu1 %vm591_vm3, %v11092_v30  ;;  %v6938_v30 = vld [vmem:[%s7020_s28 + $0x98] sm:$0xff] }
 0x662   : > { %v5184_v38 = vpop.f32.mrf.mxu2  ;;  %v5634_v37 = vpop.f32.mrf.mxu0 }
 0x663   : > { %v6064_v40 = vadd.f32 %v6935_v18, %v6023_v51  ;;  %v5240_v5 = vadd.f32 %v5184_v38, %v10074_v39  ;;  %v10334_v15 = vadd.f32 %v5634_v37, %v5429_v25 }
 0x665   : > { %v6105_v28 = vmax.f32 %v6064_v40, 0.0 }
 0x666   : > { %v5894_v33 = vpop.f32.mrf.mxu1 }
 0x667   : > { %6146 = vst.msk [vmem:[%s7025_s7 + $0x60] sm:$0xff] %vm591_vm3, %v6105_v28  ;;  %v5979_v53 = vadd.f32 %v5894_v33, %v10131_v11 }
 0x668   : > { %v5374_v57 = vpop.f32.mrf.mxu3 }
 0x669   : > { %v5430_v61 = vadd.f32 %v5374_v57, %v5240_v5  ;;  %v6024_v42 = vadd.f32 %v10191_v35, %v5979_v53  ;;  %v11094_v53 = vld [vmem:[#allocation28_spill] sm:$0xff] }
 0x66a   : > { %v5186_v50 = vpop.f32.mrf.mxu2  ;;  %v5637_v54 = vpop.f32.mrf.mxu0 }
 0x66b   : > { %v6065_v1 = vadd.f32 %v6936_v48, %v6024_v42  ;;  %v5241_v39 = vadd.f32 %v5186_v50, %v10088_v60  ;;  %v10342_v2 = vadd.f32 %v5637_v54, %v5430_v61  ;;  %v6937_v60 = vld [vmem:[%s7020_s28 + $0x90] sm:$0xff] }
 0x66d   : > { %v6106_v20 = vmax.f32 %v6065_v1, 0.0 }
 0x66e   : > { %v5897_v47 = vpop.f32.mrf.mxu1 }
 0x66f   : > { %6147 = vst.msk [vmem:[%s7025_s7 + $0x68] sm:$0xff] %vm591_vm3, %v6106_v20  ;;  %v5980_v11 = vadd.f32 %v5897_v47, %v10140_v24 }
 0x670   : > { %v5376_v43 = vpop.f32.mrf.mxu3 }
 0x671   : > { %v5431_v19 = vadd.f32 %v5376_v43, %v5241_v39  ;;  %v6025_v62 = vadd.f32 %v10191_v35, %v5980_v11  ;;  %6630 = vmatmul.msk.bf16.gmra.mxu1 %vm591_vm3, %v11093_v34 }
 0x672   : > { %v5189_v13 = vpop.f32.mrf.mxu2  ;;  %v5639_v4 = vpop.f32.mrf.mxu0 }
 0x673   : > { %v6066_v7 = vadd.f32 %v6937_v60, %v6025_v62  ;;  %v5242_v8 = vadd.f32 %v5189_v13, %v10098_v36  ;;  %v10352_v31 = vadd.f32 %v5639_v4, %v5431_v19  ;;  %v6940_v19 = vld [vmem:[%s7020_s28 + $0xa8] sm:$0xff] }
 0x675   : > { %v6107_v10 = vmax.f32 %v6066_v7, 0.0 }
 0x676   : > { %v5899_v27 = vpop.f32.mrf.mxu1 }
 0x677   : > { %6148 = vst.msk [vmem:[%s7025_s7 + $0x70] sm:$0xff] %vm591_vm3, %v6107_v10  ;;  %v5981_v24 = vadd.f32 %v5899_v27, %v10155_v41  ;;  %v11095_v10 = vld [vmem:[#allocation46_spill] sm:$0xff] }
 0x678   : > { %v5379_v26 = vpop.f32.mrf.mxu3 }
 0x679   : > { %v5432_v22 = vadd.f32 %v5379_v26, %v5242_v8  ;;  %v6026_v17 = vadd.f32 %v10191_v35, %v5981_v24 }
 0x67a   : > { %v5191_v25 = vpop.f32.mrf.mxu2  ;;  %v5642_v51 = vpop.f32.mrf.mxu0 }
 0x67b   : > { %v6067_v38 = vadd.f32 %v6938_v30, %v6026_v17  ;;  %v5243_v36 = vadd.f32 %v5191_v25, %v10112_v21  ;;  %v10360_v37 = vadd.f32 %v5642_v51, %v5432_v22  ;;  %v6939_v21 = vld [vmem:[%s7020_s28 + $0xa0] sm:$0xff] }
 0x67d   : > { %v6108_v18 = vmax.f32 %v6067_v38, 0.0 }
 0x67e   : > { %v5902_v40 = vpop.f32.mrf.mxu1 }
 0x67f   : > { %6149 = vst.msk [vmem:[%s7025_s7 + $0x78] sm:$0xff] %vm591_vm3, %v6108_v18  ;;  %v5982_v41 = vadd.f32 %v5902_v40, %v10164_v63 }
 0x680   : > { %v5381_v5 = vpop.f32.mrf.mxu3 }
 0x681   : > { %v5433_v28 = vadd.f32 %v5381_v5, %v5243_v36  ;;  %v6027_v33 = vadd.f32 %v10191_v35, %v5982_v41  ;;  %6631 = vmatmul.msk.bf16.gmra.mxu1 %vm591_vm3, %v11094_v53  ;;  %v6942_v41 = vld [vmem:[%s7020_s28 + $0xb8] sm:$0xff] }
 0x682   : > { %v5194_v57 = vpop.f32.mrf.mxu2  ;;  %v5644_v61 = vpop.f32.mrf.mxu0 }
 0x683   : > { %v6068_v42 = vadd.f32 %v6939_v21, %v6027_v33  ;;  %v5244_v50 = vadd.f32 %v5194_v57, %v10122_v16  ;;  %v10370_v54 = vadd.f32 %v5644_v61, %v5433_v28 }
 0x685   : > { %v6109_v48 = vmax.f32 %v6068_v42, 0.0  ;;  %v11096_v42 = vld [vmem:[#allocation47_spill] sm:$0xff] }
 0x686   : > { %v5904_v1 = vpop.f32.mrf.mxu1 }
 0x687   : > { %6150 = vst.msk [vmem:[%s7025_s7 + $0x80] sm:$0xff] %vm591_vm3, %v6109_v48  ;;  %v5983_v63 = vadd.f32 %v5904_v1, %v10179_v23 }
 0x688   : > { %v5384_v39 = vpop.f32.mrf.mxu3 }
 0x689   : > { %v5434_v20 = vadd.f32 %v5384_v39, %v5244_v50  ;;  %v6028_v47 = vadd.f32 %v10191_v35, %v5983_v63 }
 0x68a   : > { %v5196_v11 = vpop.f32.mrf.mxu2  ;;  %v5647_v43 = vpop.f32.mrf.mxu0 }
 0x68b   : > { %v6069_v62 = vadd.f32 %v6940_v19, %v6028_v47  ;;  %v5245_v16 = vadd.f32 %v5196_v11, %v10136_v44  ;;  %v10378_v34 = vadd.f32 %v5647_v43, %v5434_v20  ;;  %v6941_v44 = vld [vmem:[%s7020_s28 + $0xb0] sm:$0xff] }
 0x68d   : > { %v6110_v13 = vmax.f32 %v6069_v62, 0.0 }
 0x68e   : > { %v5907_v4 = vpop.f32.mrf.mxu1 }
 0x68f   : > { %6151 = vst.msk [vmem:[%s7025_s7 + $0x88] sm:$0xff] %vm591_vm3, %v6110_v13  ;;  %v5984_v23 = vadd.f32 %v5907_v4, %v10184_v32  ;;  %v6944_v13 = vld [vmem:[%s7020_s28 + $0xc8] sm:$0xff] }
 0x690   : > { %v5386_v60 = vpop.f32.mrf.mxu3 }
 0x691   : > { %v5435_v7 = vadd.f32 %v5386_v60, %v5245_v16  ;;  %v6029_v8 = vadd.f32 %v10191_v35, %v5984_v23  ;;  %6632 = vmatmul.msk.bf16.gmra.mxu1 %vm591_vm3, %v11095_v10  ;;  %v11097_v10 = vld [vmem:[#allocation48_spill] sm:$0xff] }
 0x692   : > { %v5199_v27 = vpop.f32.mrf.mxu2  ;;  %v5649_v24 = vpop.f32.mrf.mxu0 }
 0x693   : > { %v6070_v26 = vadd.f32 %v6941_v44, %v6029_v8  ;;  %v5246_v22 = vadd.f32 %v5199_v27, %v10146_v29  ;;  %v10388_v17 = vadd.f32 %v5649_v24, %v5435_v7  ;;  %v6945_v24 = vld [vmem:[%s7020_s28 + $0xd0] sm:$0xff] }
 0x695   : > { %v6111_v25 = vmax.f32 %v6070_v26, 0.0 }
 0x696   : > { %v5909_v51 = vpop.f32.mrf.mxu1 }
 0x697   : > { %6152 = vst.msk [vmem:[%s7025_s7 + $0x90] sm:$0xff] %vm591_vm3, %v6111_v25  ;;  %v5985_v32 = vadd.f32 %v5909_v51, %v10204_v12  ;;  %v6946_v51 = vld [vmem:[%s7020_s28 + $0xd8] sm:$0xff] }
 0x698   : > { %v5389_v30 = vpop.f32.mrf.mxu3 }
 0x699   : > { %v5436_v38 = vadd.f32 %v5389_v30, %v5246_v22  ;;  %v6030_v36 = vadd.f32 %v10191_v35, %v5985_v32 }
 0x69a   : > { %v5201_v18 = vpop.f32.mrf.mxu2  ;;  %v5652_v40 = vpop.f32.mrf.mxu0 }
 0x69b   : > { %v6071_v5 = vadd.f32 %v6942_v41, %v6030_v36  ;;  %v5247_v29 = vadd.f32 %v5201_v18, %v10160_v58  ;;  %v10396_v28 = vadd.f32 %v5652_v40, %v5436_v38  ;;  %v6943_v58 = vld [vmem:[%s7020_s28 + $0xc0] sm:$0xff]  ;;  %v11098_v40 = vld [vmem:[#allocation40_spill] sm:$0xff] }
 0x69c   : > { %v6947_v41 = vld [vmem:[%s7020_s28 + $0xe0] sm:$0xff] }
 0x69d   : > { %v6112_v33 = vmax.f32 %v6071_v5, 0.0 }
 0x69e   : > { %v5912_v53 = vpop.f32.mrf.mxu1 }
 0x69f   : > { %6153 = vst.msk [vmem:[%s7025_s7 + $0x98] sm:$0xff] %vm591_vm3, %v6112_v33  ;;  %v5986_v12 = vadd.f32 %v5912_v53, %v10215_v59 }
 0x6a0   : > { %v5391_v57 = vpop.f32.mrf.mxu3 }
 0x6a1   : > { %v5437_v61 = vadd.f32 %v5391_v57, %v5247_v29  ;;  %v6031_v21 = vadd.f32 %v10191_v35, %v5986_v12  ;;  %6633 = vmatmul.msk.bf16.gmra.mxu1 %vm591_vm3, %v11096_v42  ;;  %v6948_v12 = vld [vmem:[%s7020_s28 + $0xe8] sm:$0xff] }
 0x6a2   : > { %v5204_v50 = vpop.f32.mrf.mxu2  ;;  %v5654_v48 = vpop.f32.mrf.mxu0 }
 0x6a3   : > { %v6072_v1 = vadd.f32 %v6943_v58, %v6031_v21  ;;  %v5248_v63 = vadd.f32 %v5204_v50, %v10170_v45  ;;  %v10406_v39 = vadd.f32 %v5654_v48, %v5437_v61  ;;  %v6949_v50 = vld [vmem:[%s7020_s28 + $0xf0] sm:$0xff] }
 0x6a5   : > { %v6113_v20 = vmax.f32 %v6072_v1, 0.0 }
 0x6a6   : > { %v5914_v47 = vpop.f32.mrf.mxu1 }
 0x6a7   : > { %6154 = vst.msk [vmem:[%s7025_s7 + $0xa0] sm:$0xff] %vm591_vm3, %v6113_v20  ;;  %v5987_v59 = vadd.f32 %v5914_v47, %v10233_v52  ;;  %v6950_v20 = vld [vmem:[%s7020_s28 + $0xf8] sm:$0xff] }
 0x6a8   : > { %v5394_v11 = vpop.f32.mrf.mxu3 }
 0x6a9   : > { %v5438_v43 = vadd.f32 %v5394_v11, %v5248_v63  ;;  %v6032_v19 = vadd.f32 %v10191_v35, %v5987_v59 }
 0x6aa   : > { %v5206_v62 = vpop.f32.mrf.mxu2  ;;  %v5657_v16 = vpop.f32.mrf.mxu0 }
 0x6ab   : > { %v6073_v4 = vadd.f32 %v6944_v13, %v6032_v19  ;;  %v10413_v45 = vadd.f32 %v5657_v16, %v5438_v43  ;;  %v6951_v19 = vld [vmem:[%s7020_s28 + $0x100] sm:$0xff] }
 0x6ad   : > { %v6114_v23 = vmax.f32 %v6073_v4, 0.0 }
 0x6ae   : > { %v5917_v60 = vpop.f32.mrf.mxu1 }
 0x6af   : > { %6155 = vst.msk [vmem:[%s7025_s7 + $0xa8] sm:$0xff] %vm591_vm3, %v6114_v23  ;;  %v5988_v7 = vadd.f32 %v5917_v60, %v10244_v49  ;;  %v6952_v23 = vld [vmem:[%s7020_s28 + $0x108] sm:$0xff] }
 0x6b0   : > { %v5396_v52 = vpop.f32.mrf.mxu3 }
 0x6b1   : > { %v6033_v8 = vadd.f32 %v10191_v35, %v5988_v7  ;;  %6634 = vmatmul.msk.bf16.gmra.mxu1 %vm591_vm3, %v11097_v10  ;;  %v6953_v10 = vld [vmem:[%s7020_s28 + $0x110] sm:$0xff] }
 0x6b2   : > { %v5659_v27 = vpop.f32.mrf.mxu0 }
 0x6b3   : > { %v6074_v44 = vadd.f32 %v6945_v24, %v6033_v8 }
 0x6b5   : > { %v6115_v26 = vmax.f32 %v6074_v44, 0.0 }
 0x6b6   : > { %v5919_v22 = vpop.f32.mrf.mxu1 }
 0x6b7   : > { %6156 = vst.msk [vmem:[%s7025_s7 + $0xb0] sm:$0xff] %vm591_vm3, %v6115_v26  ;;  %v5989_v25 = vadd.f32 %v5919_v22, %v10260_v9  ;;  %v6954_v22 = vld [vmem:[%s7020_s28 + $0x118] sm:$0xff] }
 0x6b9   : > { %v6034_v49 = vadd.f32 %v10191_v35, %v5989_v25 }
 0x6bb   : > { %v6075_v32 = vadd.f32 %v6946_v51, %v6034_v49 }
 0x6bd   : > { %v6116_v30 = vmax.f32 %v6075_v32, 0.0 }
 0x6be   : > { %v5922_v38 = vpop.f32.mrf.mxu1 }
 0x6bf   : > { %6157 = vst.msk [vmem:[%s7025_s7 + $0xb8] sm:$0xff] %vm591_vm3, %v6116_v30  ;;  %v5990_v36 = vadd.f32 %v5922_v38, %v10269_v14  ;;  %v6955_v30 = vld [vmem:[%s7020_s28 + $0x120] sm:$0xff] }
 0x6c1   : > { %v6035_v18 = vadd.f32 %v10191_v35, %v5990_v36  ;;  %6635 = vmatmul.msk.bf16.gmra.mxu1 %vm591_vm3, %v11098_v40 }
 0x6c3   : > { %v6076_v9 = vadd.f32 %v6947_v41, %v6035_v18  ;;  %v6956_v41 = vld [vmem:[%s7020_s28 + $0x128] sm:$0xff] }
 0x6c5   : > { %v6117_v5 = vmax.f32 %v6076_v9, 0.0 }
 0x6c6   : > { %v5924_v29 = vpop.f32.mrf.mxu1 }
 0x6c7   : > { %6158 = vst.msk [vmem:[%s7025_s7 + $0xc0] sm:$0xff] %vm591_vm3, %v6117_v5  ;;  %v5991_v33 = vadd.f32 %v5924_v29, %v10280_v56 }
 0x6c9   : > { %v6036_v53 = vadd.f32 %v10191_v35, %v5991_v33 }
 0x6cb   : > { %v6077_v14 = vadd.f32 %v6948_v12, %v6036_v53  ;;  %v6957_v53 = vld [vmem:[%s7020_s28 + $0x130] sm:$0xff] }
 0x6cd   : > { %v6118_v57 = vmax.f32 %v6077_v14, 0.0 }
 0x6ce   : > { %v5927_v61 = vpop.f32.mrf.mxu1 }
 0x6cf   : > { %6159 = vst.msk [vmem:[%s7025_s7 + $0xc8] sm:$0xff] %vm591_vm3, %v6118_v57  ;;  %v5992_v21 = vadd.f32 %v5927_v61, %v10288_v0 }
 0x6d1   : > { %v6037_v42 = vadd.f32 %v10191_v35, %v5992_v21  ;;  %v6958_v21 = vld [vmem:[%s7020_s28 + $0x138] sm:$0xff] }
 0x6d3   : > { %v6078_v48 = vadd.f32 %v6949_v50, %v6037_v42 }
 0x6d5   : > { %v6119_v58 = vmax.f32 %v6078_v48, 0.0 }
 0x6d6   : > { %v5929_v56 = vpop.f32.mrf.mxu1 }
 0x6d7   : > { %6160 = vst.msk [vmem:[%s7025_s7 + $0xd0] sm:$0xff] %vm591_vm3, %v6119_v58  ;;  %v5993_v1 = vadd.f32 %v5929_v56, %v10298_v6  ;;  %v6959_v56 = vld [vmem:[%s7020_s28 + $0x140] sm:$0xff] }
 0x6d9   : > { %v6038_v63 = vadd.f32 %v10191_v35, %v5993_v1 }
 0x6db   : > { %v6079_v47 = vadd.f32 %v6950_v20, %v6038_v63 }
 0x6dd   : > { %v6120_v59 = vmax.f32 %v6079_v47, 0.0 }
 0x6de   : > { %v5932_v0 = vpop.f32.mrf.mxu1 }
 0x6df   : > { %6161 = vst.msk [vmem:[%s7025_s7 + $0xd8] sm:$0xff] %vm591_vm3, %v6120_v59  ;;  %v5994_v11 = vadd.f32 %v5932_v0, %v10306_v55  ;;  %v6960_v59 = vld [vmem:[%s7020_s28 + $0x148] sm:$0xff] }
 0x6e1   : > { %v6039_v43 = vadd.f32 %v10191_v35, %v5994_v11 }
 0x6e3   : > { %v6080_v62 = vadd.f32 %v6951_v19, %v6039_v43 }
 0x6e5   : > { %v6121_v16 = vmax.f32 %v6080_v62, 0.0  ;;  %v6961_v62 = vld [vmem:[%s7020_s28 + $0x150] sm:$0xff] }
 0x6e6   : > { %v5934_v6 = vpop.f32.mrf.mxu1 }
 0x6e7   : > { %6162 = vst.msk [vmem:[%s7025_s7 + $0xe0] sm:$0xff] %vm591_vm3, %v6121_v16  ;;  %v5995_v13 = vadd.f32 %v5934_v6, %v10316_v3 }
 0x6e9   : > { %v6040_v4 = vadd.f32 %v10191_v35, %v5995_v13 }
 0x6eb   : > { %v6081_v60 = vadd.f32 %v6952_v23, %v6040_v4  ;;  %v6962_v23 = vld [vmem:[%s7020_s28 + $0x158] sm:$0xff] }
 0x6ed   : > { %v6122_v7 = vmax.f32 %v6081_v60, 0.0 }
 0x6ee   : > { %v5937_v55 = vpop.f32.mrf.mxu1 }
 0x6ef   : > { %6163 = vst.msk [vmem:[%s7025_s7 + $0xe8] sm:$0xff] %vm591_vm3, %v6122_v7  ;;  %v5996_v52 = vadd.f32 %v5937_v55, %v10324_v46 }
 0x6f1   : > { %v6041_v8 = vadd.f32 %v10191_v35, %v5996_v52 }
 0x6f3   : > { %v6082_v27 = vadd.f32 %v6953_v10, %v6041_v8  ;;  %v6963_v8 = vld [vmem:[%s7020_s28 + $0x160] sm:$0xff] }
 0x6f5   : > { %v6123_v24 = vmax.f32 %v6082_v27, 0.0 }
 0x6f6   : > { %v5939_v3 = vpop.f32.mrf.mxu1 }
 0x6f7   : > { %6164 = vst.msk [vmem:[%s7025_s7 + $0xf0] sm:$0xff] %vm591_vm3, %v6123_v24  ;;  %v5997_v44 = vadd.f32 %v5939_v3, %v10334_v15 }
 0x6f9   : > { %v6042_v26 = vadd.f32 %v10191_v35, %v5997_v44 }
 0x6fb   : > { %v6083_v25 = vadd.f32 %v6954_v22, %v6042_v26 }
 0x6fd   : > { %v6124_v49 = vmax.f32 %v6083_v25, 0.0 }
 0x6fe   : > { %v5942_v46 = vpop.f32.mrf.mxu1 }
 0x6ff   : > { %6165 = vst.msk [vmem:[%s7025_s7 + $0xf8] sm:$0xff] %vm591_vm3, %v6124_v49  ;;  %v5998_v51 = vadd.f32 %v5942_v46, %v10342_v2 }
 0x701   : > { %v6043_v32 = vadd.f32 %v10191_v35, %v5998_v51 }
 0x703   : > { %v6084_v38 = vadd.f32 %v6955_v30, %v6043_v32 }
 0x705   : > { %v6125_v36 = vmax.f32 %v6084_v38, 0.0 }
 0x706   : > { %v5944_v15 = vpop.f32.mrf.mxu1 }
 0x707   : > { %6166 = vst.msk [vmem:[%s7025_s7 + $0x100] sm:$0xff] %vm591_vm3, %v6125_v36  ;;  %v5999_v18 = vadd.f32 %v5944_v15, %v10352_v31 }
 0x709   : > { %v6044_v40 = vadd.f32 %v10191_v35, %v5999_v18 }
 0x70b   : > { %v6085_v9 = vadd.f32 %v6956_v41, %v6044_v40 }
 0x70d   : > { %v6126_v5 = vmax.f32 %v6085_v9, 0.0 }
 0x70e   : > { %v5947_v2 = vpop.f32.mrf.mxu1 }
 0x70f   : > { %6167 = vst.msk [vmem:[%s7025_s7 + $0x108] sm:$0xff] %vm591_vm3, %v6126_v5  ;;  %v6000_v29 = vadd.f32 %v5947_v2, %v10360_v37 }
 0x711   : > { %v6045_v33 = vadd.f32 %v10191_v35, %v6000_v29 }
 0x713   : > { %v6086_v12 = vadd.f32 %v6957_v53, %v6045_v33 }
 0x715   : > { %v6127_v14 = vmax.f32 %v6086_v12, 0.0 }
 0x716   : > { %v5949_v31 = vpop.f32.mrf.mxu1 }
 0x717   : > { %6168 = vst.msk [vmem:[%s7025_s7 + $0x110] sm:$0xff] %vm591_vm3, %v6127_v14  ;;  %v6001_v57 = vadd.f32 %v5949_v31, %v10370_v54 }
 0x719   : > { %v6046_v61 = vadd.f32 %v10191_v35, %v6001_v57 }
 0x71b   : > { %v6087_v42 = vadd.f32 %v6958_v21, %v6046_v61 }
 0x71d   : > { %v6128_v50 = vmax.f32 %v6087_v42, 0.0 }
 0x71e   : > { %v5952_v37 = vpop.f32.mrf.mxu1 }
 0x71f   : > { %6169 = vst.msk [vmem:[%s7025_s7 + $0x118] sm:$0xff] %vm591_vm3, %v6128_v50  ;;  %v6002_v48 = vadd.f32 %v5952_v37, %v10378_v34 }
 0x721   : > { %v6047_v58 = vadd.f32 %v10191_v35, %v6002_v48 }
 0x723   : > { %v6088_v1 = vadd.f32 %v6959_v56, %v6047_v58 }
 0x725   : > { %v6129_v63 = vmax.f32 %v6088_v1, 0.0 }
 0x726   : > { %v5954_v54 = vpop.f32.mrf.mxu1 }
 0x727   : > { %6170 = vst.msk [vmem:[%s7025_s7 + $0x120] sm:$0xff] %vm591_vm3, %v6129_v63  ;;  %v6003_v20 = vadd.f32 %v5954_v54, %v10388_v17 }
 0x729   : > { %v6048_v47 = vadd.f32 %v10191_v35, %v6003_v20 }
 0x72b   : > { %v6089_v0 = vadd.f32 %v6960_v59, %v6048_v47 }
 0x72d   : > { %v6130_v11 = vmax.f32 %v6089_v0, 0.0 }
 0x72e   : > { %v5957_v34 = vpop.f32.mrf.mxu1 }
 0x72f   : > { %6171 = vst.msk [vmem:[%s7025_s7 + $0x128] sm:$0xff] %vm591_vm3, %v6130_v11  ;;  %v6004_v43 = vadd.f32 %v5957_v34, %v10396_v28 }
 0x731   : > { %v6049_v19 = vadd.f32 %v10191_v35, %v6004_v43 }
 0x733   : > { %v6090_v16 = vadd.f32 %v6961_v62, %v6049_v19 }
 0x735   : > { %v6131_v6 = vmax.f32 %v6090_v16, 0.0 }
 0x736   : > { %v5959_v17 = vpop.f32.mrf.mxu1 }
 0x737   : > { %6172 = vst.msk [vmem:[%s7025_s7 + $0x130] sm:$0xff] %vm591_vm3, %v6131_v6  ;;  %v6005_v13 = vadd.f32 %v5959_v17, %v10406_v39 }
 0x739   : > { %v6050_v4 = vadd.f32 %v10191_v35, %v6005_v13 }
 0x73b   : > { %v6091_v60 = vadd.f32 %v6962_v23, %v6050_v4 }
 0x73d   : > { %v6132_v7 = vmax.f32 %v6091_v60, 0.0 }
 0x73e   : > { %v5962_v55 = vpop.f32.mrf.mxu1 }
 0x73f   : > { %6173 = vst.msk [vmem:[%s7025_s7 + $0x138] sm:$0xff] %vm591_vm3, %v6132_v7  ;;  %v6006_v28 = vadd.f32 %v5962_v55, %v10413_v45 }
 0x741   : > { %v6051_v52 = vadd.f32 %v10191_v35, %v6006_v28 }
 0x743   : > { %v6092_v10 = vadd.f32 %v6963_v8, %v6051_v52 }
 0x745   : > { %v6133_v27 = vmax.f32 %v6092_v10, 0.0 }
 0x746   : > { %v5964_v24 = vpop.f32.mrf.mxu1 }
 0x747   : > { %6174 = vst.msk [vmem:[%s7025_s7 + $0x140] sm:$0xf] %vm3370_vm9, %v6133_v27 }
 0x748 PF: > { %s16_s21 = sadd.s32 1, %s6970_s21  }
 0x749   : > { %p13_p5 = scmp.ge.s32.totalorder %s16_s21, 4  }
 0x74b   :  { %15 = sbr.rel (!%p13_p5) target bundleno = 1 (0x1), region = 94 }

</bundles_post_ra>
